<compile_context>
chip_gen: v5e
topology: v5e:2x2
jax: 0.10.0
libtpu: 0.0.40
codegen_flags: <defaults>
</compile_context>

<pallas_src>
import functools

import jax
import jax.numpy as jnp
from jax.experimental import pallas as pl
from jax.experimental.pallas import tpu as pltpu


def _tail_kernel(x_ref, wt_ref, b_ref, o_ref, *, inv_hw):
    """Fused AdaptiveAvgPool2d((1,1)) + flatten + Linear for one batch tile.

    x_ref : (TN, C, HW) f32   activation tile in native NCHW layout (HW flattened)
    wt_ref: (C, NCP)    bf16  fc weight, transposed + class-padded (VMEM resident)
    b_ref : (1, NCP)    f32   fc bias, class-padded (VMEM resident)
    o_ref : (TN, NCP)         logits (padded class dim)
    """
    # Global average pool == mean over the flattened spatial (minor) axis,
    # accumulated in f32.  Result lands as (TN-sublane, C-lane), ready for fc.
    pooled = jnp.sum(x_ref[...], axis=-1) * inv_hw                       # (TN, C) f32
    # TODO(synk): nn.Dropout is treated as identity (eval-mode semantics).
    logits = jnp.dot(pooled.astype(jnp.bfloat16), wt_ref[...],
                     preferred_element_type=jnp.float32)                 # (TN, NCP)
    o_ref[...] = (logits + b_ref[...]).astype(o_ref.dtype)               # bias bcast


def _resident_spec(block_shape, index_map, single_buffer):
    """BlockSpec for a grid-constant block (constant index_map).

    With single_buffer=True the block gets one VMEM buffer instead of the
    default two -- it is DMA'd exactly once, so double-buffering it only
    wastes VMEM (most valuable on v7x's 64 MiB per-TC VMEM)."""
    if single_buffer:
        return pl.BlockSpec(block_shape, index_map, pipeline_mode=pl.Buffered(1))
    return pl.BlockSpec(block_shape, index_map)


def prepare_fc_params(fc_weight, fc_bias):
    """One-time param prep (hoisted out of the per-call forward):
    transpose (out,in)->(in,out), cast to bf16, zero-pad classes to 128 lanes
    so the kernel's output stores are lane-dense and unmasked."""
    num_classes, c = fc_weight.shape
    ncp = pl.cdiv(num_classes, 128) * 128
    w_t = jnp.zeros((c, ncp), jnp.bfloat16)
    w_t = w_t.at[:, :num_classes].set(jnp.transpose(fc_weight).astype(jnp.bfloat16))
    b2 = jnp.zeros((1, ncp), jnp.float32)
    b2 = b2.at[:, :num_classes].set(fc_bias.astype(jnp.float32))
    return w_t, b2


def _pick_tile_n(n, c, hw, requested, x_itemsize, tile_bytes_cap=8 * 1024 * 1024):
    """Batch-tile size: <= ~8 MiB per (double-buffered) streamed x block, >= 2
    grid steps whenever N >= 2 (pipelining + both v7x TensorCores), and a
    multiple of 8 sublanes when possible."""
    per_row = c * hw * x_itemsize
    cap = max(1, tile_bytes_cap // per_row)
    t = min(requested, cap, n)
    if n >= 2:
        t = min(t, max(1, n // 2))          # guarantee >= 2 grid steps
    if t >= 8:
        t = (t // 8) * 8                    # sublane-aligned batch tile
    elif t < n:
        t = min(8, n)                       # small batches: one >=8 (or full) tile
    return max(1, t)


@functools.partial(jax.jit, static_argnames=("num_classes", "tile_n", "out_dtype",
                                             "single_buffer"))
def _forward(x_nchw, w_t, b2, *, num_classes, tile_n, out_dtype, single_buffer):
    n, c, h, w = x_nchw.shape
    hw = h * w
    ncp = w_t.shape[1]

    # Free, contiguous reshape -- no extra HBM round trip (unlike the previous
    # transpose + bf16 cast).  The kernel streams x once, in f32.
    x3 = x_nchw.reshape(n, c, hw)

    tn = _pick_tile_n(n, c, hw, tile_n, x3.dtype.itemsize)
    nb = pl.cdiv(n, tn)      # ragged tail handled by Pallas block masking (no jnp.pad)

    out_itemsize = jnp.dtype(out_dtype).itemsize
    x_tile_bytes = tn * c * hw * x3.dtype.itemsize
    w_bytes = w_t.size * w_t.dtype.itemsize
    b_bytes = b2.size * b2.dtype.itemsize
    out_tile_bytes = tn * ncp * out_itemsize
    # Budget 2 buffers everywhere (even though weight/bias may be single-
    # buffered) plus headroom; clamp to v7x's 64 MiB physical VMEM.  Explicit
    # limit also covers v5e's 16 MiB scoped default.
    footprint = 2 * (x_tile_bytes + w_bytes + b_bytes + out_tile_bytes)
    vmem_limit = int(min(max(footprint * 1.4 + (2 << 20), 16 << 20), 64 << 20))

    cost = pl.CostEstimate(
        flops=2 * n * c * ncp + n * c * hw,
        transcendentals=0,
        bytes_accessed=(x3.size * x3.dtype.itemsize + w_bytes + b_bytes
                        + n * ncp * out_itemsize),
    )

    out = pl.pallas_call(
        functools.partial(_tail_kernel, inv_hw=1.0 / hw),
        out_shape=jax.ShapeDtypeStruct((n, ncp), out_dtype),
        grid_spec=pl.GridSpec(
            grid=(nb,),
            in_specs=[
                pl.BlockSpec((tn, c, hw), lambda i: (i, 0, 0)),              # streamed x (f32)
                _resident_spec((c, ncp), lambda i: (0, 0), single_buffer),   # resident weight
                _resident_spec((1, ncp), lambda i: (0, 0), single_buffer),   # resident bias
            ],
            out_specs=pl.BlockSpec((tn, ncp), lambda i: (i, 0)),
        ),
        compiler_params=pltpu.CompilerParams(
            # Batch tiles are independent -> shard grid steps across TensorCores.
            dimension_semantics=("parallel",),
            vmem_limit_bytes=vmem_limit,
        ),
        cost_estimate=cost,
    )(x3, w_t, b2)

    return out[:, :num_classes]


_SINGLE_BUFFER_OK = True  # feature-detected on first call


def inception_v3_cutted_forward(x_nchw, w_t, b2, *, num_classes, tile_n=64,
                                out_dtype=jnp.float32):
    """Post-Mixed_7c tail of InceptionV3: avgpool((1,1)) -> dropout(id) -> fc.

    x_nchw: (N, C, H, W) f32; (w_t, b2) from prepare_fc_params."""
    global _SINGLE_BUFFER_OK
    if _SINGLE_BUFFER_OK:
        try:
            return _forward(x_nchw, w_t, b2, num_classes=num_classes, tile_n=tile_n,
                            out_dtype=out_dtype, single_buffer=True)
        except Exception:
            # JAX build without BlockSpec pipeline_mode / Buffered(1) support:
            # fall back to default double-buffered resident params.
            _SINGLE_BUFFER_OK = False
    return _forward(x_nchw, w_t, b2, num_classes=num_classes, tile_n=tile_n,
                    out_dtype=out_dtype, single_buffer=False)


def _reference(x_nchw, fc_weight, fc_bias):
    """Pure-JAX f32 reference of the same forward pass."""
    pooled = jnp.mean(x_nchw.astype(jnp.float32), axis=(2, 3))      # (N, C)
    return pooled @ fc_weight.astype(jnp.float32).T + fc_bias.astype(jnp.float32)


if __name__ == "__main__":
    # Real post-Mixed_7c shapes: C=2048, H=W=8, num_classes=1000 (scaled down here).
    N, C, H, W = 16, 256, 8, 8
    NUM_CLASSES = 10

    key = jax.random.PRNGKey(0)
    kx, kw, kb = jax.random.split(key, 3)

    x = jax.random.normal(kx, (N, C, H, W), dtype=jnp.float32)
    fc_weight = jax.random.normal(kw, (NUM_CLASSES, C), dtype=jnp.float32) * 0.05
    fc_bias = jax.random.normal(kb, (NUM_CLASSES,), dtype=jnp.float32) * 0.01

    w_t, b2 = prepare_fc_params(fc_weight, fc_bias)
    y = inception_v3_cutted_forward(x, w_t, b2, num_classes=NUM_CLASSES)
    y = jax.block_until_ready(y)

    y_ref = _reference(x, fc_weight, fc_bias)
    assert y.shape == (N, NUM_CLASSES)
    # Pooling is f32; only the fc matmul inputs are bf16 -> modest tolerance.
    assert jnp.allclose(y, y_ref, atol=1e-2, rtol=1e-2), "mismatch vs reference"

    print("KERNEL_OK")
</pallas_src>

<mosaic_0001>
module attributes {stable_mosaic.version = 11 : i64} {
  func.func @_tail_kernel(%arg0: i32, %arg1: memref<8x256x64xf32, #tpu.memory_space<vmem>>, %arg2: memref<256x128xbf16, #tpu.memory_space<vmem>>, %arg3: memref<1x128xf32, #tpu.memory_space<vmem>>, %arg4: memref<8x128xf32, #tpu.memory_space<vmem>>) attributes {dimension_semantics = [#tpu.dimension_semantics<parallel>], iteration_bounds = array<i64: 2>, scalar_prefetch = 0 : i64, scratch_operands = 0 : i64, tpu.core_type = #tpu.core_type<tc>, window_params = [{transform_indices = @transform_0, window_bounds = array<i64: 8, 256, 64>}, {pipeline_mode = #tpu.pipeline_mode<synchronous>, transform_indices = @transform_1, window_bounds = array<i64: 256, 128>}, {pipeline_mode = #tpu.pipeline_mode<synchronous>, transform_indices = @transform_2, window_bounds = array<i64: 1, 128>}, {transform_indices = @transform_3, window_bounds = array<i64: 8, 128>}]} {
    %c0 = arith.constant 0 : index
    %c0_0 = arith.constant 0 : index
    %c0_1 = arith.constant 0 : index
    %0 = vector.load %arg1[%c0, %c0_0, %c0_1] : memref<8x256x64xf32, #tpu.memory_space<vmem>>, vector<8x256x64xf32>
    %cst = arith.constant dense<0.000000e+00> : vector<8x256xf32>
    %1 = vector.multi_reduction <add>, %0, %cst [2] : vector<8x256x64xf32> to vector<8x256xf32>
    %cst_2 = arith.constant 1.562500e-02 : f32
    %2 = vector.broadcast %cst_2 : f32 to vector<8x256xf32>
    %3 = arith.mulf %1, %2 : vector<8x256xf32>
    %4 = arith.truncf %3 : vector<8x256xf32> to vector<8x256xbf16>
    %c0_3 = arith.constant 0 : index
    %c0_4 = arith.constant 0 : index
    %5 = vector.load %arg2[%c0_3, %c0_4] : memref<256x128xbf16, #tpu.memory_space<vmem>>, vector<256x128xbf16>
    %cst_5 = arith.constant dense<0.000000e+00> : vector<8x128xf32>
    %6 = tpu.matmul %4, %5, %cst_5 {dimension_numbers = #tpu.dot_dimension_numbers<[1], [0], [0], [1], [0, 0, 1, 1], [], []>} : vector<8x256xbf16>, vector<256x128xbf16>, vector<8x128xf32> -> vector<8x128xf32>
    %c0_6 = arith.constant 0 : index
    %c0_7 = arith.constant 0 : index
    %7 = vector.load %arg3[%c0_6, %c0_7] : memref<1x128xf32, #tpu.memory_space<vmem>>, vector<1x128xf32>
    %8 = vector.broadcast %7 : vector<1x128xf32> to vector<8x128xf32>
    %9 = arith.addf %6, %8 : vector<8x128xf32>
    %c0_8 = arith.constant 0 : index
    %c0_9 = arith.constant 0 : index
    %10 = vector.load %arg4[%c0_8, %c0_9] : memref<8x128xf32, #tpu.memory_space<vmem>>, vector<8x128xf32>
    tpu.vector_store %arg4[%c0_8, %c0_9], %9 {strides = array<i32>} : memref<8x128xf32, #tpu.memory_space<vmem>>, vector<8x128xf32>,
    return
  }
  func.func @transform_0(%arg0: i32) -> (i32, i32, i32) {
    %c0_i32 = arith.constant 0 : i32
    %c0_i32_0 = arith.constant 0 : i32
    %c0_i32_1 = arith.constant 0 : i32
    return %arg0, %c0_i32, %c0_i32_0 : i32, i32, i32
  }
  func.func @transform_1(%arg0: i32) -> (i32, i32) {
    %c0_i32 = arith.constant 0 : i32
    %c0_i32_0 = arith.constant 0 : i32
    %c0_i32_1 = arith.constant 0 : i32
    return %c0_i32, %c0_i32_0 : i32, i32
  }
  func.func @transform_2(%arg0: i32) -> (i32, i32) {
    %c0_i32 = arith.constant 0 : i32
    %c0_i32_0 = arith.constant 0 : i32
    %c0_i32_1 = arith.constant 0 : i32
    return %c0_i32, %c0_i32_0 : i32, i32
  }
  func.func @transform_3(%arg0: i32) -> (i32, i32) {
    %c0_i32 = arith.constant 0 : i32
    %c0_i32_0 = arith.constant 0 : i32
    return %arg0, %c0_i32 : i32, i32
  }
}

module attributes {stable_mosaic.version = 11 : i64} {
  func.func @_tail_kernel(%arg0: i32, %arg1: memref<8x256x64xf32, #tpu.memory_space<vmem>>, %arg2: memref<256x128xbf16, #tpu.memory_space<vmem>>, %arg3: memref<1x128xf32, #tpu.memory_space<vmem>>, %arg4: memref<8x128xf32, #tpu.memory_space<vmem>>) attributes {dimension_semantics = [#tpu.dimension_semantics<parallel>], iteration_bounds = array<i64: 2>, scalar_prefetch = 0 : i64, scratch_operands = 0 : i64, tpu.core_type = #tpu.core_type<tc>, window_params = [{transform_indices = @transform_0, window_bounds = array<i64: 8, 256, 64>}, {pipeline_mode = #tpu.pipeline_mode<synchronous>, transform_indices = @transform_1, window_bounds = array<i64: 256, 128>}, {pipeline_mode = #tpu.pipeline_mode<synchronous>, transform_indices = @transform_2, window_bounds = array<i64: 1, 128>}, {transform_indices = @transform_3, window_bounds = array<i64: 8, 128>}]} {
    %c0 = arith.constant 0 : index
    %c0_0 = arith.constant 0 : index
    %c0_1 = arith.constant 0 : index
    %0 = vector.load %arg1[%c0, %c0_0, %c0_1] : memref<8x256x64xf32, #tpu.memory_space<vmem>>, vector<8x256x64xf32>
    %cst = arith.constant dense<0.000000e+00> : vector<8x256xf32>
    %1 = vector.multi_reduction <add>, %0, %cst [2] : vector<8x256x64xf32> to vector<8x256xf32>
    %cst_2 = arith.constant 1.562500e-02 : f32
    %2 = vector.broadcast %cst_2 : f32 to vector<8x256xf32>
    %3 = arith.mulf %1, %2 : vector<8x256xf32>
    %4 = arith.truncf %3 : vector<8x256xf32> to vector<8x256xbf16>
    %c0_3 = arith.constant 0 : index
    %c0_4 = arith.constant 0 : index
    %5 = vector.load %arg2[%c0_3, %c0_4] : memref<256x128xbf16, #tpu.memory_space<vmem>>, vector<256x128xbf16>
    %cst_5 = arith.constant dense<0.000000e+00> : vector<8x128xf32>
    %6 = tpu.matmul %4, %5, %cst_5 {dimension_numbers = #tpu.dot_dimension_numbers<[1], [0], [0], [1], [0, 0, 1, 1], [], []>} : vector<8x256xbf16>, vector<256x128xbf16>, vector<8x128xf32> -> vector<8x128xf32>
    %c0_6 = arith.constant 0 : index
    %c0_7 = arith.constant 0 : index
    %7 = vector.load %arg3[%c0_6, %c0_7] : memref<1x128xf32, #tpu.memory_space<vmem>>, vector<1x128xf32>
    %8 = vector.broadcast %7 : vector<1x128xf32> to vector<8x128xf32>
    %9 = arith.addf %6, %8 : vector<8x128xf32>
    %c0_8 = arith.constant 0 : index
    %c0_9 = arith.constant 0 : index
    %10 = vector.load %arg4[%c0_8, %c0_9] : memref<8x128xf32, #tpu.memory_space<vmem>>, vector<8x128xf32>
    tpu.vector_store %arg4[%c0_8, %c0_9], %9 {strides = array<i32>} : memref<8x128xf32, #tpu.memory_space<vmem>>, vector<8x128xf32>,
    return
  }
  func.func @transform_0(%arg0: i32) -> (i32, i32, i32) {
    %c0_i32 = arith.constant 0 : i32
    %c0_i32_0 = arith.constant 0 : i32
    %c0_i32_1 = arith.constant 0 : i32
    return %arg0, %c0_i32, %c0_i32_0 : i32, i32, i32
  }
  func.func @transform_1(%arg0: i32) -> (i32, i32) {
    %c0_i32 = arith.constant 0 : i32
    %c0_i32_0 = arith.constant 0 : i32
    %c0_i32_1 = arith.constant 0 : i32
    return %c0_i32, %c0_i32_0 : i32, i32
  }
  func.func @transform_2(%arg0: i32) -> (i32, i32) {
    %c0_i32 = arith.constant 0 : i32
    %c0_i32_0 = arith.constant 0 : i32
    %c0_i32_1 = arith.constant 0 : i32
    return %c0_i32, %c0_i32_0 : i32, i32
  }
  func.func @transform_3(%arg0: i32) -> (i32, i32) {
    %c0_i32 = arith.constant 0 : i32
    %c0_i32_0 = arith.constant 0 : i32
    return %arg0, %c0_i32 : i32, i32
  }
}

</mosaic_0001>

<bundles_post_ra>
// kernel: _forward.1
= control target key start
LH: loop header
LB: loop body
LE: loop exit
PB: predicated region body
PF: predicated region fallthrough
CT: control target
= control target key end

     0   :  { %8 = vsyncpa [#allocation3], 0  ;;  %s4634_s0 = inlined_call_operand.vmem [shape: f32[16,256,64], index: 0, kind: input, shape index: {}]   ;;  %s4635_s1 = inlined_call_operand.vmem [shape: bf16[256,128], index: 1, kind: input, shape index: {}]   ;;  %s4636_s2 = inlined_call_operand.vmem [shape: f32[1,128], index: 2, kind: input, shape index: {}]   ;;  %s4637_s3 = inlined_call_operand.hbm [shape: f32[16,128], index: 3, kind: output, shape index: {}]  }
   0x1   :  { %10 = vsyncpa [#allocation3 + $0x1], 0  ;;  %s2971_s12 = smov 0   ;;  %s2973_s13 = smov 0  }
   0x2   :  { %s2975_s14 = smov 0   ;;  %s2977_s15 = smov 0  }
   0x3 LB: > { %s2753_s16 = sadd.s32 4294967295, %s2949_s15   ;;  %s2754_s17 = sadd.s32 4294967294, %s2949_s15   ;;  %s2949_s15 = sphi %s2977_s15, %s4780_s15   ;;  %s2945_s14 = sphi %s2975_s14, %s4779_s14   ;;  %s2941_s13 = sphi %s2973_s13, %s4778_s13   ;;  %s2937_s12 = sphi %s2971_s12, %s4777_s12  }
   0x4   : > { %s2994_s18 = sadd.s32 1, %s2949_s15   ;;  %s91_s19 = sadd.s32 1, %s2945_s14 }
   0x5   : > { %s88_s20 = ssub.s32 %s2949_s15, %s2994_s18  ;;  %p101_p0 = scmp.ne.s32.totalorder %s2945_s14, %s2941_s13 }
   0x6   : > { %p89_p1 = scmp.eq.s32.totalorder %s88_s20, 0  ;;  %p102_p2 = scmp.eq.s32.totalorder %s2753_s16, 1 }
   0x7   : > { %p107_p3 = scmp.ne.s32.totalorder %s2941_s13, %s2937_s12  ;;  %p108_p4 = scmp.eq.s32.totalorder %s2754_s17, 1 }
   0x8   : > { %s3004_s21 = scalar_select %p89_p1, %s2945_s14, %s91_s19  }
   0x9   : > { %p3006_p5 = por %p102_p2, %p101_p0  ;;  %p3010_p6 = por %p108_p4, %p107_p3 }
   0xa   : > { %p2757_p7 = scmp.ge.s32.totalorder %s2949_s15, 1  ;;  %p142_p8 = scmp.lt.s32.totalorder %s2949_s15, 3 }
   0xc   : > { %p143_p9 = pnand %p2757_p7, %p142_p8 }
   0xe   : > { %146 = sbr.rel (%p143_p9) target bundleno = 972 (0x3cc), region = 32 }
  0x13   : > { %s3016_s24 = sshll.u32 %s2753_s16, 3  ;;  %vm430_vm0 = vcmask 523264   ;;  %vm2008_vm1 = vcmask 130112   ;;  %vm2012_vm2 = vcmask 195712   ;;  %vm4638_vm3 = vcmask 261312   ;;  %s2907_s17 = scalar_lea.hbm %s4637_s3, 16 }
  0x14   : > { %p168_p10 = scmp.lt.s32.totalorder %s3016_s24, 15  ;;  %vm2020_vm4 = vcmask 326912   ;;  %vm2024_vm5 = vcmask 392512   ;;  %vm2028_vm6 = vcmask 458112   ;;  %vm4639_vm7 = vcmask 523712   ;;  %s2690_s5 = scalar_lea.hbm %s4637_s3, %s3016_s24 }
  0x15   : > { %vm2036_vm8 = vcmask 589312   ;;  %vm2040_vm9 = vcmask 654912   ;;  %vm2044_vm10 = vcmask 720512   ;;  %vm4642_vm11 = vcmask 786112   ;;  %s2694_s8 = sshll.u32 %s2690_s5, 4  ;;  %s2695_s8 = int_to_ptr.hbm [resolvable:$true] %s2694_s8 }
  0x16   : > { %s169_s25 = scalar_select %p168_p10, %s3016_s24, 15  ;;  %vm2052_vm12 = vcmask 851712   ;;  %vm2056_vm13 = vcmask 917312   ;;  %vm2060_vm14 = vcmask 982912   ;;  %vm2064_vm15 = vcmask 1048512  }
  0x17   : > { %s2901_s10 = sshra.s32 %s2695_s8, 4  ;;  %s2902_s10 = int_to_ptr.hbm [resolvable:$true] %s2901_s10 }
  0x18   : > { %s2830_s26 = sshll.u32 %s169_s25, 8  ;;  %s2903_s11 = scalar_lea.hbm %s2902_s10, 8 }
  0x19   : > { %s3023_s29 = scalar_lea.vmem %s4634_s0, %s2830_s26  ;;  %s164_s26 = sand.u32 1, %s2941_s13  }
  0x1a   : > { %v178_v0 = vld [vmem:[%s3023_s29 + $0x20] sm:$0xff]  ;;  %v176_v1 = vld [vmem:[%s3023_s29 + $0x10] sm:$0xff]  ;;  %v179_v6 = vld [vmem:[%s3023_s29 + $0x28] sm:$0xff]  ;;  %s2758_s27 = sshll.u32 %s164_s26, 3  ;;  %s2680_s9 = scalar_lea.sflag [#allocation3], %s164_s26 }
  0x1b   : > { %v174_v2 = vld [vmem:[%s3023_s29] sm:$0xff]  ;;  %v443_v3 = vsel %vm430_vm0, %v178_v0, 0.0  ;;  %v437_v4 = vsel %vm430_vm0, %v176_v1, 0.0  ;;  %v177_v7 = vld [vmem:[%s3023_s29 + $0x18] sm:$0xff]  ;;  %v175_v8 = vld [vmem:[%s3023_s29 + $0x8] sm:$0xff]  ;;  %v446_v9 = vsel %vm430_vm0, %v179_v6, 0.0  ;;  %p2904_p11 = scmp.ne.s32.totalorder %s2902_s10, %s2903_s11  ;;  %p2908_p0 = scmp.lt.s32.totalorder %s2902_s10, %s4637_s3 }
  0x1c   : > { %v431_v5 = vsel %vm430_vm0, %v174_v2, 0.0  ;;  %444 = vadd.xlane.f32.xlu2 %v443_v3  ;;  %438 = vadd.xlane.f32.xlu1 %v437_v4  ;;  %v440_v10 = vsel %vm430_vm0, %v177_v7, 0.0  ;;  %v434_v11 = vsel %vm430_vm0, %v175_v8, 0.0  ;;  %v182_v12 = vld [vmem:[%s3023_s29 + $0x40] sm:$0xff]  ;;  %v181_v13 = vld [vmem:[%s3023_s29 + $0x38] sm:$0xff]  ;;  %v180_v14 = vld [vmem:[%s3023_s29 + $0x30] sm:$0xff]  ;;  %p2909_p1 = scmp.lt.s32.totalorder %s2907_s17, %s2903_s11 }
  0x1d   : > { %432 = vadd.xlane.f32.xlu0 %v431_v5  ;;  %v455_v15 = vsel %vm430_vm0, %v182_v12, 0.0  ;;  %v452_v16 = vsel %vm430_vm0, %v181_v13, 0.0  ;;  %v449_v17 = vsel %vm430_vm0, %v180_v14, 0.0  ;;  %v185_v18 = vld [vmem:[%s3023_s29 + $0x58] sm:$0xff]  ;;  %v184_v19 = vld [vmem:[%s3023_s29 + $0x50] sm:$0xff]  ;;  %v183_v20 = vld [vmem:[%s3023_s29 + $0x48] sm:$0xff]  ;;  %p2905_p12 = pnand %p2904_p11, %p3006_p5 }
  0x1e   : > { %v464_v21 = vsel %vm430_vm0, %v185_v18, 0.0  ;;  %v461_v22 = vsel %vm430_vm0, %v184_v19, 0.0  ;;  %v458_v23 = vsel %vm430_vm0, %v183_v20, 0.0  ;;  %v188_v24 = vld [vmem:[%s3023_s29 + $0x70] sm:$0xff]  ;;  %v187_v25 = vld [vmem:[%s3023_s29 + $0x68] sm:$0xff]  ;;  %v186_v26 = vld [vmem:[%s3023_s29 + $0x60] sm:$0xff]  ;;  %p2910_p2 = por %p2909_p1, %p2908_p0 }
  0x1f   : > { %v473_v27 = vsel %vm430_vm0, %v188_v24, 0.0  ;;  %v470_v28 = vsel %vm430_vm0, %v187_v25, 0.0  ;;  %v467_v29 = vsel %vm430_vm0, %v186_v26, 0.0  ;;  %v191_v30 = vld [vmem:[%s3023_s29 + $0x88] sm:$0xff]  ;;  %v190_v31 = vld [vmem:[%s3023_s29 + $0x80] sm:$0xff]  ;;  %v189_v32 = vld [vmem:[%s3023_s29 + $0x78] sm:$0xff]  ;;  %p2906_p13 = pneg %p2905_p12 }
  0x20   : > { %v482_v33 = vsel %vm430_vm0, %v191_v30, 0.0  ;;  %v479_v34 = vsel %vm430_vm0, %v190_v31, 0.0  ;;  %v476_v35 = vsel %vm430_vm0, %v189_v32, 0.0  ;;  %v194_v36 = vld [vmem:[%s3023_s29 + $0xa0] sm:$0xff]  ;;  %v193_v37 = vld [vmem:[%s3023_s29 + $0x98] sm:$0xff]  ;;  %v192_v38 = vld [vmem:[%s3023_s29 + $0x90] sm:$0xff] }
  0x21   : > { %v491_v39 = vsel %vm430_vm0, %v194_v36, 0.0  ;;  %v488_v40 = vsel %vm430_vm0, %v193_v37, 0.0  ;;  %v485_v41 = vsel %vm430_vm0, %v192_v38, 0.0  ;;  %v197_v42 = vld [vmem:[%s3023_s29 + $0xb8] sm:$0xff]  ;;  %v196_v43 = vld [vmem:[%s3023_s29 + $0xb0] sm:$0xff]  ;;  %v195_v44 = vld [vmem:[%s3023_s29 + $0xa8] sm:$0xff]  ;;  %p2911_p3 = pnand %p2910_p2, %p2906_p13 }
  0x22   : > { %v500_v45 = vsel %vm430_vm0, %v197_v42, 0.0  ;;  %v497_v46 = vsel %vm430_vm0, %v196_v43, 0.0  ;;  %v494_v47 = vsel %vm430_vm0, %v195_v44, 0.0  ;;  %v200_v48 = vld [vmem:[%s3023_s29 + $0xd0] sm:$0xff]  ;;  %v199_v49 = vld [vmem:[%s3023_s29 + $0xc8] sm:$0xff]  ;;  %v198_v50 = vld [vmem:[%s3023_s29 + $0xc0] sm:$0xff] }
  0x23   : > { %v509_v51 = vsel %vm430_vm0, %v200_v48, 0.0  ;;  %v506_v52 = vsel %vm430_vm0, %v199_v49, 0.0  ;;  %v503_v53 = vsel %vm430_vm0, %v198_v50, 0.0  ;;  %v203_v54 = vld [vmem:[%s3023_s29 + $0xe8] sm:$0xff]  ;;  %v202_v55 = vld [vmem:[%s3023_s29 + $0xe0] sm:$0xff]  ;;  %v201_v56 = vld [vmem:[%s3023_s29 + $0xd8] sm:$0xff] }
  0x24   : > { %447 = vadd.xlane.f32.xlu2 %v446_v9  ;;  %441 = vadd.xlane.f32.xlu1 %v440_v10  ;;  %v518_v57 = vsel %vm430_vm0, %v203_v54, 0.0  ;;  %v515_v58 = vsel %vm430_vm0, %v202_v55, 0.0  ;;  %v512_v59 = vsel %vm430_vm0, %v201_v56, 0.0  ;;  %v206_v60 = vld [vmem:[%s3023_s29 + $0x100] sm:$0xff]  ;;  %v205_v61 = vld [vmem:[%s3023_s29 + $0xf8] sm:$0xff]  ;;  %v204_v62 = vld [vmem:[%s3023_s29 + $0xf0] sm:$0xff] }
  0x25   : > { %435 = vadd.xlane.f32.xlu0 %v434_v11  ;;  %v527_v63 = vsel %vm430_vm0, %v206_v60, 0.0  ;;  %v524_v0 = vsel %vm430_vm0, %v205_v61, 0.0  ;;  %v521_v1 = vsel %vm430_vm0, %v204_v62, 0.0  ;;  %v209_v2 = vld [vmem:[%s3023_s29 + $0x118] sm:$0xff]  ;;  %v208_v3 = vld [vmem:[%s3023_s29 + $0x110] sm:$0xff]  ;;  %v207_v4 = vld [vmem:[%s3023_s29 + $0x108] sm:$0xff] }
  0x26   : > { %v536_v5 = vsel %vm430_vm0, %v209_v2, 0.0  ;;  %v533_v6 = vsel %vm430_vm0, %v208_v3, 0.0  ;;  %v530_v7 = vsel %vm430_vm0, %v207_v4, 0.0  ;;  %v212_v8 = vld [vmem:[%s3023_s29 + $0x130] sm:$0xff]  ;;  %v211_v9 = vld [vmem:[%s3023_s29 + $0x128] sm:$0xff]  ;;  %v210_v10 = vld [vmem:[%s3023_s29 + $0x120] sm:$0xff] }
  0x27   : > { %v545_v11 = vsel %vm430_vm0, %v212_v8, 0.0  ;;  %v542_v12 = vsel %vm430_vm0, %v211_v9, 0.0  ;;  %v539_v13 = vsel %vm430_vm0, %v210_v10, 0.0  ;;  %v215_v14 = vld [vmem:[%s3023_s29 + $0x148] sm:$0xff]  ;;  %v218_v20 = vld [vmem:[%s3023_s29 + $0x160] sm:$0xff]  ;;  %v221_v26 = vld [vmem:[%s3023_s29 + $0x178] sm:$0xff] }
  0x28   : > { %v219_v30 = vld [vmem:[%s3023_s29 + $0x168] sm:$0xff]  ;;  %v572_v32 = vsel %vm430_vm0, %v221_v26, 0.0  ;;  %v225_v48 = vld [vmem:[%s3023_s29 + $0x198] sm:$0xff]  ;;  %s166_s6 = scalar_lea.vmem [#allocation2], %s2758_s27 }
  0x29   : > { %v223_v36 = vld [vmem:[%s3023_s29 + $0x188] sm:$0xff]  ;;  %v229_v54 = vld [vmem:[%s3023_s29 + $0x1b8] sm:$0xff]  ;;  %s2692_s7 = sshll.u32 %s166_s6, 4  ;;  %s2693_s7 = int_to_ptr.vmem [resolvable:$true] %s2692_s7 }
  0x2a   : > { %v578_v42 = vsel %vm430_vm0, %v223_v36, 0.0  ;;  %v227_v44 = vld [vmem:[%s3023_s29 + $0x1a8] sm:$0xff]  ;;  %v596_v60 = vsel %vm430_vm0, %v229_v54, 0.0  ;;  %v233_v62 = vld [vmem:[%s3023_s29 + $0x1d8] sm:$0xff] }
  0x2b   : > { %v590_v50 = vsel %vm430_vm0, %v227_v44, 0.0  ;;  %v231_v2 = vld [vmem:[%s3023_s29 + $0x1c8] sm:$0xff]  ;;  %v608_v4 = vsel %vm430_vm0, %v233_v62, 0.0  ;;  %v241_v26 = vld [vmem:[%s3023_s29 + $0x218] sm:$0xff] }
  0x2c   : > { %456 = vadd.xlane.f32.xlu2 %v455_v15  ;;  %453 = vadd.xlane.f32.xlu1 %v452_v16  ;;  %v214_v15 = vld [vmem:[%s3023_s29 + $0x140] sm:$0xff]  ;;  %v213_v16 = vld [vmem:[%s3023_s29 + $0x138] sm:$0xff]  ;;  %v235_v8 = vld [vmem:[%s3023_s29 + $0x1e8] sm:$0xff] }
  0x2d   : > { %450 = vadd.xlane.f32.xlu0 %v449_v17  ;;  %v554_v17 = vsel %vm430_vm0, %v215_v14, 0.0  ;;  %v551_v18 = vsel %vm430_vm0, %v214_v15, 0.0  ;;  %v548_v19 = vsel %vm430_vm0, %v213_v16, 0.0  ;;  %v614_v14 = vsel %vm430_vm0, %v235_v8, 0.0  ;;  %v239_v16 = vld [vmem:[%s3023_s29 + $0x208] sm:$0xff] }
  0x2e   : > { %v243_v44 = vld [vmem:[%s3023_s29 + $0x228] sm:$0xff] }
  0x34   : > { %465 = vadd.xlane.f32.xlu2 %v464_v21  ;;  %462 = vadd.xlane.f32.xlu1 %v461_v22  ;;  %v217_v21 = vld [vmem:[%s3023_s29 + $0x158] sm:$0xff]  ;;  %v216_v22 = vld [vmem:[%s3023_s29 + $0x150] sm:$0xff] }
  0x35   : > { %459 = vadd.xlane.f32.xlu0 %v458_v23  ;;  %v563_v23 = vsel %vm430_vm0, %v218_v20, 0.0  ;;  %v560_v24 = vsel %vm430_vm0, %v217_v21, 0.0  ;;  %v557_v25 = vsel %vm430_vm0, %v216_v22, 0.0  ;;  %v237_v20 = vld [vmem:[%s3023_s29 + $0x1f8] sm:$0xff]  ;;  %v626_v22 = vsel %vm430_vm0, %v239_v16, 0.0 }
  0x36   : > { %v253_v16 = vld [vmem:[%s3023_s29 + $0x278] sm:$0xff] }
  0x3c   : > { %474 = vadd.xlane.f32.xlu2 %v473_v27  ;;  %471 = vadd.xlane.f32.xlu1 %v470_v28  ;;  %v220_v27 = vld [vmem:[%s3023_s29 + $0x170] sm:$0xff] }
  0x3d   : > { %468 = vadd.xlane.f32.xlu0 %v467_v29 }
  0x44   : > { %483 = vadd.xlane.f32.xlu2 %v482_v33  ;;  %480 = vadd.xlane.f32.xlu1 %v479_v34  ;;  %v569_v33 = vsel %vm430_vm0, %v220_v27, 0.0  ;;  %v566_v34 = vsel %vm430_vm0, %v219_v30, 0.0 }
  0x45   : > { %477 = vadd.xlane.f32.xlu0 %v476_v35  ;;  %v224_v35 = vld [vmem:[%s3023_s29 + $0x190] sm:$0xff] }
  0x4c   : > { %492 = vadd.xlane.f32.xlu2 %v491_v39  ;;  %489 = vadd.xlane.f32.xlu1 %v488_v40  ;;  %v222_v39 = vld [vmem:[%s3023_s29 + $0x180] sm:$0xff] }
  0x4d   : > { %486 = vadd.xlane.f32.xlu0 %v485_v41  ;;  %v581_v41 = vsel %vm430_vm0, %v224_v35, 0.0  ;;  %v575_v43 = vsel %vm430_vm0, %v222_v39, 0.0  ;;  %v632_v35 = vsel %vm430_vm0, %v241_v26, 0.0  ;;  %v245_v39 = vld [vmem:[%s3023_s29 + $0x238] sm:$0xff] }
  0x54   : > { %501 = vadd.xlane.f32.xlu2 %v500_v45  ;;  %498 = vadd.xlane.f32.xlu1 %v497_v46  ;;  %v226_v45 = vld [vmem:[%s3023_s29 + $0x1a0] sm:$0xff] }
  0x55   : > { %495 = vadd.xlane.f32.xlu0 %v494_v47 }
  0x5c   : > { %510 = vadd.xlane.f32.xlu2 %v509_v51  ;;  %507 = vadd.xlane.f32.xlu1 %v506_v52  ;;  %v587_v51 = vsel %vm430_vm0, %v226_v45, 0.0  ;;  %v584_v52 = vsel %vm430_vm0, %v225_v48, 0.0  ;;  %v644_v48 = vsel %vm430_vm0, %v245_v39, 0.0  ;;  %v255_v39 = vld [vmem:[%s3023_s29 + $0x288] sm:$0xff] }
  0x5d   : > { %504 = vadd.xlane.f32.xlu0 %v503_v53  ;;  %v230_v53 = vld [vmem:[%s3023_s29 + $0x1c0] sm:$0xff] }
  0x64   : > { %519 = vadd.xlane.f32.xlu2 %v518_v57  ;;  %516 = vadd.xlane.f32.xlu1 %v515_v58  ;;  %v228_v57 = vld [vmem:[%s3023_s29 + $0x1b0] sm:$0xff] }
  0x65   : > { %513 = vadd.xlane.f32.xlu0 %v512_v59  ;;  %v599_v59 = vsel %vm430_vm0, %v230_v53, 0.0  ;;  %v593_v61 = vsel %vm430_vm0, %v228_v57, 0.0  ;;  %v247_v53 = vld [vmem:[%s3023_s29 + $0x248] sm:$0xff] }
  0x66   : > { %v650_v62 = vsel %vm430_vm0, %v247_v53, 0.0 }
  0x6c   : > { %528 = vadd.xlane.f32.xlu2 %v527_v63  ;;  %525 = vadd.xlane.f32.xlu1 %v524_v0  ;;  %v232_v63 = vld [vmem:[%s3023_s29 + $0x1d0] sm:$0xff] }
  0x6d   : > { %522 = vadd.xlane.f32.xlu0 %v521_v1 }
  0x74   : > { %537 = vadd.xlane.f32.xlu2 %v536_v5  ;;  %534 = vadd.xlane.f32.xlu1 %v533_v6  ;;  %v605_v5 = vsel %vm430_vm0, %v232_v63, 0.0  ;;  %v602_v6 = vsel %vm430_vm0, %v231_v2, 0.0  ;;  %v251_v2 = vld [vmem:[%s3023_s29 + $0x268] sm:$0xff] }
  0x75   : > { %531 = vadd.xlane.f32.xlu0 %v530_v7  ;;  %v236_v7 = vld [vmem:[%s3023_s29 + $0x1f0] sm:$0xff] }
  0x7c   : > { %546 = vadd.xlane.f32.xlu2 %v545_v11  ;;  %543 = vadd.xlane.f32.xlu1 %v542_v12  ;;  %v234_v11 = vld [vmem:[%s3023_s29 + $0x1e0] sm:$0xff] }
  0x7d   : > { %540 = vadd.xlane.f32.xlu0 %v539_v13  ;;  %v617_v13 = vsel %vm430_vm0, %v236_v7, 0.0  ;;  %v611_v15 = vsel %vm430_vm0, %v234_v11, 0.0  ;;  %v249_v7 = vld [vmem:[%s3023_s29 + $0x258] sm:$0xff]  ;;  %v662_v11 = vsel %vm430_vm0, %v251_v2, 0.0 }
  0x84   : > { %555 = vadd.xlane.f32.xlu2 %v554_v17  ;;  %552 = vadd.xlane.f32.xlu1 %v551_v18  ;;  %v238_v17 = vld [vmem:[%s3023_s29 + $0x200] sm:$0xff] }
  0x85   : > { %549 = vadd.xlane.f32.xlu0 %v548_v19 }
  0x8c   : > { %564 = vadd.xlane.f32.xlu2 %v563_v23  ;;  %561 = vadd.xlane.f32.xlu1 %v560_v24  ;;  %v623_v23 = vsel %vm430_vm0, %v238_v17, 0.0  ;;  %v620_v24 = vsel %vm430_vm0, %v237_v20, 0.0 }
  0x8d   : > { %558 = vadd.xlane.f32.xlu0 %v557_v25  ;;  %v242_v25 = vld [vmem:[%s3023_s29 + $0x220] sm:$0xff] }
  0x8f   : > { %v3117_v28 = vpop.xlane.xlu2 %444  ;;  %v3119_v29 = vpop.xlane.xlu1 %438 }
  0x90   : > { %v3122_v31 = vpop.xlane.xlu0 %432 }
  0x94   : > { %573 = vadd.xlane.f32.xlu2 %v572_v32  ;;  %570 = vadd.xlane.f32.xlu1 %v569_v33  ;;  %v240_v32 = vld [vmem:[%s3023_s29 + $0x210] sm:$0xff] }
  0x95   : > { %567 = vadd.xlane.f32.xlu0 %v566_v34  ;;  %v635_v34 = vsel %vm430_vm0, %v242_v25, 0.0  ;;  %v629_v36 = vsel %vm430_vm0, %v240_v32, 0.0  ;;  %v668_v25 = vsel %vm430_vm0, %v253_v16, 0.0  ;;  %v257_v32 = vld [vmem:[%s3023_s29 + $0x298] sm:$0xff] }
  0x97   : > { %v3129_v37 = vpop.xlane.xlu2 %447  ;;  %v3131_v38 = vpop.xlane.xlu1 %441 }
  0x98   : > { %v3134_v40 = vpop.xlane.xlu0 %435 }
  0x9c   : > { %582 = vadd.xlane.f32.xlu2 %v581_v41  ;;  %579 = vadd.xlane.f32.xlu1 %v578_v42  ;;  %v244_v41 = vld [vmem:[%s3023_s29 + $0x230] sm:$0xff] }
  0x9d   : > { %576 = vadd.xlane.f32.xlu0 %v575_v43 }
  0x9f   : > { %v3141_v46 = vpop.xlane.xlu2 %456  ;;  %v3143_v47 = vpop.xlane.xlu1 %453 }
  0xa0   : > { %v3146_v49 = vpop.xlane.xlu0 %450 }
  0xa4   : > { %591 = vadd.xlane.f32.xlu2 %v590_v50  ;;  %588 = vadd.xlane.f32.xlu1 %v587_v51  ;;  %v641_v50 = vsel %vm430_vm0, %v244_v41, 0.0  ;;  %v638_v51 = vsel %vm430_vm0, %v243_v44, 0.0  ;;  %v680_v44 = vsel %vm430_vm0, %v257_v32, 0.0  ;;  %v265_v32 = vld [vmem:[%s3023_s29 + $0x2d8] sm:$0xff] }
  0xa5   : > { %585 = vadd.xlane.f32.xlu0 %v584_v52  ;;  %v248_v52 = vld [vmem:[%s3023_s29 + $0x250] sm:$0xff] }
  0xa7   : > { %v3153_v55 = vpop.xlane.xlu2 %465  ;;  %v3155_v56 = vpop.xlane.xlu1 %462 }
  0xa8   : > { %v3158_v58 = vpop.xlane.xlu0 %459 }
  0xac   : > { %600 = vadd.xlane.f32.xlu2 %v599_v59  ;;  %597 = vadd.xlane.f32.xlu1 %v596_v60  ;;  %v246_v59 = vld [vmem:[%s3023_s29 + $0x240] sm:$0xff] }
  0xad   : > { %594 = vadd.xlane.f32.xlu0 %v593_v61  ;;  %v653_v61 = vsel %vm430_vm0, %v248_v52, 0.0  ;;  %v647_v63 = vsel %vm430_vm0, %v246_v59, 0.0  ;;  %v259_v52 = vld [vmem:[%s3023_s29 + $0x2a8] sm:$0xff] }
  0xae   : > { %v686_v2 = vsel %vm430_vm0, %v259_v52, 0.0 }
  0xaf   : > { %v3165_v0 = vpop.xlane.xlu2 %474  ;;  %v3167_v1 = vpop.xlane.xlu1 %471 }
  0xb0   : > { %v3170_v3 = vpop.xlane.xlu0 %468 }
  0xb4   : > { %609 = vadd.xlane.f32.xlu2 %v608_v4  ;;  %606 = vadd.xlane.f32.xlu1 %v605_v5  ;;  %v250_v4 = vld [vmem:[%s3023_s29 + $0x260] sm:$0xff] }
  0xb5   : > { %603 = vadd.xlane.f32.xlu0 %v602_v6 }
  0xb7   : > { %v3177_v9 = vpop.xlane.xlu2 %483  ;;  %v3179_v10 = vpop.xlane.xlu1 %480 }
  0xb8   : > { %v3182_v12 = vpop.xlane.xlu0 %477 }
  0xbc   : > { %618 = vadd.xlane.f32.xlu2 %v617_v13  ;;  %615 = vadd.xlane.f32.xlu1 %v614_v14  ;;  %v659_v13 = vsel %vm430_vm0, %v250_v4, 0.0  ;;  %v656_v14 = vsel %vm430_vm0, %v249_v7, 0.0  ;;  %v263_v7 = vld [vmem:[%s3023_s29 + $0x2c8] sm:$0xff] }
  0xbd   : > { %612 = vadd.xlane.f32.xlu0 %v611_v15  ;;  %v254_v15 = vld [vmem:[%s3023_s29 + $0x280] sm:$0xff] }
  0xbf   : > { %v3189_v18 = vpop.xlane.xlu2 %492  ;;  %v3191_v19 = vpop.xlane.xlu1 %489 }
  0xc0   : > { %v3194_v21 = vpop.xlane.xlu0 %486 }
  0xc4   : > { %627 = vadd.xlane.f32.xlu2 %v626_v22  ;;  %624 = vadd.xlane.f32.xlu1 %v623_v23  ;;  %v252_v22 = vld [vmem:[%s3023_s29 + $0x270] sm:$0xff] }
  0xc5   : > { %621 = vadd.xlane.f32.xlu0 %v620_v24  ;;  %v671_v24 = vsel %vm430_vm0, %v254_v15, 0.0  ;;  %v665_v26 = vsel %vm430_vm0, %v252_v22, 0.0  ;;  %v261_v15 = vld [vmem:[%s3023_s29 + $0x2b8] sm:$0xff]  ;;  %v698_v22 = vsel %vm430_vm0, %v263_v7, 0.0  ;;  %v267_v7 = vld [vmem:[%s3023_s29 + $0x2e8] sm:$0xff] }
  0xc7   : > { %v3201_v27 = vpop.xlane.xlu2 %501  ;;  %v3203_v30 = vpop.xlane.xlu1 %498 }
  0xc8   : > { %v3206_v33 = vpop.xlane.xlu0 %495 }
  0xcc   : > { %636 = vadd.xlane.f32.xlu2 %v635_v34  ;;  %633 = vadd.xlane.f32.xlu1 %v632_v35  ;;  %v256_v34 = vld [vmem:[%s3023_s29 + $0x290] sm:$0xff] }
  0xcd   : > { %630 = vadd.xlane.f32.xlu0 %v629_v36 }
  0xcf   : > { %v3213_v42 = vpop.xlane.xlu2 %510  ;;  %v3215_v43 = vpop.xlane.xlu1 %507 }
  0xd0   : > { %v3218_v45 = vpop.xlane.xlu0 %504 }
  0xd4   : > { %645 = vadd.xlane.f32.xlu2 %v644_v48  ;;  %642 = vadd.xlane.f32.xlu1 %v641_v50  ;;  %v677_v48 = vsel %vm430_vm0, %v256_v34, 0.0  ;;  %v674_v50 = vsel %vm430_vm0, %v255_v39, 0.0 }
  0xd5   : > { %639 = vadd.xlane.f32.xlu0 %v638_v51  ;;  %v260_v51 = vld [vmem:[%s3023_s29 + $0x2b0] sm:$0xff] }
  0xd7   : > { %v3225_v54 = vpop.xlane.xlu2 %519  ;;  %v3227_v57 = vpop.xlane.xlu1 %516 }
  0xd8   : > { %v3230_v60 = vpop.xlane.xlu0 %513 }
  0xdc   : > { %654 = vadd.xlane.f32.xlu2 %v653_v61  ;;  %651 = vadd.xlane.f32.xlu1 %v650_v62  ;;  %v258_v61 = vld [vmem:[%s3023_s29 + $0x2a0] sm:$0xff] }
  0xdd   : > { %648 = vadd.xlane.f32.xlu0 %v647_v63  ;;  %v689_v63 = vsel %vm430_vm0, %v260_v51, 0.0  ;;  %v683_v4 = vsel %vm430_vm0, %v258_v61, 0.0  ;;  %v704_v51 = vsel %vm430_vm0, %v265_v32, 0.0  ;;  %v269_v61 = vld [vmem:[%s3023_s29 + $0x2f8] sm:$0xff] }
  0xdf   : > { %v3237_v5 = vpop.xlane.xlu2 %528  ;;  %v3239_v6 = vpop.xlane.xlu1 %525 }
  0xe0   : > { %v3242_v8 = vpop.xlane.xlu0 %522 }
  0xe1   : > { %4646 = vst [vmem:[#allocation5_spill] sm:$0xff] %v3242_v8 }
  0xe4   : > { %663 = vadd.xlane.f32.xlu2 %v662_v11  ;;  %660 = vadd.xlane.f32.xlu1 %v659_v13  ;;  %v262_v11 = vld [vmem:[%s3023_s29 + $0x2c0] sm:$0xff] }
  0xe5   : > { %657 = vadd.xlane.f32.xlu0 %v656_v14 }
  0xe7   : > { %v3249_v17 = vpop.xlane.xlu2 %537  ;;  %v3251_v20 = vpop.xlane.xlu1 %534 }
  0xe8   : > { %v3254_v23 = vpop.xlane.xlu0 %531 }
  0xec   : > { %672 = vadd.xlane.f32.xlu2 %v671_v24  ;;  %669 = vadd.xlane.f32.xlu1 %v668_v25  ;;  %v695_v24 = vsel %vm430_vm0, %v262_v11, 0.0  ;;  %v692_v25 = vsel %vm430_vm0, %v261_v15, 0.0  ;;  %v716_v15 = vsel %vm430_vm0, %v269_v61, 0.0 }
  0xed   : > { %666 = vadd.xlane.f32.xlu0 %v665_v26  ;;  %v266_v26 = vld [vmem:[%s3023_s29 + $0x2e0] sm:$0xff] }
  0xef   : > { %v3261_v35 = vpop.xlane.xlu2 %546  ;;  %v3263_v36 = vpop.xlane.xlu1 %543 }
  0xf0   : > { %v3266_v41 = vpop.xlane.xlu0 %540 }
  0xf4   : > { %681 = vadd.xlane.f32.xlu2 %v680_v44  ;;  %678 = vadd.xlane.f32.xlu1 %v677_v48  ;;  %v264_v44 = vld [vmem:[%s3023_s29 + $0x2d0] sm:$0xff] }
  0xf5   : > { %675 = vadd.xlane.f32.xlu0 %v674_v50  ;;  %v707_v50 = vsel %vm430_vm0, %v266_v26, 0.0  ;;  %v701_v52 = vsel %vm430_vm0, %v264_v44, 0.0  ;;  %v271_v26 = vld [vmem:[%s3023_s29 + $0x308] sm:$0xff] }
  0xf6   : > { %v722_v61 = vsel %vm430_vm0, %v271_v26, 0.0 }
  0xf7   : > { %v3273_v53 = vpop.xlane.xlu2 %555  ;;  %v3275_v59 = vpop.xlane.xlu1 %552 }
  0xf8   : > { %v3278_v62 = vpop.xlane.xlu0 %549 }
  0xfc   : > { %690 = vadd.xlane.f32.xlu2 %v689_v63  ;;  %687 = vadd.xlane.f32.xlu1 %v686_v2  ;;  %v268_v63 = vld [vmem:[%s3023_s29 + $0x2f0] sm:$0xff] }
  0xfd   : > { %684 = vadd.xlane.f32.xlu0 %v683_v4 }
  0xff   : > { %v3285_v13 = vpop.xlane.xlu2 %564  ;;  %v3287_v14 = vpop.xlane.xlu1 %561 }
 0x100   : > { %4647 = vst [vmem:[#allocation6_spill] sm:$0xff] %v3285_v13  ;;  %v3290_v16 = vpop.xlane.xlu0 %558 }
 0x104   : > { %699 = vadd.xlane.f32.xlu2 %v698_v22  ;;  %696 = vadd.xlane.f32.xlu1 %v695_v24  ;;  %v713_v22 = vsel %vm430_vm0, %v268_v63, 0.0  ;;  %v710_v24 = vsel %vm430_vm0, %v267_v7, 0.0  ;;  %v275_v7 = vld [vmem:[%s3023_s29 + $0x328] sm:$0xff] }
 0x105   : > { %693 = vadd.xlane.f32.xlu0 %v692_v25  ;;  %v272_v25 = vld [vmem:[%s3023_s29 + $0x310] sm:$0xff] }
 0x107   : > { %v3297_v34 = vpop.xlane.xlu2 %573  ;;  %v3299_v39 = vpop.xlane.xlu1 %570 }
 0x108   : > { %4648 = vst [vmem:[#allocation7_spill] sm:$0xff] %v3297_v34  ;;  %v3302_v48 = vpop.xlane.xlu0 %567  ;;  %v1212_v34 = vmul.f32 0.015625, %v3167_v1 }
 0x109   : > { %4649 = vst [vmem:[#allocation8_spill] sm:$0xff] %v3299_v39  ;;  %v1215_v39 = vmul.f32 0.015625, %v3179_v10 }
 0x10a   : > { %4650 = vst [vmem:[#allocation9_spill] sm:$0xff] %v3302_v48  ;;  %v1216_v48 = vmul.f32 0.015625, %v3177_v9 }
 0x10c   : > { %708 = vadd.xlane.f32.xlu2 %v707_v50  ;;  %705 = vadd.xlane.f32.xlu1 %v704_v51  ;;  %v270_v50 = vld [vmem:[%s3023_s29 + $0x300] sm:$0xff] }
 0x10d   : > { %702 = vadd.xlane.f32.xlu0 %v701_v52  ;;  %v725_v52 = vsel %vm430_vm0, %v272_v25, 0.0  ;;  %v719_v63 = vsel %vm430_vm0, %v270_v50, 0.0  ;;  %v734_v25 = vsel %vm430_vm0, %v275_v7, 0.0 }
 0x10f   : > { %v3309_v2 = vpop.xlane.xlu2 %582  ;;  %v3311_v4 = vpop.xlane.xlu1 %579 }
 0x110   : > { %4651 = vst [vmem:[#allocation10_spill] sm:$0xff] %v3309_v2  ;;  %v3314_v11 = vpop.xlane.xlu0 %576 }
 0x111   : > { %4652 = vst [vmem:[#allocation11_spill] sm:$0xff] %v3311_v4 }
 0x112   : > { %4653 = vst [vmem:[#allocation12_spill] sm:$0xff] %v3314_v11 }
 0x114   : > { %717 = vadd.xlane.f32.xlu2 %v716_v15  ;;  %714 = vadd.xlane.f32.xlu1 %v713_v22  ;;  %v274_v15 = vld [vmem:[%s3023_s29 + $0x320] sm:$0xff] }
 0x115   : > { %711 = vadd.xlane.f32.xlu0 %v710_v24  ;;  %v731_v26 = vsel %vm430_vm0, %v274_v15, 0.0 }
 0x117   : > { %v3321_v32 = vpop.xlane.xlu2 %591  ;;  %v3323_v44 = vpop.xlane.xlu1 %588 }
 0x118   : > { %4654 = vst [vmem:[#allocation13_spill] sm:$0xff] %v3321_v32  ;;  %v3326_v51 = vpop.xlane.xlu0 %585 }
 0x119   : > { %4655 = vst [vmem:[#allocation14_spill] sm:$0xff] %v3323_v44  ;;  %v273_v44 = vld [vmem:[%s3023_s29 + $0x318] sm:$0xff] }
 0x11a   : > { %4656 = vst [vmem:[#allocation15_spill] sm:$0xff] %v3326_v51  ;;  %v728_v50 = vsel %vm430_vm0, %v273_v44, 0.0 }
 0x11c   : > { %726 = vadd.xlane.f32.xlu2 %v725_v52  ;;  %723 = vadd.xlane.f32.xlu1 %v722_v61  ;;  %v278_v52 = vld [vmem:[%s3023_s29 + $0x340] sm:$0xff]  ;;  %v277_v61 = vld [vmem:[%s3023_s29 + $0x338] sm:$0xff] }
 0x11d   : > { %720 = vadd.xlane.f32.xlu0 %v719_v63  ;;  %v743_v7 = vsel %vm430_vm0, %v278_v52, 0.0  ;;  %v740_v15 = vsel %vm430_vm0, %v277_v61, 0.0 }
 0x11f   : > { %v3333_v22 = vpop.xlane.xlu2 %600  ;;  %v3335_v24 = vpop.xlane.xlu1 %597 }
 0x120   : > { %4657 = vst [vmem:[#allocation16_spill] sm:$0xff] %v3333_v22  ;;  %v3338_v32 = vpop.xlane.xlu0 %594 }
 0x121   : > { %4658 = vst [vmem:[#allocation17_spill] sm:$0xff] %v3335_v24  ;;  %v276_v24 = vld [vmem:[%s3023_s29 + $0x330] sm:$0xff] }
 0x122   : > { %4659 = vst [vmem:[#allocation18_spill] sm:$0xff] %v3338_v32  ;;  %v737_v44 = vsel %vm430_vm0, %v276_v24, 0.0 }
 0x124   : > { %735 = vadd.xlane.f32.xlu2 %v734_v25  ;;  %732 = vadd.xlane.f32.xlu1 %v731_v26  ;;  %v281_v25 = vld [vmem:[%s3023_s29 + $0x358] sm:$0xff]  ;;  %v280_v26 = vld [vmem:[%s3023_s29 + $0x350] sm:$0xff] }
 0x125   : > { %729 = vadd.xlane.f32.xlu0 %v728_v50  ;;  %v752_v52 = vsel %vm430_vm0, %v281_v25, 0.0  ;;  %v749_v61 = vsel %vm430_vm0, %v280_v26, 0.0 }
 0x127   : > { %v3345_v63 = vpop.xlane.xlu2 %609  ;;  %v3347_v22 = vpop.xlane.xlu1 %606 }
 0x128   : > { %4660 = vst [vmem:[#allocation19_spill] sm:$0xff] %v3345_v63  ;;  %v3350_v32 = vpop.xlane.xlu0 %603  ;;  %v279_v63 = vld [vmem:[%s3023_s29 + $0x348] sm:$0xff] }
 0x129   : > { %4661 = vst [vmem:[#allocation20_spill] sm:$0xff] %v3347_v22  ;;  %v746_v24 = vsel %vm430_vm0, %v279_v63, 0.0 }
 0x12a   : > { %4662 = vst [vmem:[#allocation21_spill] sm:$0xff] %v3350_v32 }
 0x12c   : > { %744 = vadd.xlane.f32.xlu2 %v743_v7  ;;  %741 = vadd.xlane.f32.xlu1 %v740_v15  ;;  %v284_v7 = vld [vmem:[%s3023_s29 + $0x370] sm:$0xff]  ;;  %v283_v15 = vld [vmem:[%s3023_s29 + $0x368] sm:$0xff] }
 0x12d   : > { %738 = vadd.xlane.f32.xlu0 %v737_v44  ;;  %v761_v25 = vsel %vm430_vm0, %v284_v7, 0.0  ;;  %v758_v26 = vsel %vm430_vm0, %v283_v15, 0.0 }
 0x12f   : > { %v3357_v50 = vpop.xlane.xlu2 %618  ;;  %v3359_v22 = vpop.xlane.xlu1 %615 }
 0x130   : > { %4663 = vst [vmem:[#allocation22_spill] sm:$0xff] %v3357_v50  ;;  %v3362_v32 = vpop.xlane.xlu0 %612  ;;  %v282_v50 = vld [vmem:[%s3023_s29 + $0x360] sm:$0xff] }
 0x131   : > { %4664 = vst [vmem:[#allocation23_spill] sm:$0xff] %v3359_v22  ;;  %v755_v63 = vsel %vm430_vm0, %v282_v50, 0.0 }
 0x132   : > { %4665 = vst [vmem:[#allocation24_spill] sm:$0xff] %v3362_v32 }
 0x134   : > { %753 = vadd.xlane.f32.xlu2 %v752_v52  ;;  %750 = vadd.xlane.f32.xlu1 %v749_v61  ;;  %v287_v52 = vld [vmem:[%s3023_s29 + $0x388] sm:$0xff]  ;;  %v286_v61 = vld [vmem:[%s3023_s29 + $0x380] sm:$0xff] }
 0x135   : > { %747 = vadd.xlane.f32.xlu0 %v746_v24  ;;  %v770_v7 = vsel %vm430_vm0, %v287_v52, 0.0  ;;  %v767_v15 = vsel %vm430_vm0, %v286_v61, 0.0 }
 0x137   : > { %v3369_v44 = vpop.xlane.xlu2 %627  ;;  %v3371_v22 = vpop.xlane.xlu1 %624 }
 0x138   : > { %4666 = vst [vmem:[#allocation25_spill] sm:$0xff] %v3369_v44  ;;  %v3374_v32 = vpop.xlane.xlu0 %621  ;;  %v285_v44 = vld [vmem:[%s3023_s29 + $0x378] sm:$0xff] }
 0x139   : > { %4667 = vst [vmem:[#allocation26_spill] sm:$0xff] %v3371_v22  ;;  %v764_v50 = vsel %vm430_vm0, %v285_v44, 0.0 }
 0x13a   : > { %4668 = vst [vmem:[#allocation27_spill] sm:$0xff] %v3374_v32 }
 0x13c   : > { %762 = vadd.xlane.f32.xlu2 %v761_v25  ;;  %759 = vadd.xlane.f32.xlu1 %v758_v26  ;;  %v290_v25 = vld [vmem:[%s3023_s29 + $0x3a0] sm:$0xff]  ;;  %v289_v26 = vld [vmem:[%s3023_s29 + $0x398] sm:$0xff] }
 0x13d   : > { %756 = vadd.xlane.f32.xlu0 %v755_v63  ;;  %v779_v52 = vsel %vm430_vm0, %v290_v25, 0.0  ;;  %v776_v61 = vsel %vm430_vm0, %v289_v26, 0.0 }
 0x13f   : > { %v3381_v24 = vpop.xlane.xlu2 %636  ;;  %v3383_v22 = vpop.xlane.xlu1 %633 }
 0x140   : > { %4669 = vst [vmem:[#allocation28_spill] sm:$0xff] %v3381_v24  ;;  %v3386_v32 = vpop.xlane.xlu0 %630 }
 0x141   : > { %4670 = vst [vmem:[#allocation29_spill] sm:$0xff] %v3383_v22  ;;  %v288_v22 = vld [vmem:[%s3023_s29 + $0x390] sm:$0xff] }
 0x142   : > { %4671 = vst [vmem:[#allocation30_spill] sm:$0xff] %v3386_v32  ;;  %v773_v44 = vsel %vm430_vm0, %v288_v22, 0.0 }
 0x144   : > { %771 = vadd.xlane.f32.xlu2 %v770_v7  ;;  %768 = vadd.xlane.f32.xlu1 %v767_v15  ;;  %v293_v7 = vld [vmem:[%s3023_s29 + $0x3b8] sm:$0xff]  ;;  %v292_v15 = vld [vmem:[%s3023_s29 + $0x3b0] sm:$0xff] }
 0x145   : > { %765 = vadd.xlane.f32.xlu0 %v764_v50  ;;  %v788_v25 = vsel %vm430_vm0, %v293_v7, 0.0  ;;  %v785_v26 = vsel %vm430_vm0, %v292_v15, 0.0 }
 0x147   : > { %v3393_v63 = vpop.xlane.xlu2 %645  ;;  %v3395_v24 = vpop.xlane.xlu1 %642 }
 0x148   : > { %4672 = vst [vmem:[#allocation31_spill] sm:$0xff] %v3393_v63  ;;  %v3398_v32 = vpop.xlane.xlu0 %639  ;;  %v291_v63 = vld [vmem:[%s3023_s29 + $0x3a8] sm:$0xff] }
 0x149   : > { %4673 = vst [vmem:[#allocation32_spill] sm:$0xff] %v3395_v24  ;;  %v782_v22 = vsel %vm430_vm0, %v291_v63, 0.0 }
 0x14a   : > { %4674 = vst [vmem:[#allocation33_spill] sm:$0xff] %v3398_v32 }
 0x14c   : > { %780 = vadd.xlane.f32.xlu2 %v779_v52  ;;  %777 = vadd.xlane.f32.xlu1 %v776_v61  ;;  %v296_v52 = vld [vmem:[%s3023_s29 + $0x3d0] sm:$0xff]  ;;  %v295_v61 = vld [vmem:[%s3023_s29 + $0x3c8] sm:$0xff] }
 0x14d   : > { %774 = vadd.xlane.f32.xlu0 %v773_v44  ;;  %v797_v7 = vsel %vm430_vm0, %v296_v52, 0.0  ;;  %v794_v15 = vsel %vm430_vm0, %v295_v61, 0.0 }
 0x14f   : > { %v3405_v50 = vpop.xlane.xlu2 %654  ;;  %v3407_v24 = vpop.xlane.xlu1 %651 }
 0x150   : > { %4675 = vst [vmem:[#allocation34_spill] sm:$0xff] %v3405_v50  ;;  %v3410_v32 = vpop.xlane.xlu0 %648 }
 0x151   : > { %4676 = vst [vmem:[#allocation35_spill] sm:$0xff] %v3407_v24  ;;  %v294_v24 = vld [vmem:[%s3023_s29 + $0x3c0] sm:$0xff] }
 0x152   : > { %4677 = vst [vmem:[#allocation36_spill] sm:$0xff] %v3410_v32  ;;  %v791_v63 = vsel %vm430_vm0, %v294_v24, 0.0  ;;  %v2003_v24 = vlaneseq }
 0x154   : > { %789 = vadd.xlane.f32.xlu2 %v788_v25  ;;  %786 = vadd.xlane.f32.xlu1 %v785_v26  ;;  %v299_v25 = vld [vmem:[%s3023_s29 + $0x3e8] sm:$0xff]  ;;  %v298_v26 = vld [vmem:[%s3023_s29 + $0x3e0] sm:$0xff] }
 0x155   : > { %783 = vadd.xlane.f32.xlu0 %v782_v22  ;;  %v806_v52 = vsel %vm430_vm0, %v299_v25, 0.0  ;;  %v803_v61 = vsel %vm430_vm0, %v298_v26, 0.0  ;;  %v301_v26 = vld [vmem:[%s3023_s29 + $0x3f8] sm:$0xff] }
 0x157   : > { %v3417_v44 = vpop.xlane.xlu2 %663  ;;  %v3419_v50 = vpop.xlane.xlu1 %660 }
 0x158   : > { %4678 = vst [vmem:[#allocation37_spill] sm:$0xff] %v3417_v44  ;;  %v3422_v32 = vpop.xlane.xlu0 %657 }
 0x159   : > { %4679 = vst [vmem:[#allocation38_spill] sm:$0xff] %v3419_v50  ;;  %v297_v50 = vld [vmem:[%s3023_s29 + $0x3d8] sm:$0xff] }
 0x15a   : > { %4680 = vst [vmem:[#allocation39_spill] sm:$0xff] %v3422_v32  ;;  %v302_v32 = vld [vmem:[%s3023_s29 + $0x400] sm:$0xff] }
 0x15c   : > { %798 = vadd.xlane.f32.xlu2 %v797_v7  ;;  %795 = vadd.xlane.f32.xlu1 %v794_v15  ;;  %v1200_v7 = vmul.f32 0.015625, %v3134_v40  ;;  %v800_v15 = vsel %vm430_vm0, %v297_v50, 0.0  ;;  %v300_v40 = vld [vmem:[%s3023_s29 + $0x3f0] sm:$0xff] }
 0x15d   : > { %792 = vadd.xlane.f32.xlu0 %v791_v63  ;;  %v1199_v63 = vmul.f32 0.015625, %v3122_v31 }
 0x15f   : > { %v3429_v22 = vpop.xlane.xlu2 %672  ;;  %v3431_v51 = vpop.xlane.xlu1 %669  ;;  %v1455_v25 = vpack.c.bf16 %v1200_v7, %v1199_v63  ;;  %v809_v7 = vsel %vm430_vm0, %v300_v40, 0.0  ;;  %v1204_v63 = vmul.f32 0.015625, %v3129_v37  ;;  %v1206_v40 = vmul.f32 0.015625, %v3143_v47 }
 0x160   : > { %4681 = vst [vmem:[#allocation40_spill] sm:$0xff] %v3429_v22  ;;  %v3434_v44 = vpop.xlane.xlu0 %666  ;;  %v1201_v22 = vmul.f32 0.015625, %v3119_v29  ;;  %v812_v29 = vsel %vm430_vm0, %v301_v26, 0.0 }
 0x161   : > { %4682 = vst [vmem:[#allocation41_spill] sm:$0xff] %v3431_v51  ;;  %v1202_v51 = vmul.f32 0.015625, %v3131_v38 }
 0x162   : > { %4683 = vst [vmem:[#allocation42_spill] sm:$0xff] %v3434_v44  ;;  %v3443_v44 = vand.u32 127, %v2003_v24  ;;  %v1748_v24 = vunpack.c.h.b16 %v1455_v25 }
 0x163   : > { %v1456_v31 = vpack.c.bf16 %v1202_v51, %v1201_v22 }
 0x164   : > { %807 = vadd.xlane.f32.xlu2 %v806_v52  ;;  %804 = vadd.xlane.f32.xlu1 %v803_v61  ;;  %v815_v52 = vsel %vm430_vm0, %v302_v32, 0.0  ;;  %v3457_v38 = vadd.s32 4294967288, %v3443_v44  ;;  %v1747_v61 = vunpack.c.l.b16 %v1455_v25  ;;  %v3463_v51 = vadd.s32 4294967280, %v3443_v44  ;;  %v304_v25 = vld [vmem:[%s3023_s29 + $0x410] sm:$0xff] }
 0x165   : > { %801 = vadd.xlane.f32.xlu0 %v800_v15  ;;  %v1203_v15 = vmul.f32 0.015625, %v3117_v28  ;;  %v1749_v32 = vunpack.c.l.b16 %v1456_v31  ;;  %v1205_v28 = vmul.f32 0.015625, %v3146_v49  ;;  %v821_v4 = vsel %vm430_vm0, %v304_v25, 0.0 }
 0x166   : > { %v2005_v22 = vperm.slane %v1747_v61, %v3443_v44  ;;  %v2007_v26 = vperm.slane %v1748_v24, %v3457_v38  ;;  %v1750_v47 = vunpack.c.h.b16 %v1456_v31  ;;  %v3493_v31 = vadd.s32 4294967256, %v3443_v44 }
 0x167   : > { %v3447_v2 = vpop.xlane.xlu2 %681  ;;  %v3449_v11 = vpop.xlane.xlu1 %678  ;;  %v2011_v61 = vperm.slane %v1749_v32, %v3463_v51 }
 0x168   : > { %4684 = vst [vmem:[#allocation43_spill] sm:$0xff] %v3447_v2  ;;  %v3452_v50 = vpop.xlane.xlu0 %675  ;;  %v2009_v49 = vsel %vm2008_vm1, %v2007_v26, %v2005_v22  ;;  %v3499_v26 = vadd.s32 4294967248, %v3443_v44 }
 0x169   : > { %4685 = vst [vmem:[#allocation44_spill] sm:$0xff] %v3449_v11  ;;  %v305_v11 = vld [vmem:[%s3023_s29 + $0x418] sm:$0xff] }
 0x16a   : > { %4686 = vst [vmem:[#allocation45_spill] sm:$0xff] %v3452_v50  ;;  %v824_v24 = vsel %vm430_vm0, %v305_v11, 0.0  ;;  %v2013_v11 = vsel %vm2012_vm2, %v2011_v61, %v2009_v49 }
 0x16c   : > { %816 = vadd.xlane.f32.xlu2 %v815_v52  ;;  %813 = vadd.xlane.f32.xlu1 %v812_v29  ;;  %v303_v52 = vld [vmem:[%s3023_s29 + $0x408] sm:$0xff]  ;;  %v1457_v29 = vpack.c.bf16 %v1204_v63, %v1203_v15  ;;  %v1207_v15 = vmul.f32 0.015625, %v3141_v46  ;;  %v1458_v63 = vpack.c.bf16 %v1206_v40, %v1205_v28  ;;  %v308_v46 = vld [vmem:[%s3023_s29 + $0x430] sm:$0xff] }
 0x16d   : > { %810 = vadd.xlane.f32.xlu0 %v809_v7  ;;  %v3479_v7 = vadd.s32 4294967272, %v3443_v44 }
 0x16e   : > { %v1751_v32 = vunpack.c.l.b16 %v1457_v29  ;;  %v1753_v25 = vunpack.c.l.b16 %v1458_v63 }
 0x16f   : > { %v3471_v2 = vpop.xlane.xlu2 %690  ;;  %v3473_v37 = vpop.xlane.xlu1 %687  ;;  %v2015_v22 = vperm.slane %v1750_v47, %v3479_v7  ;;  %v3509_v47 = vadd.s32 4294967240, %v3443_v44 }
 0x170   : > { %4687 = vst [vmem:[#allocation46_spill] sm:$0xff] %v3471_v2  ;;  %v3476_v50 = vpop.xlane.xlu0 %684  ;;  %v818_v2 = vsel %vm430_vm0, %v303_v52, 0.0  ;;  %v1752_v52 = vunpack.c.h.b16 %v1457_v29  ;;  %v1210_v29 = vmul.f32 0.015625, %v3153_v55  ;;  %v1217_v55 = vmul.f32 0.015625, %v3194_v21  ;;  %v311_v21 = vld [vmem:[%s3023_s29 + $0x448] sm:$0xff] }
 0x171   : > { %4688 = vst [vmem:[#allocation47_spill] sm:$0xff] %v3473_v37  ;;  %v3489_v37 = vadd.s32 4294967264, %v3443_v44 }
 0x172   : > { %4689 = vst [vmem:[#allocation48_spill] sm:$0xff] %v3476_v50  ;;  %v1208_v50 = vmul.f32 0.015625, %v3158_v58  ;;  %v307_v58 = vld [vmem:[%s3023_s29 + $0x428] sm:$0xff]  ;;  %v2023_v10 = vperm.slane %v1752_v52, %v3493_v31 }
 0x173   : > { %v2019_v61 = vperm.slane %v1751_v32, %v3489_v37  ;;  %v1209_v32 = vmul.f32 0.015625, %v3155_v56  ;;  %v3529_v56 = vadd.s32 4294967216, %v3443_v44 }
 0x174   : > { %825 = vadd.xlane.f32.xlu2 %v824_v24  ;;  %822 = vadd.xlane.f32.xlu1 %v821_v4  ;;  %v1459_v4 = vpack.c.bf16 %v1208_v50, %v1207_v15  ;;  %v2017_v24 = vsel %vm4638_vm3, %v2015_v22, %v2013_v11  ;;  %v833_v50 = vsel %vm430_vm0, %v308_v46, 0.0  ;;  %v830_v15 = vsel %vm430_vm0, %v307_v58, 0.0 }
 0x175   : > { %819 = vadd.xlane.f32.xlu0 %v818_v2  ;;  %v306_v2 = vld [vmem:[%s3023_s29 + $0x420] sm:$0xff]  ;;  %v2021_v22 = vsel %vm2020_vm4, %v2019_v61, %v2017_v24  ;;  %v3532_v46 = vadd.s32 4294967208, %v3443_v44  ;;  %v3535_v58 = vadd.s32 4294967224, %v3443_v44  ;;  %v1460_v52 = vpack.c.bf16 %v1210_v29, %v1209_v32 }
 0x176   : > { %v827_v11 = vsel %vm430_vm0, %v306_v2, 0.0  ;;  %v1755_v9 = vunpack.c.l.b16 %v1459_v4  ;;  %v2025_v2 = vsel %vm2024_vm5, %v2023_v10, %v2021_v22  ;;  %v310_v61 = vld [vmem:[%s3023_s29 + $0x440] sm:$0xff]  ;;  %v1220_v32 = vmul.f32 0.015625, %v3206_v33 }
 0x177   : > { %v3501_v40 = vpop.xlane.xlu2 %699  ;;  %v3503_v28 = vpop.xlane.xlu1 %696  ;;  %v842_v22 = vsel %vm430_vm0, %v311_v21, 0.0  ;;  %v839_v1 = vsel %vm430_vm0, %v310_v61, 0.0  ;;  %v1757_v10 = vunpack.c.l.b16 %v1460_v52  ;;  %v1213_v33 = vmul.f32 0.015625, %v3165_v0 }
 0x178   : > { %4690 = vst [vmem:[#allocation49_spill] sm:$0xff] %v3501_v40  ;;  %v3511_v49 = vpop.xlane.xlu0 %693  ;;  %v2027_v40 = vperm.slane %v1753_v25, %v3499_v26  ;;  %v1463_v25 = vpack.c.bf16 %v1216_v48, %v1215_v39  ;;  %v309_v39 = vld [vmem:[%s3023_s29 + $0x438] sm:$0xff]  ;;  %v1211_v48 = vmul.f32 0.015625, %v3170_v3  ;;  %v3566_v0 = vadd.s32 4294967200, %v3443_v44 }
 0x179   : > { %4691 = vst [vmem:[#allocation50_spill] sm:$0xff] %v3503_v28  ;;  %v1754_v28 = vunpack.c.h.b16 %v1458_v63  ;;  %v1218_v63 = vmul.f32 0.015625, %v3191_v19 }
 0x17a   : > { %4692 = vst [vmem:[#allocation51_spill] sm:$0xff] %v3511_v49  ;;  %v3523_v49 = vadd.s32 4294967232, %v3443_v44  ;;  %v2029_v24 = vsel %vm2028_vm6, %v2027_v40, %v2025_v2  ;;  %v1763_v40 = vunpack.c.l.b16 %v1463_v25  ;;  %v836_v2 = vsel %vm430_vm0, %v309_v39, 0.0  ;;  %v313_v39 = vld [vmem:[%s3023_s29 + $0x458] sm:$0xff] }
 0x17b   : > { %v2031_v19 = vperm.slane %v1754_v28, %v3509_v47  ;;  %v1219_v28 = vmul.f32 0.015625, %v3189_v18  ;;  %v1464_v29 = vpack.c.bf16 %v1218_v63, %v1217_v55  ;;  %v1461_v63 = vpack.c.bf16 %v1212_v34, %v1211_v48 }
 0x17c   : > { %834 = vadd.xlane.f32.xlu2 %v833_v50  ;;  %831 = vadd.xlane.f32.xlu1 %v830_v15  ;;  %v1756_v50 = vunpack.c.h.b16 %v1459_v4  ;;  %v2035_v15 = vperm.slane %v1755_v9, %v3523_v49  ;;  %v1764_v4 = vunpack.c.h.b16 %v1463_v25  ;;  %v1214_v55 = vmul.f32 0.015625, %v3182_v12 }
 0x17d   : > { %828 = vadd.xlane.f32.xlu0 %v827_v11  ;;  %v2033_v9 = vsel %vm4639_vm7, %v2031_v19, %v2029_v24  ;;  %v1765_v25 = vunpack.c.l.b16 %v1464_v29  ;;  %v1465_v21 = vpack.c.bf16 %v1220_v32, %v1219_v28  ;;  %v1758_v19 = vunpack.c.h.b16 %v1460_v52 }
 0x17e   : > { %v2037_v3 = vsel %vm2036_vm8, %v2035_v15, %v2033_v9  ;;  %v2039_v18 = vperm.slane %v1756_v50, %v3535_v58  ;;  %v2066_v61 = vperm.slane %v1763_v40, %v3443_v44  ;;  %v2067_v24 = vperm.slane %v1764_v4, %v3457_v38  ;;  %v314_v15 = vld [vmem:[%s3023_s29 + $0x460] sm:$0xff] }
 0x17f   : > { %v3544_v13 = vpop.xlane.xlu2 %708  ;;  %v3546_v8 = vpop.xlane.xlu1 %705  ;;  %v2043_v50 = vperm.slane %v1757_v10, %v3529_v56  ;;  %v1222_v34 = vmul.f32 0.015625, %v3201_v27  ;;  %v1221_v12 = vmul.f32 0.015625, %v3203_v30  ;;  %v3574_v48 = vadd.s32 4294967192, %v3443_v44 }
 0x180   : > { %4693 = vst [vmem:[#allocation52_spill] sm:$0xff] %v3544_v13  ;;  %v3552_v11 = vpop.xlane.xlu0 %702  ;;  %v2041_v52 = vsel %vm2040_vm9, %v2039_v18, %v2037_v3  ;;  %v3577_v28 = vadd.s32 4294967184, %v3443_v44  ;;  %v1766_v32 = vunpack.c.h.b16 %v1464_v29  ;;  %v3584_v27 = vpack.c.bf16 %v1214_v55, %v1213_v33 }
 0x181   : > { %4694 = vst [vmem:[#allocation53_spill] sm:$0xff] %v3552_v11  ;;  %v2069_v30 = vperm.slane %v1765_v25, %v3463_v51  ;;  %v1767_v9 = vunpack.c.l.b16 %v1465_v21  ;;  %v2068_v3 = vsel %vm2008_vm1, %v2067_v24, %v2066_v61  ;;  %v851_v18 = vsel %vm430_vm0, %v314_v15, 0.0  ;;  %v316_v15 = vld [vmem:[%s3023_s29 + $0x470] sm:$0xff] }
 0x182   : > { %v848_v29 = vsel %vm430_vm0, %v313_v39, 0.0  ;;  %v1466_v13 = vpack.c.bf16 %v1222_v34, %v1221_v12  ;;  %v2071_v55 = vperm.slane %v1766_v32, %v3479_v7  ;;  %v1768_v25 = vunpack.c.h.b16 %v1465_v21  ;;  %v317_v12 = vld [vmem:[%s3023_s29 + $0x478] sm:$0xff] }
 0x183   : > { %v1224_v11 = vmul.f32 0.015625, %v3215_v43  ;;  %v1761_v61 = vunpack.c.l.b16 %v3584_v27  ;;  %v2070_v24 = vsel %vm2012_vm2, %v2069_v30, %v2068_v3  ;;  %v3603_v43 = vadd.s32 4294967176, %v3443_v44 }
 0x184   : > { %843 = vadd.xlane.f32.xlu2 %v842_v22  ;;  %840 = vadd.xlane.f32.xlu1 %v839_v1  ;;  %v312_v22 = vld [vmem:[%s3023_s29 + $0x450] sm:$0xff]  ;;  %v1759_v1 = vunpack.c.l.b16 %v1461_v63  ;;  %v1769_v21 = vunpack.c.l.b16 %v1466_v13  ;;  %v1232_v34 = vmul.f32 0.015625, %v3254_v23  ;;  %v2075_v32 = vperm.slane %v1768_v25, %v3493_v31 }
 0x185   : > { %837 = vadd.xlane.f32.xlu0 %v836_v2  ;;  %v2047_v2 = vperm.slane %v1758_v19, %v3532_v46  ;;  %v845_v33 = vsel %vm430_vm0, %v312_v22, 0.0 }
 0x186   : > { %v2051_v19 = vperm.slane %v1759_v1, %v3566_v0 }
 0x187   : > { %v3579_v40 = vpop.xlane.xlu2 %717  ;;  %v3581_v4 = vpop.xlane.xlu1 %714 }
 0x188   : > { %4695 = vst [vmem:[#allocation54_spill] sm:$0xff] %v3579_v40  ;;  %v3587_v10 = vpop.xlane.xlu0 %711  ;;  %v2045_v40 = vsel %vm2044_vm10, %v2043_v50, %v2041_v52  ;;  %v1231_v50 = vmul.f32 0.015625, %v3237_v5  ;;  %v2072_v52 = vsel %vm4638_vm3, %v2071_v55, %v2070_v24  ;;  %v2059_v5 = vperm.slane %v1761_v61, %v3577_v28 }
 0x189   : > { %4696 = vst [vmem:[#allocation55_spill] sm:$0xff] %v3581_v4  ;;  %v1760_v4 = vunpack.c.h.b16 %v1461_v63  ;;  %v2073_v63 = vperm.slane %v1767_v9, %v3489_v37  ;;  %v315_v9 = vld [vmem:[%s3023_s29 + $0x468] sm:$0xff]  ;;  %v1226_v24 = vmul.f32 0.015625, %v3230_v60 }
 0x18a   : > { %4697 = vst [vmem:[#allocation56_spill] sm:$0xff] %v3587_v10  ;;  %v1223_v10 = vmul.f32 0.015625, %v3218_v45  ;;  %v2049_v45 = vsel %vm4642_vm11, %v2047_v2, %v2045_v40  ;;  %v1762_v2 = vunpack.c.h.b16 %v3584_v27  ;;  %v1471_v55 = vpack.c.bf16 %v1232_v34, %v1231_v50  ;;  %v320_v34 = vld [vmem:[%s3023_s29 + $0x490] sm:$0xff]  ;;  %v319_v60 = vld [vmem:[%s3023_s29 + $0x488] sm:$0xff] }
 0x18b   : > { %v2055_v39 = vperm.slane %v1760_v4, %v3574_v48  ;;  %v2053_v40 = vsel %vm2052_vm12, %v2051_v19, %v2049_v45  ;;  %v2074_v23 = vsel %vm2020_vm4, %v2073_v63, %v2072_v52  ;;  %v1234_v4 = vmul.f32 0.015625, %v3249_v17 }
 0x18c   : > { %852 = vadd.xlane.f32.xlu2 %v851_v18  ;;  %849 = vadd.xlane.f32.xlu1 %v848_v29  ;;  %v3613_v22 = vpack.c.bf16 %v1224_v11, %v1223_v10  ;;  %v1233_v18 = vmul.f32 0.015625, %v3251_v20  ;;  %v860_v29 = vsel %vm430_vm0, %v317_v12, 0.0  ;;  %v857_v11 = vsel %vm430_vm0, %v316_v15, 0.0 }
 0x18d   : > { %846 = vadd.xlane.f32.xlu0 %v845_v33  ;;  %v1770_v10 = vunpack.c.h.b16 %v1466_v13  ;;  %v2077_v33 = vperm.slane %v1769_v21, %v3499_v26  ;;  %v854_v25 = vsel %vm430_vm0, %v315_v9, 0.0  ;;  %v2076_v27 = vsel %vm2024_vm5, %v2075_v32, %v2074_v23  ;;  %v318_v9 = vld [vmem:[%s3023_s29 + $0x480] sm:$0xff] }
 0x18e   : > { %v1225_v19 = vmul.f32 0.015625, %v3213_v42  ;;  %v1771_v61 = vunpack.c.l.b16 %v3613_v22  ;;  %v1228_v17 = vmul.f32 0.015625, %v3225_v54  ;;  %v1227_v20 = vmul.f32 0.015625, %v3227_v57 }
 0x18f   : > { %v727_v1 = vpop.xlane.xlu2 %726  ;;  %v724_v30 = vpop.xlane.xlu1 %723  ;;  %v2057_v45 = vsel %vm2056_vm13, %v2055_v39, %v2053_v40  ;;  %v3633_v21 = vpack.c.bf16 %v1234_v4, %v1233_v18  ;;  %v2063_v54 = vperm.slane %v1762_v2, %v3603_v43  ;;  %v2079_v50 = vperm.slane %v1770_v10, %v3509_v47 }
 0x190   : > { %v721_v3 = vpop.xlane.xlu0 %720  ;;  %v1296_v13 = vmul.f32 0.015625, %v724_v30  ;;  %v2061_v42 = vsel %vm2060_vm14, %v2059_v5, %v2057_v45  ;;  %v1779_v57 = vunpack.c.l.b16 %v1471_v55  ;;  %v2078_v12 = vsel %vm2028_vm6, %v2077_v33, %v2076_v27 }
 0x191   : > { %v1295_v63 = vmul.f32 0.015625, %v721_v3  ;;  %v1772_v15 = vunpack.c.h.b16 %v3613_v22  ;;  %v1780_v52 = vunpack.c.h.b16 %v1471_v55  ;;  %v1297_v39 = vmul.f32 0.015625, %v727_v1 }
 0x192   : > { %v2081_v40 = vperm.slane %v1771_v61, %v3523_v49  ;;  %v3644_v23 = vpack.c.bf16 %v1228_v17, %v1227_v20  ;;  %v3646_v5 = vpack.c.bf16 %v1226_v24, %v1225_v19  ;;  %v1781_v4 = vunpack.c.l.b16 %v3633_v21 }
 0x193   : > { %v1503_v2 = vpack.c.bf16 %v1296_v13, %v1295_v63  ;;  %v866_v22 = vsel %vm430_vm0, %v319_v60, 0.0  ;;  %v2097_v1 = vperm.slane %v1779_v57, %v3443_v44  ;;  %v1235_v10 = vmul.f32 0.015625, %v3266_v41  ;;  %v322_v60 = vld [vmem:[%s3023_s29 + $0x4a0] sm:$0xff] }
 0x194   : > { %861 = vadd.xlane.f32.xlu2 %v860_v29  ;;  %858 = vadd.xlane.f32.xlu1 %v857_v11  ;;  %v869_v29 = vsel %vm430_vm0, %v320_v34, 0.0  ;;  %v1236_v11 = vmul.f32 0.015625, %v3263_v36  ;;  %v863_v33 = vsel %vm430_vm0, %v318_v9, 0.0  ;;  %v2098_v55 = vperm.slane %v1780_v52, %v3457_v38  ;;  %v323_v34 = vld [vmem:[%s3023_s29 + $0x4a8] sm:$0xff] }
 0x195   : > { %855 = vadd.xlane.f32.xlu0 %v854_v25  ;;  %v2080_v61 = vsel %vm4639_vm7, %v2079_v50, %v2078_v12  ;;  %v1843_v17 = vunpack.c.l.b16 %v1503_v2  ;;  %v1844_v20 = vunpack.c.h.b16 %v1503_v2  ;;  %v3658_v24 = vsel %vm2064_vm15, %v2063_v54, %v2061_v42 }
 0x196   : > { %v2082_v36 = vsel %vm2036_vm8, %v2081_v40, %v2080_v61  ;;  %v2083_v41 = vperm.slane %v1772_v15, %v3535_v58  ;;  %v1775_v63 = vunpack.c.l.b16 %v3644_v23  ;;  %v1776_v45 = vunpack.c.h.b16 %v3644_v23 }
 0x197   : > { %v736_v32 = vpop.xlane.xlu2 %735  ;;  %v733_v30 = vpop.xlane.xlu1 %732  ;;  %v1782_v50 = vunpack.c.h.b16 %v3633_v21  ;;  %v1473_v57 = vpack.c.bf16 %v1236_v11, %v1235_v10  ;;  %v1773_v12 = vunpack.c.l.b16 %v3646_v5  ;;  %v2100_v42 = vperm.slane %v1781_v4, %v3463_v51 }
 0x198   : > { %v730_v3 = vpop.xlane.xlu0 %729  ;;  %v1300_v25 = vmul.f32 0.015625, %v736_v32  ;;  %v1299_v27 = vmul.f32 0.015625, %v733_v30  ;;  %v2099_v54 = vsel %vm2008_vm1, %v2098_v55, %v2097_v1  ;;  %v321_v32 = vld [vmem:[%s3023_s29 + $0x498] sm:$0xff]  ;;  %v2221_v30 = vperm.slane %v1843_v17, %v3443_v44 }
 0x199   : > { %v1298_v18 = vmul.f32 0.015625, %v730_v3  ;;  %v2222_v9 = vperm.slane %v1844_v20, %v3457_v38  ;;  %v875_v4 = vsel %vm430_vm0, %v322_v60, 0.0  ;;  %v1783_v1 = vunpack.c.l.b16 %v1473_v57  ;;  %v325_v60 = vld [vmem:[%s3023_s29 + $0x4b8] sm:$0xff] }
 0x19a   : > { %v1505_v52 = vpack.c.bf16 %v1300_v25, %v1299_v27  ;;  %v872_v11 = vsel %vm430_vm0, %v321_v32, 0.0  ;;  %v2101_v10 = vsel %vm2012_vm2, %v2100_v42, %v2099_v54  ;;  %v2084_v27 = vsel %vm2040_vm9, %v2083_v41, %v2082_v36  ;;  %v326_v41 = vld [vmem:[%s3023_s29 + $0x4c0] sm:$0xff] }
 0x19b   : > { %v1504_v19 = vpack.c.bf16 %v1298_v18, %v1297_v39  ;;  %v878_v18 = vsel %vm430_vm0, %v323_v34, 0.0  ;;  %v2223_v61 = vsel %vm2008_vm1, %v2222_v9, %v2221_v30  ;;  %v3689_v20 = vperm.slane %v1776_v45, %v3574_v48  ;;  %v324_v30 = vld [vmem:[%s3023_s29 + $0x4b0] sm:$0xff] }
 0x19c   : > { %870 = vadd.xlane.f32.xlu2 %v869_v29  ;;  %867 = vadd.xlane.f32.xlu1 %v866_v22  ;;  %v2102_v29 = vperm.slane %v1782_v50, %v3479_v7  ;;  %v1237_v22 = vmul.f32 0.015625, %v3261_v35  ;;  %v1847_v55 = vunpack.c.l.b16 %v1505_v52  ;;  %v3686_v35 = vperm.slane %v1775_v63, %v3566_v0 }
 0x19d   : > { %v1845_v13 = vunpack.c.l.b16 %v1504_v19  ;;  %864 = vadd.xlane.f32.xlu0 %v863_v33  ;;  %v1846_v40 = vunpack.c.h.b16 %v1504_v19  ;;  %v1238_v33 = vmul.f32 0.015625, %v3278_v62  ;;  %v1774_v19 = vunpack.c.h.b16 %v3646_v5 }
 0x19e   : > { %v2085_v62 = vperm.slane %v1773_v12, %v3529_v56  ;;  %v2103_v5 = vsel %vm4638_vm3, %v2102_v29, %v2101_v10  ;;  %v2104_v50 = vperm.slane %v1783_v1, %v3489_v37  ;;  %v1848_v34 = vunpack.c.h.b16 %v1505_v52 }
 0x19f   : > { %v745_v39 = vpop.xlane.xlu2 %744  ;;  %v742_v15 = vpop.xlane.xlu1 %741  ;;  %v2224_v2 = vperm.slane %v1845_v13, %v3463_v51  ;;  %v2226_v17 = vperm.slane %v1846_v40, %v3479_v7  ;;  %v1784_v13 = vunpack.c.h.b16 %v1473_v57  ;;  %v1474_v42 = vpack.c.bf16 %v1238_v33, %v1237_v22 }
 0x1a0   : > { %v1302_v23 = vmul.f32 0.015625, %v742_v15  ;;  %v739_v21 = vpop.xlane.xlu0 %738  ;;  %v2228_v63 = vperm.slane %v1847_v55, %v3489_v37  ;;  %v1303_v54 = vmul.f32 0.015625, %v745_v39  ;;  %v1240_v12 = vmul.f32 0.015625, %v3273_v53 }
 0x1a1   : > { %v1301_v3 = vmul.f32 0.015625, %v739_v21  ;;  %v2225_v36 = vsel %vm2012_vm2, %v2224_v2, %v2223_v61  ;;  %v1239_v9 = vmul.f32 0.015625, %v3275_v59  ;;  %v887_v57 = vsel %vm430_vm0, %v326_v41, 0.0 }
 0x1a2   : > { %v2227_v40 = vsel %vm4638_vm3, %v2226_v17, %v2225_v36  ;;  %v2106_v39 = vperm.slane %v1784_v13, %v3493_v31  ;;  %v881_v29 = vsel %vm430_vm0, %v324_v30, 0.0  ;;  %v1785_v53 = vunpack.c.l.b16 %v1474_v42 }
 0x1a3   : > { %v1506_v25 = vpack.c.bf16 %v1302_v23, %v1301_v3  ;;  %v884_v3 = vsel %vm430_vm0, %v325_v60, 0.0  ;;  %v2229_v59 = vsel %vm2020_vm4, %v2228_v63, %v2227_v40  ;;  %v2105_v10 = vsel %vm2020_vm4, %v2104_v50, %v2103_v5  ;;  %v329_v5 = vld [vmem:[%s3023_s29 + $0x4d8] sm:$0xff]  ;;  %v328_v50 = vld [vmem:[%s3023_s29 + $0x4d0] sm:$0xff] }
 0x1a4   : > { %879 = vadd.xlane.f32.xlu2 %v878_v18  ;;  %876 = vadd.xlane.f32.xlu1 %v875_v4  ;;  %v2230_v18 = vperm.slane %v1848_v34, %v3493_v31  ;;  %v1475_v33 = vpack.c.bf16 %v1240_v12, %v1239_v9  ;;  %v1786_v55 = vunpack.c.h.b16 %v1474_v42  ;;  %v1242_v61 = vmul.f32 0.015625, %v3287_v14 }
 0x1a5   : > { %873 = vadd.xlane.f32.xlu0 %v872_v11  ;;  %v1849_v45 = vunpack.c.l.b16 %v1506_v25  ;;  %v1850_v4 = vunpack.c.h.b16 %v1506_v25  ;;  %v2087_v11 = vperm.slane %v1774_v19, %v3532_v46  ;;  %v2086_v25 = vsel %vm2044_vm10, %v2085_v62, %v2084_v27 }
 0x1a6   : > { %v1241_v41 = vmul.f32 0.015625, %v3290_v16  ;;  %v2231_v13 = vsel %vm2024_vm5, %v2230_v18, %v2229_v59  ;;  %v2107_v60 = vsel %vm2024_vm5, %v2106_v39, %v2105_v10  ;;  %v2108_v42 = vperm.slane %v1785_v53, %v3499_v26  ;;  %v4698_v53 = vld [vmem:[#allocation5_spill] sm:$0xff] }
 0x1a7   : > { %v754_v15 = vpop.xlane.xlu2 %753  ;;  %v751_v32 = vpop.xlane.xlu1 %750  ;;  %v2232_v22 = vperm.slane %v1849_v45, %v3499_v26  ;;  %v2234_v19 = vperm.slane %v1850_v4, %v3509_v47  ;;  %v1787_v45 = vunpack.c.l.b16 %v1475_v33  ;;  %v1788_v16 = vunpack.c.h.b16 %v1475_v33  ;;  %v332_v10 = vld [vmem:[%s3023_s29 + $0x4f0] sm:$0xff]  ;;  %v4699_v33 = vld [vmem:[#allocation6_spill] sm:$0xff] }
 0x1a8   : > { %v748_v23 = vpop.xlane.xlu0 %747  ;;  %v1306_v21 = vmul.f32 0.015625, %v754_v15  ;;  %v1305_v52 = vmul.f32 0.015625, %v751_v32  ;;  %v2110_v15 = vperm.slane %v1786_v55, %v3509_v47  ;;  %v896_v40 = vsel %vm430_vm0, %v329_v5, 0.0 }
 0x1a9   : > { %v1304_v2 = vmul.f32 0.015625, %v748_v23  ;;  %v2233_v27 = vsel %vm2028_vm6, %v2232_v22, %v2231_v13  ;;  %v893_v23 = vsel %vm430_vm0, %v328_v50, 0.0  ;;  %v2109_v39 = vsel %vm2028_vm6, %v2108_v42, %v2107_v60  ;;  %v4702_v50 = vld [vmem:[#allocation9_spill] sm:$0xff] }
 0x1aa   : > { %v1508_v17 = vpack.c.bf16 %v1306_v21, %v1305_v52  ;;  %v2235_v21 = vsel %vm4639_vm7, %v2234_v19, %v2233_v27  ;;  %v3736_v59 = vmul.f32 0.015625, %v4698_v53  ;;  %v2112_v22 = vperm.slane %v1787_v45, %v3523_v49 }
 0x1ab   : > { %v1507_v1 = vpack.c.bf16 %v1304_v2, %v1303_v54  ;;  %v327_v54 = vld [vmem:[%s3023_s29 + $0x4c8] sm:$0xff]  ;;  %v1243_v55 = vmul.f32 0.015625, %v4699_v33  ;;  %v1244_v60 = vmul.f32 0.015625, %v4702_v50 }
 0x1ac   : > { %888 = vadd.xlane.f32.xlu2 %v887_v57  ;;  %885 = vadd.xlane.f32.xlu1 %v884_v3  ;;  %v1853_v12 = vunpack.c.l.b16 %v1508_v17  ;;  %v1476_v57 = vpack.c.bf16 %v1242_v61, %v1241_v41  ;;  %v890_v2 = vsel %vm430_vm0, %v327_v54, 0.0  ;;  %v3730_v3 = vmul.f32 0.015625, %v3239_v6  ;;  %v4700_v41 = vld [vmem:[#allocation7_spill] sm:$0xff]  ;;  %v4704_v33 = vld [vmem:[#allocation12_spill] sm:$0xff] }
 0x1ad   : > { %v1851_v36 = vunpack.c.l.b16 %v1507_v1  ;;  %882 = vadd.xlane.f32.xlu0 %v881_v29  ;;  %v1852_v34 = vunpack.c.h.b16 %v1507_v1  ;;  %v2088_v29 = vsel %vm4642_vm11, %v2087_v11, %v2086_v25  ;;  %v1854_v1 = vunpack.c.h.b16 %v1508_v17  ;;  %v331_v17 = vld [vmem:[%s3023_s29 + $0x4e8] sm:$0xff]  ;;  %v330_v54 = vld [vmem:[%s3023_s29 + $0x4e0] sm:$0xff] }
 0x1ae   : > { %v2114_v6 = vperm.slane %v1788_v16, %v3535_v58  ;;  %v2240_v61 = vperm.slane %v1853_v12, %v3529_v56  ;;  %v2111_v11 = vsel %vm4639_vm7, %v2110_v15, %v2109_v39  ;;  %v1789_v25 = vunpack.c.l.b16 %v1476_v57 }
 0x1af   : > { %v2236_v14 = vperm.slane %v1851_v36, %v3523_v49  ;;  %v763_v62 = vpop.xlane.xlu2 %762  ;;  %v760_v63 = vpop.xlane.xlu1 %759  ;;  %v2238_v52 = vperm.slane %v1852_v34, %v3535_v58  ;;  %v1246_v13 = vmul.f32 0.015625, %v4700_v41  ;;  %v4701_v34 = vld [vmem:[#allocation8_spill] sm:$0xff]  ;;  %v2242_v45 = vperm.slane %v1854_v1, %v3532_v46  ;;  %v4703_v1 = vld [vmem:[#allocation11_spill] sm:$0xff] }
 0x1b0   : > { %v1308_v32 = vmul.f32 0.015625, %v760_v63  ;;  %v757_v30 = vpop.xlane.xlu0 %756  ;;  %v1245_v5 = vmul.f32 0.015625, %v4701_v34  ;;  %v1309_v42 = vmul.f32 0.015625, %v763_v62  ;;  %v905_v63 = vsel %vm430_vm0, %v332_v10, 0.0  ;;  %v335_v34 = vld [vmem:[%s3023_s29 + $0x508] sm:$0xff] }
 0x1b1   : > { %v1307_v9 = vmul.f32 0.015625, %v757_v30  ;;  %v2237_v18 = vsel %vm2036_vm8, %v2236_v14, %v2235_v21  ;;  %v2113_v62 = vsel %vm2036_vm8, %v2112_v22, %v2111_v11  ;;  %v1790_v21 = vunpack.c.h.b16 %v1476_v57 }
 0x1b2   : > { %v2239_v19 = vsel %vm2040_vm9, %v2238_v52, %v2237_v18  ;;  %v2116_v39 = vperm.slane %v1789_v25, %v3529_v56  ;;  %v3758_v18 = vpack.c.bf16 %v1246_v13, %v1245_v5  ;;  %v1248_v10 = vmul.f32 0.015625, %v4703_v1  ;;  %v334_v5 = vld [vmem:[%s3023_s29 + $0x500] sm:$0xff] }
 0x1b3   : > { %v1509_v4 = vpack.c.bf16 %v1308_v32, %v1307_v9  ;;  %v2241_v12 = vsel %vm2044_vm10, %v2240_v61, %v2239_v19  ;;  %v1247_v61 = vmul.f32 0.015625, %v4704_v33  ;;  %v3768_v22 = vsel %vm2052_vm12, %v3686_v35, %v2088_v29 }
 0x1b4   : > { %897 = vadd.xlane.f32.xlu2 %v896_v40  ;;  %894 = vadd.xlane.f32.xlu1 %v893_v23  ;;  %v902_v23 = vsel %vm430_vm0, %v331_v17, 0.0  ;;  %v2115_v41 = vsel %vm2040_vm9, %v2114_v6, %v2113_v62  ;;  %v2118_v13 = vperm.slane %v1790_v21, %v3532_v46  ;;  %v3795_v21 = vpack.c.bf16 %v3730_v3, %v3736_v59 }
 0x1b5   : > { %v1855_v36 = vunpack.c.l.b16 %v1509_v4  ;;  %891 = vadd.xlane.f32.xlu0 %v890_v2  ;;  %v1856_v16 = vunpack.c.h.b16 %v1509_v4  ;;  %v899_v2 = vsel %vm430_vm0, %v330_v54, 0.0  ;;  %v3760_v4 = vpack.c.bf16 %v1244_v60, %v1243_v55 }
 0x1b6   : > { %v2117_v50 = vsel %vm2044_vm10, %v2116_v39, %v2115_v41  ;;  %v1793_v60 = vunpack.c.l.b16 %v3758_v18  ;;  %v3781_v6 = vpack.c.bf16 %v1248_v10, %v1247_v61  ;;  %v4705_v10 = vld [vmem:[#allocation10_spill] sm:$0xff]  ;;  %v4706_v61 = vld [vmem:[#allocation15_spill] sm:$0xff] }
 0x1b7   : > { %v772_v27 = vpop.xlane.xlu2 %771  ;;  %v769_v14 = vpop.xlane.xlu1 %768  ;;  %v2244_v9 = vperm.slane %v1855_v36, %v3566_v0  ;;  %v2243_v36 = vsel %vm4642_vm11, %v2242_v45, %v2241_v12  ;;  %v2246_v57 = vperm.slane %v1856_v16, %v3574_v48  ;;  %v911_v12 = vsel %vm430_vm0, %v334_v5, 0.0  ;;  %v4708_v41 = vld [vmem:[#allocation26_spill] sm:$0xff] }
 0x1b8   : > { %v1312_v15 = vmul.f32 0.015625, %v772_v27  ;;  %v1311_v32 = vmul.f32 0.015625, %v769_v14  ;;  %v766_v30 = vpop.xlane.xlu0 %765  ;;  %v333_v14 = vld [vmem:[%s3023_s29 + $0x4f8] sm:$0xff]  ;;  %v1792_v1 = vunpack.c.h.b16 %v3760_v4  ;;  %v1249_v33 = vmul.f32 0.015625, %v4705_v10 }
 0x1b9   : > { %v1310_v40 = vmul.f32 0.015625, %v766_v30  ;;  %v2245_v55 = vsel %vm2052_vm12, %v2244_v9, %v2243_v36  ;;  %v914_v30 = vsel %vm430_vm0, %v335_v34, 0.0  ;;  %v908_v62 = vsel %vm430_vm0, %v333_v14, 0.0  ;;  %v4709_v34 = vld [vmem:[#allocation13_spill] sm:$0xff] }
 0x1ba   : > { %v1511_v52 = vpack.c.bf16 %v1312_v15, %v1311_v32  ;;  %v2247_v54 = vsel %vm2056_vm13, %v2246_v57, %v2245_v55  ;;  %v1250_v36 = vmul.f32 0.015625, %v4706_v61  ;;  %v1795_v59 = vunpack.c.l.b16 %v3781_v6  ;;  %v336_v14 = vld [vmem:[%s3023_s29 + $0x510] sm:$0xff] }
 0x1bb   : > { %v1510_v53 = vpack.c.bf16 %v1310_v40, %v1309_v42  ;;  %v1796_v55 = vunpack.c.h.b16 %v3781_v6  ;;  %v1252_v5 = vmul.f32 0.015625, %v4709_v34 }
 0x1bc   : > { %906 = vadd.xlane.f32.xlu2 %v905_v63  ;;  %903 = vadd.xlane.f32.xlu1 %v902_v23  ;;  %v1859_v19 = vunpack.c.l.b16 %v1511_v52  ;;  %v1860_v17 = vunpack.c.h.b16 %v1511_v52  ;;  %v1791_v63 = vunpack.c.l.b16 %v3760_v4  ;;  %v2119_v52 = vsel %vm4642_vm11, %v2118_v13, %v2117_v50 }
 0x1bd   : > { %v1857_v11 = vunpack.c.l.b16 %v1510_v53  ;;  %v1858_v25 = vunpack.c.h.b16 %v1510_v53  ;;  %900 = vadd.xlane.f32.xlu0 %v899_v2  ;;  %v1794_v2 = vunpack.c.h.b16 %v3758_v18  ;;  %v3800_v53 = vperm.slane %v1793_v60, %v3577_v28 }
 0x1be   : > { %v2252_v9 = vperm.slane %v1859_v19, %v3443_v44  ;;  %v2253_v40 = vperm.slane %v1860_v17, %v3457_v38  ;;  %v2120_v3 = vperm.slane %v1791_v63, %v3566_v0  ;;  %v1263_v4 = vmul.f32 0.015625, %v4708_v41  ;;  %v338_v19 = vld [vmem:[%s3023_s29 + $0x520] sm:$0xff]  ;;  %v337_v17 = vld [vmem:[%s3023_s29 + $0x518] sm:$0xff] }
 0x1bf   : > { %v2248_v35 = vperm.slane %v1857_v11, %v3577_v28  ;;  %v2250_v29 = vperm.slane %v1858_v25, %v3603_v43  ;;  %v781_v42 = vpop.xlane.xlu2 %780  ;;  %v778_v27 = vpop.xlane.xlu1 %777  ;;  %v4707_v11 = vld [vmem:[#allocation25_spill] sm:$0xff]  ;;  %v4710_v63 = vld [vmem:[#allocation14_spill] sm:$0xff]  ;;  %v3826_v10 = vperm.slane %v1794_v2, %v3603_v43  ;;  %v2122_v41 = vperm.slane %v1792_v1, %v3574_v48 }
 0x1c0   : > { %v1314_v45 = vmul.f32 0.015625, %v778_v27  ;;  %v775_v16 = vpop.xlane.xlu0 %774  ;;  %v1264_v25 = vmul.f32 0.015625, %v4707_v11  ;;  %v2254_v13 = vsel %vm2008_vm1, %v2253_v40, %v2252_v9  ;;  %v1315_v50 = vmul.f32 0.015625, %v781_v42  ;;  %v340_v1 = vld [vmem:[%s3023_s29 + $0x530] sm:$0xff] }
 0x1c1   : > { %v2249_v15 = vsel %vm2060_vm14, %v2248_v35, %v2247_v54  ;;  %v1313_v32 = vmul.f32 0.015625, %v775_v16  ;;  %v1251_v6 = vmul.f32 0.015625, %v4710_v63  ;;  %v3818_v54 = vpack.c.bf16 %v1250_v36, %v1249_v33  ;;  %v4711_v33 = vld [vmem:[#allocation29_spill] sm:$0xff]  ;;  %v4712_v36 = vld [vmem:[#allocation30_spill] sm:$0xff]  ;;  %v339_v63 = vld [vmem:[%s3023_s29 + $0x528] sm:$0xff] }
 0x1c2   : > { %v3790_v23 = vsel %vm2064_vm15, %v2250_v29, %v2249_v15  ;;  %v920_v42 = vsel %vm430_vm0, %v337_v17, 0.0  ;;  %v1487_v9 = vpack.c.bf16 %v1264_v25, %v1263_v4  ;;  %v1266_v61 = vmul.f32 0.015625, %v4711_v33 }
 0x1c3   : > { %v1512_v39 = vpack.c.bf16 %v1314_v45, %v1313_v32  ;;  %v2121_v11 = vsel %vm2052_vm12, %v2120_v3, %v2119_v52  ;;  %v2129_v2 = vperm.slane %v1796_v55, %v3457_v38  ;;  %v3834_v34 = vpack.c.bf16 %v1252_v5, %v1251_v6  ;;  %v4714_v5 = vld [vmem:[#allocation33_spill] sm:$0xff] }
 0x1c4   : > { %915 = vadd.xlane.f32.xlu2 %v914_v30  ;;  %912 = vadd.xlane.f32.xlu1 %v911_v12  ;;  %v923_v12 = vsel %vm430_vm0, %v338_v19, 0.0  ;;  %v1811_v52 = vunpack.c.l.b16 %v1487_v9  ;;  %v1812_v3 = vunpack.c.h.b16 %v1487_v9  ;;  %v1268_v6 = vmul.f32 0.015625, %v4714_v5 }
 0x1c5   : > { %v1861_v18 = vunpack.c.l.b16 %v1512_v39  ;;  %v1862_v57 = vunpack.c.h.b16 %v1512_v39  ;;  %909 = vadd.xlane.f32.xlu0 %v908_v62  ;;  %v917_v39 = vsel %vm430_vm0, %v336_v14, 0.0 }
 0x1c6   : > { %v2160_v33 = vperm.slane %v1812_v3, %v3457_v38  ;;  %v1799_v3 = vunpack.c.l.b16 %v3834_v34 }
 0x1c7   : > { %v2255_v60 = vperm.slane %v1861_v18, %v3463_v51  ;;  %v2257_v35 = vperm.slane %v1862_v57, %v3479_v7  ;;  %v790_v29 = vpop.xlane.xlu2 %789  ;;  %v787_v27 = vpop.xlane.xlu1 %786  ;;  %v1265_v18 = vmul.f32 0.015625, %v4712_v36  ;;  %v926_v36 = vsel %vm430_vm0, %v339_v63, 0.0 }
 0x1c8   : > { %v1318_v45 = vmul.f32 0.015625, %v790_v29  ;;  %v1317_v16 = vmul.f32 0.015625, %v787_v27  ;;  %v784_v15 = vpop.xlane.xlu0 %783 }
 0x1c9   : > { %v2256_v32 = vsel %vm2012_vm2, %v2255_v60, %v2254_v13  ;;  %v1316_v30 = vmul.f32 0.015625, %v784_v15  ;;  %v2128_v13 = vperm.slane %v1795_v59, %v3443_v44  ;;  %v341_v60 = vld [vmem:[%s3023_s29 + $0x538] sm:$0xff] }
 0x1ca   : > { %v2258_v40 = vsel %vm4638_vm3, %v2257_v35, %v2256_v32  ;;  %v1514_v62 = vpack.c.bf16 %v1318_v45, %v1317_v16  ;;  %v1488_v35 = vpack.c.bf16 %v1266_v61, %v1265_v18  ;;  %v4713_v45 = vld [vmem:[#allocation28_spill] sm:$0xff]  ;;  %v932_v9 = vsel %vm430_vm0, %v341_v60, 0.0 }
 0x1cb   : > { %v1513_v57 = vpack.c.bf16 %v1316_v30, %v1315_v50  ;;  %v1797_v50 = vunpack.c.l.b16 %v3818_v54  ;;  %v1267_v16 = vmul.f32 0.015625, %v4713_v45  ;;  %v3854_v18 = vsel %vm2056_vm13, %v2122_v41, %v2121_v11 }
 0x1cc   : > { %v1865_v25 = vunpack.c.l.b16 %v1514_v62  ;;  %v1866_v4 = vunpack.c.h.b16 %v1514_v62  ;;  %924 = vadd.xlane.f32.xlu2 %v923_v12  ;;  %921 = vadd.xlane.f32.xlu1 %v920_v42  ;;  %v929_v62 = vsel %vm430_vm0, %v340_v1, 0.0  ;;  %v1798_v60 = vunpack.c.h.b16 %v3818_v54 }
 0x1cd   : > { %v1863_v19 = vunpack.c.l.b16 %v1513_v57  ;;  %v1864_v17 = vunpack.c.h.b16 %v1513_v57  ;;  %918 = vadd.xlane.f32.xlu0 %v917_v39  ;;  %v2159_v39 = vperm.slane %v1811_v52, %v3443_v44  ;;  %v1813_v57 = vunpack.c.l.b16 %v1488_v35 }
 0x1ce   : > { %v2263_v29 = vperm.slane %v1865_v25, %v3499_v26  ;;  %v2265_v15 = vperm.slane %v1866_v4, %v3509_v47  ;;  %v2130_v4 = vsel %vm2008_vm1, %v2129_v2, %v2128_v13  ;;  %v2131_v1 = vperm.slane %v1797_v50, %v3463_v51  ;;  %v4715_v13 = vld [vmem:[#allocation31_spill] sm:$0xff] }
 0x1cf   : > { %v2259_v27 = vperm.slane %v1863_v19, %v3489_v37  ;;  %v2261_v59 = vperm.slane %v1864_v17, %v3493_v31  ;;  %v799_v55 = vpop.xlane.xlu2 %798  ;;  %v796_v14 = vpop.xlane.xlu1 %795  ;;  %v1814_v19 = vunpack.c.h.b16 %v1488_v35  ;;  %v1489_v17 = vpack.c.bf16 %v1268_v6, %v1267_v16  ;;  %v4716_v35 = vld [vmem:[#allocation32_spill] sm:$0xff] }
 0x1d0   : > { %v1320_v32 = vmul.f32 0.015625, %v796_v14  ;;  %v793_v30 = vpop.xlane.xlu0 %792  ;;  %v1270_v2 = vmul.f32 0.015625, %v4715_v13  ;;  %v343_v14 = vld [vmem:[%s3023_s29 + $0x548] sm:$0xff]  ;;  %v2162_v63 = vperm.slane %v1813_v57, %v3463_v51  ;;  %v1321_v45 = vmul.f32 0.015625, %v799_v55 }
 0x1d1   : > { %v2260_v12 = vsel %vm2020_vm4, %v2259_v27, %v2258_v40  ;;  %v1319_v42 = vmul.f32 0.015625, %v793_v30  ;;  %v1269_v27 = vmul.f32 0.015625, %v4716_v35  ;;  %v2164_v50 = vperm.slane %v1814_v19, %v3479_v7 }
 0x1d2   : > { %v2262_v61 = vsel %vm2024_vm5, %v2261_v59, %v2260_v12  ;;  %v344_v59 = vld [vmem:[%s3023_s29 + $0x550] sm:$0xff]  ;;  %v938_v55 = vsel %vm430_vm0, %v343_v14, 0.0  ;;  %v1816_v19 = vunpack.c.h.b16 %v1489_v17 }
 0x1d3   : > { %v2264_v25 = vsel %vm2028_vm6, %v2263_v29, %v2262_v61  ;;  %v1515_v40 = vpack.c.bf16 %v1320_v32, %v1319_v42  ;;  %v2161_v29 = vsel %vm2008_vm1, %v2160_v33, %v2159_v39  ;;  %v1815_v32 = vunpack.c.l.b16 %v1489_v17 }
 0x1d4   : > { %v2266_v52 = vsel %vm4639_vm7, %v2265_v15, %v2264_v25  ;;  %933 = vadd.xlane.f32.xlu2 %v932_v9  ;;  %930 = vadd.xlane.f32.xlu1 %v929_v62  ;;  %v342_v15 = vld [vmem:[%s3023_s29 + $0x540] sm:$0xff]  ;;  %v941_v39 = vsel %vm430_vm0, %v344_v59, 0.0  ;;  %v1490_v33 = vpack.c.bf16 %v1270_v2, %v1269_v27  ;;  %v2133_v25 = vperm.slane %v1798_v60, %v3479_v7  ;;  %v4718_v27 = vld [vmem:[#allocation18_spill] sm:$0xff] }
 0x1d5   : > { %v1867_v11 = vunpack.c.l.b16 %v1515_v40  ;;  %v1868_v41 = vunpack.c.h.b16 %v1515_v40  ;;  %927 = vadd.xlane.f32.xlu0 %v926_v36  ;;  %v935_v57 = vsel %vm430_vm0, %v342_v15, 0.0  ;;  %v2163_v40 = vsel %vm2012_vm2, %v2162_v63, %v2161_v29  ;;  %v4719_v63 = vld [vmem:[#allocation35_spill] sm:$0xff] }
 0x1d6   : > { %v2166_v13 = vperm.slane %v1815_v32, %v3489_v37  ;;  %v2132_v2 = vsel %vm2012_vm2, %v2131_v1, %v2130_v4  ;;  %v1253_v14 = vmul.f32 0.015625, %v4718_v27  ;;  %v2165_v17 = vsel %vm4638_vm3, %v2164_v50, %v2163_v40  ;;  %v346_v15 = vld [vmem:[%s3023_s29 + $0x560] sm:$0xff] }
 0x1d7   : > { %v2267_v16 = vperm.slane %v1867_v11, %v3523_v49  ;;  %v2269_v54 = vperm.slane %v1868_v41, %v3535_v58  ;;  %v808_v5 = vpop.xlane.xlu2 %807  ;;  %v805_v6 = vpop.xlane.xlu1 %804  ;;  %v4717_v41 = vld [vmem:[#allocation17_spill] sm:$0xff]  ;;  %v1817_v29 = vunpack.c.l.b16 %v1490_v33  ;;  %v2168_v32 = vperm.slane %v1816_v19, %v3493_v31 }
 0x1d8   : > { %v1324_v30 = vmul.f32 0.015625, %v808_v5  ;;  %v1323_v12 = vmul.f32 0.015625, %v805_v6  ;;  %v802_v42 = vpop.xlane.xlu0 %801  ;;  %v347_v6 = vld [vmem:[%s3023_s29 + $0x568] sm:$0xff]  ;;  %v2167_v50 = vsel %vm2020_vm4, %v2166_v13, %v2165_v17  ;;  %v1800_v13 = vunpack.c.h.b16 %v3834_v34  ;;  %v4721_v17 = vld [vmem:[#allocation34_spill] sm:$0xff] }
 0x1d9   : > { %v2268_v9 = vsel %vm2036_vm8, %v2267_v16, %v2266_v52  ;;  %v1322_v62 = vmul.f32 0.015625, %v802_v42  ;;  %v1254_v52 = vmul.f32 0.015625, %v4717_v41  ;;  %v950_v19 = vsel %vm430_vm0, %v347_v6, 0.0 }
 0x1da   : > { %v2270_v61 = vsel %vm2040_vm9, %v2269_v54, %v2268_v9  ;;  %v1517_v36 = vpack.c.bf16 %v1324_v30, %v1323_v12  ;;  %v4720_v54 = vld [vmem:[#allocation36_spill] sm:$0xff]  ;;  %v345_v9 = vld [vmem:[%s3023_s29 + $0x558] sm:$0xff]  ;;  %v2170_v41 = vperm.slane %v1817_v29, %v3499_v26  ;;  %v1273_v29 = vmul.f32 0.015625, %v4721_v17 }
 0x1db   : > { %v1516_v11 = vpack.c.bf16 %v1322_v62, %v1321_v45  ;;  %v1272_v45 = vmul.f32 0.015625, %v4719_v63  ;;  %v1271_v5 = vmul.f32 0.015625, %v4720_v54  ;;  %v1818_v62 = vunpack.c.h.b16 %v1490_v33  ;;  %v4722_v63 = vld [vmem:[#allocation39_spill] sm:$0xff] }
 0x1dc   : > { %v1871_v35 = vunpack.c.l.b16 %v1517_v36  ;;  %v1872_v59 = vunpack.c.h.b16 %v1517_v36  ;;  %942 = vadd.xlane.f32.xlu2 %v941_v39  ;;  %939 = vadd.xlane.f32.xlu1 %v938_v55  ;;  %v944_v33 = vsel %vm430_vm0, %v345_v9, 0.0  ;;  %v3911_v6 = vpack.c.bf16 %v1254_v52, %v1253_v14  ;;  %v349_v9 = vld [vmem:[%s3023_s29 + $0x578] sm:$0xff] }
 0x1dd   : > { %v1869_v60 = vunpack.c.l.b16 %v1516_v11  ;;  %v1870_v16 = vunpack.c.h.b16 %v1516_v11  ;;  %936 = vadd.xlane.f32.xlu0 %v935_v57  ;;  %v947_v11 = vsel %vm430_vm0, %v346_v15, 0.0  ;;  %v2172_v34 = vperm.slane %v1818_v62, %v3509_v47 }
 0x1de   : > { %v2275_v30 = vperm.slane %v1871_v35, %v3566_v0  ;;  %v2277_v39 = vperm.slane %v1872_v59, %v3574_v48  ;;  %v1491_v35 = vpack.c.bf16 %v1272_v45, %v1271_v5  ;;  %v2169_v59 = vsel %vm2024_vm5, %v2168_v32, %v2167_v50  ;;  %v4724_v50 = vld [vmem:[#allocation38_spill] sm:$0xff] }
 0x1df   : > { %v2271_v4 = vperm.slane %v1869_v60, %v3529_v56  ;;  %v2273_v1 = vperm.slane %v1870_v16, %v3532_v46  ;;  %v817_v12 = vpop.xlane.xlu2 %816  ;;  %v814_v42 = vpop.xlane.xlu1 %813  ;;  %v1274_v45 = vmul.f32 0.015625, %v4722_v63  ;;  %v2134_v5 = vsel %vm4638_vm3, %v2133_v25, %v2132_v2 }
 0x1e0   : > { %v1326_v55 = vmul.f32 0.015625, %v814_v42  ;;  %v811_v36 = vpop.xlane.xlu0 %810  ;;  %v350_v42 = vld [vmem:[%s3023_s29 + $0x580] sm:$0xff] }
 0x1e1   : > { %v2272_v57 = vsel %vm2044_vm10, %v2271_v4, %v2270_v61  ;;  %v1325_v40 = vmul.f32 0.015625, %v811_v36  ;;  %v2135_v61 = vperm.slane %v1799_v3, %v3489_v37  ;;  %v2171_v3 = vsel %vm2028_vm6, %v2170_v41, %v2169_v59  ;;  %v4723_v4 = vld [vmem:[#allocation37_spill] sm:$0xff] }
 0x1e2   : > { %v2274_v27 = vsel %vm4642_vm11, %v2273_v1, %v2272_v57  ;;  %v1276_v1 = vmul.f32 0.015625, %v4723_v4  ;;  %v348_v36 = vld [vmem:[%s3023_s29 + $0x570] sm:$0xff]  ;;  %v1820_v57 = vunpack.c.h.b16 %v1491_v35  ;;  %v956_v59 = vsel %vm430_vm0, %v349_v9, 0.0 }
 0x1e3   : > { %v2276_v60 = vsel %vm2052_vm12, %v2275_v30, %v2274_v27  ;;  %v1518_v16 = vpack.c.bf16 %v1326_v55, %v1325_v40  ;;  %v1819_v30 = vunpack.c.l.b16 %v1491_v35  ;;  %v1327_v55 = vmul.f32 0.015625, %v817_v12 }
 0x1e4   : > { %v2278_v54 = vsel %vm2056_vm13, %v2277_v39, %v2276_v60  ;;  %951 = vadd.xlane.f32.xlu2 %v950_v19  ;;  %948 = vadd.xlane.f32.xlu1 %v947_v11  ;;  %v1275_v39 = vmul.f32 0.015625, %v4724_v50  ;;  %v1492_v40 = vpack.c.bf16 %v1274_v45, %v1273_v29  ;;  %v953_v17 = vsel %vm430_vm0, %v348_v36, 0.0  ;;  %v352_v50 = vld [vmem:[%s3023_s29 + $0x590] sm:$0xff] }
 0x1e5   : > { %v1873_v15 = vunpack.c.l.b16 %v1518_v16  ;;  %v1874_v32 = vunpack.c.h.b16 %v1518_v16  ;;  %945 = vadd.xlane.f32.xlu0 %v944_v33  ;;  %v959_v33 = vsel %vm430_vm0, %v350_v42, 0.0  ;;  %v2174_v12 = vperm.slane %v1819_v30, %v3523_v49 }
 0x1e6   : > { %v2125_v35 = vsel %vm2060_vm14, %v3800_v53, %v3854_v18  ;;  %v2137_v29 = vperm.slane %v1800_v13, %v3493_v31  ;;  %v1493_v63 = vpack.c.bf16 %v1276_v1, %v1275_v39  ;;  %v1801_v4 = vunpack.c.l.b16 %v3911_v6  ;;  %v353_v1 = vld [vmem:[%s3023_s29 + $0x598] sm:$0xff] }
 0x1e7   : > { %v2279_v25 = vperm.slane %v1873_v15, %v3577_v28  ;;  %v2281_v52 = vperm.slane %v1874_v32, %v3603_v43  ;;  %v826_v2 = vpop.xlane.xlu2 %825  ;;  %v823_v14 = vpop.xlane.xlu1 %822  ;;  %v1821_v15 = vunpack.c.l.b16 %v1492_v40  ;;  %v2173_v42 = vsel %vm4639_vm7, %v2172_v34, %v2171_v3 }
 0x1e8   : > { %v1330_v62 = vmul.f32 0.015625, %v826_v2  ;;  %v1329_v19 = vmul.f32 0.015625, %v823_v14  ;;  %v820_v11 = vpop.xlane.xlu0 %819  ;;  %v1802_v18 = vunpack.c.h.b16 %v3911_v6  ;;  %v2175_v13 = vsel %vm2036_vm8, %v2174_v12, %v2173_v42  ;;  %v351_v2 = vld [vmem:[%s3023_s29 + $0x588] sm:$0xff]  ;;  %v4726_v12 = vld [vmem:[#allocation42_spill] sm:$0xff] }
 0x1e9   : > { %v2280_v41 = vsel %vm2060_vm14, %v2279_v25, %v2278_v54  ;;  %v1328_v27 = vmul.f32 0.015625, %v820_v11  ;;  %v2136_v54 = vsel %vm2020_vm4, %v2135_v61, %v2134_v5  ;;  %v2176_v61 = vperm.slane %v1820_v57, %v3535_v58 }
 0x1ea   : > { %v3927_v60 = vsel %vm2064_vm15, %v2281_v52, %v2280_v41  ;;  %v1520_v16 = vpack.c.bf16 %v1330_v62, %v1329_v19  ;;  %v1823_v39 = vunpack.c.l.b16 %v1493_v63  ;;  %v1824_v14 = vunpack.c.h.b16 %v1493_v63 }
 0x1eb   : > { %v1519_v45 = vpack.c.bf16 %v1328_v27, %v1327_v55  ;;  %v1822_v6 = vunpack.c.h.b16 %v1492_v40  ;;  %v2178_v36 = vperm.slane %v1821_v15, %v3529_v56  ;;  %v968_v41 = vsel %vm430_vm0, %v353_v1, 0.0  ;;  %v4728_v1 = vld [vmem:[#allocation21_spill] sm:$0xff] }
 0x1ec   : > { %v1877_v32 = vunpack.c.l.b16 %v1520_v16  ;;  %v1878_v30 = vunpack.c.h.b16 %v1520_v16  ;;  %960 = vadd.xlane.f32.xlu2 %v959_v33  ;;  %957 = vadd.xlane.f32.xlu1 %v956_v59  ;;  %v965_v27 = vsel %vm430_vm0, %v352_v50, 0.0  ;;  %v4725_v33 = vld [vmem:[#allocation41_spill] sm:$0xff]  ;;  %v1277_v16 = vmul.f32 0.015625, %v4726_v12 }
 0x1ed   : > { %v1875_v9 = vunpack.c.l.b16 %v1519_v45  ;;  %v1876_v53 = vunpack.c.h.b16 %v1519_v45  ;;  %954 = vadd.xlane.f32.xlu0 %v953_v17  ;;  %v1278_v59 = vmul.f32 0.015625, %v4725_v33  ;;  %v962_v63 = vsel %vm430_vm0, %v351_v2, 0.0 }
 0x1ee   : > { %v2286_v5 = vperm.slane %v1877_v32, %v3463_v51  ;;  %v2288_v55 = vperm.slane %v1878_v30, %v3479_v7  ;;  %v3957_v40 = vsel %vm2064_vm15, %v3826_v10, %v2125_v35  ;;  %v2138_v45 = vsel %vm2024_vm5, %v2137_v29, %v2136_v54  ;;  %v4727_v30 = vld [vmem:[#allocation16_spill] sm:$0xff] }
 0x1ef   : > { %v2283_v25 = vperm.slane %v1875_v9, %v3443_v44  ;;  %v2284_v34 = vperm.slane %v1876_v53, %v3457_v38  ;;  %v835_v3 = vpop.xlane.xlu2 %834  ;;  %v832_v52 = vpop.xlane.xlu1 %831  ;;  %v1255_v42 = vmul.f32 0.015625, %v4727_v30  ;;  %v2139_v9 = vperm.slane %v1801_v4, %v3499_v26 }
 0x1f0   : > { %v1332_v62 = vmul.f32 0.015625, %v832_v52  ;;  %v829_v57 = vpop.xlane.xlu0 %828  ;;  %v2177_v53 = vsel %vm2040_vm9, %v2176_v61, %v2175_v13  ;;  %v3966_v10 = vperm.slane %v1802_v18, %v3509_v47  ;;  %v1256_v50 = vmul.f32 0.015625, %v4728_v1  ;;  %v356_v61 = vld [vmem:[%s3023_s29 + $0x5b0] sm:$0xff] }
 0x1f1   : > { %v2285_v19 = vsel %vm2008_vm1, %v2284_v34, %v2283_v25  ;;  %v1331_v11 = vmul.f32 0.015625, %v829_v57  ;;  %v2179_v35 = vsel %vm2044_vm10, %v2178_v36, %v2177_v53  ;;  %v2184_v4 = vperm.slane %v1824_v14, %v3574_v48  ;;  %v355_v25 = vld [vmem:[%s3023_s29 + $0x5a8] sm:$0xff]  ;;  %v354_v57 = vld [vmem:[%s3023_s29 + $0x5a0] sm:$0xff] }
 0x1f2   : > { %v2287_v17 = vsel %vm2012_vm2, %v2286_v5, %v2285_v19  ;;  %v2180_v5 = vperm.slane %v1822_v6, %v3532_v46  ;;  %v1494_v13 = vpack.c.bf16 %v1278_v59, %v1277_v16  ;;  %v4729_v34 = vld [vmem:[#allocation40_spill] sm:$0xff]  ;;  %v1333_v2 = vmul.f32 0.015625, %v835_v3 }
 0x1f3   : > { %v2289_v15 = vsel %vm4638_vm3, %v2288_v55, %v2287_v17  ;;  %v1521_v32 = vpack.c.bf16 %v1332_v62, %v1331_v11  ;;  %v2182_v55 = vperm.slane %v1823_v39, %v3566_v0  ;;  %v1279_v52 = vmul.f32 0.015625, %v4729_v34  ;;  %v4730_v11 = vld [vmem:[#allocation45_spill] sm:$0xff] }
 0x1f4   : > { %969 = vadd.xlane.f32.xlu2 %v968_v41  ;;  %966 = vadd.xlane.f32.xlu1 %v965_v27  ;;  %v2181_v19 = vsel %vm4642_vm11, %v2180_v5, %v2179_v35  ;;  %v1280_v41 = vmul.f32 0.015625, %v4730_v11  ;;  %vm4641_vm3 = vcmask 1041409   ;;  %v977_v3 = vsel %vm430_vm0, %v356_v61, 0.0  ;;  %v4731_v5 = vld [vmem:[#allocation43_spill] sm:$0xff] }
 0x1f5   : > { %v1879_v29 = vunpack.c.l.b16 %v1521_v32  ;;  %v1880_v54 = vunpack.c.h.b16 %v1521_v32  ;;  %963 = vadd.xlane.f32.xlu0 %v962_v63  ;;  %v974_v12 = vsel %vm430_vm0, %v355_v25, 0.0  ;;  %v1825_v16 = vunpack.c.l.b16 %v1494_v13  ;;  %v4733_v25 = vld [vmem:[#allocation19_spill] sm:$0xff] }
 0x1f6   : > { %v971_v32 = vsel %vm430_vm0, %v354_v57, 0.0  ;;  %v2183_v30 = vsel %vm2052_vm12, %v2182_v55, %v2181_v19  ;;  %v1826_v53 = vunpack.c.h.b16 %v1494_v13  ;;  %v1282_v35 = vmul.f32 0.015625, %v4731_v5  ;;  %v359_v19 = vld [vmem:[%s3023_s29 + $0x5c8] sm:$0xff]  ;;  %v358_v11 = vld [vmem:[%s3023_s29 + $0x5c0] sm:$0xff] }
 0x1f7   : > { %v2290_v18 = vperm.slane %v1879_v29, %v3489_v37  ;;  %v2292_v6 = vperm.slane %v1880_v54, %v3493_v31  ;;  %v844_v36 = vpop.xlane.xlu2 %843  ;;  %v841_v62 = vpop.xlane.xlu1 %840  ;;  %v4732_v54 = vld [vmem:[#allocation44_spill] sm:$0xff]  ;;  %v1495_v1 = vpack.c.bf16 %v1280_v41, %v1279_v52  ;;  %v2140_v13 = vsel %vm2028_vm6, %v2139_v9, %v2138_v45 }
 0x1f8   : > { %v1336_v39 = vmul.f32 0.015625, %v844_v36  ;;  %v1335_v27 = vmul.f32 0.015625, %v841_v62  ;;  %v838_v14 = vpop.xlane.xlu0 %837  ;;  %v2185_v57 = vsel %vm2056_vm13, %v2184_v4, %v2183_v30  ;;  %v2186_v52 = vperm.slane %v1825_v16, %v3577_v28  ;;  %v4735_v30 = vld [vmem:[#allocation47_spill] sm:$0xff]  ;;  %v4736_v5 = vld [vmem:[#allocation48_spill] sm:$0xff] }
 0x1f9   : > { %v2291_v33 = vsel %vm2020_vm4, %v2290_v18, %v2289_v15  ;;  %v1334_v59 = vmul.f32 0.015625, %v838_v14  ;;  %v1281_v15 = vmul.f32 0.015625, %v4732_v54  ;;  %v1258_v18 = vmul.f32 0.015625, %v4733_v25 }
 0x1fa   : > { %v2293_v17 = vsel %vm2024_vm5, %v2292_v6, %v2291_v33  ;;  %v1523_v63 = vpack.c.bf16 %v1336_v39, %v1335_v27  ;;  %v4734_v6 = vld [vmem:[#allocation20_spill] sm:$0xff]  ;;  %v2188_v41 = vperm.slane %v1826_v53, %v3603_v43  ;;  %v1284_v53 = vmul.f32 0.015625, %v4735_v30 }
 0x1fb   : > { %v1522_v29 = vpack.c.bf16 %v1334_v59, %v1333_v2  ;;  %v1257_v36 = vmul.f32 0.015625, %v4734_v6  ;;  %v3991_v2 = vpack.c.bf16 %v1256_v50, %v1255_v42  ;;  %v4002_v45 = vpack.c.bf16 %v1282_v35, %v1281_v15 }
 0x1fc   : > { %v1883_v61 = vunpack.c.l.b16 %v1523_v63  ;;  %v1884_v34 = vunpack.c.h.b16 %v1523_v63  ;;  %978 = vadd.xlane.f32.xlu2 %v977_v3  ;;  %975 = vadd.xlane.f32.xlu1 %v974_v12  ;;  %v357_v3 = vld [vmem:[%s3023_s29 + $0x5b8] sm:$0xff]  ;;  %v1827_v42 = vunpack.c.l.b16 %v1495_v1  ;;  %v986_v63 = vsel %vm430_vm0, %v359_v19, 0.0 }
 0x1fd   : > { %v1881_v62 = vunpack.c.l.b16 %v1522_v29  ;;  %v1882_v55 = vunpack.c.h.b16 %v1522_v29  ;;  %972 = vadd.xlane.f32.xlu0 %v971_v32  ;;  %v983_v32 = vsel %vm430_vm0, %v358_v11, 0.0  ;;  %v1283_v29 = vmul.f32 0.015625, %v4736_v5 }
 0x1fe   : > { %v2298_v39 = vperm.slane %v1883_v61, %v3523_v49  ;;  %v2300_v9 = vperm.slane %v1884_v34, %v3535_v58  ;;  %v980_v35 = vsel %vm430_vm0, %v357_v3, 0.0  ;;  %v2187_v15 = vsel %vm2060_vm14, %v2186_v52, %v2185_v57  ;;  %v360_v3 = vld [vmem:[%s3023_s29 + $0x5d0] sm:$0xff] }
 0x1ff   : > { %v2294_v27 = vperm.slane %v1881_v62, %v3499_v26  ;;  %v2296_v14 = vperm.slane %v1882_v55, %v3509_v47  ;;  %v853_v33 = vpop.xlane.xlu2 %852  ;;  %v850_v59 = vpop.xlane.xlu1 %849  ;;  %v1828_v61 = vunpack.c.h.b16 %v1495_v1  ;;  %v4016_v25 = vsel %vm4639_vm7, %v3966_v10, %v2140_v13 }
 0x200   : > { %v1338_v50 = vmul.f32 0.015625, %v850_v59  ;;  %v847_v4 = vpop.xlane.xlu0 %846  ;;  %v1829_v6 = vunpack.c.l.b16 %v4002_v45  ;;  %v2532_v55 = vsel %vm4641_vm3, %v3957_v40, %v3658_v24  ;;  %v4023_v1 = vpack.c.bf16 %v1258_v18, %v1257_v36 }
 0x201   : > { %v2295_v12 = vsel %vm2028_vm6, %v2294_v27, %v2293_v17  ;;  %v1337_v16 = vmul.f32 0.015625, %v847_v4  ;;  %v1803_v57 = vunpack.c.l.b16 %v3991_v2  ;;  %v2189_v10 = vsel %vm2064_vm15, %v2188_v41, %v2187_v15  ;;  %v361_v27 = vld [vmem:[%s3023_s29 + $0x5d8] sm:$0xff] }
 0x202   : > { %v2297_v54 = vsel %vm4639_vm7, %v2296_v14, %v2295_v12  ;;  %v2190_v13 = vperm.slane %v1827_v42, %v3443_v44  ;;  %v4028_v11 = vpack.c.bf16 %v1284_v53, %v1283_v29  ;;  %vm4640_vm7 = vcmask 1042434   ;;  %v4737_v15 = vld [vmem:[#allocation46_spill] sm:$0xff] }
 0x203   : > { %v2299_v34 = vsel %vm2036_vm8, %v2298_v39, %v2297_v54  ;;  %v1524_v17 = vpack.c.bf16 %v1338_v50, %v1337_v16  ;;  %v362_v39 = vld [vmem:[%s3023_s29 + $0x5e0] sm:$0xff]  ;;  %v2191_v14 = vperm.slane %v1828_v61, %v3457_v38  ;;  %v1339_v24 = vmul.f32 0.015625, %v853_v33 }
 0x204   : > { %v2301_v62 = vsel %vm2040_vm9, %v2300_v9, %v2299_v34  ;;  %987 = vadd.xlane.f32.xlu2 %v986_v63  ;;  %984 = vadd.xlane.f32.xlu1 %v983_v32  ;;  %v1830_v9 = vunpack.c.h.b16 %v4002_v45  ;;  %v2193_v41 = vperm.slane %v1829_v6, %v3463_v51  ;;  %v995_v63 = vsel %vm430_vm0, %v362_v39, 0.0  ;;  %v4738_v34 = vld [vmem:[#allocation51_spill] sm:$0xff] }
 0x205   : > { %v1885_v52 = vunpack.c.l.b16 %v1524_v17  ;;  %v1886_v19 = vunpack.c.h.b16 %v1524_v17  ;;  %981 = vadd.xlane.f32.xlu0 %v980_v35  ;;  %v992_v33 = vsel %vm430_vm0, %v361_v27, 0.0  ;;  %v1831_v32 = vunpack.c.l.b16 %v4028_v11 }
 0x206   : > { %v989_v5 = vsel %vm430_vm0, %v360_v3, 0.0  ;;  %v1805_v45 = vunpack.c.l.b16 %v4023_v1  ;;  %v1804_v29 = vunpack.c.h.b16 %v3991_v2  ;;  %v2192_v54 = vsel %vm2008_vm1, %v2191_v14, %v2190_v13 }
 0x207   : > { %v2302_v40 = vperm.slane %v1885_v52, %v3529_v56  ;;  %v2304_v18 = vperm.slane %v1886_v19, %v3532_v46  ;;  %v862_v36 = vpop.xlane.xlu2 %861  ;;  %v859_v59 = vpop.xlane.xlu1 %858  ;;  %v1285_v61 = vmul.f32 0.015625, %v4737_v15  ;;  %v1286_v17 = vmul.f32 0.015625, %v4738_v34 }
 0x208   : > { %v1342_v42 = vmul.f32 0.015625, %v862_v36  ;;  %v1341_v50 = vmul.f32 0.015625, %v859_v59  ;;  %v856_v4 = vpop.xlane.xlu0 %855  ;;  %v2143_v52 = vperm.slane %v1803_v57, %v3523_v49  ;;  %v2534_v2 = vsel %vm4640_vm7, %v2189_v10, %v2532_v55  ;;  %v4739_v36 = vld [vmem:[#allocation49_spill] sm:$0xff]  ;;  %v363_v10 = vld [vmem:[%s3023_s29 + $0x5e8] sm:$0xff] }
 0x209   : > { %v2303_v12 = vsel %vm2044_vm10, %v2302_v40, %v2301_v62  ;;  %v1340_v16 = vmul.f32 0.015625, %v856_v4  ;;  %v2195_v13 = vperm.slane %v1830_v9, %v3479_v7  ;;  %v2194_v27 = vsel %vm2012_vm2, %v2193_v41, %v2192_v54  ;;  %v367_v40 = vld [vmem:[%s3023_s29 + $0x608] sm:$0xff] }
 0x20a   : > { %v2305_v30 = vsel %vm4642_vm11, %v2304_v18, %v2303_v12  ;;  %v1526_v53 = vpack.c.bf16 %v1342_v42, %v1341_v50  ;;  %v1832_v14 = vunpack.c.h.b16 %v4028_v11  ;;  %v366_v18 = vld [vmem:[%s3023_s29 + $0x600] sm:$0xff]  ;;  %v1288_v59 = vmul.f32 0.015625, %v4739_v36 }
 0x20b   : > { %v1525_v35 = vpack.c.bf16 %v1340_v16, %v1339_v24  ;;  %v2197_v24 = vperm.slane %v1831_v32, %v3489_v37  ;;  %v1498_v9 = vpack.c.bf16 %v1286_v17, %v1285_v61  ;;  %vm2535_vm7 = vcmask 1043459   ;;  %v4740_v32 = vld [vmem:[#allocation50_spill] sm:$0xff] }
 0x20c   : > { %v1889_v6 = vunpack.c.l.b16 %v1526_v53  ;;  %v1890_v62 = vunpack.c.h.b16 %v1526_v53  ;;  %996 = vadd.xlane.f32.xlu2 %v995_v63  ;;  %993 = vadd.xlane.f32.xlu1 %v992_v33  ;;  %v1010_v63 = vsel %vm430_vm0, %v367_v40, 0.0  ;;  %v1007_v33 = vsel %vm430_vm0, %v366_v18, 0.0  ;;  %v4743_v18 = vld [vmem:[#allocation23_spill] sm:$0xff] }
 0x20d   : > { %v1887_v19 = vunpack.c.l.b16 %v1525_v35  ;;  %v1888_v39 = vunpack.c.h.b16 %v1525_v35  ;;  %990 = vadd.xlane.f32.xlu0 %v989_v5  ;;  %v1287_v53 = vmul.f32 0.015625, %v4740_v32  ;;  %v998_v54 = vsel %vm430_vm0, %v363_v10, 0.0 }
 0x20e   : > { %v2310_v57 = vperm.slane %v1889_v6, %v3577_v28  ;;  %v2312_v41 = vperm.slane %v1890_v62, %v3603_v43  ;;  %vm4643_vm3 = vcmask 1044484   ;;  %vm4741_vm11 = vcmask 261312  }
 0x20f   : > { %v2306_v3 = vperm.slane %v1887_v19, %v3566_v0  ;;  %v2308_v42 = vperm.slane %v1888_v39, %v3574_v48  ;;  %v871_v50 = vpop.xlane.xlu2 %870  ;;  %v868_v55 = vpop.xlane.xlu1 %867  ;;  %v2196_v35 = vsel %vm4741_vm11, %v2195_v13, %v2194_v27  ;;  %v2199_v15 = vperm.slane %v1832_v14, %v3493_v31 }
 0x210   : > { %v1344_v4 = vmul.f32 0.015625, %v868_v55  ;;  %v865_v11 = vpop.xlane.xlu0 %864  ;;  %v2198_v17 = vsel %vm2020_vm4, %v2197_v24, %v2196_v35  ;;  %v2536_v62 = vsel %vm2535_vm7, %v3790_v23, %v2534_v2  ;;  %v4078_v19 = vperm.slane %v1805_v45, %v3529_v56  ;;  %v4742_v24 = vld [vmem:[#allocation22_spill] sm:$0xff]  ;;  %v368_v2 = vld [vmem:[%s3023_s29 + $0x610] sm:$0xff]  ;;  %v383_v45 = vld [vmem:[%s3023_s29 + $0x688] sm:$0xff] }
 0x211   : > { %v2307_v12 = vsel %vm2052_vm12, %v2306_v3, %v2305_v30  ;;  %v1343_v16 = vmul.f32 0.015625, %v865_v11  ;;  %v1806_v30 = vunpack.c.h.b16 %v4023_v1  ;;  %v2145_v39 = vperm.slane %v1804_v29, %v3535_v58 }
 0x212   : > { %v2309_v5 = vsel %vm2056_vm13, %v2308_v42, %v2307_v12  ;;  %v1833_v13 = vunpack.c.l.b16 %v1498_v9  ;;  %v2144_v14 = vsel %vm2036_vm8, %v2143_v52, %v4016_v25  ;;  %v4087_v40 = vmul.f32 0.015625, %v4742_v24 }
 0x213   : > { %v1527_v61 = vpack.c.bf16 %v1344_v4, %v1343_v16  ;;  %v2311_v34 = vsel %vm2060_vm14, %v2310_v57, %v2309_v5  ;;  %v1260_v36 = vmul.f32 0.015625, %v4743_v18  ;;  %v1499_v23 = vpack.c.bf16 %v1288_v59, %v1287_v53  ;;  %v4744_v57 = vld [vmem:[#allocation24_spill] sm:$0xff]  ;;  %v382_v4 = vld [vmem:[%s3023_s29 + $0x680] sm:$0xff] }
 0x214   : > { %1011 = vadd.xlane.f32.xlu2 %v1010_v63  ;;  %1008 = vadd.xlane.f32.xlu1 %v1007_v33  ;;  %v2313_v6 = vsel %vm2064_vm15, %v2312_v41, %v2311_v34  ;;  %v1259_v3 = vmul.f32 0.015625, %v4744_v57  ;;  %v2200_v29 = vsel %vm2024_vm5, %v2199_v15, %v2198_v17  ;;  %v1834_v42 = vunpack.c.h.b16 %v1498_v9  ;;  %v4745_v15 = vld [vmem:[#allocation53_spill] sm:$0xff] }
 0x215   : > { %999 = vadd.xlane.f32.xlu0 %v998_v54  ;;  %v4082_v27 = vsel %vm4643_vm3, %v2313_v6, %v2536_v62  ;;  %v1345_v55 = vmul.f32 0.015625, %v871_v50  ;;  %v1891_v11 = vunpack.c.l.b16 %v1527_v61  ;;  %v1892_v12 = vunpack.c.h.b16 %v1527_v61 }
 0x216   : > { %v2201_v63 = vperm.slane %v1833_v13, %v3499_v26  ;;  %v1013_v59 = vsel %vm430_vm0, %v368_v2, 0.0  ;;  %v1058_v32 = vsel %vm430_vm0, %v383_v45, 0.0  ;;  %v1835_v53 = vunpack.c.l.b16 %v1499_v23  ;;  %v4746_v45 = vld [vmem:[#allocation27_spill] sm:$0xff] }
 0x217   : > { %v880_v10 = vpop.xlane.xlu2 %879  ;;  %v877_v41 = vpop.xlane.xlu1 %876  ;;  %v1836_v5 = vunpack.c.h.b16 %v1499_v23  ;;  %v1055_v50 = vsel %vm430_vm0, %v382_v4, 0.0  ;;  %v2203_v9 = vperm.slane %v1834_v42, %v3509_v47  ;;  %v1290_v35 = vmul.f32 0.015625, %v3546_v8 }
 0x218   : > { %v1348_v25 = vmul.f32 0.015625, %v880_v10  ;;  %v1347_v52 = vmul.f32 0.015625, %v877_v41  ;;  %v874_v16 = vpop.xlane.xlu0 %873  ;;  %v1289_v61 = vmul.f32 0.015625, %v4745_v15  ;;  %v2314_v17 = vperm.slane %v1891_v11, %v3443_v44  ;;  %v385_v10 = vld [vmem:[%s3023_s29 + $0x698] sm:$0xff]  ;;  %v384_v41 = vld [vmem:[%s3023_s29 + $0x690] sm:$0xff] }
 0x219   : > { %v1346_v33 = vmul.f32 0.015625, %v874_v16  ;;  %v2315_v6 = vperm.slane %v1892_v12, %v3457_v38  ;;  %v2146_v24 = vsel %vm2040_vm9, %v2145_v39, %v2144_v14  ;;  %v2202_v18 = vsel %vm2028_vm6, %v2201_v63, %v2200_v29 }
 0x21a   : > { %v1529_v54 = vpack.c.bf16 %v1348_v25, %v1347_v52  ;;  %v4106_v2 = vpack.c.bf16 %v1260_v36, %v1259_v3  ;;  %v1262_v57 = vmul.f32 0.015625, %v4746_v45  ;;  %v2205_v42 = vperm.slane %v1835_v53, %v3523_v49  ;;  %v369_v36 = vld [vmem:[%s3023_s29 + $0x618] sm:$0xff] }
 0x21b   : > { %v1528_v34 = vpack.c.bf16 %v1346_v33, %v1345_v55  ;;  %v2207_v55 = vperm.slane %v1836_v5, %v3535_v58  ;;  %v4113_v4 = vpack.c.bf16 %v1290_v35, %v1289_v61  ;;  %vm4747_vm11 = vcmask 523712   ;;  %v4748_v5 = vld [vmem:[#allocation52_spill] sm:$0xff] }
 0x21c   : > { %v1895_v62 = vunpack.c.l.b16 %v1529_v54  ;;  %v1896_v13 = vunpack.c.h.b16 %v1529_v54  ;;  %1014 = vadd.xlane.f32.xlu2 %v1013_v59  ;;  %1059 = vadd.xlane.f32.xlu1 %v1058_v32  ;;  %v2204_v3 = vsel %vm4747_vm11, %v2203_v9, %v2202_v18  ;;  %v2316_v25 = vsel %vm2008_vm1, %v2315_v6, %v2314_v17 }
 0x21d   : > { %v1893_v23 = vunpack.c.l.b16 %v1528_v34  ;;  %v1894_v8 = vunpack.c.h.b16 %v1528_v34  ;;  %1056 = vadd.xlane.f32.xlu0 %v1055_v50  ;;  %v1064_v32 = vsel %vm430_vm0, %v385_v10, 0.0  ;;  %v1061_v53 = vsel %vm430_vm0, %v384_v41, 0.0  ;;  %v4749_v50 = vld [vmem:[#allocation56_spill] sm:$0xff] }
 0x21e   : > { %v2321_v39 = vperm.slane %v1895_v62, %v3489_v37  ;;  %v2323_v52 = vperm.slane %v1896_v13, %v3493_v31  ;;  %v1291_v54 = vmul.f32 0.015625, %v4748_v5  ;;  %v1292_v35 = vmul.f32 0.015625, %v4749_v50  ;;  %v399_v41 = vld [vmem:[%s3023_s29 + $0x708] sm:$0xff] }
 0x21f   : > { %v2317_v14 = vperm.slane %v1893_v23, %v3463_v51  ;;  %v2319_v29 = vperm.slane %v1894_v8, %v3479_v7  ;;  %v889_v11 = vpop.xlane.xlu2 %888  ;;  %v886_v12 = vpop.xlane.xlu1 %885  ;;  %vm4750_vm3 = vcmask 261312   ;;  %v1016_v9 = vsel %vm430_vm0, %v369_v36, 0.0 }
 0x220   : > { %v1350_v16 = vmul.f32 0.015625, %v886_v12  ;;  %v883_v63 = vpop.xlane.xlu0 %882  ;;  %v2206_v61 = vsel %vm2036_vm8, %v2205_v42, %v2204_v3  ;;  %v1837_v34 = vunpack.c.l.b16 %v4113_v4  ;;  %v2149_v62 = vperm.slane %v1806_v30, %v3532_v46  ;;  %v398_v3 = vld [vmem:[%s3023_s29 + $0x700] sm:$0xff] }
 0x221   : > { %v2318_v33 = vsel %vm2012_vm2, %v2317_v14, %v2316_v25  ;;  %v1349_v59 = vmul.f32 0.015625, %v883_v63  ;;  %v2148_v13 = vsel %vm2044_vm10, %v4078_v19, %v2146_v24  ;;  %v1807_v23 = vunpack.c.l.b16 %v4106_v2  ;;  %v414_v24 = vld [vmem:[%s3023_s29 + $0x780] sm:$0xff]  ;;  %v4751_v25 = vld [vmem:[#allocation54_spill] sm:$0xff] }
 0x222   : > { %v2320_v15 = vsel %vm4750_vm3, %v2319_v29, %v2318_v33  ;;  %v1808_v8 = vunpack.c.h.b16 %v4106_v2  ;;  %v4141_v10 = vpack.c.bf16 %v1262_v57, %v4087_v40  ;;  %v2208_v1 = vsel %vm2040_vm9, %v2207_v55, %v2206_v61  ;;  %v4752_v57 = vld [vmem:[#allocation55_spill] sm:$0xff]  ;;  %vm4753_vm3 = vmmov %vm4747_vm11 }
 0x223   : > { %v2322_v17 = vsel %vm2020_vm4, %v2321_v39, %v2320_v15  ;;  %v1530_v6 = vpack.c.bf16 %v1350_v16, %v1349_v59  ;;  %v1838_v30 = vunpack.c.h.b16 %v4113_v4  ;;  %v1501_v19 = vpack.c.bf16 %v1292_v35, %v1291_v54 }
 0x224   : > { %v2324_v18 = vsel %vm2024_vm5, %v2323_v52, %v2322_v17  ;;  %1065 = vadd.xlane.f32.xlu2 %v1064_v32  ;;  %1062 = vadd.xlane.f32.xlu1 %v1061_v53  ;;  %v2209_v39 = vperm.slane %v1837_v34, %v3529_v56  ;;  %v1351_v14 = vmul.f32 0.015625, %v889_v11  ;;  %v1294_v40 = vmul.f32 0.015625, %v4751_v25 }
 0x225   : > { %v1897_v45 = vunpack.c.l.b16 %v1530_v6  ;;  %v1898_v42 = vunpack.c.h.b16 %v1530_v6  ;;  %1017 = vadd.xlane.f32.xlu0 %v1016_v9  ;;  %v1293_v52 = vmul.f32 0.015625, %v4752_v57  ;;  %v1151_v59 = vsel %vm430_vm0, %v414_v24, 0.0 }
 0x226   : > { %v1106_v11 = vsel %vm430_vm0, %v399_v41, 0.0  ;;  %v1839_v32 = vunpack.c.l.b16 %v1501_v19  ;;  %v1103_v54 = vsel %vm430_vm0, %v398_v3, 0.0  ;;  %v1777_v50 = vunpack.c.l.b16 %v3795_v21 }
 0x227   : > { %v2325_v29 = vperm.slane %v1897_v45, %v3499_v26  ;;  %v2327_v2 = vperm.slane %v1898_v42, %v3509_v47  ;;  %v898_v12 = vpop.xlane.xlu2 %897  ;;  %v895_v36 = vpop.xlane.xlu1 %894  ;;  %v2210_v35 = vsel %vm2044_vm10, %v2209_v39, %v2208_v1  ;;  %v2211_v15 = vperm.slane %v1838_v30, %v3532_v46  ;;  %v401_v39 = vld [vmem:[%s3023_s29 + $0x718] sm:$0xff] }
 0x228   : > { %v1354_v55 = vmul.f32 0.015625, %v898_v12  ;;  %v1353_v16 = vmul.f32 0.015625, %v895_v36  ;;  %v892_v4 = vpop.xlane.xlu0 %891  ;;  %v4161_v61 = vpack.c.bf16 %v1294_v40, %v1293_v52  ;;  %v1840_v34 = vunpack.c.h.b16 %v1501_v19  ;;  %v415_v36 = vld [vmem:[%s3023_s29 + $0x788] sm:$0xff] }
 0x229   : > { %v2326_v63 = vsel %vm2028_vm6, %v2325_v29, %v2324_v18  ;;  %v1352_v33 = vmul.f32 0.015625, %v892_v4  ;;  %v1778_v18 = vunpack.c.h.b16 %v3795_v21  ;;  %vm4754_vm11 = vcmask 786112  }
 0x22a   : > { %v2328_v53 = vsel %vm4753_vm3, %v2327_v2, %v2326_v63  ;;  %v1532_v5 = vpack.c.bf16 %v1354_v55, %v1353_v16  ;;  %v2150_v45 = vsel %vm4754_vm11, %v2149_v62, %v2148_v13  ;;  %v2151_v1 = vperm.slane %v1807_v23, %v3566_v0  ;;  %vm4755_vm3 = vmmov %vm4754_vm11 }
 0x22b   : > { %v1531_v9 = vpack.c.bf16 %v1352_v33, %v1351_v14  ;;  %v2153_v30 = vperm.slane %v1808_v8, %v3574_v48  ;;  %v1809_v41 = vunpack.c.l.b16 %v4141_v10  ;;  %v2213_v19 = vperm.slane %v1839_v32, %v3566_v0  ;;  %v400_v14 = vld [vmem:[%s3023_s29 + $0x710] sm:$0xff]  ;;  %vm4756_vm11 = vmmov %vm4755_vm3 }
 0x22c   : > { %v1901_v17 = vunpack.c.l.b16 %v1532_v5  ;;  %v1902_v6 = vunpack.c.h.b16 %v1532_v5  ;;  %1152 = vadd.xlane.f32.xlu2 %v1151_v59  ;;  %1107 = vadd.xlane.f32.xlu1 %v1106_v11  ;;  %v2212_v29 = vsel %vm4755_vm3, %v2211_v15, %v2210_v35  ;;  %v1841_v23 = vunpack.c.l.b16 %v4161_v61 }
 0x22d   : > { %v1899_v42 = vunpack.c.l.b16 %v1531_v9  ;;  %v1900_v24 = vunpack.c.h.b16 %v1531_v9  ;;  %1104 = vadd.xlane.f32.xlu0 %v1103_v54  ;;  %v2215_v8 = vperm.slane %v1840_v34, %v3574_v48  ;;  %v1112_v55 = vsel %vm430_vm0, %v401_v39, 0.0 }
 0x22e   : > { %v2333_v21 = vperm.slane %v1901_v17, %v3529_v56  ;;  %v2335_v3 = vperm.slane %v1902_v6, %v3532_v46  ;;  %v1109_v16 = vsel %vm430_vm0, %v400_v14, 0.0  ;;  %v1810_v4 = vunpack.c.h.b16 %v4141_v10 }
 0x22f   : > { %v2329_v62 = vperm.slane %v1899_v42, %v3523_v49  ;;  %v2331_v13 = vperm.slane %v1900_v24, %v3535_v58  ;;  %v907_v2 = vpop.xlane.xlu2 %906  ;;  %v904_v12 = vpop.xlane.xlu1 %903  ;;  %v2214_v63 = vsel %vm2052_vm12, %v2213_v19, %v2212_v29  ;;  %v1154_v59 = vsel %vm430_vm0, %v415_v36, 0.0  ;;  %v370_v24 = vld [vmem:[%s3023_s29 + $0x620] sm:$0xff]  ;;  %v416_v29 = vld [vmem:[%s3023_s29 + $0x790] sm:$0xff] }
 0x230   : > { %v1356_v25 = vmul.f32 0.015625, %v904_v12  ;;  %v901_v40 = vpop.xlane.xlu0 %900  ;;  %v2152_v11 = vsel %vm2052_vm12, %v2151_v1, %v2150_v45  ;;  %v2155_v32 = vperm.slane %v1809_v41, %v3577_v28  ;;  %v1842_v54 = vunpack.c.h.b16 %v4161_v61  ;;  %v417_v1 = vld [vmem:[%s3023_s29 + $0x798] sm:$0xff] }
 0x231   : > { %v2330_v57 = vsel %vm2036_vm8, %v2329_v62, %v2328_v53  ;;  %v1355_v52 = vmul.f32 0.015625, %v901_v40  ;;  %v2217_v35 = vperm.slane %v1841_v23, %v3577_v28  ;;  %v2092_v15 = vsel %vm2056_vm13, %v3689_v20, %v3768_v22 }
 0x232   : > { %v2332_v33 = vsel %vm2040_vm9, %v2331_v13, %v2330_v57  ;;  %v2216_v9 = vsel %vm2056_vm13, %v2215_v8, %v2214_v63  ;;  %v2093_v6 = vperm.slane %v1777_v50, %v3577_v28  ;;  %v2095_v61 = vperm.slane %v1778_v18, %v3603_v43 }
 0x233   : > { %v2334_v5 = vsel %vm2044_vm10, %v2333_v21, %v2332_v33  ;;  %v1533_v53 = vpack.c.bf16 %v1356_v25, %v1355_v52  ;;  %v2154_v45 = vsel %vm2056_vm13, %v2153_v30, %v2152_v11  ;;  %v2157_v42 = vperm.slane %v1810_v4, %v3603_v43  ;;  %v387_v11 = vld [vmem:[%s3023_s29 + $0x6a8] sm:$0xff] }
 0x234   : > { %v2336_v10 = vsel %vm4756_vm11, %v2335_v3, %v2334_v5  ;;  %1113 = vadd.xlane.f32.xlu2 %v1112_v55  ;;  %1110 = vadd.xlane.f32.xlu1 %v1109_v16  ;;  %v2156_v41 = vsel %vm2060_vm14, %v2155_v32, %v2154_v45  ;;  %v1357_v19 = vmul.f32 0.015625, %v907_v2  ;;  %v2219_v50 = vperm.slane %v1842_v54, %v3603_v43  ;;  %v386_v32 = vld [vmem:[%s3023_s29 + $0x6a0] sm:$0xff] }
 0x235   : > { %v1903_v34 = vunpack.c.l.b16 %v1533_v53  ;;  %v1904_v17 = vunpack.c.h.b16 %v1533_v53  ;;  %1155 = vadd.xlane.f32.xlu0 %v1154_v59  ;;  %v2218_v18 = vsel %vm2060_vm14, %v2217_v35, %v2216_v9  ;;  %v1019_v36 = vsel %vm430_vm0, %v370_v24, 0.0 }
 0x236   : > { %v1160_v2 = vsel %vm430_vm0, %v417_v1, 0.0  ;;  %v2094_v23 = vsel %vm2060_vm14, %v2093_v6, %v2092_v15  ;;  %v1157_v25 = vsel %vm430_vm0, %v416_v29, 0.0  ;;  %v2158_v40 = vsel %vm2064_vm15, %v2157_v42, %v2156_v41  ;;  %v418_v29 = vld [vmem:[%s3023_s29 + $0x7a0] sm:$0xff] }
 0x237   : > { %v2337_v20 = vperm.slane %v1903_v34, %v3566_v0  ;;  %v2339_v22 = vperm.slane %v1904_v17, %v3574_v48  ;;  %v916_v39 = vpop.xlane.xlu2 %915  ;;  %v913_v14 = vpop.xlane.xlu1 %912  ;;  %v2220_v52 = vsel %vm2064_vm15, %v2219_v50, %v2218_v18  ;;  %v2096_v55 = vsel %vm2064_vm15, %v2095_v61, %v2094_v23  ;;  %v403_v50 = vld [vmem:[%s3023_s29 + $0x728] sm:$0xff] }
 0x238   : > { %v1360_v21 = vmul.f32 0.015625, %v916_v39  ;;  %v1359_v30 = vmul.f32 0.015625, %v913_v14  ;;  %v910_v62 = vpop.xlane.xlu0 %909  ;;  %vm4757_vm3 = vcmask 1041409   ;;  %vm4758_vm11 = vcmask 1042434  }
 0x239   : > { %v2338_v13 = vsel %vm2052_vm12, %v2337_v20, %v2336_v10  ;;  %v1358_v12 = vmul.f32 0.015625, %v910_v62  ;;  %v2545_v63 = vsel %vm4757_vm3, %v2158_v40, %v2096_v55  ;;  %v371_v10 = vld [vmem:[%s3023_s29 + $0x628] sm:$0xff]  ;;  %v1070_v45 = vsel %vm430_vm0, %v387_v11, 0.0  ;;  %v373_v11 = vld [vmem:[%s3023_s29 + $0x638] sm:$0xff] }
 0x23a   : > { %v2340_v8 = vsel %vm2056_vm13, %v2339_v22, %v2338_v13  ;;  %v1535_v3 = vpack.c.bf16 %v1360_v21, %v1359_v30  ;;  %v2546_v15 = vsel %vm4758_vm11, %v2220_v52, %v2545_v63  ;;  %v1067_v42 = vsel %vm430_vm0, %v386_v32, 0.0  ;;  %v372_v32 = vld [vmem:[%s3023_s29 + $0x630] sm:$0xff] }
 0x23b   : > { %v1534_v57 = vpack.c.bf16 %v1358_v12, %v1357_v19  ;;  %v2547_v17 = vsel %vm2535_vm7, %v3927_v60, %v2546_v15  ;;  %v1022_v41 = vsel %vm430_vm0, %v371_v10, 0.0  ;;  %vm4759_vm7 = vcmask 1044484   ;;  %v402_v12 = vld [vmem:[%s3023_s29 + $0x720] sm:$0xff]  ;;  %v419_v15 = vld [vmem:[%s3023_s29 + $0x7a8] sm:$0xff] }
 0x23c   : > { %1020 = vadd.xlane.f32.xlu2 %v1019_v36  ;;  %1161 = vadd.xlane.f32.xlu1 %v1160_v2  ;;  %v1907_v33 = vunpack.c.l.b16 %v1535_v3  ;;  %v1908_v59 = vunpack.c.h.b16 %v1535_v3  ;;  %v1118_v40 = vsel %vm430_vm0, %v403_v50, 0.0  ;;  %vm4760_vm3 = vcmask 261312  }
 0x23d   : > { %v1905_v16 = vunpack.c.l.b16 %v1534_v57  ;;  %v1906_v4 = vunpack.c.h.b16 %v1534_v57  ;;  %1158 = vadd.xlane.f32.xlu0 %v1157_v25  ;;  %v1163_v25 = vsel %vm430_vm0, %v418_v29, 0.0  ;;  %v1115_v55 = vsel %vm430_vm0, %v402_v12, 0.0  ;;  %v389_v29 = vld [vmem:[%s3023_s29 + $0x6b8] sm:$0xff] }
 0x23e   : > { %v2345_v24 = vperm.slane %v1907_v33, %v3443_v44  ;;  %v2346_v1 = vperm.slane %v1908_v59, %v3457_v38  ;;  %vm4761_vm11 = vcmask 523712  }
 0x23f   : > { %v2341_v5 = vperm.slane %v1905_v16, %v3577_v28  ;;  %v2343_v53 = vperm.slane %v1906_v4, %v3603_v43  ;;  %v925_v54 = vpop.xlane.xlu2 %924  ;;  %v922_v35 = vpop.xlane.xlu1 %921 }
 0x240   : > { %v1362_v9 = vmul.f32 0.015625, %v922_v35  ;;  %v919_v34 = vpop.xlane.xlu0 %918  ;;  %v2347_v14 = vsel %vm2008_vm1, %v2346_v1, %v2345_v24  ;;  %v1363_v18 = vmul.f32 0.015625, %v925_v54  ;;  %v1166_v1 = vsel %vm430_vm0, %v419_v15, 0.0 }
 0x241   : > { %v2342_v6 = vsel %vm2060_vm14, %v2341_v5, %v2340_v8  ;;  %v1361_v61 = vmul.f32 0.015625, %v919_v34 }
 0x242   : > { %v2344_v19 = vsel %vm2064_vm15, %v2343_v53, %v2342_v6 }
 0x243   : > { %v1536_v20 = vpack.c.bf16 %v1362_v9, %v1361_v61  ;;  %v4234_v60 = vsel %vm4759_vm7, %v2344_v19, %v2547_v17  ;;  %vm4762_vm7 = vcmask 786112  }
 0x244   : > { %1071 = vadd.xlane.f32.xlu2 %v1070_v45  ;;  %1068 = vadd.xlane.f32.xlu1 %v1067_v42  ;;  %v1028_v45 = vsel %vm430_vm0, %v373_v11, 0.0  ;;  %v1025_v42 = vsel %vm430_vm0, %v372_v32, 0.0  ;;  %v420_v11 = vld [vmem:[%s3023_s29 + $0x7b0] sm:$0xff] }
 0x245   : > { %v1909_v22 = vunpack.c.l.b16 %v1536_v20  ;;  %v1910_v39 = vunpack.c.h.b16 %v1536_v20  ;;  %1023 = vadd.xlane.f32.xlu0 %v1022_v41 }
 0x247   : > { %v2348_v21 = vperm.slane %v1909_v22, %v3463_v51  ;;  %v2350_v30 = vperm.slane %v1910_v39, %v3479_v7  ;;  %v934_v62 = vpop.xlane.xlu2 %933  ;;  %v931_v13 = vpop.xlane.xlu1 %930 }
 0x248   : > { %v1366_v36 = vmul.f32 0.015625, %v934_v62  ;;  %v1365_v2 = vmul.f32 0.015625, %v931_v13  ;;  %v928_v23 = vpop.xlane.xlu0 %927  ;;  %v388_v13 = vld [vmem:[%s3023_s29 + $0x6b0] sm:$0xff] }
 0x249   : > { %v2349_v8 = vsel %vm2012_vm2, %v2348_v21, %v2347_v14  ;;  %v1364_v3 = vmul.f32 0.015625, %v928_v23  ;;  %v404_v14 = vld [vmem:[%s3023_s29 + $0x730] sm:$0xff] }
 0x24a   : > { %v2351_v57 = vsel %vm4760_vm3, %v2350_v30, %v2349_v8  ;;  %v1538_v52 = vpack.c.bf16 %v1366_v36, %v1365_v2  ;;  %vm2539_vm3 = vcmask 1045509  }
 0x24b   : > { %v1537_v16 = vpack.c.bf16 %v1364_v3, %v1363_v18  ;;  %v1121_v3 = vsel %vm430_vm0, %v404_v14, 0.0  ;;  %v375_v14 = vld [vmem:[%s3023_s29 + $0x648] sm:$0xff] }
 0x24c   : > { %v1913_v4 = vunpack.c.l.b16 %v1538_v52  ;;  %v1914_v63 = vunpack.c.h.b16 %v1538_v52  ;;  %1164 = vadd.xlane.f32.xlu2 %v1163_v25  ;;  %1119 = vadd.xlane.f32.xlu1 %v1118_v40  ;;  %v1076_v25 = vsel %vm430_vm0, %v389_v29, 0.0  ;;  %v1073_v52 = vsel %vm430_vm0, %v388_v13, 0.0 }
 0x24d   : > { %v1911_v33 = vunpack.c.l.b16 %v1537_v16  ;;  %v1912_v59 = vunpack.c.h.b16 %v1537_v16  ;;  %1116 = vadd.xlane.f32.xlu0 %v1115_v55 }
 0x24e   : > { %v2356_v5 = vperm.slane %v1913_v4, %v3499_v26  ;;  %v2358_v9 = vperm.slane %v1914_v63, %v3509_v47 }
 0x24f   : > { %v2352_v53 = vperm.slane %v1911_v33, %v3489_v37  ;;  %v2354_v54 = vperm.slane %v1912_v59, %v3493_v31  ;;  %v943_v35 = vpop.xlane.xlu2 %942  ;;  %v940_v10 = vpop.xlane.xlu1 %939  ;;  %v421_v59 = vld [vmem:[%s3023_s29 + $0x7b8] sm:$0xff] }
 0x250   : > { %v1368_v34 = vmul.f32 0.015625, %v940_v10  ;;  %v937_v17 = vpop.xlane.xlu0 %936  ;;  %v1369_v50 = vmul.f32 0.015625, %v943_v35  ;;  %v405_v10 = vld [vmem:[%s3023_s29 + $0x738] sm:$0xff] }
 0x251   : > { %v2353_v6 = vsel %vm2020_vm4, %v2352_v53, %v2351_v57  ;;  %v1367_v61 = vmul.f32 0.015625, %v937_v17 }
 0x252   : > { %v2355_v24 = vsel %vm2024_vm5, %v2354_v54, %v2353_v6 }
 0x253   : > { %v2357_v41 = vsel %vm2028_vm6, %v2356_v5, %v2355_v24  ;;  %v1539_v19 = vpack.c.bf16 %v1368_v34, %v1367_v61  ;;  %v1172_v61 = vsel %vm430_vm0, %v421_v59, 0.0  ;;  %v1124_v24 = vsel %vm430_vm0, %v405_v10, 0.0  ;;  %v391_v10 = vld [vmem:[%s3023_s29 + $0x6c8] sm:$0xff] }
 0x254   : > { %v2359_v20 = vsel %vm4761_vm11, %v2358_v9, %v2357_v41  ;;  %1029 = vadd.xlane.f32.xlu2 %v1028_v45  ;;  %1026 = vadd.xlane.f32.xlu1 %v1025_v42  ;;  %v1169_v45 = vsel %vm430_vm0, %v420_v11, 0.0  ;;  %v407_v11 = vld [vmem:[%s3023_s29 + $0x748] sm:$0xff]  ;;  %vm4763_vm11 = vcmask 261312  }
 0x255   : > { %v1915_v22 = vunpack.c.l.b16 %v1539_v19  ;;  %v1916_v39 = vunpack.c.h.b16 %v1539_v19  ;;  %1167 = vadd.xlane.f32.xlu0 %v1166_v1 }
 0x257   : > { %v2360_v18 = vperm.slane %v1915_v22, %v3523_v49  ;;  %v2362_v21 = vperm.slane %v1916_v39, %v3535_v58  ;;  %v952_v30 = vpop.xlane.xlu2 %951  ;;  %v949_v62 = vpop.xlane.xlu1 %948  ;;  %v390_v39 = vld [vmem:[%s3023_s29 + $0x6c0] sm:$0xff] }
 0x258   : > { %v1372_v12 = vmul.f32 0.015625, %v952_v30  ;;  %v1371_v36 = vmul.f32 0.015625, %v949_v62  ;;  %v946_v2 = vpop.xlane.xlu0 %945  ;;  %v374_v62 = vld [vmem:[%s3023_s29 + $0x640] sm:$0xff] }
 0x259   : > { %v2361_v23 = vsel %vm2036_vm8, %v2360_v18, %v2359_v20  ;;  %v1370_v8 = vmul.f32 0.015625, %v946_v2 }
 0x25a   : > { %v2363_v40 = vsel %vm2040_vm9, %v2362_v21, %v2361_v23  ;;  %v1541_v57 = vpack.c.bf16 %v1372_v12, %v1371_v36  ;;  %v1079_v23 = vsel %vm430_vm0, %v390_v39, 0.0 }
 0x25b   : > { %v1540_v55 = vpack.c.bf16 %v1370_v8, %v1369_v50  ;;  %v1034_v8 = vsel %vm430_vm0, %v375_v14, 0.0 }
 0x25c   : > { %v1919_v16 = vunpack.c.l.b16 %v1541_v57  ;;  %v1920_v4 = vunpack.c.h.b16 %v1541_v57  ;;  %1122 = vadd.xlane.f32.xlu2 %v1121_v3  ;;  %1077 = vadd.xlane.f32.xlu1 %v1076_v25 }
 0x25d   : > { %v1917_v63 = vunpack.c.l.b16 %v1540_v55  ;;  %v1918_v33 = vunpack.c.h.b16 %v1540_v55  ;;  %1074 = vadd.xlane.f32.xlu0 %v1073_v52 }
 0x25e   : > { %v2368_v32 = vperm.slane %v1919_v16, %v3566_v0  ;;  %v2370_v15 = vperm.slane %v1920_v4, %v3574_v48 }
 0x25f   : > { %v2364_v5 = vperm.slane %v1917_v63, %v3529_v56  ;;  %v2366_v53 = vperm.slane %v1918_v33, %v3532_v46  ;;  %v961_v54 = vpop.xlane.xlu2 %960  ;;  %v958_v35 = vpop.xlane.xlu1 %957 }
 0x260   : > { %v1374_v9 = vmul.f32 0.015625, %v958_v35  ;;  %v955_v34 = vpop.xlane.xlu0 %954  ;;  %v1375_v29 = vmul.f32 0.015625, %v961_v54 }
 0x261   : > { %v2365_v17 = vsel %vm2044_vm10, %v2364_v5, %v2363_v40  ;;  %v1373_v6 = vmul.f32 0.015625, %v955_v34  ;;  %v1031_v40 = vsel %vm430_vm0, %v374_v62, 0.0 }
 0x262   : > { %v2367_v42 = vsel %vm4762_vm7, %v2366_v53, %v2365_v17  ;;  %vm4764_vm7 = vcmask 523712  }
 0x263   : > { %v2369_v1 = vsel %vm2052_vm12, %v2368_v32, %v2367_v42  ;;  %v1542_v41 = vpack.c.bf16 %v1374_v9, %v1373_v6  ;;  %v406_v32 = vld [vmem:[%s3023_s29 + $0x740] sm:$0xff]  ;;  %v1130_v6 = vsel %vm430_vm0, %v407_v11, 0.0  ;;  %v1082_v42 = vsel %vm430_vm0, %v391_v10, 0.0 }
 0x264   : > { %1173 = vadd.xlane.f32.xlu2 %v1172_v61  ;;  %1170 = vadd.xlane.f32.xlu1 %v1169_v45  ;;  %v2371_v19 = vsel %vm2056_vm13, %v2370_v15, %v2369_v1  ;;  %v1127_v61 = vsel %vm430_vm0, %v406_v32, 0.0 }
 0x265   : > { %v1921_v20 = vunpack.c.l.b16 %v1542_v41  ;;  %v1922_v22 = vunpack.c.h.b16 %v1542_v41  ;;  %1125 = vadd.xlane.f32.xlu0 %v1124_v24 }
 0x267   : > { %v2372_v50 = vperm.slane %v1921_v20, %v3577_v28  ;;  %v2374_v18 = vperm.slane %v1922_v22, %v3603_v43  ;;  %v970_v21 = vpop.xlane.xlu2 %969  ;;  %v967_v30 = vpop.xlane.xlu1 %966  ;;  %v376_v20 = vld [vmem:[%s3023_s29 + $0x650] sm:$0xff]  ;;  %v423_v22 = vld [vmem:[%s3023_s29 + $0x7c8] sm:$0xff] }
 0x268   : > { %v1378_v13 = vmul.f32 0.015625, %v970_v21  ;;  %v1377_v12 = vmul.f32 0.015625, %v967_v30  ;;  %v964_v36 = vpop.xlane.xlu0 %963  ;;  %v422_v21 = vld [vmem:[%s3023_s29 + $0x7c0] sm:$0xff] }
 0x269   : > { %v1376_v2 = vmul.f32 0.015625, %v964_v36  ;;  %v2373_v3 = vsel %vm2060_vm14, %v2372_v50, %v2371_v19 }
 0x26a   : > { %v1544_v25 = vpack.c.bf16 %v1378_v13, %v1377_v12  ;;  %v2375_v57 = vsel %vm2064_vm15, %v2374_v18, %v2373_v3 }
 0x26b   : > { %v1543_v52 = vpack.c.bf16 %v1376_v2, %v1375_v29  ;;  %v4297_v55 = vsel %vm2539_vm3, %v2375_v57, %v4082_v27  ;;  %v1037_v2 = vsel %vm430_vm0, %v376_v20, 0.0  ;;  %v409_v20 = vld [vmem:[%s3023_s29 + $0x758] sm:$0xff] }
 0x26c   : > { %v1925_v16 = vunpack.c.l.b16 %v1544_v25  ;;  %v1926_v4 = vunpack.c.h.b16 %v1544_v25  ;;  %1080 = vadd.xlane.f32.xlu2 %v1079_v23  ;;  %1035 = vadd.xlane.f32.xlu1 %v1034_v8  ;;  %v1178_v23 = vsel %vm430_vm0, %v423_v22, 0.0  ;;  %v1175_v25 = vsel %vm430_vm0, %v422_v21, 0.0 }
 0x26d   : > { %v1923_v63 = vunpack.c.l.b16 %v1543_v52  ;;  %v1924_v33 = vunpack.c.h.b16 %v1543_v52  ;;  %1032 = vadd.xlane.f32.xlu0 %v1031_v40 }
 0x26e   : > { %v2379_v59 = vperm.slane %v1925_v16, %v3463_v51  ;;  %v2381_v5 = vperm.slane %v1926_v4, %v3479_v7 }
 0x26f   : > { %v2376_v53 = vperm.slane %v1923_v63, %v3443_v44  ;;  %v2377_v54 = vperm.slane %v1924_v33, %v3457_v38  ;;  %v979_v27 = vpop.xlane.xlu2 %978  ;;  %v976_v35 = vpop.xlane.xlu1 %975  ;;  %v393_v63 = vld [vmem:[%s3023_s29 + $0x6d8] sm:$0xff]  ;;  %v392_v33 = vld [vmem:[%s3023_s29 + $0x6d0] sm:$0xff] }
 0x270   : > { %v1380_v15 = vmul.f32 0.015625, %v976_v35  ;;  %v973_v9 = vpop.xlane.xlu0 %972  ;;  %v1381_v39 = vmul.f32 0.015625, %v979_v27 }
 0x271   : > { %v2378_v34 = vsel %vm2008_vm1, %v2377_v54, %v2376_v53  ;;  %v1379_v17 = vmul.f32 0.015625, %v973_v9  ;;  %v377_v54 = vld [vmem:[%s3023_s29 + $0x658] sm:$0xff] }
 0x272   : > { %v2380_v45 = vsel %vm2012_vm2, %v2379_v59, %v2378_v34  ;;  %v1088_v34 = vsel %vm430_vm0, %v393_v63, 0.0 }
 0x273   : > { %v2382_v24 = vsel %vm4763_vm11, %v2381_v5, %v2380_v45  ;;  %v1545_v1 = vpack.c.bf16 %v1380_v15, %v1379_v17  ;;  %v1085_v17 = vsel %vm430_vm0, %v392_v33, 0.0  ;;  %vm4765_vm11 = vcmask 786112  }
 0x274   : > { %1131 = vadd.xlane.f32.xlu2 %v1130_v6  ;;  %1128 = vadd.xlane.f32.xlu1 %v1127_v61  ;;  %v1040_v61 = vsel %vm430_vm0, %v377_v54, 0.0 }
 0x275   : > { %v1927_v41 = vunpack.c.l.b16 %v1545_v1  ;;  %v1928_v19 = vunpack.c.h.b16 %v1545_v1  ;;  %1083 = vadd.xlane.f32.xlu0 %v1082_v42 }
 0x277   : > { %v2383_v14 = vperm.slane %v1927_v41, %v3489_v37  ;;  %v2385_v29 = vperm.slane %v1928_v19, %v3493_v31  ;;  %v988_v50 = vpop.xlane.xlu2 %987  ;;  %v985_v18 = vpop.xlane.xlu1 %984  ;;  %v424_v19 = vld [vmem:[%s3023_s29 + $0x7d0] sm:$0xff] }
 0x278   : > { %v1384_v30 = vmul.f32 0.015625, %v988_v50  ;;  %v1383_v62 = vmul.f32 0.015625, %v985_v18  ;;  %v982_v13 = vpop.xlane.xlu0 %981  ;;  %v408_v18 = vld [vmem:[%s3023_s29 + $0x750] sm:$0xff] }
 0x279   : > { %v2384_v12 = vsel %vm2020_vm4, %v2383_v14, %v2382_v24  ;;  %v1382_v36 = vmul.f32 0.015625, %v982_v13 }
 0x27a   : > { %v2386_v8 = vsel %vm2024_vm5, %v2385_v29, %v2384_v12  ;;  %v1547_v3 = vpack.c.bf16 %v1384_v30, %v1383_v62 }
 0x27b   : > { %v1546_v40 = vpack.c.bf16 %v1382_v36, %v1381_v39  ;;  %v1181_v36 = vsel %vm430_vm0, %v424_v19, 0.0 }
 0x27c   : > { %v1931_v57 = vunpack.c.l.b16 %v1547_v3  ;;  %v1932_v52 = vunpack.c.h.b16 %v1547_v3  ;;  %1038 = vadd.xlane.f32.xlu2 %v1037_v2  ;;  %1179 = vadd.xlane.f32.xlu1 %v1178_v23  ;;  %v1136_v2 = vsel %vm430_vm0, %v409_v20, 0.0  ;;  %v1133_v3 = vsel %vm430_vm0, %v408_v18, 0.0 }
 0x27d   : > { %v1929_v16 = vunpack.c.l.b16 %v1546_v40  ;;  %v1930_v4 = vunpack.c.h.b16 %v1546_v40  ;;  %1176 = vadd.xlane.f32.xlu0 %v1175_v25 }
 0x27e   : > { %v2391_v59 = vperm.slane %v1931_v57, %v3523_v49  ;;  %v2393_v27 = vperm.slane %v1932_v52, %v3535_v58  ;;  %v379_v52 = vld [vmem:[%s3023_s29 + $0x668] sm:$0xff] }
 0x27f   : > { %v2387_v11 = vperm.slane %v1929_v16, %v3499_v26  ;;  %v2389_v32 = vperm.slane %v1930_v4, %v3509_v47  ;;  %v997_v5 = vpop.xlane.xlu2 %996  ;;  %v994_v53 = vpop.xlane.xlu1 %993  ;;  %v378_v16 = vld [vmem:[%s3023_s29 + $0x660] sm:$0xff] }
 0x280   : > { %v1386_v35 = vmul.f32 0.015625, %v994_v53  ;;  %v991_v10 = vpop.xlane.xlu0 %990  ;;  %v1387_v22 = vmul.f32 0.015625, %v997_v5 }
 0x281   : > { %v2388_v15 = vsel %vm2028_vm6, %v2387_v11, %v2386_v8  ;;  %v1385_v9 = vmul.f32 0.015625, %v991_v10  ;;  %v425_v11 = vld [vmem:[%s3023_s29 + $0x7d8] sm:$0xff] }
 0x282   : > { %v2390_v6 = vsel %vm4764_vm7, %v2389_v32, %v2388_v15  ;;  %v1184_v15 = vsel %vm430_vm0, %v425_v11, 0.0  ;;  %v365_v11 = vld [vmem:[%s3023_s29 + $0x5f8] sm:$0xff]  ;;  %vm4766_vm7 = vcmask 261312  }
 0x283   : > { %v2392_v45 = vsel %vm2036_vm8, %v2391_v59, %v2390_v6  ;;  %v1548_v42 = vpack.c.bf16 %v1386_v35, %v1385_v9  ;;  %v1043_v35 = vsel %vm430_vm0, %v378_v16, 0.0 }
 0x284   : > { %v2394_v24 = vsel %vm2040_vm9, %v2393_v27, %v2392_v45  ;;  %1089 = vadd.xlane.f32.xlu2 %v1088_v34  ;;  %1086 = vadd.xlane.f32.xlu1 %v1085_v17  ;;  %v1046_v27 = vsel %vm430_vm0, %v379_v52, 0.0  ;;  %v364_v34 = vld [vmem:[%s3023_s29 + $0x5f0] sm:$0xff]  ;;  %v395_v17 = vld [vmem:[%s3023_s29 + $0x6e8] sm:$0xff]  ;;  %v410_v52 = vld [vmem:[%s3023_s29 + $0x760] sm:$0xff] }
 0x285   : > { %v1933_v1 = vunpack.c.l.b16 %v1548_v42  ;;  %v1934_v41 = vunpack.c.h.b16 %v1548_v42  ;;  %1041 = vadd.xlane.f32.xlu0 %v1040_v61 }
 0x287   : > { %v2395_v39 = vperm.slane %v1933_v1, %v3529_v56  ;;  %v2397_v14 = vperm.slane %v1934_v41, %v3532_v46  ;;  %v1012_v29 = vpop.xlane.xlu2 %1011  ;;  %v1009_v50 = vpop.xlane.xlu1 %1008  ;;  %v394_v1 = vld [vmem:[%s3023_s29 + $0x6e0] sm:$0xff] }
 0x288   : > { %v1392_v21 = vmul.f32 0.015625, %v1012_v29  ;;  %v1391_v30 = vmul.f32 0.015625, %v1009_v50  ;;  %v1000_v62 = vpop.xlane.xlu0 %999  ;;  %v1001_v29 = vsel %vm430_vm0, %v364_v34, 0.0  ;;  %v1094_v50 = vsel %vm430_vm0, %v395_v17, 0.0 }
 0x289   : > { %v2396_v13 = vsel %vm2044_vm10, %v2395_v39, %v2394_v24  ;;  %v1388_v12 = vmul.f32 0.015625, %v1000_v62  ;;  %v1139_v34 = vsel %vm430_vm0, %v410_v52, 0.0 }
 0x28a   : > { %v2398_v23 = vsel %vm4765_vm11, %v2397_v14, %v2396_v13  ;;  %v1551_v8 = vpack.c.bf16 %v1392_v21, %v1391_v30  ;;  %v1091_v21 = vsel %vm430_vm0, %v394_v1, 0.0  ;;  %vm4767_vm11 = vmmov %vm4766_vm7 }
 0x28b   : > { %v1549_v25 = vpack.c.bf16 %v1388_v12, %v1387_v22 }
 0x28c   : > { %1182 = vadd.xlane.f32.xlu2 %v1181_v36  ;;  %1137 = vadd.xlane.f32.xlu1 %v1136_v2  ;;  %v1939_v41 = vunpack.c.l.b16 %v1551_v8  ;;  %v1940_v19 = vunpack.c.h.b16 %v1551_v8 }
 0x28d   : > { %v1935_v40 = vunpack.c.l.b16 %v1549_v25  ;;  %v1936_v57 = vunpack.c.h.b16 %v1549_v25  ;;  %1134 = vadd.xlane.f32.xlu0 %v1133_v3  ;;  %v411_v25 = vld [vmem:[%s3023_s29 + $0x768] sm:$0xff] }
 0x28e   : > { %v2407_v12 = vperm.slane %v1939_v41, %v3443_v44  ;;  %v2408_v36 = vperm.slane %v1940_v19, %v3457_v38 }
 0x28f   : > { %v2399_v4 = vperm.slane %v1935_v40, %v3566_v0  ;;  %v2401_v63 = vperm.slane %v1936_v57, %v3574_v48  ;;  %v1015_v33 = vpop.xlane.xlu2 %1014  ;;  %v1060_v59 = vpop.xlane.xlu1 %1059 }
 0x290   : > { %v1408_v32 = vmul.f32 0.015625, %v1060_v59  ;;  %v1057_v5 = vpop.xlane.xlu0 %1056  ;;  %v1393_v6 = vmul.f32 0.015625, %v1015_v33 }
 0x291   : > { %v2400_v53 = vsel %vm2052_vm12, %v2399_v4, %v2398_v23  ;;  %v1407_v54 = vmul.f32 0.015625, %v1057_v5 }
 0x292   : > { %v4355_v10 = vsel %vm2056_vm13, %v2401_v63, %v2400_v53 }
 0x293   : > { %v1559_v9 = vpack.c.bf16 %v1408_v32, %v1407_v54  ;;  %v2409_v32 = vsel %vm2008_vm1, %v2408_v36, %v2407_v12 }
 0x294   : > { %1047 = vadd.xlane.f32.xlu2 %v1046_v27  ;;  %1044 = vadd.xlane.f32.xlu1 %v1043_v35  ;;  %v1142_v27 = vsel %vm430_vm0, %v411_v25, 0.0  ;;  %v397_v25 = vld [vmem:[%s3023_s29 + $0x6f8] sm:$0xff] }
 0x295   : > { %1185 = vadd.xlane.f32.xlu0 %v1184_v15  ;;  %v1955_v61 = vunpack.c.l.b16 %v1559_v9  ;;  %v1956_v45 = vunpack.c.h.b16 %v1559_v9 }
 0x297   : > { %v1066_v42 = vpop.xlane.xlu2 %1065  ;;  %v1063_v24 = vpop.xlane.xlu1 %1062  ;;  %v2438_v30 = vperm.slane %v1955_v61, %v3443_v44  ;;  %v2439_v62 = vperm.slane %v1956_v45, %v3457_v38  ;;  %v380_v45 = vld [vmem:[%s3023_s29 + $0x670] sm:$0xff] }
 0x298   : > { %v1410_v20 = vmul.f32 0.015625, %v1066_v42  ;;  %v1409_v22 = vmul.f32 0.015625, %v1063_v24  ;;  %v1018_v39 = vpop.xlane.xlu0 %1017  ;;  %v427_v42 = vld [vmem:[%s3023_s29 + $0x7e8] sm:$0xff] }
 0x299   : > { %v1394_v14 = vmul.f32 0.015625, %v1018_v39  ;;  %v2440_v16 = vsel %vm2008_vm1, %v2439_v62, %v2438_v30 }
 0x29a   : > { %v1560_v18 = vpack.c.bf16 %v1410_v20, %v1409_v22  ;;  %v426_v22 = vld [vmem:[%s3023_s29 + $0x7e0] sm:$0xff] }
 0x29b   : > { %v1552_v13 = vpack.c.bf16 %v1394_v14, %v1393_v6  ;;  %v1004_v6 = vsel %vm430_vm0, %v365_v11, 0.0  ;;  %v1187_v62 = vsel %vm430_vm0, %v426_v22, 0.0 }
 0x29c   : > { %v1957_v2 = vunpack.c.l.b16 %v1560_v18  ;;  %v1958_v23 = vunpack.c.h.b16 %v1560_v18  ;;  %1002 = vadd.xlane.f32.xlu2 %v1001_v29  ;;  %1095 = vadd.xlane.f32.xlu1 %v1094_v50  ;;  %v1049_v18 = vsel %vm430_vm0, %v380_v45, 0.0 }
 0x29d   : > { %v1941_v8 = vunpack.c.l.b16 %v1552_v13  ;;  %v1942_v3 = vunpack.c.h.b16 %v1552_v13  ;;  %1092 = vadd.xlane.f32.xlu0 %v1091_v21  ;;  %v1190_v21 = vsel %vm430_vm0, %v427_v42, 0.0  ;;  %v413_v42 = vld [vmem:[%s3023_s29 + $0x778] sm:$0xff] }
 0x29e   : > { %v2441_v40 = vperm.slane %v1957_v2, %v3463_v51  ;;  %v2443_v57 = vperm.slane %v1958_v23, %v3479_v7 }
 0x29f   : > { %v2410_v4 = vperm.slane %v1941_v8, %v3463_v51  ;;  %v2412_v63 = vperm.slane %v1942_v3, %v3479_v7  ;;  %v1153_v33 = vpop.xlane.xlu2 %1152  ;;  %v1108_v59 = vpop.xlane.xlu1 %1107 }
 0x2a0   : > { %v2442_v5 = vsel %vm2012_vm2, %v2441_v40, %v2440_v16  ;;  %v1424_v53 = vmul.f32 0.015625, %v1108_v59  ;;  %v1105_v54 = vpop.xlane.xlu0 %1104  ;;  %v1439_v24 = vmul.f32 0.015625, %v1153_v33  ;;  %v396_v40 = vld [vmem:[%s3023_s29 + $0x6f0] sm:$0xff] }
 0x2a1   : > { %v4380_v35 = vsel %vm4766_vm7, %v2443_v57, %v2442_v5  ;;  %v2411_v15 = vsel %vm2012_vm2, %v2410_v4, %v2409_v32  ;;  %v1423_v9 = vmul.f32 0.015625, %v1105_v54  ;;  %v381_v4 = vld [vmem:[%s3023_s29 + $0x678] sm:$0xff]  ;;  %v1100_v54 = vsel %vm430_vm0, %v397_v25, 0.0 }
 0x2a2   : > { %v4385_v17 = vsel %vm4767_vm11, %v2412_v63, %v2411_v15  ;;  %v1052_v15 = vsel %vm430_vm0, %v381_v4, 0.0  ;;  %vm4768_vm11 = vmmov %vm4766_vm7 }
 0x2a3   : > { %v1567_v61 = vpack.c.bf16 %v1424_v53, %v1423_v9 }
 0x2a4   : > { %1143 = vadd.xlane.f32.xlu2 %v1142_v27  ;;  %1140 = vadd.xlane.f32.xlu1 %v1139_v34  ;;  %v1097_v27 = vsel %vm430_vm0, %v396_v40, 0.0 }
 0x2a5   : > { %1005 = vadd.xlane.f32.xlu0 %v1004_v6  ;;  %v1971_v1 = vunpack.c.l.b16 %v1567_v61  ;;  %v1972_v41 = vunpack.c.h.b16 %v1567_v61 }
 0x2a7   : > { %v1114_v19 = vpop.xlane.xlu2 %1113  ;;  %v1111_v20 = vpop.xlane.xlu1 %1110  ;;  %v2469_v13 = vperm.slane %v1971_v1, %v3443_v44  ;;  %v2470_v12 = vperm.slane %v1972_v41, %v3457_v38 }
 0x2a8   : > { %v1426_v39 = vmul.f32 0.015625, %v1114_v19  ;;  %v1425_v14 = vmul.f32 0.015625, %v1111_v20  ;;  %v1156_v29 = vpop.xlane.xlu0 %1155 }
 0x2a9   : > { %v1440_v50 = vmul.f32 0.015625, %v1156_v29  ;;  %v2471_v57 = vsel %vm2008_vm1, %v2470_v12, %v2469_v13 }
 0x2aa   : > { %v1568_v30 = vpack.c.bf16 %v1426_v39, %v1425_v14  ;;  %v412_v39 = vld [vmem:[%s3023_s29 + $0x770] sm:$0xff] }
 0x2ab   : > { %v1575_v36 = vpack.c.bf16 %v1440_v50, %v1439_v24  ;;  %v428_v24 = vld [vmem:[%s3023_s29 + $0x7f0] sm:$0xff] }
 0x2ac   : > { %v1973_v2 = vunpack.c.l.b16 %v1568_v30  ;;  %v1974_v23 = vunpack.c.h.b16 %v1568_v30  ;;  %1050 = vadd.xlane.f32.xlu2 %v1049_v18  ;;  %1191 = vadd.xlane.f32.xlu1 %v1190_v21  ;;  %v1148_v21 = vsel %vm430_vm0, %v413_v42, 0.0  ;;  %v1193_v30 = vsel %vm430_vm0, %v428_v24, 0.0 }
 0x2ad   : > { %1188 = vadd.xlane.f32.xlu0 %v1187_v62  ;;  %v1987_v33 = vunpack.c.l.b16 %v1575_v36  ;;  %v1988_v59 = vunpack.c.h.b16 %v1575_v36 }
 0x2ae   : > { %v2472_v8 = vperm.slane %v1973_v2, %v3463_v51  ;;  %v2474_v3 = vperm.slane %v1974_v23, %v3479_v7 }
 0x2af   : > { %v1021_v52 = vpop.xlane.xlu2 %1020  ;;  %v1162_v16 = vpop.xlane.xlu1 %1161  ;;  %v2500_v34 = vperm.slane %v1987_v33, %v3443_v44  ;;  %v2501_v6 = vperm.slane %v1988_v59, %v3457_v38 }
 0x2b0   : > { %v2473_v63 = vsel %vm2012_vm2, %v2472_v8, %v2471_v57  ;;  %v1442_v11 = vmul.f32 0.015625, %v1162_v16  ;;  %v1159_v32 = vpop.xlane.xlu0 %1158  ;;  %v1395_v1 = vmul.f32 0.015625, %v1021_v52  ;;  %v429_v16 = vld [vmem:[%s3023_s29 + $0x7f8] sm:$0xff] }
 0x2b1   : > { %v4404_v5 = vsel %vm4766_vm7, %v2474_v3, %v2473_v63  ;;  %v1441_v53 = vmul.f32 0.015625, %v1159_v32  ;;  %v2502_v14 = vsel %vm2008_vm1, %v2501_v6, %v2500_v34 }
 0x2b3   : > { %v1576_v9 = vpack.c.bf16 %v1442_v11, %v1441_v53 }
 0x2b4   : > { %1101 = vadd.xlane.f32.xlu2 %v1100_v54  ;;  %1098 = vadd.xlane.f32.xlu1 %v1097_v27  ;;  %v1196_v54 = vsel %vm430_vm0, %v429_v16, 0.0 }
 0x2b5   : > { %v1989_v61 = vunpack.c.l.b16 %v1576_v9  ;;  %v1990_v45 = vunpack.c.h.b16 %v1576_v9  ;;  %1053 = vadd.xlane.f32.xlu0 %v1052_v15 }
 0x2b7   : > { %v2503_v41 = vperm.slane %v1989_v61, %v3463_v51  ;;  %v2505_v19 = vperm.slane %v1990_v45, %v3479_v7  ;;  %v1072_v20 = vpop.xlane.xlu2 %1071  ;;  %v1069_v22 = vpop.xlane.xlu1 %1068  ;;  %v1145_v7 = vsel %vm430_vm0, %v412_v39, 0.0  ;;  %vm4769_vm0 = vcmask 523712  }
 0x2b8   : > { %v1412_v44 = vmul.f32 0.015625, %v1072_v20  ;;  %v1411_v29 = vmul.f32 0.015625, %v1069_v22  ;;  %v1024_v38 = vpop.xlane.xlu0 %1023  ;;  %vm4770_vm1 = vmmov %vm4769_vm0 }
 0x2b9   : > { %v2504_v50 = vsel %vm2012_vm2, %v2503_v41, %v2502_v14  ;;  %v1396_v18 = vmul.f32 0.015625, %v1024_v38  ;;  %vm4771_vm2 = vmmov %vm4769_vm0 }
 0x2ba   : > { %v2506_v62 = vsel %vm4768_vm11, %v2505_v19, %v2504_v50  ;;  %v1561_v51 = vpack.c.bf16 %v1412_v44, %v1411_v29 }
 0x2bb   : > { %v1553_v13 = vpack.c.bf16 %v1396_v18, %v1395_v1 }
 0x2bc   : > { %v1959_v12 = vunpack.c.l.b16 %v1561_v51  ;;  %v1960_v36 = vunpack.c.h.b16 %v1561_v51  ;;  %1149 = vadd.xlane.f32.xlu1 %v1148_v21  ;;  %1194 = vadd.xlane.f32.xlu2 %v1193_v30 }
 0x2bd   : > { %v1943_v2 = vunpack.c.l.b16 %v1553_v13  ;;  %v1944_v23 = vunpack.c.h.b16 %v1553_v13  ;;  %1146 = vadd.xlane.f32.xlu0 %v1145_v7 }
 0x2be   : > { %v2445_v8 = vperm.slane %v1959_v12, %v3489_v37  ;;  %v2447_v3 = vperm.slane %v1960_v36, %v3493_v31 }
 0x2bf   : > { %v2414_v25 = vperm.slane %v1943_v2, %v3489_v37  ;;  %v2416_v40 = vperm.slane %v1944_v23, %v3493_v31  ;;  %v1165_v57 = vpop.xlane.xlu2 %1164  ;;  %v1120_v52 = vpop.xlane.xlu1 %1119 }
 0x2c0   : > { %v2446_v4 = vsel %vm2020_vm4, %v2445_v8, %v4380_v35  ;;  %v1428_v63 = vmul.f32 0.015625, %v1120_v52  ;;  %v1117_v33 = vpop.xlane.xlu0 %1116  ;;  %v1443_v34 = vmul.f32 0.015625, %v1165_v57 }
 0x2c1   : > { %v2448_v59 = vsel %vm2024_vm5, %v2447_v3, %v2446_v4  ;;  %v2415_v11 = vsel %vm2020_vm4, %v2414_v25, %v4385_v17  ;;  %v1427_v32 = vmul.f32 0.015625, %v1117_v33 }
 0x2c2   : > { %v2417_v53 = vsel %vm2024_vm5, %v2416_v40, %v2415_v11 }
 0x2c3   : > { %v1569_v27 = vpack.c.bf16 %v1428_v63, %v1427_v32 }
 0x2c5   : > { %v1975_v15 = vunpack.c.l.b16 %v1569_v27  ;;  %v1976_v9 = vunpack.c.h.b16 %v1569_v27  ;;  %1197 = vadd.xlane.f32.xlu0 %v1196_v54 }
 0x2c7   : > { %v2476_v6 = vperm.slane %v1975_v15, %v3489_v37  ;;  %v2478_v35 = vperm.slane %v1976_v9, %v3493_v31  ;;  %v1030_v61 = vpop.xlane.xlu2 %1029  ;;  %v1027_v45 = vpop.xlane.xlu1 %1026 }
 0x2c8   : > { %v1398_v42 = vmul.f32 0.015625, %v1030_v61  ;;  %v1397_v24 = vmul.f32 0.015625, %v1027_v45  ;;  %v1168_v1 = vpop.xlane.xlu0 %1167 }
 0x2c9   : > { %v2477_v17 = vsel %vm2020_vm4, %v2476_v6, %v4404_v5  ;;  %v1444_v41 = vmul.f32 0.015625, %v1168_v1 }
 0x2ca   : > { %v2479_v19 = vsel %vm2024_vm5, %v2478_v35, %v2477_v17  ;;  %v1554_v20 = vpack.c.bf16 %v1398_v42, %v1397_v24 }
 0x2cb   : > { %v1577_v22 = vpack.c.bf16 %v1444_v41, %v1443_v34 }
 0x2cc   : > { %v1945_v39 = vunpack.c.l.b16 %v1554_v20  ;;  %v1946_v14 = vunpack.c.h.b16 %v1554_v20 }
 0x2cd   : > { %v1991_v44 = vunpack.c.l.b16 %v1577_v22  ;;  %v1992_v29 = vunpack.c.h.b16 %v1577_v22 }
 0x2ce   : > { %v2418_v38 = vperm.slane %v1945_v39, %v3499_v26  ;;  %v2420_v50 = vperm.slane %v1946_v14, %v3509_v47 }
 0x2cf   : > { %v2507_v18 = vperm.slane %v1991_v44, %v3489_v37  ;;  %v2509_v21 = vperm.slane %v1992_v29, %v3493_v31  ;;  %v1123_v30 = vpop.xlane.xlu2 %1122  ;;  %v1078_v51 = vpop.xlane.xlu1 %1077 }
 0x2d0   : > { %v2419_v5 = vsel %vm2028_vm6, %v2418_v38, %v2417_v53  ;;  %v1414_v7 = vmul.f32 0.015625, %v1078_v51  ;;  %v1075_v13 = vpop.xlane.xlu0 %1074  ;;  %v1429_v40 = vmul.f32 0.015625, %v1123_v30 }
 0x2d1   : > { %v2421_v12 = vsel %vm4769_vm0, %v2420_v50, %v2419_v5  ;;  %v2508_v36 = vsel %vm2020_vm4, %v2507_v18, %v2506_v62  ;;  %v1413_v2 = vmul.f32 0.015625, %v1075_v13  ;;  %vm4772_vm4 = vmmov %vm4769_vm0 }
 0x2d2   : > { %v2510_v23 = vsel %vm2024_vm5, %v2509_v21, %v2508_v36  ;;  %vm4773_vm5 = vcmask 786112  }
 0x2d3   : > { %v1562_v8 = vpack.c.bf16 %v1414_v7, %v1413_v2  ;;  %vm4776_vm7 = vmmov %vm4773_vm5 }
 0x2d5   : > { %v1961_v3 = vunpack.c.l.b16 %v1562_v8  ;;  %v1962_v25 = vunpack.c.h.b16 %v1562_v8 }
 0x2d7   : > { %v2449_v37 = vperm.slane %v1961_v3, %v3499_v26  ;;  %v2451_v31 = vperm.slane %v1962_v25, %v3509_v47  ;;  %v1174_v57 = vpop.xlane.xlu2 %1173  ;;  %v1171_v52 = vpop.xlane.xlu1 %1170 }
 0x2d8   : > { %v1446_v16 = vmul.f32 0.015625, %v1174_v57  ;;  %v1445_v4 = vmul.f32 0.015625, %v1171_v52  ;;  %v1126_v63 = vpop.xlane.xlu0 %1125 }
 0x2d9   : > { %v2450_v33 = vsel %vm2028_vm6, %v2449_v37, %v2448_v59  ;;  %v1430_v11 = vmul.f32 0.015625, %v1126_v63 }
 0x2da   : > { %v2452_v62 = vsel %vm4770_vm1, %v2451_v31, %v2450_v33  ;;  %v1578_v32 = vpack.c.bf16 %v1446_v16, %v1445_v4 }
 0x2db   : > { %v1570_v53 = vpack.c.bf16 %v1430_v11, %v1429_v40 }
 0x2dc   : > { %v1993_v54 = vunpack.c.l.b16 %v1578_v32  ;;  %v1994_v27 = vunpack.c.h.b16 %v1578_v32 }
 0x2dd   : > { %v1977_v15 = vunpack.c.l.b16 %v1570_v53  ;;  %v1978_v9 = vunpack.c.h.b16 %v1570_v53 }
 0x2de   : > { %v2511_v34 = vperm.slane %v1993_v54, %v3499_v26  ;;  %v2513_v6 = vperm.slane %v1994_v27, %v3509_v47 }
 0x2df   : > { %v2480_v35 = vperm.slane %v1977_v15, %v3499_v26  ;;  %v2482_v61 = vperm.slane %v1978_v9, %v3509_v47  ;;  %v1081_v45 = vpop.xlane.xlu2 %1080  ;;  %v1036_v42 = vpop.xlane.xlu1 %1035 }
 0x2e0   : > { %v2512_v59 = vsel %vm2028_vm6, %v2511_v34, %v2510_v23  ;;  %v1400_v24 = vmul.f32 0.015625, %v1036_v42  ;;  %v1033_v1 = vpop.xlane.xlu0 %1032  ;;  %v1415_v29 = vmul.f32 0.015625, %v1081_v45 }
 0x2e1   : > { %v2514_v17 = vsel %vm4771_vm2, %v2513_v6, %v2512_v59  ;;  %v2481_v41 = vsel %vm2028_vm6, %v2480_v35, %v2479_v19  ;;  %v1399_v20 = vmul.f32 0.015625, %v1033_v1  ;;  %vm4774_vm6 = vmmov %vm4773_vm5 }
 0x2e2   : > { %v2483_v22 = vsel %vm4772_vm4, %v2482_v61, %v2481_v41 }
 0x2e3   : > { %v1555_v39 = vpack.c.bf16 %v1400_v24, %v1399_v20  ;;  %v2846_v24 = vld [vmem:[%s4635_s1 + $0x78] sm:$0xff]  ;;  %v2835_v20 = vld [vmem:[%s4635_s1 + $0x20] sm:$0xff] }
 0x2e4   : > { %2665 = vmatpush.bf16.msra.mxu1 %v2846_v24 }
 0x2e5   : > { %v1947_v14 = vunpack.c.l.b16 %v1555_v39  ;;  %v1948_v44 = vunpack.c.h.b16 %v1555_v39  ;;  %v2834_v39 = vld [vmem:[%s4635_s1 + $0x18] sm:$0xff] }
 0x2e7   : > { %v2422_v26 = vperm.slane %v1947_v14, %v3523_v49  ;;  %v2424_v47 = vperm.slane %v1948_v44, %v3535_v58  ;;  %v1132_v38 = vpop.xlane.xlu2 %1131  ;;  %v1129_v50 = vpop.xlane.xlu1 %1128  ;;  %v2844_v14 = vld [vmem:[%s4635_s1 + $0x68] sm:$0xff] }
 0x2e8   : > { %v1432_v18 = vmul.f32 0.015625, %v1132_v38  ;;  %v1431_v21 = vmul.f32 0.015625, %v1129_v50  ;;  %v1084_v30 = vpop.xlane.xlu0 %1083  ;;  %v2843_v38 = vld [vmem:[%s4635_s1 + $0x60] sm:$0xff] }
 0x2e9   : > { %v2423_v51 = vsel %vm2036_vm8, %v2422_v26, %v2421_v12  ;;  %v1416_v5 = vmul.f32 0.015625, %v1084_v30  ;;  %v2842_v30 = vld [vmem:[%s4635_s1 + $0x58] sm:$0xff] }
 0x2ea   : > { %v4463_v19 = vsel %vm2040_vm9, %v2424_v47, %v2423_v51  ;;  %v1571_v7 = vpack.c.bf16 %v1432_v18, %v1431_v21  ;;  %v2833_v47 = vld [vmem:[%s4635_s1 + $0x10] sm:$0xff]  ;;  %v2832_v21 = vld [vmem:[%s4635_s1 + $0x8] sm:$0xff] }
 0x2eb   : > { %v1563_v13 = vpack.c.bf16 %v1416_v5, %v1415_v29 }
 0x2ec   : > { %v1979_v36 = vunpack.c.l.b16 %v1571_v7  ;;  %v1980_v2 = vunpack.c.h.b16 %v1571_v7 }
 0x2ed   : > { %v1963_v23 = vunpack.c.l.b16 %v1563_v13  ;;  %v1964_v8 = vunpack.c.h.b16 %v1563_v13 }
 0x2ee   : > { %v2484_v3 = vperm.slane %v1979_v36, %v3523_v49  ;;  %v2486_v25 = vperm.slane %v1980_v2, %v3535_v58 }
 0x2ef   : > { %v2453_v40 = vperm.slane %v1963_v23, %v3523_v49  ;;  %v2455_v37 = vperm.slane %v1964_v8, %v3535_v58  ;;  %v1039_v31 = vpop.xlane.xlu2 %1038  ;;  %v1180_v12 = vpop.xlane.xlu1 %1179 }
 0x2f0   : > { %v2485_v57 = vsel %vm2036_vm8, %v2484_v3, %v2483_v22  ;;  %v1448_v52 = vmul.f32 0.015625, %v1180_v12  ;;  %v1177_v16 = vpop.xlane.xlu0 %1176  ;;  %v2845_v22 = vld [vmem:[%s4635_s1 + $0x70] sm:$0xff]  ;;  %v1401_v51 = vmul.f32 0.015625, %v1039_v31  ;;  %v2831_v3 = vld [vmem:[%s4635_s1] sm:$0xff] }
 0x2f1   : > { %v4471_v4 = vsel %vm2040_vm9, %v2486_v25, %v2485_v57  ;;  %v2454_v63 = vsel %vm2036_vm8, %v2453_v40, %v2452_v62  ;;  %v1447_v33 = vmul.f32 0.015625, %v1177_v16  ;;  %v2838_v62 = vld [vmem:[%s4635_s1 + $0x38] sm:$0xff]  ;;  %2666 = vmatpush.bf16.msra.mxu1 %v2845_v22  ;;  %v2841_v25 = vld [vmem:[%s4635_s1 + $0x50] sm:$0xff] }
 0x2f2   : > { %v4475_v11 = vsel %vm2040_vm9, %v2455_v37, %v2454_v63  ;;  %2652 = vmatpush.bf16.msra.mxu0 %v2838_v62 }
 0x2f3   : > { %v1579_v32 = vpack.c.bf16 %v1448_v52, %v1447_v33 }
 0x2f5   : > { %v1995_v53 = vunpack.c.l.b16 %v1579_v32  ;;  %v1996_v54 = vunpack.c.h.b16 %v1579_v32  ;;  %2667 = vmatpush.bf16.msra.mxu1 %v2844_v14 }
 0x2f7   : > { %v2515_v27 = vperm.slane %v1995_v53, %v3523_v49  ;;  %v2517_v15 = vperm.slane %v1996_v54, %v3535_v58  ;;  %v1090_v9 = vpop.xlane.xlu2 %1089  ;;  %v1087_v34 = vpop.xlane.xlu1 %1086  ;;  %v2837_v49 = vld [vmem:[%s4635_s1 + $0x30] sm:$0xff]  ;;  %v2836_v58 = vld [vmem:[%s4635_s1 + $0x28] sm:$0xff] }
 0x2f8   : > { %v1042_v6 = vpop.xlane.xlu0 %1041  ;;  %2653 = vmatpush.bf16.msra.mxu0 %v2837_v49  ;;  %v1418_v50 = vmul.f32 0.015625, %v1090_v9  ;;  %v1417_v18 = vmul.f32 0.015625, %v1087_v34  ;;  %v2840_v54 = vld [vmem:[%s4635_s1 + $0x48] sm:$0xff] }
 0x2f9   : > { %v2516_v35 = vsel %vm2036_vm8, %v2515_v27, %v2514_v17  ;;  %2668 = vmatpush.bf16.msra.mxu1 %v2843_v38  ;;  %v1402_v5 = vmul.f32 0.015625, %v1042_v6  ;;  %vm2541_vm8 = vcmask 1046534  }
 0x2fa   : > { %v4481_v61 = vsel %vm2040_vm9, %v2517_v15, %v2516_v35  ;;  %v1564_v23 = vpack.c.bf16 %v1418_v50, %v1417_v18  ;;  %vm4775_vm9 = vmmov %vm4773_vm5 }
 0x2fb   : > { %v1556_v40 = vpack.c.bf16 %v1402_v5, %v1401_v51 }
 0x2fc   : > { %2654 = vmatpush.bf16.msra.mxu0 %v2836_v58  ;;  %v1965_v33 = vunpack.c.l.b16 %v1564_v23  ;;  %v1966_v58 = vunpack.c.h.b16 %v1564_v23 }
 0x2fd   : > { %2669 = vmatpush.bf16.msra.mxu1 %v2842_v30  ;;  %v1949_v27 = vunpack.c.l.b16 %v1556_v40 }
 0x2fe   : > { %v2457_v24 = vperm.slane %v1965_v33, %v3529_v56  ;;  %v2459_v50 = vperm.slane %v1966_v58, %v3532_v46 }
 0x2ff   : > { %v4486_v45 = vpop.xlane.xlu2 %1182  ;;  %v1138_v42 = vpop.xlane.xlu1 %1137 }
 0x300   : > { %v1135_v59 = vpop.xlane.xlu0 %1134  ;;  %2655 = vmatpush.bf16.msra.mxu0 %v2835_v20  ;;  %v1434_v37 = vmul.f32 0.015625, %v1138_v42  ;;  %v2839_v42 = vld [vmem:[%s4635_s1 + $0x40] sm:$0xff]  ;;  %v2426_v20 = vperm.slane %v1949_v27, %v3529_v56  ;;  %v2458_v38 = vsel %vm2044_vm10, %v2457_v24, %v4475_v11  ;;  %v1449_v18 = vmul.f32 0.015625, %v4486_v45 }
 0x301   : > { %v1433_v31 = vmul.f32 0.015625, %v1135_v59  ;;  %2670 = vmatpush.bf16.msra.mxu1 %v2841_v25 }
 0x303   : > { %v1572_v15 = vpack.c.bf16 %v1434_v37, %v1433_v31 }
 0x304   : > { %2656 = vmatpush.bf16.msra.mxu0 %v2834_v39 }
 0x305   : > { %2671 = vmatpush.bf16.msra.mxu1 %v2840_v54  ;;  %v1981_v39 = vunpack.c.l.b16 %v1572_v15  ;;  %v1982_v30 = vunpack.c.h.b16 %v1572_v15 }
 0x307   : > { %v1048_v1 = vpop.xlane.xlu2 %1047  ;;  %v1045_v17 = vpop.xlane.xlu1 %1044 }
 0x308   : > { %v4497_v41 = vpop.xlane.xlu0 %1185  ;;  %2657 = vmatpush.bf16.msra.mxu0 %v2833_v47  ;;  %v1404_v12 = vmul.f32 0.015625, %v1048_v1  ;;  %v1403_v57 = vmul.f32 0.015625, %v1045_v17  ;;  %v1950_v1 = vunpack.c.h.b16 %v1556_v40 }
 0x309   : > { %2672 = vmatpush.bf16.msra.mxu1 %v2839_v42  ;;  %v1450_v5 = vmul.f32 0.015625, %v4497_v41  ;;  %v2490_v41 = vperm.slane %v1982_v30, %v3532_v46 }
 0x30a   : > { %v1557_v9 = vpack.c.bf16 %v1404_v12, %v1403_v57 }
 0x30b   : > { %v1580_v12 = vpack.c.bf16 %v1450_v5, %v1449_v18 }
 0x30c   : > { %2658 = vmatpush.bf16.msra.mxu0 %v2832_v21  ;;  %v1951_v14 = vunpack.c.l.b16 %v1557_v9  ;;  %v2427_v21 = vsel %vm2044_vm10, %v2426_v20, %v4463_v19  ;;  %v1952_v51 = vunpack.c.h.b16 %v1557_v9  ;;  %v2460_v19 = vsel %vm4773_vm5, %v2459_v50, %v2458_v38 }
 0x30d   : > { %v1998_v30 = vunpack.c.h.b16 %v1580_v12 }
 0x30e   : > { %v2432_v31 = vperm.slane %v1952_v51, %v3574_v48 }
 0x30f   : > { %v1003_v44 = vpop.xlane.xlu2 %1002  ;;  %v1096_v29 = vpop.xlane.xlu1 %1095 }
 0x310   : > { %v1093_v26 = vpop.xlane.xlu0 %1092  ;;  %v1389_v7 = vmul.f32 0.015625, %v1003_v44  ;;  %2659 = vmatpush.bf16.msra.mxu0 %v2831_v3  ;;  %v1420_v16 = vmul.f32 0.015625, %v1096_v29 }
 0x311   : > { %v1419_v63 = vmul.f32 0.015625, %v1093_v26 }
 0x313   : > { %v1565_v59 = vpack.c.bf16 %v1420_v16, %v1419_v63 }
 0x315   : > { %v1967_v29 = vunpack.c.l.b16 %v1565_v59 }
 0x317   : > { %v1144_v13 = vpop.xlane.xlu2 %1143  ;;  %v1141_v36 = vpop.xlane.xlu1 %1140  ;;  %v2461_v23 = vperm.slane %v1967_v29, %v3566_v0 }
 0x318   : > { %v1006_v2 = vpop.xlane.xlu0 %1005  ;;  %v1436_v26 = vmul.f32 0.015625, %v1144_v13  ;;  %v1435_v47 = vmul.f32 0.015625, %v1141_v36  ;;  %v1968_v13 = vunpack.c.h.b16 %v1565_v59 }
 0x319   : > { %v1390_v8 = vmul.f32 0.015625, %v1006_v2 }
 0x31a   : > { %v2463_v63 = vperm.slane %v1968_v13, %v3574_v48 }
 0x31b   : > { %v1550_v52 = vpack.c.bf16 %v1390_v8, %v1389_v7  ;;  %v2430_v7 = vperm.slane %v1951_v14, %v3566_v0  ;;  %v1573_v8 = vpack.c.bf16 %v1436_v26, %v1435_v47 }
 0x31d   : > { %v1937_v32 = vunpack.c.l.b16 %v1550_v52  ;;  %v1938_v53 = vunpack.c.h.b16 %v1550_v52  ;;  %v1984_v20 = vunpack.c.h.b16 %v1573_v8 }
 0x31f   : > { %v2403_v34 = vperm.slane %v1937_v32, %v3577_v28  ;;  %v2405_v6 = vperm.slane %v1938_v53, %v3603_v43  ;;  %v1051_v35 = vpop.xlane.xlu2 %1050  ;;  %v1192_v62 = vpop.xlane.xlu1 %1191  ;;  %v2462_v32 = vsel %vm2052_vm12, %v2461_v23, %v2460_v19  ;;  %v1983_v53 = vunpack.c.l.b16 %v1573_v8 }
 0x320   : > { %v1189_v49 = vpop.xlane.xlu0 %1188  ;;  %v1405_v36 = vmul.f32 0.015625, %v1051_v35  ;;  %v1452_v15 = vmul.f32 0.015625, %v1192_v62  ;;  %v1997_v35 = vunpack.c.l.b16 %v1580_v12  ;;  %v2494_v5 = vperm.slane %v1984_v20, %v3574_v48 }
 0x321   : > { %v2404_v17 = vsel %vm2060_vm14, %v2403_v34, %v4355_v10  ;;  %v2428_v10 = vperm.slane %v1950_v1, %v3532_v46  ;;  %v1451_v9 = vmul.f32 0.015625, %v1189_v49  ;;  %v2492_v62 = vperm.slane %v1983_v53, %v3566_v0 }
 0x322   : > { %v2406_v22 = vsel %vm2064_vm15, %v2405_v6, %v2404_v17  ;;  %v2464_v17 = vsel %vm2056_vm13, %v2463_v63, %v2462_v32  ;;  %v2519_v51 = vperm.slane %v1997_v35, %v3529_v56 }
 0x323   : > { %v2549_v44 = vsel %vm2539_vm3, %v2406_v22, %v4234_v60  ;;  %v2488_v60 = vperm.slane %v1981_v39, %v3529_v56  ;;  %v2429_v40 = vsel %vm4774_vm6, %v2428_v10, %v2427_v21  ;;  %v1581_v14 = vpack.c.bf16 %v1452_v15, %v1451_v9  ;;  %v2886_v15 = vld [vmem:[%s4636_s2] ss:$0 sm:$0xff] }
 0x324   : > { %v2431_v16 = vsel %vm2052_vm12, %v2430_v7, %v2429_v40  ;;  %vm2543_vm3 = vcmask 1047559   ;;  %v2520_v56 = vsel %vm2044_vm10, %v2519_v51, %v4481_v61 }
 0x325   : > { %v2489_v52 = vsel %vm2044_vm10, %v2488_v60, %v4471_v4  ;;  %v2433_v4 = vsel %vm2056_vm13, %v2432_v31, %v2431_v16  ;;  %v1999_v7 = vunpack.c.l.b16 %v1581_v14  ;;  %v2000_v8 = vunpack.c.h.b16 %v1581_v14 }
 0x326   : > { %v2491_v21 = vsel %vm4775_vm9, %v2490_v41, %v2489_v52 }
 0x327   : > { %v1102_v11 = vpop.xlane.xlu2 %1101  ;;  %v1099_v2 = vpop.xlane.xlu1 %1098  ;;  %v2525_v12 = vperm.slane %v2000_v8, %v3574_v48 }
 0x328   : > { %v1422_v3 = vmul.f32 0.015625, %v1102_v11  ;;  %v1421_v45 = vmul.f32 0.015625, %v1099_v2  ;;  %v1054_v25 = vpop.xlane.xlu0 %1053  ;;  %v2493_v11 = vsel %vm2052_vm12, %v2492_v62, %v2491_v21 }
 0x329   : > { %v1406_v37 = vmul.f32 0.015625, %v1054_v25  ;;  %v2523_v25 = vperm.slane %v1999_v7, %v3566_v0 }
 0x32a   : > { %v1566_v57 = vpack.c.bf16 %v1422_v3, %v1421_v45  ;;  %v2495_v45 = vsel %vm2056_vm13, %v2494_v5, %v2493_v11 }
 0x32b   : > { %v1558_v33 = vpack.c.bf16 %v1406_v37, %v1405_v36 }
 0x32c   : > { %v1969_v54 = vunpack.c.l.b16 %v1566_v57  ;;  %v1970_v27 = vunpack.c.h.b16 %v1566_v57 }
 0x32d   : > { %v1953_v34 = vunpack.c.l.b16 %v1558_v33  ;;  %v1954_v6 = vunpack.c.h.b16 %v1558_v33 }
 0x32e   : > { %v2465_v42 = vperm.slane %v1969_v54, %v3577_v28  ;;  %v2467_v59 = vperm.slane %v1970_v27, %v3603_v43 }
 0x32f   : > { %v2434_v58 = vperm.slane %v1953_v34, %v3577_v28  ;;  %v2436_v24 = vperm.slane %v1954_v6, %v3603_v43  ;;  %v1150_v1 = vpop.xlane.xlu1 %1149  ;;  %v1195_v60 = vpop.xlane.xlu2 %1194 }
 0x330   : > { %v1438_v49 = vmul.f32 0.015625, %v1150_v1  ;;  %v1147_v22 = vpop.xlane.xlu0 %1146  ;;  %v2466_v39 = vsel %vm2060_vm14, %v2465_v42, %v2464_v17  ;;  %v1453_v23 = vmul.f32 0.015625, %v1195_v60 }
 0x331   : > { %v1437_v29 = vmul.f32 0.015625, %v1147_v22  ;;  %v2435_v26 = vsel %vm2060_vm14, %v2434_v58, %v2433_v4  ;;  %v2468_v47 = vsel %vm2064_vm15, %v2467_v59, %v2466_v39 }
 0x332   : > { %v2437_v38 = vsel %vm2064_vm15, %v2436_v24, %v2435_v26  ;;  %v2550_v50 = vsel %vm2541_vm8, %v2468_v47, %v2549_v44 }
 0x333   : > { %v1574_v10 = vpack.c.bf16 %v1438_v49, %v1437_v29  ;;  %v2542_v18 = vsel %vm2541_vm8, %v2437_v38, %v4297_v55  ;;  %v2521_v55 = vperm.slane %v1998_v30, %v3532_v46 }
 0x335   : > { %v1985_v13 = vunpack.c.l.b16 %v1574_v10  ;;  %v1986_v36 = vunpack.c.h.b16 %v1574_v10  ;;  %v2522_v46 = vsel %vm4776_vm7, %v2521_v55, %v2520_v56 }
 0x336   : > { %v2524_v61 = vsel %vm2052_vm12, %v2523_v25, %v2522_v46 }
 0x337   : > { %v2496_v2 = vperm.slane %v1985_v13, %v3577_v28  ;;  %v2498_v44 = vperm.slane %v1986_v36, %v3603_v43  ;;  %v2526_v33 = vsel %vm2056_vm13, %v2525_v12, %v2524_v61 }
 0x338   : > { %v1198_v3 = vpop.xlane.xlu0 %1197 }
 0x339   : > { %v1454_v19 = vmul.f32 0.015625, %v1198_v3  ;;  %v2497_v40 = vsel %vm2060_vm14, %v2496_v2, %v2495_v45 }
 0x33a   : > { %v2499_v37 = vsel %vm2064_vm15, %v2498_v44, %v2497_v40 }
 0x33b   : > { %v1582_v41 = vpack.c.bf16 %v1454_v19, %v1453_v23  ;;  %v2544_v31 = vsel %vm2543_vm3, %v2499_v37, %v2542_v18 }
 0x33c   : > { %v2552_v57 = vpack.c.b16 %v2544_v31, %v2544_v31 }
 0x33d   : > { %v2001_v52 = vunpack.c.l.b16 %v1582_v41  ;;  %v2002_v16 = vunpack.c.h.b16 %v1582_v41 }
 0x33e   : > { %2660 = vmatmul.bf16.vlgmr.msra.gmra.mxu0 %v2552_v57 }
 0x33f   : > { %v2527_v0 = vperm.slane %v2001_v52, %v3577_v28  ;;  %v2529_v63 = vperm.slane %v2002_v16, %v3603_v43 }
 0x341   : > { %v2528_v32 = vsel %vm2060_vm14, %v2527_v0, %v2526_v33 }
 0x342   : > { %v2530_v53 = vsel %vm2064_vm15, %v2529_v63, %v2528_v32 }
 0x343   : > { %v2551_v54 = vsel %vm2543_vm3, %v2530_v53, %v2550_v50 }
 0x344   : > { %v2553_v48 = vpack.c.b16 %v2551_v54, %v2551_v54 }
 0x346   : > { %2673 = vmatmul.bf16.vlgmr.msra.gmra.mxu1 %v2553_v48 }
 0x3bb   : > { %v2661_v27 = vpop.f32.mrf.mxu0 }
 0x3bc   : > { %v2662_v28 = vadd.f32 %v2886_v15, %v2661_v27 }
 0x3c3   : > { %v2663_v43 = vpop.f32.mrf.mxu0  ;;  %v2674_v9 = vpop.f32.mrf.mxu1 }
 0x3c4   : > { %v2675_v34 = vadd.f32 %v2674_v9, %v2662_v28 }
 0x3c6   : > { %2678 = vst [vmem:[%s166_s6] sm:$0xff] %v2675_v34 }
 0x3c7   : > { %2914 = shalt.err (!%p2911_p3)
}
 0x3c8   : > { %2847 = dma.vmem_to_hbm [thread:$0]  (%p3006_p5), %s2693_s7, 128, %s2695_s8, %s2680_s9  }
 0x3cb   : > { %v2676_v6 = vpop.f32.mrf.mxu1 }
 0x3cc PF: > { %p2853_p4 = scmp.ge.s32.totalorder %s2949_s15, 2  ;;  %s2706_s25 = sand.u32 1, %s2937_s12  }
 0x3cd   : > { %s2707_s26 = scalar_lea.sflag [#allocation3], %s2706_s25 }
 0x3ce   : > { %p2850_p7 = pnand %p2853_p4, %p3010_p6 }
 0x3d0   : > { %p2851_p8 = pneg %p2850_p7 }
 0x3d2   : > { %2932 = dma.done.wait (%p2851_p8), %s2707_s26, 128  }
 0x3d3   : > { %2934 = vsyncadd (%p2851_p8), %s2707_s26, 4294967168  ;;  %p13_p9 = scmp.ge.s32.totalorder %s2994_s18, 4   ;;  %s4777_s12 = smov %s2941_s13 }
 0x3d4   : > { %s4778_s13 = smov %s2945_s14  ;;  %s4779_s14 = smov %s3004_s21 }
 0x3d5   : > { %s4780_s15 = smov %s2994_s18  ;;  %15 = sbr.rel (!%p13_p9) target bundleno = 3 (0x3), region = 67 }
 0x3da   :  { %2713 = vsyncpa [#allocation3], 1 }
 0x3db   :  { %2715 = vsyncpa [#allocation3 + $0x1], 1 }

// kernel: _forward.1
= control target key start
LH: loop header
LB: loop body
LE: loop exit
PB: predicated region body
PF: predicated region fallthrough
CT: control target
= control target key end

     0   :  { %8 = vsyncpa [#allocation3], 0  ;;  %s4634_s0 = inlined_call_operand.vmem [shape: f32[16,256,64], index: 0, kind: input, shape index: {}]   ;;  %s4635_s1 = inlined_call_operand.vmem [shape: bf16[256,128], index: 1, kind: input, shape index: {}]   ;;  %s4636_s2 = inlined_call_operand.vmem [shape: f32[1,128], index: 2, kind: input, shape index: {}]   ;;  %s4637_s3 = inlined_call_operand.hbm [shape: f32[16,128], index: 3, kind: output, shape index: {}]  }
   0x1   :  { %10 = vsyncpa [#allocation3 + $0x1], 0  ;;  %s2971_s12 = smov 0   ;;  %s2973_s13 = smov 0  }
   0x2   :  { %s2975_s14 = smov 0   ;;  %s2977_s15 = smov 0  }
   0x3 LB: > { %s2753_s16 = sadd.s32 4294967295, %s2949_s15   ;;  %s2754_s17 = sadd.s32 4294967294, %s2949_s15   ;;  %s2949_s15 = sphi %s2977_s15, %s4780_s15   ;;  %s2945_s14 = sphi %s2975_s14, %s4779_s14   ;;  %s2941_s13 = sphi %s2973_s13, %s4778_s13   ;;  %s2937_s12 = sphi %s2971_s12, %s4777_s12  }
   0x4   : > { %s2994_s18 = sadd.s32 1, %s2949_s15   ;;  %s91_s19 = sadd.s32 1, %s2945_s14 }
   0x5   : > { %s88_s20 = ssub.s32 %s2949_s15, %s2994_s18  ;;  %p101_p0 = scmp.ne.s32.totalorder %s2945_s14, %s2941_s13 }
   0x6   : > { %p89_p1 = scmp.eq.s32.totalorder %s88_s20, 0  ;;  %p102_p2 = scmp.eq.s32.totalorder %s2753_s16, 1 }
   0x7   : > { %p107_p3 = scmp.ne.s32.totalorder %s2941_s13, %s2937_s12  ;;  %p108_p4 = scmp.eq.s32.totalorder %s2754_s17, 1 }
   0x8   : > { %s3004_s21 = scalar_select %p89_p1, %s2945_s14, %s91_s19  }
   0x9   : > { %p3006_p5 = por %p102_p2, %p101_p0  ;;  %p3010_p6 = por %p108_p4, %p107_p3 }
   0xa   : > { %p2757_p7 = scmp.ge.s32.totalorder %s2949_s15, 1  ;;  %p142_p8 = scmp.lt.s32.totalorder %s2949_s15, 3 }
   0xc   : > { %p143_p9 = pnand %p2757_p7, %p142_p8 }
   0xe   : > { %146 = sbr.rel (%p143_p9) target bundleno = 972 (0x3cc), region = 32 }
  0x13   : > { %s3016_s24 = sshll.u32 %s2753_s16, 3  ;;  %vm430_vm0 = vcmask 523264   ;;  %vm2008_vm1 = vcmask 130112   ;;  %vm2012_vm2 = vcmask 195712   ;;  %vm4638_vm3 = vcmask 261312   ;;  %s2907_s17 = scalar_lea.hbm %s4637_s3, 16 }
  0x14   : > { %p168_p10 = scmp.lt.s32.totalorder %s3016_s24, 15  ;;  %vm2020_vm4 = vcmask 326912   ;;  %vm2024_vm5 = vcmask 392512   ;;  %vm2028_vm6 = vcmask 458112   ;;  %vm4639_vm7 = vcmask 523712   ;;  %s2690_s5 = scalar_lea.hbm %s4637_s3, %s3016_s24 }
  0x15   : > { %vm2036_vm8 = vcmask 589312   ;;  %vm2040_vm9 = vcmask 654912   ;;  %vm2044_vm10 = vcmask 720512   ;;  %vm4642_vm11 = vcmask 786112   ;;  %s2694_s8 = sshll.u32 %s2690_s5, 4  ;;  %s2695_s8 = int_to_ptr.hbm [resolvable:$true] %s2694_s8 }
  0x16   : > { %s169_s25 = scalar_select %p168_p10, %s3016_s24, 15  ;;  %vm2052_vm12 = vcmask 851712   ;;  %vm2056_vm13 = vcmask 917312   ;;  %vm2060_vm14 = vcmask 982912   ;;  %vm2064_vm15 = vcmask 1048512  }
  0x17   : > { %s2901_s10 = sshra.s32 %s2695_s8, 4  ;;  %s2902_s10 = int_to_ptr.hbm [resolvable:$true] %s2901_s10 }
  0x18   : > { %s2830_s26 = sshll.u32 %s169_s25, 8  ;;  %s2903_s11 = scalar_lea.hbm %s2902_s10, 8 }
  0x19   : > { %s3023_s29 = scalar_lea.vmem %s4634_s0, %s2830_s26  ;;  %s164_s26 = sand.u32 1, %s2941_s13  }
  0x1a   : > { %v178_v0 = vld [vmem:[%s3023_s29 + $0x20] sm:$0xff]  ;;  %v176_v1 = vld [vmem:[%s3023_s29 + $0x10] sm:$0xff]  ;;  %v179_v6 = vld [vmem:[%s3023_s29 + $0x28] sm:$0xff]  ;;  %s2758_s27 = sshll.u32 %s164_s26, 3  ;;  %s2680_s9 = scalar_lea.sflag [#allocation3], %s164_s26 }
  0x1b   : > { %v174_v2 = vld [vmem:[%s3023_s29] sm:$0xff]  ;;  %v443_v3 = vsel %vm430_vm0, %v178_v0, 0.0  ;;  %v437_v4 = vsel %vm430_vm0, %v176_v1, 0.0  ;;  %v177_v7 = vld [vmem:[%s3023_s29 + $0x18] sm:$0xff]  ;;  %v175_v8 = vld [vmem:[%s3023_s29 + $0x8] sm:$0xff]  ;;  %v446_v9 = vsel %vm430_vm0, %v179_v6, 0.0  ;;  %p2904_p11 = scmp.ne.s32.totalorder %s2902_s10, %s2903_s11  ;;  %p2908_p0 = scmp.lt.s32.totalorder %s2902_s10, %s4637_s3 }
  0x1c   : > { %v431_v5 = vsel %vm430_vm0, %v174_v2, 0.0  ;;  %444 = vadd.xlane.f32.xlu2 %v443_v3  ;;  %438 = vadd.xlane.f32.xlu1 %v437_v4  ;;  %v440_v10 = vsel %vm430_vm0, %v177_v7, 0.0  ;;  %v434_v11 = vsel %vm430_vm0, %v175_v8, 0.0  ;;  %v182_v12 = vld [vmem:[%s3023_s29 + $0x40] sm:$0xff]  ;;  %v181_v13 = vld [vmem:[%s3023_s29 + $0x38] sm:$0xff]  ;;  %v180_v14 = vld [vmem:[%s3023_s29 + $0x30] sm:$0xff]  ;;  %p2909_p1 = scmp.lt.s32.totalorder %s2907_s17, %s2903_s11 }
  0x1d   : > { %432 = vadd.xlane.f32.xlu0 %v431_v5  ;;  %v455_v15 = vsel %vm430_vm0, %v182_v12, 0.0  ;;  %v452_v16 = vsel %vm430_vm0, %v181_v13, 0.0  ;;  %v449_v17 = vsel %vm430_vm0, %v180_v14, 0.0  ;;  %v185_v18 = vld [vmem:[%s3023_s29 + $0x58] sm:$0xff]  ;;  %v184_v19 = vld [vmem:[%s3023_s29 + $0x50] sm:$0xff]  ;;  %v183_v20 = vld [vmem:[%s3023_s29 + $0x48] sm:$0xff]  ;;  %p2905_p12 = pnand %p2904_p11, %p3006_p5 }
  0x1e   : > { %v464_v21 = vsel %vm430_vm0, %v185_v18, 0.0  ;;  %v461_v22 = vsel %vm430_vm0, %v184_v19, 0.0  ;;  %v458_v23 = vsel %vm430_vm0, %v183_v20, 0.0  ;;  %v188_v24 = vld [vmem:[%s3023_s29 + $0x70] sm:$0xff]  ;;  %v187_v25 = vld [vmem:[%s3023_s29 + $0x68] sm:$0xff]  ;;  %v186_v26 = vld [vmem:[%s3023_s29 + $0x60] sm:$0xff]  ;;  %p2910_p2 = por %p2909_p1, %p2908_p0 }
  0x1f   : > { %v473_v27 = vsel %vm430_vm0, %v188_v24, 0.0  ;;  %v470_v28 = vsel %vm430_vm0, %v187_v25, 0.0  ;;  %v467_v29 = vsel %vm430_vm0, %v186_v26, 0.0  ;;  %v191_v30 = vld [vmem:[%s3023_s29 + $0x88] sm:$0xff]  ;;  %v190_v31 = vld [vmem:[%s3023_s29 + $0x80] sm:$0xff]  ;;  %v189_v32 = vld [vmem:[%s3023_s29 + $0x78] sm:$0xff]  ;;  %p2906_p13 = pneg %p2905_p12 }
  0x20   : > { %v482_v33 = vsel %vm430_vm0, %v191_v30, 0.0  ;;  %v479_v34 = vsel %vm430_vm0, %v190_v31, 0.0  ;;  %v476_v35 = vsel %vm430_vm0, %v189_v32, 0.0  ;;  %v194_v36 = vld [vmem:[%s3023_s29 + $0xa0] sm:$0xff]  ;;  %v193_v37 = vld [vmem:[%s3023_s29 + $0x98] sm:$0xff]  ;;  %v192_v38 = vld [vmem:[%s3023_s29 + $0x90] sm:$0xff] }
  0x21   : > { %v491_v39 = vsel %vm430_vm0, %v194_v36, 0.0  ;;  %v488_v40 = vsel %vm430_vm0, %v193_v37, 0.0  ;;  %v485_v41 = vsel %vm430_vm0, %v192_v38, 0.0  ;;  %v197_v42 = vld [vmem:[%s3023_s29 + $0xb8] sm:$0xff]  ;;  %v196_v43 = vld [vmem:[%s3023_s29 + $0xb0] sm:$0xff]  ;;  %v195_v44 = vld [vmem:[%s3023_s29 + $0xa8] sm:$0xff]  ;;  %p2911_p3 = pnand %p2910_p2, %p2906_p13 }
  0x22   : > { %v500_v45 = vsel %vm430_vm0, %v197_v42, 0.0  ;;  %v497_v46 = vsel %vm430_vm0, %v196_v43, 0.0  ;;  %v494_v47 = vsel %vm430_vm0, %v195_v44, 0.0  ;;  %v200_v48 = vld [vmem:[%s3023_s29 + $0xd0] sm:$0xff]  ;;  %v199_v49 = vld [vmem:[%s3023_s29 + $0xc8] sm:$0xff]  ;;  %v198_v50 = vld [vmem:[%s3023_s29 + $0xc0] sm:$0xff] }
  0x23   : > { %v509_v51 = vsel %vm430_vm0, %v200_v48, 0.0  ;;  %v506_v52 = vsel %vm430_vm0, %v199_v49, 0.0  ;;  %v503_v53 = vsel %vm430_vm0, %v198_v50, 0.0  ;;  %v203_v54 = vld [vmem:[%s3023_s29 + $0xe8] sm:$0xff]  ;;  %v202_v55 = vld [vmem:[%s3023_s29 + $0xe0] sm:$0xff]  ;;  %v201_v56 = vld [vmem:[%s3023_s29 + $0xd8] sm:$0xff] }
  0x24   : > { %447 = vadd.xlane.f32.xlu2 %v446_v9  ;;  %441 = vadd.xlane.f32.xlu1 %v440_v10  ;;  %v518_v57 = vsel %vm430_vm0, %v203_v54, 0.0  ;;  %v515_v58 = vsel %vm430_vm0, %v202_v55, 0.0  ;;  %v512_v59 = vsel %vm430_vm0, %v201_v56, 0.0  ;;  %v206_v60 = vld [vmem:[%s3023_s29 + $0x100] sm:$0xff]  ;;  %v205_v61 = vld [vmem:[%s3023_s29 + $0xf8] sm:$0xff]  ;;  %v204_v62 = vld [vmem:[%s3023_s29 + $0xf0] sm:$0xff] }
  0x25   : > { %435 = vadd.xlane.f32.xlu0 %v434_v11  ;;  %v527_v63 = vsel %vm430_vm0, %v206_v60, 0.0  ;;  %v524_v0 = vsel %vm430_vm0, %v205_v61, 0.0  ;;  %v521_v1 = vsel %vm430_vm0, %v204_v62, 0.0  ;;  %v209_v2 = vld [vmem:[%s3023_s29 + $0x118] sm:$0xff]  ;;  %v208_v3 = vld [vmem:[%s3023_s29 + $0x110] sm:$0xff]  ;;  %v207_v4 = vld [vmem:[%s3023_s29 + $0x108] sm:$0xff] }
  0x26   : > { %v536_v5 = vsel %vm430_vm0, %v209_v2, 0.0  ;;  %v533_v6 = vsel %vm430_vm0, %v208_v3, 0.0  ;;  %v530_v7 = vsel %vm430_vm0, %v207_v4, 0.0  ;;  %v212_v8 = vld [vmem:[%s3023_s29 + $0x130] sm:$0xff]  ;;  %v211_v9 = vld [vmem:[%s3023_s29 + $0x128] sm:$0xff]  ;;  %v210_v10 = vld [vmem:[%s3023_s29 + $0x120] sm:$0xff] }
  0x27   : > { %v545_v11 = vsel %vm430_vm0, %v212_v8, 0.0  ;;  %v542_v12 = vsel %vm430_vm0, %v211_v9, 0.0  ;;  %v539_v13 = vsel %vm430_vm0, %v210_v10, 0.0  ;;  %v215_v14 = vld [vmem:[%s3023_s29 + $0x148] sm:$0xff]  ;;  %v218_v20 = vld [vmem:[%s3023_s29 + $0x160] sm:$0xff]  ;;  %v221_v26 = vld [vmem:[%s3023_s29 + $0x178] sm:$0xff] }
  0x28   : > { %v219_v30 = vld [vmem:[%s3023_s29 + $0x168] sm:$0xff]  ;;  %v572_v32 = vsel %vm430_vm0, %v221_v26, 0.0  ;;  %v225_v48 = vld [vmem:[%s3023_s29 + $0x198] sm:$0xff]  ;;  %s166_s6 = scalar_lea.vmem [#allocation2], %s2758_s27 }
  0x29   : > { %v223_v36 = vld [vmem:[%s3023_s29 + $0x188] sm:$0xff]  ;;  %v229_v54 = vld [vmem:[%s3023_s29 + $0x1b8] sm:$0xff]  ;;  %s2692_s7 = sshll.u32 %s166_s6, 4  ;;  %s2693_s7 = int_to_ptr.vmem [resolvable:$true] %s2692_s7 }
  0x2a   : > { %v578_v42 = vsel %vm430_vm0, %v223_v36, 0.0  ;;  %v227_v44 = vld [vmem:[%s3023_s29 + $0x1a8] sm:$0xff]  ;;  %v596_v60 = vsel %vm430_vm0, %v229_v54, 0.0  ;;  %v233_v62 = vld [vmem:[%s3023_s29 + $0x1d8] sm:$0xff] }
  0x2b   : > { %v590_v50 = vsel %vm430_vm0, %v227_v44, 0.0  ;;  %v231_v2 = vld [vmem:[%s3023_s29 + $0x1c8] sm:$0xff]  ;;  %v608_v4 = vsel %vm430_vm0, %v233_v62, 0.0  ;;  %v241_v26 = vld [vmem:[%s3023_s29 + $0x218] sm:$0xff] }
  0x2c   : > { %456 = vadd.xlane.f32.xlu2 %v455_v15  ;;  %453 = vadd.xlane.f32.xlu1 %v452_v16  ;;  %v214_v15 = vld [vmem:[%s3023_s29 + $0x140] sm:$0xff]  ;;  %v213_v16 = vld [vmem:[%s3023_s29 + $0x138] sm:$0xff]  ;;  %v235_v8 = vld [vmem:[%s3023_s29 + $0x1e8] sm:$0xff] }
  0x2d   : > { %450 = vadd.xlane.f32.xlu0 %v449_v17  ;;  %v554_v17 = vsel %vm430_vm0, %v215_v14, 0.0  ;;  %v551_v18 = vsel %vm430_vm0, %v214_v15, 0.0  ;;  %v548_v19 = vsel %vm430_vm0, %v213_v16, 0.0  ;;  %v614_v14 = vsel %vm430_vm0, %v235_v8, 0.0  ;;  %v239_v16 = vld [vmem:[%s3023_s29 + $0x208] sm:$0xff] }
  0x2e   : > { %v243_v44 = vld [vmem:[%s3023_s29 + $0x228] sm:$0xff] }
  0x34   : > { %465 = vadd.xlane.f32.xlu2 %v464_v21  ;;  %462 = vadd.xlane.f32.xlu1 %v461_v22  ;;  %v217_v21 = vld [vmem:[%s3023_s29 + $0x158] sm:$0xff]  ;;  %v216_v22 = vld [vmem:[%s3023_s29 + $0x150] sm:$0xff] }
  0x35   : > { %459 = vadd.xlane.f32.xlu0 %v458_v23  ;;  %v563_v23 = vsel %vm430_vm0, %v218_v20, 0.0  ;;  %v560_v24 = vsel %vm430_vm0, %v217_v21, 0.0  ;;  %v557_v25 = vsel %vm430_vm0, %v216_v22, 0.0  ;;  %v237_v20 = vld [vmem:[%s3023_s29 + $0x1f8] sm:$0xff]  ;;  %v626_v22 = vsel %vm430_vm0, %v239_v16, 0.0 }
  0x36   : > { %v253_v16 = vld [vmem:[%s3023_s29 + $0x278] sm:$0xff] }
  0x3c   : > { %474 = vadd.xlane.f32.xlu2 %v473_v27  ;;  %471 = vadd.xlane.f32.xlu1 %v470_v28  ;;  %v220_v27 = vld [vmem:[%s3023_s29 + $0x170] sm:$0xff] }
  0x3d   : > { %468 = vadd.xlane.f32.xlu0 %v467_v29 }
  0x44   : > { %483 = vadd.xlane.f32.xlu2 %v482_v33  ;;  %480 = vadd.xlane.f32.xlu1 %v479_v34  ;;  %v569_v33 = vsel %vm430_vm0, %v220_v27, 0.0  ;;  %v566_v34 = vsel %vm430_vm0, %v219_v30, 0.0 }
  0x45   : > { %477 = vadd.xlane.f32.xlu0 %v476_v35  ;;  %v224_v35 = vld [vmem:[%s3023_s29 + $0x190] sm:$0xff] }
  0x4c   : > { %492 = vadd.xlane.f32.xlu2 %v491_v39  ;;  %489 = vadd.xlane.f32.xlu1 %v488_v40  ;;  %v222_v39 = vld [vmem:[%s3023_s29 + $0x180] sm:$0xff] }
  0x4d   : > { %486 = vadd.xlane.f32.xlu0 %v485_v41  ;;  %v581_v41 = vsel %vm430_vm0, %v224_v35, 0.0  ;;  %v575_v43 = vsel %vm430_vm0, %v222_v39, 0.0  ;;  %v632_v35 = vsel %vm430_vm0, %v241_v26, 0.0  ;;  %v245_v39 = vld [vmem:[%s3023_s29 + $0x238] sm:$0xff] }
  0x54   : > { %501 = vadd.xlane.f32.xlu2 %v500_v45  ;;  %498 = vadd.xlane.f32.xlu1 %v497_v46  ;;  %v226_v45 = vld [vmem:[%s3023_s29 + $0x1a0] sm:$0xff] }
  0x55   : > { %495 = vadd.xlane.f32.xlu0 %v494_v47 }
  0x5c   : > { %510 = vadd.xlane.f32.xlu2 %v509_v51  ;;  %507 = vadd.xlane.f32.xlu1 %v506_v52  ;;  %v587_v51 = vsel %vm430_vm0, %v226_v45, 0.0  ;;  %v584_v52 = vsel %vm430_vm0, %v225_v48, 0.0  ;;  %v644_v48 = vsel %vm430_vm0, %v245_v39, 0.0  ;;  %v255_v39 = vld [vmem:[%s3023_s29 + $0x288] sm:$0xff] }
  0x5d   : > { %504 = vadd.xlane.f32.xlu0 %v503_v53  ;;  %v230_v53 = vld [vmem:[%s3023_s29 + $0x1c0] sm:$0xff] }
  0x64   : > { %519 = vadd.xlane.f32.xlu2 %v518_v57  ;;  %516 = vadd.xlane.f32.xlu1 %v515_v58  ;;  %v228_v57 = vld [vmem:[%s3023_s29 + $0x1b0] sm:$0xff] }
  0x65   : > { %513 = vadd.xlane.f32.xlu0 %v512_v59  ;;  %v599_v59 = vsel %vm430_vm0, %v230_v53, 0.0  ;;  %v593_v61 = vsel %vm430_vm0, %v228_v57, 0.0  ;;  %v247_v53 = vld [vmem:[%s3023_s29 + $0x248] sm:$0xff] }
  0x66   : > { %v650_v62 = vsel %vm430_vm0, %v247_v53, 0.0 }
  0x6c   : > { %528 = vadd.xlane.f32.xlu2 %v527_v63  ;;  %525 = vadd.xlane.f32.xlu1 %v524_v0  ;;  %v232_v63 = vld [vmem:[%s3023_s29 + $0x1d0] sm:$0xff] }
  0x6d   : > { %522 = vadd.xlane.f32.xlu0 %v521_v1 }
  0x74   : > { %537 = vadd.xlane.f32.xlu2 %v536_v5  ;;  %534 = vadd.xlane.f32.xlu1 %v533_v6  ;;  %v605_v5 = vsel %vm430_vm0, %v232_v63, 0.0  ;;  %v602_v6 = vsel %vm430_vm0, %v231_v2, 0.0  ;;  %v251_v2 = vld [vmem:[%s3023_s29 + $0x268] sm:$0xff] }
  0x75   : > { %531 = vadd.xlane.f32.xlu0 %v530_v7  ;;  %v236_v7 = vld [vmem:[%s3023_s29 + $0x1f0] sm:$0xff] }
  0x7c   : > { %546 = vadd.xlane.f32.xlu2 %v545_v11  ;;  %543 = vadd.xlane.f32.xlu1 %v542_v12  ;;  %v234_v11 = vld [vmem:[%s3023_s29 + $0x1e0] sm:$0xff] }
  0x7d   : > { %540 = vadd.xlane.f32.xlu0 %v539_v13  ;;  %v617_v13 = vsel %vm430_vm0, %v236_v7, 0.0  ;;  %v611_v15 = vsel %vm430_vm0, %v234_v11, 0.0  ;;  %v249_v7 = vld [vmem:[%s3023_s29 + $0x258] sm:$0xff]  ;;  %v662_v11 = vsel %vm430_vm0, %v251_v2, 0.0 }
  0x84   : > { %555 = vadd.xlane.f32.xlu2 %v554_v17  ;;  %552 = vadd.xlane.f32.xlu1 %v551_v18  ;;  %v238_v17 = vld [vmem:[%s3023_s29 + $0x200] sm:$0xff] }
  0x85   : > { %549 = vadd.xlane.f32.xlu0 %v548_v19 }
  0x8c   : > { %564 = vadd.xlane.f32.xlu2 %v563_v23  ;;  %561 = vadd.xlane.f32.xlu1 %v560_v24  ;;  %v623_v23 = vsel %vm430_vm0, %v238_v17, 0.0  ;;  %v620_v24 = vsel %vm430_vm0, %v237_v20, 0.0 }
  0x8d   : > { %558 = vadd.xlane.f32.xlu0 %v557_v25  ;;  %v242_v25 = vld [vmem:[%s3023_s29 + $0x220] sm:$0xff] }
  0x8f   : > { %v3117_v28 = vpop.xlane.xlu2 %444  ;;  %v3119_v29 = vpop.xlane.xlu1 %438 }
  0x90   : > { %v3122_v31 = vpop.xlane.xlu0 %432 }
  0x94   : > { %573 = vadd.xlane.f32.xlu2 %v572_v32  ;;  %570 = vadd.xlane.f32.xlu1 %v569_v33  ;;  %v240_v32 = vld [vmem:[%s3023_s29 + $0x210] sm:$0xff] }
  0x95   : > { %567 = vadd.xlane.f32.xlu0 %v566_v34  ;;  %v635_v34 = vsel %vm430_vm0, %v242_v25, 0.0  ;;  %v629_v36 = vsel %vm430_vm0, %v240_v32, 0.0  ;;  %v668_v25 = vsel %vm430_vm0, %v253_v16, 0.0  ;;  %v257_v32 = vld [vmem:[%s3023_s29 + $0x298] sm:$0xff] }
  0x97   : > { %v3129_v37 = vpop.xlane.xlu2 %447  ;;  %v3131_v38 = vpop.xlane.xlu1 %441 }
  0x98   : > { %v3134_v40 = vpop.xlane.xlu0 %435 }
  0x9c   : > { %582 = vadd.xlane.f32.xlu2 %v581_v41  ;;  %579 = vadd.xlane.f32.xlu1 %v578_v42  ;;  %v244_v41 = vld [vmem:[%s3023_s29 + $0x230] sm:$0xff] }
  0x9d   : > { %576 = vadd.xlane.f32.xlu0 %v575_v43 }
  0x9f   : > { %v3141_v46 = vpop.xlane.xlu2 %456  ;;  %v3143_v47 = vpop.xlane.xlu1 %453 }
  0xa0   : > { %v3146_v49 = vpop.xlane.xlu0 %450 }
  0xa4   : > { %591 = vadd.xlane.f32.xlu2 %v590_v50  ;;  %588 = vadd.xlane.f32.xlu1 %v587_v51  ;;  %v641_v50 = vsel %vm430_vm0, %v244_v41, 0.0  ;;  %v638_v51 = vsel %vm430_vm0, %v243_v44, 0.0  ;;  %v680_v44 = vsel %vm430_vm0, %v257_v32, 0.0  ;;  %v265_v32 = vld [vmem:[%s3023_s29 + $0x2d8] sm:$0xff] }
  0xa5   : > { %585 = vadd.xlane.f32.xlu0 %v584_v52  ;;  %v248_v52 = vld [vmem:[%s3023_s29 + $0x250] sm:$0xff] }
  0xa7   : > { %v3153_v55 = vpop.xlane.xlu2 %465  ;;  %v3155_v56 = vpop.xlane.xlu1 %462 }
  0xa8   : > { %v3158_v58 = vpop.xlane.xlu0 %459 }
  0xac   : > { %600 = vadd.xlane.f32.xlu2 %v599_v59  ;;  %597 = vadd.xlane.f32.xlu1 %v596_v60  ;;  %v246_v59 = vld [vmem:[%s3023_s29 + $0x240] sm:$0xff] }
  0xad   : > { %594 = vadd.xlane.f32.xlu0 %v593_v61  ;;  %v653_v61 = vsel %vm430_vm0, %v248_v52, 0.0  ;;  %v647_v63 = vsel %vm430_vm0, %v246_v59, 0.0  ;;  %v259_v52 = vld [vmem:[%s3023_s29 + $0x2a8] sm:$0xff] }
  0xae   : > { %v686_v2 = vsel %vm430_vm0, %v259_v52, 0.0 }
  0xaf   : > { %v3165_v0 = vpop.xlane.xlu2 %474  ;;  %v3167_v1 = vpop.xlane.xlu1 %471 }
  0xb0   : > { %v3170_v3 = vpop.xlane.xlu0 %468 }
  0xb4   : > { %609 = vadd.xlane.f32.xlu2 %v608_v4  ;;  %606 = vadd.xlane.f32.xlu1 %v605_v5  ;;  %v250_v4 = vld [vmem:[%s3023_s29 + $0x260] sm:$0xff] }
  0xb5   : > { %603 = vadd.xlane.f32.xlu0 %v602_v6 }
  0xb7   : > { %v3177_v9 = vpop.xlane.xlu2 %483  ;;  %v3179_v10 = vpop.xlane.xlu1 %480 }
  0xb8   : > { %v3182_v12 = vpop.xlane.xlu0 %477 }
  0xbc   : > { %618 = vadd.xlane.f32.xlu2 %v617_v13  ;;  %615 = vadd.xlane.f32.xlu1 %v614_v14  ;;  %v659_v13 = vsel %vm430_vm0, %v250_v4, 0.0  ;;  %v656_v14 = vsel %vm430_vm0, %v249_v7, 0.0  ;;  %v263_v7 = vld [vmem:[%s3023_s29 + $0x2c8] sm:$0xff] }
  0xbd   : > { %612 = vadd.xlane.f32.xlu0 %v611_v15  ;;  %v254_v15 = vld [vmem:[%s3023_s29 + $0x280] sm:$0xff] }
  0xbf   : > { %v3189_v18 = vpop.xlane.xlu2 %492  ;;  %v3191_v19 = vpop.xlane.xlu1 %489 }
  0xc0   : > { %v3194_v21 = vpop.xlane.xlu0 %486 }
  0xc4   : > { %627 = vadd.xlane.f32.xlu2 %v626_v22  ;;  %624 = vadd.xlane.f32.xlu1 %v623_v23  ;;  %v252_v22 = vld [vmem:[%s3023_s29 + $0x270] sm:$0xff] }
  0xc5   : > { %621 = vadd.xlane.f32.xlu0 %v620_v24  ;;  %v671_v24 = vsel %vm430_vm0, %v254_v15, 0.0  ;;  %v665_v26 = vsel %vm430_vm0, %v252_v22, 0.0  ;;  %v261_v15 = vld [vmem:[%s3023_s29 + $0x2b8] sm:$0xff]  ;;  %v698_v22 = vsel %vm430_vm0, %v263_v7, 0.0  ;;  %v267_v7 = vld [vmem:[%s3023_s29 + $0x2e8] sm:$0xff] }
  0xc7   : > { %v3201_v27 = vpop.xlane.xlu2 %501  ;;  %v3203_v30 = vpop.xlane.xlu1 %498 }
  0xc8   : > { %v3206_v33 = vpop.xlane.xlu0 %495 }
  0xcc   : > { %636 = vadd.xlane.f32.xlu2 %v635_v34  ;;  %633 = vadd.xlane.f32.xlu1 %v632_v35  ;;  %v256_v34 = vld [vmem:[%s3023_s29 + $0x290] sm:$0xff] }
  0xcd   : > { %630 = vadd.xlane.f32.xlu0 %v629_v36 }
  0xcf   : > { %v3213_v42 = vpop.xlane.xlu2 %510  ;;  %v3215_v43 = vpop.xlane.xlu1 %507 }
  0xd0   : > { %v3218_v45 = vpop.xlane.xlu0 %504 }
  0xd4   : > { %645 = vadd.xlane.f32.xlu2 %v644_v48  ;;  %642 = vadd.xlane.f32.xlu1 %v641_v50  ;;  %v677_v48 = vsel %vm430_vm0, %v256_v34, 0.0  ;;  %v674_v50 = vsel %vm430_vm0, %v255_v39, 0.0 }
  0xd5   : > { %639 = vadd.xlane.f32.xlu0 %v638_v51  ;;  %v260_v51 = vld [vmem:[%s3023_s29 + $0x2b0] sm:$0xff] }
  0xd7   : > { %v3225_v54 = vpop.xlane.xlu2 %519  ;;  %v3227_v57 = vpop.xlane.xlu1 %516 }
  0xd8   : > { %v3230_v60 = vpop.xlane.xlu0 %513 }
  0xdc   : > { %654 = vadd.xlane.f32.xlu2 %v653_v61  ;;  %651 = vadd.xlane.f32.xlu1 %v650_v62  ;;  %v258_v61 = vld [vmem:[%s3023_s29 + $0x2a0] sm:$0xff] }
  0xdd   : > { %648 = vadd.xlane.f32.xlu0 %v647_v63  ;;  %v689_v63 = vsel %vm430_vm0, %v260_v51, 0.0  ;;  %v683_v4 = vsel %vm430_vm0, %v258_v61, 0.0  ;;  %v704_v51 = vsel %vm430_vm0, %v265_v32, 0.0  ;;  %v269_v61 = vld [vmem:[%s3023_s29 + $0x2f8] sm:$0xff] }
  0xdf   : > { %v3237_v5 = vpop.xlane.xlu2 %528  ;;  %v3239_v6 = vpop.xlane.xlu1 %525 }
  0xe0   : > { %v3242_v8 = vpop.xlane.xlu0 %522 }
  0xe1   : > { %4646 = vst [vmem:[#allocation5_spill] sm:$0xff] %v3242_v8 }
  0xe4   : > { %663 = vadd.xlane.f32.xlu2 %v662_v11  ;;  %660 = vadd.xlane.f32.xlu1 %v659_v13  ;;  %v262_v11 = vld [vmem:[%s3023_s29 + $0x2c0] sm:$0xff] }
  0xe5   : > { %657 = vadd.xlane.f32.xlu0 %v656_v14 }
  0xe7   : > { %v3249_v17 = vpop.xlane.xlu2 %537  ;;  %v3251_v20 = vpop.xlane.xlu1 %534 }
  0xe8   : > { %v3254_v23 = vpop.xlane.xlu0 %531 }
  0xec   : > { %672 = vadd.xlane.f32.xlu2 %v671_v24  ;;  %669 = vadd.xlane.f32.xlu1 %v668_v25  ;;  %v695_v24 = vsel %vm430_vm0, %v262_v11, 0.0  ;;  %v692_v25 = vsel %vm430_vm0, %v261_v15, 0.0  ;;  %v716_v15 = vsel %vm430_vm0, %v269_v61, 0.0 }
  0xed   : > { %666 = vadd.xlane.f32.xlu0 %v665_v26  ;;  %v266_v26 = vld [vmem:[%s3023_s29 + $0x2e0] sm:$0xff] }
  0xef   : > { %v3261_v35 = vpop.xlane.xlu2 %546  ;;  %v3263_v36 = vpop.xlane.xlu1 %543 }
  0xf0   : > { %v3266_v41 = vpop.xlane.xlu0 %540 }
  0xf4   : > { %681 = vadd.xlane.f32.xlu2 %v680_v44  ;;  %678 = vadd.xlane.f32.xlu1 %v677_v48  ;;  %v264_v44 = vld [vmem:[%s3023_s29 + $0x2d0] sm:$0xff] }
  0xf5   : > { %675 = vadd.xlane.f32.xlu0 %v674_v50  ;;  %v707_v50 = vsel %vm430_vm0, %v266_v26, 0.0  ;;  %v701_v52 = vsel %vm430_vm0, %v264_v44, 0.0  ;;  %v271_v26 = vld [vmem:[%s3023_s29 + $0x308] sm:$0xff] }
  0xf6   : > { %v722_v61 = vsel %vm430_vm0, %v271_v26, 0.0 }
  0xf7   : > { %v3273_v53 = vpop.xlane.xlu2 %555  ;;  %v3275_v59 = vpop.xlane.xlu1 %552 }
  0xf8   : > { %v3278_v62 = vpop.xlane.xlu0 %549 }
  0xfc   : > { %690 = vadd.xlane.f32.xlu2 %v689_v63  ;;  %687 = vadd.xlane.f32.xlu1 %v686_v2  ;;  %v268_v63 = vld [vmem:[%s3023_s29 + $0x2f0] sm:$0xff] }
  0xfd   : > { %684 = vadd.xlane.f32.xlu0 %v683_v4 }
  0xff   : > { %v3285_v13 = vpop.xlane.xlu2 %564  ;;  %v3287_v14 = vpop.xlane.xlu1 %561 }
 0x100   : > { %4647 = vst [vmem:[#allocation6_spill] sm:$0xff] %v3285_v13  ;;  %v3290_v16 = vpop.xlane.xlu0 %558 }
 0x104   : > { %699 = vadd.xlane.f32.xlu2 %v698_v22  ;;  %696 = vadd.xlane.f32.xlu1 %v695_v24  ;;  %v713_v22 = vsel %vm430_vm0, %v268_v63, 0.0  ;;  %v710_v24 = vsel %vm430_vm0, %v267_v7, 0.0  ;;  %v275_v7 = vld [vmem:[%s3023_s29 + $0x328] sm:$0xff] }
 0x105   : > { %693 = vadd.xlane.f32.xlu0 %v692_v25  ;;  %v272_v25 = vld [vmem:[%s3023_s29 + $0x310] sm:$0xff] }
 0x107   : > { %v3297_v34 = vpop.xlane.xlu2 %573  ;;  %v3299_v39 = vpop.xlane.xlu1 %570 }
 0x108   : > { %4648 = vst [vmem:[#allocation7_spill] sm:$0xff] %v3297_v34  ;;  %v3302_v48 = vpop.xlane.xlu0 %567  ;;  %v1212_v34 = vmul.f32 0.015625, %v3167_v1 }
 0x109   : > { %4649 = vst [vmem:[#allocation8_spill] sm:$0xff] %v3299_v39  ;;  %v1215_v39 = vmul.f32 0.015625, %v3179_v10 }
 0x10a   : > { %4650 = vst [vmem:[#allocation9_spill] sm:$0xff] %v3302_v48  ;;  %v1216_v48 = vmul.f32 0.015625, %v3177_v9 }
 0x10c   : > { %708 = vadd.xlane.f32.xlu2 %v707_v50  ;;  %705 = vadd.xlane.f32.xlu1 %v704_v51  ;;  %v270_v50 = vld [vmem:[%s3023_s29 + $0x300] sm:$0xff] }
 0x10d   : > { %702 = vadd.xlane.f32.xlu0 %v701_v52  ;;  %v725_v52 = vsel %vm430_vm0, %v272_v25, 0.0  ;;  %v719_v63 = vsel %vm430_vm0, %v270_v50, 0.0  ;;  %v734_v25 = vsel %vm430_vm0, %v275_v7, 0.0 }
 0x10f   : > { %v3309_v2 = vpop.xlane.xlu2 %582  ;;  %v3311_v4 = vpop.xlane.xlu1 %579 }
 0x110   : > { %4651 = vst [vmem:[#allocation10_spill] sm:$0xff] %v3309_v2  ;;  %v3314_v11 = vpop.xlane.xlu0 %576 }
 0x111   : > { %4652 = vst [vmem:[#allocation11_spill] sm:$0xff] %v3311_v4 }
 0x112   : > { %4653 = vst [vmem:[#allocation12_spill] sm:$0xff] %v3314_v11 }
 0x114   : > { %717 = vadd.xlane.f32.xlu2 %v716_v15  ;;  %714 = vadd.xlane.f32.xlu1 %v713_v22  ;;  %v274_v15 = vld [vmem:[%s3023_s29 + $0x320] sm:$0xff] }
 0x115   : > { %711 = vadd.xlane.f32.xlu0 %v710_v24  ;;  %v731_v26 = vsel %vm430_vm0, %v274_v15, 0.0 }
 0x117   : > { %v3321_v32 = vpop.xlane.xlu2 %591  ;;  %v3323_v44 = vpop.xlane.xlu1 %588 }
 0x118   : > { %4654 = vst [vmem:[#allocation13_spill] sm:$0xff] %v3321_v32  ;;  %v3326_v51 = vpop.xlane.xlu0 %585 }
 0x119   : > { %4655 = vst [vmem:[#allocation14_spill] sm:$0xff] %v3323_v44  ;;  %v273_v44 = vld [vmem:[%s3023_s29 + $0x318] sm:$0xff] }
 0x11a   : > { %4656 = vst [vmem:[#allocation15_spill] sm:$0xff] %v3326_v51  ;;  %v728_v50 = vsel %vm430_vm0, %v273_v44, 0.0 }
 0x11c   : > { %726 = vadd.xlane.f32.xlu2 %v725_v52  ;;  %723 = vadd.xlane.f32.xlu1 %v722_v61  ;;  %v278_v52 = vld [vmem:[%s3023_s29 + $0x340] sm:$0xff]  ;;  %v277_v61 = vld [vmem:[%s3023_s29 + $0x338] sm:$0xff] }
 0x11d   : > { %720 = vadd.xlane.f32.xlu0 %v719_v63  ;;  %v743_v7 = vsel %vm430_vm0, %v278_v52, 0.0  ;;  %v740_v15 = vsel %vm430_vm0, %v277_v61, 0.0 }
 0x11f   : > { %v3333_v22 = vpop.xlane.xlu2 %600  ;;  %v3335_v24 = vpop.xlane.xlu1 %597 }
 0x120   : > { %4657 = vst [vmem:[#allocation16_spill] sm:$0xff] %v3333_v22  ;;  %v3338_v32 = vpop.xlane.xlu0 %594 }
 0x121   : > { %4658 = vst [vmem:[#allocation17_spill] sm:$0xff] %v3335_v24  ;;  %v276_v24 = vld [vmem:[%s3023_s29 + $0x330] sm:$0xff] }
 0x122   : > { %4659 = vst [vmem:[#allocation18_spill] sm:$0xff] %v3338_v32  ;;  %v737_v44 = vsel %vm430_vm0, %v276_v24, 0.0 }
 0x124   : > { %735 = vadd.xlane.f32.xlu2 %v734_v25  ;;  %732 = vadd.xlane.f32.xlu1 %v731_v26  ;;  %v281_v25 = vld [vmem:[%s3023_s29 + $0x358] sm:$0xff]  ;;  %v280_v26 = vld [vmem:[%s3023_s29 + $0x350] sm:$0xff] }
 0x125   : > { %729 = vadd.xlane.f32.xlu0 %v728_v50  ;;  %v752_v52 = vsel %vm430_vm0, %v281_v25, 0.0  ;;  %v749_v61 = vsel %vm430_vm0, %v280_v26, 0.0 }
 0x127   : > { %v3345_v63 = vpop.xlane.xlu2 %609  ;;  %v3347_v22 = vpop.xlane.xlu1 %606 }
 0x128   : > { %4660 = vst [vmem:[#allocation19_spill] sm:$0xff] %v3345_v63  ;;  %v3350_v32 = vpop.xlane.xlu0 %603  ;;  %v279_v63 = vld [vmem:[%s3023_s29 + $0x348] sm:$0xff] }
 0x129   : > { %4661 = vst [vmem:[#allocation20_spill] sm:$0xff] %v3347_v22  ;;  %v746_v24 = vsel %vm430_vm0, %v279_v63, 0.0 }
 0x12a   : > { %4662 = vst [vmem:[#allocation21_spill] sm:$0xff] %v3350_v32 }
 0x12c   : > { %744 = vadd.xlane.f32.xlu2 %v743_v7  ;;  %741 = vadd.xlane.f32.xlu1 %v740_v15  ;;  %v284_v7 = vld [vmem:[%s3023_s29 + $0x370] sm:$0xff]  ;;  %v283_v15 = vld [vmem:[%s3023_s29 + $0x368] sm:$0xff] }
 0x12d   : > { %738 = vadd.xlane.f32.xlu0 %v737_v44  ;;  %v761_v25 = vsel %vm430_vm0, %v284_v7, 0.0  ;;  %v758_v26 = vsel %vm430_vm0, %v283_v15, 0.0 }
 0x12f   : > { %v3357_v50 = vpop.xlane.xlu2 %618  ;;  %v3359_v22 = vpop.xlane.xlu1 %615 }
 0x130   : > { %4663 = vst [vmem:[#allocation22_spill] sm:$0xff] %v3357_v50  ;;  %v3362_v32 = vpop.xlane.xlu0 %612  ;;  %v282_v50 = vld [vmem:[%s3023_s29 + $0x360] sm:$0xff] }
 0x131   : > { %4664 = vst [vmem:[#allocation23_spill] sm:$0xff] %v3359_v22  ;;  %v755_v63 = vsel %vm430_vm0, %v282_v50, 0.0 }
 0x132   : > { %4665 = vst [vmem:[#allocation24_spill] sm:$0xff] %v3362_v32 }
 0x134   : > { %753 = vadd.xlane.f32.xlu2 %v752_v52  ;;  %750 = vadd.xlane.f32.xlu1 %v749_v61  ;;  %v287_v52 = vld [vmem:[%s3023_s29 + $0x388] sm:$0xff]  ;;  %v286_v61 = vld [vmem:[%s3023_s29 + $0x380] sm:$0xff] }
 0x135   : > { %747 = vadd.xlane.f32.xlu0 %v746_v24  ;;  %v770_v7 = vsel %vm430_vm0, %v287_v52, 0.0  ;;  %v767_v15 = vsel %vm430_vm0, %v286_v61, 0.0 }
 0x137   : > { %v3369_v44 = vpop.xlane.xlu2 %627  ;;  %v3371_v22 = vpop.xlane.xlu1 %624 }
 0x138   : > { %4666 = vst [vmem:[#allocation25_spill] sm:$0xff] %v3369_v44  ;;  %v3374_v32 = vpop.xlane.xlu0 %621  ;;  %v285_v44 = vld [vmem:[%s3023_s29 + $0x378] sm:$0xff] }
 0x139   : > { %4667 = vst [vmem:[#allocation26_spill] sm:$0xff] %v3371_v22  ;;  %v764_v50 = vsel %vm430_vm0, %v285_v44, 0.0 }
 0x13a   : > { %4668 = vst [vmem:[#allocation27_spill] sm:$0xff] %v3374_v32 }
 0x13c   : > { %762 = vadd.xlane.f32.xlu2 %v761_v25  ;;  %759 = vadd.xlane.f32.xlu1 %v758_v26  ;;  %v290_v25 = vld [vmem:[%s3023_s29 + $0x3a0] sm:$0xff]  ;;  %v289_v26 = vld [vmem:[%s3023_s29 + $0x398] sm:$0xff] }
 0x13d   : > { %756 = vadd.xlane.f32.xlu0 %v755_v63  ;;  %v779_v52 = vsel %vm430_vm0, %v290_v25, 0.0  ;;  %v776_v61 = vsel %vm430_vm0, %v289_v26, 0.0 }
 0x13f   : > { %v3381_v24 = vpop.xlane.xlu2 %636  ;;  %v3383_v22 = vpop.xlane.xlu1 %633 }
 0x140   : > { %4669 = vst [vmem:[#allocation28_spill] sm:$0xff] %v3381_v24  ;;  %v3386_v32 = vpop.xlane.xlu0 %630 }
 0x141   : > { %4670 = vst [vmem:[#allocation29_spill] sm:$0xff] %v3383_v22  ;;  %v288_v22 = vld [vmem:[%s3023_s29 + $0x390] sm:$0xff] }
 0x142   : > { %4671 = vst [vmem:[#allocation30_spill] sm:$0xff] %v3386_v32  ;;  %v773_v44 = vsel %vm430_vm0, %v288_v22, 0.0 }
 0x144   : > { %771 = vadd.xlane.f32.xlu2 %v770_v7  ;;  %768 = vadd.xlane.f32.xlu1 %v767_v15  ;;  %v293_v7 = vld [vmem:[%s3023_s29 + $0x3b8] sm:$0xff]  ;;  %v292_v15 = vld [vmem:[%s3023_s29 + $0x3b0] sm:$0xff] }
 0x145   : > { %765 = vadd.xlane.f32.xlu0 %v764_v50  ;;  %v788_v25 = vsel %vm430_vm0, %v293_v7, 0.0  ;;  %v785_v26 = vsel %vm430_vm0, %v292_v15, 0.0 }
 0x147   : > { %v3393_v63 = vpop.xlane.xlu2 %645  ;;  %v3395_v24 = vpop.xlane.xlu1 %642 }
 0x148   : > { %4672 = vst [vmem:[#allocation31_spill] sm:$0xff] %v3393_v63  ;;  %v3398_v32 = vpop.xlane.xlu0 %639  ;;  %v291_v63 = vld [vmem:[%s3023_s29 + $0x3a8] sm:$0xff] }
 0x149   : > { %4673 = vst [vmem:[#allocation32_spill] sm:$0xff] %v3395_v24  ;;  %v782_v22 = vsel %vm430_vm0, %v291_v63, 0.0 }
 0x14a   : > { %4674 = vst [vmem:[#allocation33_spill] sm:$0xff] %v3398_v32 }
 0x14c   : > { %780 = vadd.xlane.f32.xlu2 %v779_v52  ;;  %777 = vadd.xlane.f32.xlu1 %v776_v61  ;;  %v296_v52 = vld [vmem:[%s3023_s29 + $0x3d0] sm:$0xff]  ;;  %v295_v61 = vld [vmem:[%s3023_s29 + $0x3c8] sm:$0xff] }
 0x14d   : > { %774 = vadd.xlane.f32.xlu0 %v773_v44  ;;  %v797_v7 = vsel %vm430_vm0, %v296_v52, 0.0  ;;  %v794_v15 = vsel %vm430_vm0, %v295_v61, 0.0 }
 0x14f   : > { %v3405_v50 = vpop.xlane.xlu2 %654  ;;  %v3407_v24 = vpop.xlane.xlu1 %651 }
 0x150   : > { %4675 = vst [vmem:[#allocation34_spill] sm:$0xff] %v3405_v50  ;;  %v3410_v32 = vpop.xlane.xlu0 %648 }
 0x151   : > { %4676 = vst [vmem:[#allocation35_spill] sm:$0xff] %v3407_v24  ;;  %v294_v24 = vld [vmem:[%s3023_s29 + $0x3c0] sm:$0xff] }
 0x152   : > { %4677 = vst [vmem:[#allocation36_spill] sm:$0xff] %v3410_v32  ;;  %v791_v63 = vsel %vm430_vm0, %v294_v24, 0.0  ;;  %v2003_v24 = vlaneseq }
 0x154   : > { %789 = vadd.xlane.f32.xlu2 %v788_v25  ;;  %786 = vadd.xlane.f32.xlu1 %v785_v26  ;;  %v299_v25 = vld [vmem:[%s3023_s29 + $0x3e8] sm:$0xff]  ;;  %v298_v26 = vld [vmem:[%s3023_s29 + $0x3e0] sm:$0xff] }
 0x155   : > { %783 = vadd.xlane.f32.xlu0 %v782_v22  ;;  %v806_v52 = vsel %vm430_vm0, %v299_v25, 0.0  ;;  %v803_v61 = vsel %vm430_vm0, %v298_v26, 0.0  ;;  %v301_v26 = vld [vmem:[%s3023_s29 + $0x3f8] sm:$0xff] }
 0x157   : > { %v3417_v44 = vpop.xlane.xlu2 %663  ;;  %v3419_v50 = vpop.xlane.xlu1 %660 }
 0x158   : > { %4678 = vst [vmem:[#allocation37_spill] sm:$0xff] %v3417_v44  ;;  %v3422_v32 = vpop.xlane.xlu0 %657 }
 0x159   : > { %4679 = vst [vmem:[#allocation38_spill] sm:$0xff] %v3419_v50  ;;  %v297_v50 = vld [vmem:[%s3023_s29 + $0x3d8] sm:$0xff] }
 0x15a   : > { %4680 = vst [vmem:[#allocation39_spill] sm:$0xff] %v3422_v32  ;;  %v302_v32 = vld [vmem:[%s3023_s29 + $0x400] sm:$0xff] }
 0x15c   : > { %798 = vadd.xlane.f32.xlu2 %v797_v7  ;;  %795 = vadd.xlane.f32.xlu1 %v794_v15  ;;  %v1200_v7 = vmul.f32 0.015625, %v3134_v40  ;;  %v800_v15 = vsel %vm430_vm0, %v297_v50, 0.0  ;;  %v300_v40 = vld [vmem:[%s3023_s29 + $0x3f0] sm:$0xff] }
 0x15d   : > { %792 = vadd.xlane.f32.xlu0 %v791_v63  ;;  %v1199_v63 = vmul.f32 0.015625, %v3122_v31 }
 0x15f   : > { %v3429_v22 = vpop.xlane.xlu2 %672  ;;  %v3431_v51 = vpop.xlane.xlu1 %669  ;;  %v1455_v25 = vpack.c.bf16 %v1200_v7, %v1199_v63  ;;  %v809_v7 = vsel %vm430_vm0, %v300_v40, 0.0  ;;  %v1204_v63 = vmul.f32 0.015625, %v3129_v37  ;;  %v1206_v40 = vmul.f32 0.015625, %v3143_v47 }
 0x160   : > { %4681 = vst [vmem:[#allocation40_spill] sm:$0xff] %v3429_v22  ;;  %v3434_v44 = vpop.xlane.xlu0 %666  ;;  %v1201_v22 = vmul.f32 0.015625, %v3119_v29  ;;  %v812_v29 = vsel %vm430_vm0, %v301_v26, 0.0 }
 0x161   : > { %4682 = vst [vmem:[#allocation41_spill] sm:$0xff] %v3431_v51  ;;  %v1202_v51 = vmul.f32 0.015625, %v3131_v38 }
 0x162   : > { %4683 = vst [vmem:[#allocation42_spill] sm:$0xff] %v3434_v44  ;;  %v3443_v44 = vand.u32 127, %v2003_v24  ;;  %v1748_v24 = vunpack.c.h.b16 %v1455_v25 }
 0x163   : > { %v1456_v31 = vpack.c.bf16 %v1202_v51, %v1201_v22 }
 0x164   : > { %807 = vadd.xlane.f32.xlu2 %v806_v52  ;;  %804 = vadd.xlane.f32.xlu1 %v803_v61  ;;  %v815_v52 = vsel %vm430_vm0, %v302_v32, 0.0  ;;  %v3457_v38 = vadd.s32 4294967288, %v3443_v44  ;;  %v1747_v61 = vunpack.c.l.b16 %v1455_v25  ;;  %v3463_v51 = vadd.s32 4294967280, %v3443_v44  ;;  %v304_v25 = vld [vmem:[%s3023_s29 + $0x410] sm:$0xff] }
 0x165   : > { %801 = vadd.xlane.f32.xlu0 %v800_v15  ;;  %v1203_v15 = vmul.f32 0.015625, %v3117_v28  ;;  %v1749_v32 = vunpack.c.l.b16 %v1456_v31  ;;  %v1205_v28 = vmul.f32 0.015625, %v3146_v49  ;;  %v821_v4 = vsel %vm430_vm0, %v304_v25, 0.0 }
 0x166   : > { %v2005_v22 = vperm.slane %v1747_v61, %v3443_v44  ;;  %v2007_v26 = vperm.slane %v1748_v24, %v3457_v38  ;;  %v1750_v47 = vunpack.c.h.b16 %v1456_v31  ;;  %v3493_v31 = vadd.s32 4294967256, %v3443_v44 }
 0x167   : > { %v3447_v2 = vpop.xlane.xlu2 %681  ;;  %v3449_v11 = vpop.xlane.xlu1 %678  ;;  %v2011_v61 = vperm.slane %v1749_v32, %v3463_v51 }
 0x168   : > { %4684 = vst [vmem:[#allocation43_spill] sm:$0xff] %v3447_v2  ;;  %v3452_v50 = vpop.xlane.xlu0 %675  ;;  %v2009_v49 = vsel %vm2008_vm1, %v2007_v26, %v2005_v22  ;;  %v3499_v26 = vadd.s32 4294967248, %v3443_v44 }
 0x169   : > { %4685 = vst [vmem:[#allocation44_spill] sm:$0xff] %v3449_v11  ;;  %v305_v11 = vld [vmem:[%s3023_s29 + $0x418] sm:$0xff] }
 0x16a   : > { %4686 = vst [vmem:[#allocation45_spill] sm:$0xff] %v3452_v50  ;;  %v824_v24 = vsel %vm430_vm0, %v305_v11, 0.0  ;;  %v2013_v11 = vsel %vm2012_vm2, %v2011_v61, %v2009_v49 }
 0x16c   : > { %816 = vadd.xlane.f32.xlu2 %v815_v52  ;;  %813 = vadd.xlane.f32.xlu1 %v812_v29  ;;  %v303_v52 = vld [vmem:[%s3023_s29 + $0x408] sm:$0xff]  ;;  %v1457_v29 = vpack.c.bf16 %v1204_v63, %v1203_v15  ;;  %v1207_v15 = vmul.f32 0.015625, %v3141_v46  ;;  %v1458_v63 = vpack.c.bf16 %v1206_v40, %v1205_v28  ;;  %v308_v46 = vld [vmem:[%s3023_s29 + $0x430] sm:$0xff] }
 0x16d   : > { %810 = vadd.xlane.f32.xlu0 %v809_v7  ;;  %v3479_v7 = vadd.s32 4294967272, %v3443_v44 }
 0x16e   : > { %v1751_v32 = vunpack.c.l.b16 %v1457_v29  ;;  %v1753_v25 = vunpack.c.l.b16 %v1458_v63 }
 0x16f   : > { %v3471_v2 = vpop.xlane.xlu2 %690  ;;  %v3473_v37 = vpop.xlane.xlu1 %687  ;;  %v2015_v22 = vperm.slane %v1750_v47, %v3479_v7  ;;  %v3509_v47 = vadd.s32 4294967240, %v3443_v44 }
 0x170   : > { %4687 = vst [vmem:[#allocation46_spill] sm:$0xff] %v3471_v2  ;;  %v3476_v50 = vpop.xlane.xlu0 %684  ;;  %v818_v2 = vsel %vm430_vm0, %v303_v52, 0.0  ;;  %v1752_v52 = vunpack.c.h.b16 %v1457_v29  ;;  %v1210_v29 = vmul.f32 0.015625, %v3153_v55  ;;  %v1217_v55 = vmul.f32 0.015625, %v3194_v21  ;;  %v311_v21 = vld [vmem:[%s3023_s29 + $0x448] sm:$0xff] }
 0x171   : > { %4688 = vst [vmem:[#allocation47_spill] sm:$0xff] %v3473_v37  ;;  %v3489_v37 = vadd.s32 4294967264, %v3443_v44 }
 0x172   : > { %4689 = vst [vmem:[#allocation48_spill] sm:$0xff] %v3476_v50  ;;  %v1208_v50 = vmul.f32 0.015625, %v3158_v58  ;;  %v307_v58 = vld [vmem:[%s3023_s29 + $0x428] sm:$0xff]  ;;  %v2023_v10 = vperm.slane %v1752_v52, %v3493_v31 }
 0x173   : > { %v2019_v61 = vperm.slane %v1751_v32, %v3489_v37  ;;  %v1209_v32 = vmul.f32 0.015625, %v3155_v56  ;;  %v3529_v56 = vadd.s32 4294967216, %v3443_v44 }
 0x174   : > { %825 = vadd.xlane.f32.xlu2 %v824_v24  ;;  %822 = vadd.xlane.f32.xlu1 %v821_v4  ;;  %v1459_v4 = vpack.c.bf16 %v1208_v50, %v1207_v15  ;;  %v2017_v24 = vsel %vm4638_vm3, %v2015_v22, %v2013_v11  ;;  %v833_v50 = vsel %vm430_vm0, %v308_v46, 0.0  ;;  %v830_v15 = vsel %vm430_vm0, %v307_v58, 0.0 }
 0x175   : > { %819 = vadd.xlane.f32.xlu0 %v818_v2  ;;  %v306_v2 = vld [vmem:[%s3023_s29 + $0x420] sm:$0xff]  ;;  %v2021_v22 = vsel %vm2020_vm4, %v2019_v61, %v2017_v24  ;;  %v3532_v46 = vadd.s32 4294967208, %v3443_v44  ;;  %v3535_v58 = vadd.s32 4294967224, %v3443_v44  ;;  %v1460_v52 = vpack.c.bf16 %v1210_v29, %v1209_v32 }
 0x176   : > { %v827_v11 = vsel %vm430_vm0, %v306_v2, 0.0  ;;  %v1755_v9 = vunpack.c.l.b16 %v1459_v4  ;;  %v2025_v2 = vsel %vm2024_vm5, %v2023_v10, %v2021_v22  ;;  %v310_v61 = vld [vmem:[%s3023_s29 + $0x440] sm:$0xff]  ;;  %v1220_v32 = vmul.f32 0.015625, %v3206_v33 }
 0x177   : > { %v3501_v40 = vpop.xlane.xlu2 %699  ;;  %v3503_v28 = vpop.xlane.xlu1 %696  ;;  %v842_v22 = vsel %vm430_vm0, %v311_v21, 0.0  ;;  %v839_v1 = vsel %vm430_vm0, %v310_v61, 0.0  ;;  %v1757_v10 = vunpack.c.l.b16 %v1460_v52  ;;  %v1213_v33 = vmul.f32 0.015625, %v3165_v0 }
 0x178   : > { %4690 = vst [vmem:[#allocation49_spill] sm:$0xff] %v3501_v40  ;;  %v3511_v49 = vpop.xlane.xlu0 %693  ;;  %v2027_v40 = vperm.slane %v1753_v25, %v3499_v26  ;;  %v1463_v25 = vpack.c.bf16 %v1216_v48, %v1215_v39  ;;  %v309_v39 = vld [vmem:[%s3023_s29 + $0x438] sm:$0xff]  ;;  %v1211_v48 = vmul.f32 0.015625, %v3170_v3  ;;  %v3566_v0 = vadd.s32 4294967200, %v3443_v44 }
 0x179   : > { %4691 = vst [vmem:[#allocation50_spill] sm:$0xff] %v3503_v28  ;;  %v1754_v28 = vunpack.c.h.b16 %v1458_v63  ;;  %v1218_v63 = vmul.f32 0.015625, %v3191_v19 }
 0x17a   : > { %4692 = vst [vmem:[#allocation51_spill] sm:$0xff] %v3511_v49  ;;  %v3523_v49 = vadd.s32 4294967232, %v3443_v44  ;;  %v2029_v24 = vsel %vm2028_vm6, %v2027_v40, %v2025_v2  ;;  %v1763_v40 = vunpack.c.l.b16 %v1463_v25  ;;  %v836_v2 = vsel %vm430_vm0, %v309_v39, 0.0  ;;  %v313_v39 = vld [vmem:[%s3023_s29 + $0x458] sm:$0xff] }
 0x17b   : > { %v2031_v19 = vperm.slane %v1754_v28, %v3509_v47  ;;  %v1219_v28 = vmul.f32 0.015625, %v3189_v18  ;;  %v1464_v29 = vpack.c.bf16 %v1218_v63, %v1217_v55  ;;  %v1461_v63 = vpack.c.bf16 %v1212_v34, %v1211_v48 }
 0x17c   : > { %834 = vadd.xlane.f32.xlu2 %v833_v50  ;;  %831 = vadd.xlane.f32.xlu1 %v830_v15  ;;  %v1756_v50 = vunpack.c.h.b16 %v1459_v4  ;;  %v2035_v15 = vperm.slane %v1755_v9, %v3523_v49  ;;  %v1764_v4 = vunpack.c.h.b16 %v1463_v25  ;;  %v1214_v55 = vmul.f32 0.015625, %v3182_v12 }
 0x17d   : > { %828 = vadd.xlane.f32.xlu0 %v827_v11  ;;  %v2033_v9 = vsel %vm4639_vm7, %v2031_v19, %v2029_v24  ;;  %v1765_v25 = vunpack.c.l.b16 %v1464_v29  ;;  %v1465_v21 = vpack.c.bf16 %v1220_v32, %v1219_v28  ;;  %v1758_v19 = vunpack.c.h.b16 %v1460_v52 }
 0x17e   : > { %v2037_v3 = vsel %vm2036_vm8, %v2035_v15, %v2033_v9  ;;  %v2039_v18 = vperm.slane %v1756_v50, %v3535_v58  ;;  %v2066_v61 = vperm.slane %v1763_v40, %v3443_v44  ;;  %v2067_v24 = vperm.slane %v1764_v4, %v3457_v38  ;;  %v314_v15 = vld [vmem:[%s3023_s29 + $0x460] sm:$0xff] }
 0x17f   : > { %v3544_v13 = vpop.xlane.xlu2 %708  ;;  %v3546_v8 = vpop.xlane.xlu1 %705  ;;  %v2043_v50 = vperm.slane %v1757_v10, %v3529_v56  ;;  %v1222_v34 = vmul.f32 0.015625, %v3201_v27  ;;  %v1221_v12 = vmul.f32 0.015625, %v3203_v30  ;;  %v3574_v48 = vadd.s32 4294967192, %v3443_v44 }
 0x180   : > { %4693 = vst [vmem:[#allocation52_spill] sm:$0xff] %v3544_v13  ;;  %v3552_v11 = vpop.xlane.xlu0 %702  ;;  %v2041_v52 = vsel %vm2040_vm9, %v2039_v18, %v2037_v3  ;;  %v3577_v28 = vadd.s32 4294967184, %v3443_v44  ;;  %v1766_v32 = vunpack.c.h.b16 %v1464_v29  ;;  %v3584_v27 = vpack.c.bf16 %v1214_v55, %v1213_v33 }
 0x181   : > { %4694 = vst [vmem:[#allocation53_spill] sm:$0xff] %v3552_v11  ;;  %v2069_v30 = vperm.slane %v1765_v25, %v3463_v51  ;;  %v1767_v9 = vunpack.c.l.b16 %v1465_v21  ;;  %v2068_v3 = vsel %vm2008_vm1, %v2067_v24, %v2066_v61  ;;  %v851_v18 = vsel %vm430_vm0, %v314_v15, 0.0  ;;  %v316_v15 = vld [vmem:[%s3023_s29 + $0x470] sm:$0xff] }
 0x182   : > { %v848_v29 = vsel %vm430_vm0, %v313_v39, 0.0  ;;  %v1466_v13 = vpack.c.bf16 %v1222_v34, %v1221_v12  ;;  %v2071_v55 = vperm.slane %v1766_v32, %v3479_v7  ;;  %v1768_v25 = vunpack.c.h.b16 %v1465_v21  ;;  %v317_v12 = vld [vmem:[%s3023_s29 + $0x478] sm:$0xff] }
 0x183   : > { %v1224_v11 = vmul.f32 0.015625, %v3215_v43  ;;  %v1761_v61 = vunpack.c.l.b16 %v3584_v27  ;;  %v2070_v24 = vsel %vm2012_vm2, %v2069_v30, %v2068_v3  ;;  %v3603_v43 = vadd.s32 4294967176, %v3443_v44 }
 0x184   : > { %843 = vadd.xlane.f32.xlu2 %v842_v22  ;;  %840 = vadd.xlane.f32.xlu1 %v839_v1  ;;  %v312_v22 = vld [vmem:[%s3023_s29 + $0x450] sm:$0xff]  ;;  %v1759_v1 = vunpack.c.l.b16 %v1461_v63  ;;  %v1769_v21 = vunpack.c.l.b16 %v1466_v13  ;;  %v1232_v34 = vmul.f32 0.015625, %v3254_v23  ;;  %v2075_v32 = vperm.slane %v1768_v25, %v3493_v31 }
 0x185   : > { %837 = vadd.xlane.f32.xlu0 %v836_v2  ;;  %v2047_v2 = vperm.slane %v1758_v19, %v3532_v46  ;;  %v845_v33 = vsel %vm430_vm0, %v312_v22, 0.0 }
 0x186   : > { %v2051_v19 = vperm.slane %v1759_v1, %v3566_v0 }
 0x187   : > { %v3579_v40 = vpop.xlane.xlu2 %717  ;;  %v3581_v4 = vpop.xlane.xlu1 %714 }
 0x188   : > { %4695 = vst [vmem:[#allocation54_spill] sm:$0xff] %v3579_v40  ;;  %v3587_v10 = vpop.xlane.xlu0 %711  ;;  %v2045_v40 = vsel %vm2044_vm10, %v2043_v50, %v2041_v52  ;;  %v1231_v50 = vmul.f32 0.015625, %v3237_v5  ;;  %v2072_v52 = vsel %vm4638_vm3, %v2071_v55, %v2070_v24  ;;  %v2059_v5 = vperm.slane %v1761_v61, %v3577_v28 }
 0x189   : > { %4696 = vst [vmem:[#allocation55_spill] sm:$0xff] %v3581_v4  ;;  %v1760_v4 = vunpack.c.h.b16 %v1461_v63  ;;  %v2073_v63 = vperm.slane %v1767_v9, %v3489_v37  ;;  %v315_v9 = vld [vmem:[%s3023_s29 + $0x468] sm:$0xff]  ;;  %v1226_v24 = vmul.f32 0.015625, %v3230_v60 }
 0x18a   : > { %4697 = vst [vmem:[#allocation56_spill] sm:$0xff] %v3587_v10  ;;  %v1223_v10 = vmul.f32 0.015625, %v3218_v45  ;;  %v2049_v45 = vsel %vm4642_vm11, %v2047_v2, %v2045_v40  ;;  %v1762_v2 = vunpack.c.h.b16 %v3584_v27  ;;  %v1471_v55 = vpack.c.bf16 %v1232_v34, %v1231_v50  ;;  %v320_v34 = vld [vmem:[%s3023_s29 + $0x490] sm:$0xff]  ;;  %v319_v60 = vld [vmem:[%s3023_s29 + $0x488] sm:$0xff] }
 0x18b   : > { %v2055_v39 = vperm.slane %v1760_v4, %v3574_v48  ;;  %v2053_v40 = vsel %vm2052_vm12, %v2051_v19, %v2049_v45  ;;  %v2074_v23 = vsel %vm2020_vm4, %v2073_v63, %v2072_v52  ;;  %v1234_v4 = vmul.f32 0.015625, %v3249_v17 }
 0x18c   : > { %852 = vadd.xlane.f32.xlu2 %v851_v18  ;;  %849 = vadd.xlane.f32.xlu1 %v848_v29  ;;  %v3613_v22 = vpack.c.bf16 %v1224_v11, %v1223_v10  ;;  %v1233_v18 = vmul.f32 0.015625, %v3251_v20  ;;  %v860_v29 = vsel %vm430_vm0, %v317_v12, 0.0  ;;  %v857_v11 = vsel %vm430_vm0, %v316_v15, 0.0 }
 0x18d   : > { %846 = vadd.xlane.f32.xlu0 %v845_v33  ;;  %v1770_v10 = vunpack.c.h.b16 %v1466_v13  ;;  %v2077_v33 = vperm.slane %v1769_v21, %v3499_v26  ;;  %v854_v25 = vsel %vm430_vm0, %v315_v9, 0.0  ;;  %v2076_v27 = vsel %vm2024_vm5, %v2075_v32, %v2074_v23  ;;  %v318_v9 = vld [vmem:[%s3023_s29 + $0x480] sm:$0xff] }
 0x18e   : > { %v1225_v19 = vmul.f32 0.015625, %v3213_v42  ;;  %v1771_v61 = vunpack.c.l.b16 %v3613_v22  ;;  %v1228_v17 = vmul.f32 0.015625, %v3225_v54  ;;  %v1227_v20 = vmul.f32 0.015625, %v3227_v57 }
 0x18f   : > { %v727_v1 = vpop.xlane.xlu2 %726  ;;  %v724_v30 = vpop.xlane.xlu1 %723  ;;  %v2057_v45 = vsel %vm2056_vm13, %v2055_v39, %v2053_v40  ;;  %v3633_v21 = vpack.c.bf16 %v1234_v4, %v1233_v18  ;;  %v2063_v54 = vperm.slane %v1762_v2, %v3603_v43  ;;  %v2079_v50 = vperm.slane %v1770_v10, %v3509_v47 }
 0x190   : > { %v721_v3 = vpop.xlane.xlu0 %720  ;;  %v1296_v13 = vmul.f32 0.015625, %v724_v30  ;;  %v2061_v42 = vsel %vm2060_vm14, %v2059_v5, %v2057_v45  ;;  %v1779_v57 = vunpack.c.l.b16 %v1471_v55  ;;  %v2078_v12 = vsel %vm2028_vm6, %v2077_v33, %v2076_v27 }
 0x191   : > { %v1295_v63 = vmul.f32 0.015625, %v721_v3  ;;  %v1772_v15 = vunpack.c.h.b16 %v3613_v22  ;;  %v1780_v52 = vunpack.c.h.b16 %v1471_v55  ;;  %v1297_v39 = vmul.f32 0.015625, %v727_v1 }
 0x192   : > { %v2081_v40 = vperm.slane %v1771_v61, %v3523_v49  ;;  %v3644_v23 = vpack.c.bf16 %v1228_v17, %v1227_v20  ;;  %v3646_v5 = vpack.c.bf16 %v1226_v24, %v1225_v19  ;;  %v1781_v4 = vunpack.c.l.b16 %v3633_v21 }
 0x193   : > { %v1503_v2 = vpack.c.bf16 %v1296_v13, %v1295_v63  ;;  %v866_v22 = vsel %vm430_vm0, %v319_v60, 0.0  ;;  %v2097_v1 = vperm.slane %v1779_v57, %v3443_v44  ;;  %v1235_v10 = vmul.f32 0.015625, %v3266_v41  ;;  %v322_v60 = vld [vmem:[%s3023_s29 + $0x4a0] sm:$0xff] }
 0x194   : > { %861 = vadd.xlane.f32.xlu2 %v860_v29  ;;  %858 = vadd.xlane.f32.xlu1 %v857_v11  ;;  %v869_v29 = vsel %vm430_vm0, %v320_v34, 0.0  ;;  %v1236_v11 = vmul.f32 0.015625, %v3263_v36  ;;  %v863_v33 = vsel %vm430_vm0, %v318_v9, 0.0  ;;  %v2098_v55 = vperm.slane %v1780_v52, %v3457_v38  ;;  %v323_v34 = vld [vmem:[%s3023_s29 + $0x4a8] sm:$0xff] }
 0x195   : > { %855 = vadd.xlane.f32.xlu0 %v854_v25  ;;  %v2080_v61 = vsel %vm4639_vm7, %v2079_v50, %v2078_v12  ;;  %v1843_v17 = vunpack.c.l.b16 %v1503_v2  ;;  %v1844_v20 = vunpack.c.h.b16 %v1503_v2  ;;  %v3658_v24 = vsel %vm2064_vm15, %v2063_v54, %v2061_v42 }
 0x196   : > { %v2082_v36 = vsel %vm2036_vm8, %v2081_v40, %v2080_v61  ;;  %v2083_v41 = vperm.slane %v1772_v15, %v3535_v58  ;;  %v1775_v63 = vunpack.c.l.b16 %v3644_v23  ;;  %v1776_v45 = vunpack.c.h.b16 %v3644_v23 }
 0x197   : > { %v736_v32 = vpop.xlane.xlu2 %735  ;;  %v733_v30 = vpop.xlane.xlu1 %732  ;;  %v1782_v50 = vunpack.c.h.b16 %v3633_v21  ;;  %v1473_v57 = vpack.c.bf16 %v1236_v11, %v1235_v10  ;;  %v1773_v12 = vunpack.c.l.b16 %v3646_v5  ;;  %v2100_v42 = vperm.slane %v1781_v4, %v3463_v51 }
 0x198   : > { %v730_v3 = vpop.xlane.xlu0 %729  ;;  %v1300_v25 = vmul.f32 0.015625, %v736_v32  ;;  %v1299_v27 = vmul.f32 0.015625, %v733_v30  ;;  %v2099_v54 = vsel %vm2008_vm1, %v2098_v55, %v2097_v1  ;;  %v321_v32 = vld [vmem:[%s3023_s29 + $0x498] sm:$0xff]  ;;  %v2221_v30 = vperm.slane %v1843_v17, %v3443_v44 }
 0x199   : > { %v1298_v18 = vmul.f32 0.015625, %v730_v3  ;;  %v2222_v9 = vperm.slane %v1844_v20, %v3457_v38  ;;  %v875_v4 = vsel %vm430_vm0, %v322_v60, 0.0  ;;  %v1783_v1 = vunpack.c.l.b16 %v1473_v57  ;;  %v325_v60 = vld [vmem:[%s3023_s29 + $0x4b8] sm:$0xff] }
 0x19a   : > { %v1505_v52 = vpack.c.bf16 %v1300_v25, %v1299_v27  ;;  %v872_v11 = vsel %vm430_vm0, %v321_v32, 0.0  ;;  %v2101_v10 = vsel %vm2012_vm2, %v2100_v42, %v2099_v54  ;;  %v2084_v27 = vsel %vm2040_vm9, %v2083_v41, %v2082_v36  ;;  %v326_v41 = vld [vmem:[%s3023_s29 + $0x4c0] sm:$0xff] }
 0x19b   : > { %v1504_v19 = vpack.c.bf16 %v1298_v18, %v1297_v39  ;;  %v878_v18 = vsel %vm430_vm0, %v323_v34, 0.0  ;;  %v2223_v61 = vsel %vm2008_vm1, %v2222_v9, %v2221_v30  ;;  %v3689_v20 = vperm.slane %v1776_v45, %v3574_v48  ;;  %v324_v30 = vld [vmem:[%s3023_s29 + $0x4b0] sm:$0xff] }
 0x19c   : > { %870 = vadd.xlane.f32.xlu2 %v869_v29  ;;  %867 = vadd.xlane.f32.xlu1 %v866_v22  ;;  %v2102_v29 = vperm.slane %v1782_v50, %v3479_v7  ;;  %v1237_v22 = vmul.f32 0.015625, %v3261_v35  ;;  %v1847_v55 = vunpack.c.l.b16 %v1505_v52  ;;  %v3686_v35 = vperm.slane %v1775_v63, %v3566_v0 }
 0x19d   : > { %v1845_v13 = vunpack.c.l.b16 %v1504_v19  ;;  %864 = vadd.xlane.f32.xlu0 %v863_v33  ;;  %v1846_v40 = vunpack.c.h.b16 %v1504_v19  ;;  %v1238_v33 = vmul.f32 0.015625, %v3278_v62  ;;  %v1774_v19 = vunpack.c.h.b16 %v3646_v5 }
 0x19e   : > { %v2085_v62 = vperm.slane %v1773_v12, %v3529_v56  ;;  %v2103_v5 = vsel %vm4638_vm3, %v2102_v29, %v2101_v10  ;;  %v2104_v50 = vperm.slane %v1783_v1, %v3489_v37  ;;  %v1848_v34 = vunpack.c.h.b16 %v1505_v52 }
 0x19f   : > { %v745_v39 = vpop.xlane.xlu2 %744  ;;  %v742_v15 = vpop.xlane.xlu1 %741  ;;  %v2224_v2 = vperm.slane %v1845_v13, %v3463_v51  ;;  %v2226_v17 = vperm.slane %v1846_v40, %v3479_v7  ;;  %v1784_v13 = vunpack.c.h.b16 %v1473_v57  ;;  %v1474_v42 = vpack.c.bf16 %v1238_v33, %v1237_v22 }
 0x1a0   : > { %v1302_v23 = vmul.f32 0.015625, %v742_v15  ;;  %v739_v21 = vpop.xlane.xlu0 %738  ;;  %v2228_v63 = vperm.slane %v1847_v55, %v3489_v37  ;;  %v1303_v54 = vmul.f32 0.015625, %v745_v39  ;;  %v1240_v12 = vmul.f32 0.015625, %v3273_v53 }
 0x1a1   : > { %v1301_v3 = vmul.f32 0.015625, %v739_v21  ;;  %v2225_v36 = vsel %vm2012_vm2, %v2224_v2, %v2223_v61  ;;  %v1239_v9 = vmul.f32 0.015625, %v3275_v59  ;;  %v887_v57 = vsel %vm430_vm0, %v326_v41, 0.0 }
 0x1a2   : > { %v2227_v40 = vsel %vm4638_vm3, %v2226_v17, %v2225_v36  ;;  %v2106_v39 = vperm.slane %v1784_v13, %v3493_v31  ;;  %v881_v29 = vsel %vm430_vm0, %v324_v30, 0.0  ;;  %v1785_v53 = vunpack.c.l.b16 %v1474_v42 }
 0x1a3   : > { %v1506_v25 = vpack.c.bf16 %v1302_v23, %v1301_v3  ;;  %v884_v3 = vsel %vm430_vm0, %v325_v60, 0.0  ;;  %v2229_v59 = vsel %vm2020_vm4, %v2228_v63, %v2227_v40  ;;  %v2105_v10 = vsel %vm2020_vm4, %v2104_v50, %v2103_v5  ;;  %v329_v5 = vld [vmem:[%s3023_s29 + $0x4d8] sm:$0xff]  ;;  %v328_v50 = vld [vmem:[%s3023_s29 + $0x4d0] sm:$0xff] }
 0x1a4   : > { %879 = vadd.xlane.f32.xlu2 %v878_v18  ;;  %876 = vadd.xlane.f32.xlu1 %v875_v4  ;;  %v2230_v18 = vperm.slane %v1848_v34, %v3493_v31  ;;  %v1475_v33 = vpack.c.bf16 %v1240_v12, %v1239_v9  ;;  %v1786_v55 = vunpack.c.h.b16 %v1474_v42  ;;  %v1242_v61 = vmul.f32 0.015625, %v3287_v14 }
 0x1a5   : > { %873 = vadd.xlane.f32.xlu0 %v872_v11  ;;  %v1849_v45 = vunpack.c.l.b16 %v1506_v25  ;;  %v1850_v4 = vunpack.c.h.b16 %v1506_v25  ;;  %v2087_v11 = vperm.slane %v1774_v19, %v3532_v46  ;;  %v2086_v25 = vsel %vm2044_vm10, %v2085_v62, %v2084_v27 }
 0x1a6   : > { %v1241_v41 = vmul.f32 0.015625, %v3290_v16  ;;  %v2231_v13 = vsel %vm2024_vm5, %v2230_v18, %v2229_v59  ;;  %v2107_v60 = vsel %vm2024_vm5, %v2106_v39, %v2105_v10  ;;  %v2108_v42 = vperm.slane %v1785_v53, %v3499_v26  ;;  %v4698_v53 = vld [vmem:[#allocation5_spill] sm:$0xff] }
 0x1a7   : > { %v754_v15 = vpop.xlane.xlu2 %753  ;;  %v751_v32 = vpop.xlane.xlu1 %750  ;;  %v2232_v22 = vperm.slane %v1849_v45, %v3499_v26  ;;  %v2234_v19 = vperm.slane %v1850_v4, %v3509_v47  ;;  %v1787_v45 = vunpack.c.l.b16 %v1475_v33  ;;  %v1788_v16 = vunpack.c.h.b16 %v1475_v33  ;;  %v332_v10 = vld [vmem:[%s3023_s29 + $0x4f0] sm:$0xff]  ;;  %v4699_v33 = vld [vmem:[#allocation6_spill] sm:$0xff] }
 0x1a8   : > { %v748_v23 = vpop.xlane.xlu0 %747  ;;  %v1306_v21 = vmul.f32 0.015625, %v754_v15  ;;  %v1305_v52 = vmul.f32 0.015625, %v751_v32  ;;  %v2110_v15 = vperm.slane %v1786_v55, %v3509_v47  ;;  %v896_v40 = vsel %vm430_vm0, %v329_v5, 0.0 }
 0x1a9   : > { %v1304_v2 = vmul.f32 0.015625, %v748_v23  ;;  %v2233_v27 = vsel %vm2028_vm6, %v2232_v22, %v2231_v13  ;;  %v893_v23 = vsel %vm430_vm0, %v328_v50, 0.0  ;;  %v2109_v39 = vsel %vm2028_vm6, %v2108_v42, %v2107_v60  ;;  %v4702_v50 = vld [vmem:[#allocation9_spill] sm:$0xff] }
 0x1aa   : > { %v1508_v17 = vpack.c.bf16 %v1306_v21, %v1305_v52  ;;  %v2235_v21 = vsel %vm4639_vm7, %v2234_v19, %v2233_v27  ;;  %v3736_v59 = vmul.f32 0.015625, %v4698_v53  ;;  %v2112_v22 = vperm.slane %v1787_v45, %v3523_v49 }
 0x1ab   : > { %v1507_v1 = vpack.c.bf16 %v1304_v2, %v1303_v54  ;;  %v327_v54 = vld [vmem:[%s3023_s29 + $0x4c8] sm:$0xff]  ;;  %v1243_v55 = vmul.f32 0.015625, %v4699_v33  ;;  %v1244_v60 = vmul.f32 0.015625, %v4702_v50 }
 0x1ac   : > { %888 = vadd.xlane.f32.xlu2 %v887_v57  ;;  %885 = vadd.xlane.f32.xlu1 %v884_v3  ;;  %v1853_v12 = vunpack.c.l.b16 %v1508_v17  ;;  %v1476_v57 = vpack.c.bf16 %v1242_v61, %v1241_v41  ;;  %v890_v2 = vsel %vm430_vm0, %v327_v54, 0.0  ;;  %v3730_v3 = vmul.f32 0.015625, %v3239_v6  ;;  %v4700_v41 = vld [vmem:[#allocation7_spill] sm:$0xff]  ;;  %v4704_v33 = vld [vmem:[#allocation12_spill] sm:$0xff] }
 0x1ad   : > { %v1851_v36 = vunpack.c.l.b16 %v1507_v1  ;;  %882 = vadd.xlane.f32.xlu0 %v881_v29  ;;  %v1852_v34 = vunpack.c.h.b16 %v1507_v1  ;;  %v2088_v29 = vsel %vm4642_vm11, %v2087_v11, %v2086_v25  ;;  %v1854_v1 = vunpack.c.h.b16 %v1508_v17  ;;  %v331_v17 = vld [vmem:[%s3023_s29 + $0x4e8] sm:$0xff]  ;;  %v330_v54 = vld [vmem:[%s3023_s29 + $0x4e0] sm:$0xff] }
 0x1ae   : > { %v2114_v6 = vperm.slane %v1788_v16, %v3535_v58  ;;  %v2240_v61 = vperm.slane %v1853_v12, %v3529_v56  ;;  %v2111_v11 = vsel %vm4639_vm7, %v2110_v15, %v2109_v39  ;;  %v1789_v25 = vunpack.c.l.b16 %v1476_v57 }
 0x1af   : > { %v2236_v14 = vperm.slane %v1851_v36, %v3523_v49  ;;  %v763_v62 = vpop.xlane.xlu2 %762  ;;  %v760_v63 = vpop.xlane.xlu1 %759  ;;  %v2238_v52 = vperm.slane %v1852_v34, %v3535_v58  ;;  %v1246_v13 = vmul.f32 0.015625, %v4700_v41  ;;  %v4701_v34 = vld [vmem:[#allocation8_spill] sm:$0xff]  ;;  %v2242_v45 = vperm.slane %v1854_v1, %v3532_v46  ;;  %v4703_v1 = vld [vmem:[#allocation11_spill] sm:$0xff] }
 0x1b0   : > { %v1308_v32 = vmul.f32 0.015625, %v760_v63  ;;  %v757_v30 = vpop.xlane.xlu0 %756  ;;  %v1245_v5 = vmul.f32 0.015625, %v4701_v34  ;;  %v1309_v42 = vmul.f32 0.015625, %v763_v62  ;;  %v905_v63 = vsel %vm430_vm0, %v332_v10, 0.0  ;;  %v335_v34 = vld [vmem:[%s3023_s29 + $0x508] sm:$0xff] }
 0x1b1   : > { %v1307_v9 = vmul.f32 0.015625, %v757_v30  ;;  %v2237_v18 = vsel %vm2036_vm8, %v2236_v14, %v2235_v21  ;;  %v2113_v62 = vsel %vm2036_vm8, %v2112_v22, %v2111_v11  ;;  %v1790_v21 = vunpack.c.h.b16 %v1476_v57 }
 0x1b2   : > { %v2239_v19 = vsel %vm2040_vm9, %v2238_v52, %v2237_v18  ;;  %v2116_v39 = vperm.slane %v1789_v25, %v3529_v56  ;;  %v3758_v18 = vpack.c.bf16 %v1246_v13, %v1245_v5  ;;  %v1248_v10 = vmul.f32 0.015625, %v4703_v1  ;;  %v334_v5 = vld [vmem:[%s3023_s29 + $0x500] sm:$0xff] }
 0x1b3   : > { %v1509_v4 = vpack.c.bf16 %v1308_v32, %v1307_v9  ;;  %v2241_v12 = vsel %vm2044_vm10, %v2240_v61, %v2239_v19  ;;  %v1247_v61 = vmul.f32 0.015625, %v4704_v33  ;;  %v3768_v22 = vsel %vm2052_vm12, %v3686_v35, %v2088_v29 }
 0x1b4   : > { %897 = vadd.xlane.f32.xlu2 %v896_v40  ;;  %894 = vadd.xlane.f32.xlu1 %v893_v23  ;;  %v902_v23 = vsel %vm430_vm0, %v331_v17, 0.0  ;;  %v2115_v41 = vsel %vm2040_vm9, %v2114_v6, %v2113_v62  ;;  %v2118_v13 = vperm.slane %v1790_v21, %v3532_v46  ;;  %v3795_v21 = vpack.c.bf16 %v3730_v3, %v3736_v59 }
 0x1b5   : > { %v1855_v36 = vunpack.c.l.b16 %v1509_v4  ;;  %891 = vadd.xlane.f32.xlu0 %v890_v2  ;;  %v1856_v16 = vunpack.c.h.b16 %v1509_v4  ;;  %v899_v2 = vsel %vm430_vm0, %v330_v54, 0.0  ;;  %v3760_v4 = vpack.c.bf16 %v1244_v60, %v1243_v55 }
 0x1b6   : > { %v2117_v50 = vsel %vm2044_vm10, %v2116_v39, %v2115_v41  ;;  %v1793_v60 = vunpack.c.l.b16 %v3758_v18  ;;  %v3781_v6 = vpack.c.bf16 %v1248_v10, %v1247_v61  ;;  %v4705_v10 = vld [vmem:[#allocation10_spill] sm:$0xff]  ;;  %v4706_v61 = vld [vmem:[#allocation15_spill] sm:$0xff] }
 0x1b7   : > { %v772_v27 = vpop.xlane.xlu2 %771  ;;  %v769_v14 = vpop.xlane.xlu1 %768  ;;  %v2244_v9 = vperm.slane %v1855_v36, %v3566_v0  ;;  %v2243_v36 = vsel %vm4642_vm11, %v2242_v45, %v2241_v12  ;;  %v2246_v57 = vperm.slane %v1856_v16, %v3574_v48  ;;  %v911_v12 = vsel %vm430_vm0, %v334_v5, 0.0  ;;  %v4708_v41 = vld [vmem:[#allocation26_spill] sm:$0xff] }
 0x1b8   : > { %v1312_v15 = vmul.f32 0.015625, %v772_v27  ;;  %v1311_v32 = vmul.f32 0.015625, %v769_v14  ;;  %v766_v30 = vpop.xlane.xlu0 %765  ;;  %v333_v14 = vld [vmem:[%s3023_s29 + $0x4f8] sm:$0xff]  ;;  %v1792_v1 = vunpack.c.h.b16 %v3760_v4  ;;  %v1249_v33 = vmul.f32 0.015625, %v4705_v10 }
 0x1b9   : > { %v1310_v40 = vmul.f32 0.015625, %v766_v30  ;;  %v2245_v55 = vsel %vm2052_vm12, %v2244_v9, %v2243_v36  ;;  %v914_v30 = vsel %vm430_vm0, %v335_v34, 0.0  ;;  %v908_v62 = vsel %vm430_vm0, %v333_v14, 0.0  ;;  %v4709_v34 = vld [vmem:[#allocation13_spill] sm:$0xff] }
 0x1ba   : > { %v1511_v52 = vpack.c.bf16 %v1312_v15, %v1311_v32  ;;  %v2247_v54 = vsel %vm2056_vm13, %v2246_v57, %v2245_v55  ;;  %v1250_v36 = vmul.f32 0.015625, %v4706_v61  ;;  %v1795_v59 = vunpack.c.l.b16 %v3781_v6  ;;  %v336_v14 = vld [vmem:[%s3023_s29 + $0x510] sm:$0xff] }
 0x1bb   : > { %v1510_v53 = vpack.c.bf16 %v1310_v40, %v1309_v42  ;;  %v1796_v55 = vunpack.c.h.b16 %v3781_v6  ;;  %v1252_v5 = vmul.f32 0.015625, %v4709_v34 }
 0x1bc   : > { %906 = vadd.xlane.f32.xlu2 %v905_v63  ;;  %903 = vadd.xlane.f32.xlu1 %v902_v23  ;;  %v1859_v19 = vunpack.c.l.b16 %v1511_v52  ;;  %v1860_v17 = vunpack.c.h.b16 %v1511_v52  ;;  %v1791_v63 = vunpack.c.l.b16 %v3760_v4  ;;  %v2119_v52 = vsel %vm4642_vm11, %v2118_v13, %v2117_v50 }
 0x1bd   : > { %v1857_v11 = vunpack.c.l.b16 %v1510_v53  ;;  %v1858_v25 = vunpack.c.h.b16 %v1510_v53  ;;  %900 = vadd.xlane.f32.xlu0 %v899_v2  ;;  %v1794_v2 = vunpack.c.h.b16 %v3758_v18  ;;  %v3800_v53 = vperm.slane %v1793_v60, %v3577_v28 }
 0x1be   : > { %v2252_v9 = vperm.slane %v1859_v19, %v3443_v44  ;;  %v2253_v40 = vperm.slane %v1860_v17, %v3457_v38  ;;  %v2120_v3 = vperm.slane %v1791_v63, %v3566_v0  ;;  %v1263_v4 = vmul.f32 0.015625, %v4708_v41  ;;  %v338_v19 = vld [vmem:[%s3023_s29 + $0x520] sm:$0xff]  ;;  %v337_v17 = vld [vmem:[%s3023_s29 + $0x518] sm:$0xff] }
 0x1bf   : > { %v2248_v35 = vperm.slane %v1857_v11, %v3577_v28  ;;  %v2250_v29 = vperm.slane %v1858_v25, %v3603_v43  ;;  %v781_v42 = vpop.xlane.xlu2 %780  ;;  %v778_v27 = vpop.xlane.xlu1 %777  ;;  %v4707_v11 = vld [vmem:[#allocation25_spill] sm:$0xff]  ;;  %v4710_v63 = vld [vmem:[#allocation14_spill] sm:$0xff]  ;;  %v3826_v10 = vperm.slane %v1794_v2, %v3603_v43  ;;  %v2122_v41 = vperm.slane %v1792_v1, %v3574_v48 }
 0x1c0   : > { %v1314_v45 = vmul.f32 0.015625, %v778_v27  ;;  %v775_v16 = vpop.xlane.xlu0 %774  ;;  %v1264_v25 = vmul.f32 0.015625, %v4707_v11  ;;  %v2254_v13 = vsel %vm2008_vm1, %v2253_v40, %v2252_v9  ;;  %v1315_v50 = vmul.f32 0.015625, %v781_v42  ;;  %v340_v1 = vld [vmem:[%s3023_s29 + $0x530] sm:$0xff] }
 0x1c1   : > { %v2249_v15 = vsel %vm2060_vm14, %v2248_v35, %v2247_v54  ;;  %v1313_v32 = vmul.f32 0.015625, %v775_v16  ;;  %v1251_v6 = vmul.f32 0.015625, %v4710_v63  ;;  %v3818_v54 = vpack.c.bf16 %v1250_v36, %v1249_v33  ;;  %v4711_v33 = vld [vmem:[#allocation29_spill] sm:$0xff]  ;;  %v4712_v36 = vld [vmem:[#allocation30_spill] sm:$0xff]  ;;  %v339_v63 = vld [vmem:[%s3023_s29 + $0x528] sm:$0xff] }
 0x1c2   : > { %v3790_v23 = vsel %vm2064_vm15, %v2250_v29, %v2249_v15  ;;  %v920_v42 = vsel %vm430_vm0, %v337_v17, 0.0  ;;  %v1487_v9 = vpack.c.bf16 %v1264_v25, %v1263_v4  ;;  %v1266_v61 = vmul.f32 0.015625, %v4711_v33 }
 0x1c3   : > { %v1512_v39 = vpack.c.bf16 %v1314_v45, %v1313_v32  ;;  %v2121_v11 = vsel %vm2052_vm12, %v2120_v3, %v2119_v52  ;;  %v2129_v2 = vperm.slane %v1796_v55, %v3457_v38  ;;  %v3834_v34 = vpack.c.bf16 %v1252_v5, %v1251_v6  ;;  %v4714_v5 = vld [vmem:[#allocation33_spill] sm:$0xff] }
 0x1c4   : > { %915 = vadd.xlane.f32.xlu2 %v914_v30  ;;  %912 = vadd.xlane.f32.xlu1 %v911_v12  ;;  %v923_v12 = vsel %vm430_vm0, %v338_v19, 0.0  ;;  %v1811_v52 = vunpack.c.l.b16 %v1487_v9  ;;  %v1812_v3 = vunpack.c.h.b16 %v1487_v9  ;;  %v1268_v6 = vmul.f32 0.015625, %v4714_v5 }
 0x1c5   : > { %v1861_v18 = vunpack.c.l.b16 %v1512_v39  ;;  %v1862_v57 = vunpack.c.h.b16 %v1512_v39  ;;  %909 = vadd.xlane.f32.xlu0 %v908_v62  ;;  %v917_v39 = vsel %vm430_vm0, %v336_v14, 0.0 }
 0x1c6   : > { %v2160_v33 = vperm.slane %v1812_v3, %v3457_v38  ;;  %v1799_v3 = vunpack.c.l.b16 %v3834_v34 }
 0x1c7   : > { %v2255_v60 = vperm.slane %v1861_v18, %v3463_v51  ;;  %v2257_v35 = vperm.slane %v1862_v57, %v3479_v7  ;;  %v790_v29 = vpop.xlane.xlu2 %789  ;;  %v787_v27 = vpop.xlane.xlu1 %786  ;;  %v1265_v18 = vmul.f32 0.015625, %v4712_v36  ;;  %v926_v36 = vsel %vm430_vm0, %v339_v63, 0.0 }
 0x1c8   : > { %v1318_v45 = vmul.f32 0.015625, %v790_v29  ;;  %v1317_v16 = vmul.f32 0.015625, %v787_v27  ;;  %v784_v15 = vpop.xlane.xlu0 %783 }
 0x1c9   : > { %v2256_v32 = vsel %vm2012_vm2, %v2255_v60, %v2254_v13  ;;  %v1316_v30 = vmul.f32 0.015625, %v784_v15  ;;  %v2128_v13 = vperm.slane %v1795_v59, %v3443_v44  ;;  %v341_v60 = vld [vmem:[%s3023_s29 + $0x538] sm:$0xff] }
 0x1ca   : > { %v2258_v40 = vsel %vm4638_vm3, %v2257_v35, %v2256_v32  ;;  %v1514_v62 = vpack.c.bf16 %v1318_v45, %v1317_v16  ;;  %v1488_v35 = vpack.c.bf16 %v1266_v61, %v1265_v18  ;;  %v4713_v45 = vld [vmem:[#allocation28_spill] sm:$0xff]  ;;  %v932_v9 = vsel %vm430_vm0, %v341_v60, 0.0 }
 0x1cb   : > { %v1513_v57 = vpack.c.bf16 %v1316_v30, %v1315_v50  ;;  %v1797_v50 = vunpack.c.l.b16 %v3818_v54  ;;  %v1267_v16 = vmul.f32 0.015625, %v4713_v45  ;;  %v3854_v18 = vsel %vm2056_vm13, %v2122_v41, %v2121_v11 }
 0x1cc   : > { %v1865_v25 = vunpack.c.l.b16 %v1514_v62  ;;  %v1866_v4 = vunpack.c.h.b16 %v1514_v62  ;;  %924 = vadd.xlane.f32.xlu2 %v923_v12  ;;  %921 = vadd.xlane.f32.xlu1 %v920_v42  ;;  %v929_v62 = vsel %vm430_vm0, %v340_v1, 0.0  ;;  %v1798_v60 = vunpack.c.h.b16 %v3818_v54 }
 0x1cd   : > { %v1863_v19 = vunpack.c.l.b16 %v1513_v57  ;;  %v1864_v17 = vunpack.c.h.b16 %v1513_v57  ;;  %918 = vadd.xlane.f32.xlu0 %v917_v39  ;;  %v2159_v39 = vperm.slane %v1811_v52, %v3443_v44  ;;  %v1813_v57 = vunpack.c.l.b16 %v1488_v35 }
 0x1ce   : > { %v2263_v29 = vperm.slane %v1865_v25, %v3499_v26  ;;  %v2265_v15 = vperm.slane %v1866_v4, %v3509_v47  ;;  %v2130_v4 = vsel %vm2008_vm1, %v2129_v2, %v2128_v13  ;;  %v2131_v1 = vperm.slane %v1797_v50, %v3463_v51  ;;  %v4715_v13 = vld [vmem:[#allocation31_spill] sm:$0xff] }
 0x1cf   : > { %v2259_v27 = vperm.slane %v1863_v19, %v3489_v37  ;;  %v2261_v59 = vperm.slane %v1864_v17, %v3493_v31  ;;  %v799_v55 = vpop.xlane.xlu2 %798  ;;  %v796_v14 = vpop.xlane.xlu1 %795  ;;  %v1814_v19 = vunpack.c.h.b16 %v1488_v35  ;;  %v1489_v17 = vpack.c.bf16 %v1268_v6, %v1267_v16  ;;  %v4716_v35 = vld [vmem:[#allocation32_spill] sm:$0xff] }
 0x1d0   : > { %v1320_v32 = vmul.f32 0.015625, %v796_v14  ;;  %v793_v30 = vpop.xlane.xlu0 %792  ;;  %v1270_v2 = vmul.f32 0.015625, %v4715_v13  ;;  %v343_v14 = vld [vmem:[%s3023_s29 + $0x548] sm:$0xff]  ;;  %v2162_v63 = vperm.slane %v1813_v57, %v3463_v51  ;;  %v1321_v45 = vmul.f32 0.015625, %v799_v55 }
 0x1d1   : > { %v2260_v12 = vsel %vm2020_vm4, %v2259_v27, %v2258_v40  ;;  %v1319_v42 = vmul.f32 0.015625, %v793_v30  ;;  %v1269_v27 = vmul.f32 0.015625, %v4716_v35  ;;  %v2164_v50 = vperm.slane %v1814_v19, %v3479_v7 }
 0x1d2   : > { %v2262_v61 = vsel %vm2024_vm5, %v2261_v59, %v2260_v12  ;;  %v344_v59 = vld [vmem:[%s3023_s29 + $0x550] sm:$0xff]  ;;  %v938_v55 = vsel %vm430_vm0, %v343_v14, 0.0  ;;  %v1816_v19 = vunpack.c.h.b16 %v1489_v17 }
 0x1d3   : > { %v2264_v25 = vsel %vm2028_vm6, %v2263_v29, %v2262_v61  ;;  %v1515_v40 = vpack.c.bf16 %v1320_v32, %v1319_v42  ;;  %v2161_v29 = vsel %vm2008_vm1, %v2160_v33, %v2159_v39  ;;  %v1815_v32 = vunpack.c.l.b16 %v1489_v17 }
 0x1d4   : > { %v2266_v52 = vsel %vm4639_vm7, %v2265_v15, %v2264_v25  ;;  %933 = vadd.xlane.f32.xlu2 %v932_v9  ;;  %930 = vadd.xlane.f32.xlu1 %v929_v62  ;;  %v342_v15 = vld [vmem:[%s3023_s29 + $0x540] sm:$0xff]  ;;  %v941_v39 = vsel %vm430_vm0, %v344_v59, 0.0  ;;  %v1490_v33 = vpack.c.bf16 %v1270_v2, %v1269_v27  ;;  %v2133_v25 = vperm.slane %v1798_v60, %v3479_v7  ;;  %v4718_v27 = vld [vmem:[#allocation18_spill] sm:$0xff] }
 0x1d5   : > { %v1867_v11 = vunpack.c.l.b16 %v1515_v40  ;;  %v1868_v41 = vunpack.c.h.b16 %v1515_v40  ;;  %927 = vadd.xlane.f32.xlu0 %v926_v36  ;;  %v935_v57 = vsel %vm430_vm0, %v342_v15, 0.0  ;;  %v2163_v40 = vsel %vm2012_vm2, %v2162_v63, %v2161_v29  ;;  %v4719_v63 = vld [vmem:[#allocation35_spill] sm:$0xff] }
 0x1d6   : > { %v2166_v13 = vperm.slane %v1815_v32, %v3489_v37  ;;  %v2132_v2 = vsel %vm2012_vm2, %v2131_v1, %v2130_v4  ;;  %v1253_v14 = vmul.f32 0.015625, %v4718_v27  ;;  %v2165_v17 = vsel %vm4638_vm3, %v2164_v50, %v2163_v40  ;;  %v346_v15 = vld [vmem:[%s3023_s29 + $0x560] sm:$0xff] }
 0x1d7   : > { %v2267_v16 = vperm.slane %v1867_v11, %v3523_v49  ;;  %v2269_v54 = vperm.slane %v1868_v41, %v3535_v58  ;;  %v808_v5 = vpop.xlane.xlu2 %807  ;;  %v805_v6 = vpop.xlane.xlu1 %804  ;;  %v4717_v41 = vld [vmem:[#allocation17_spill] sm:$0xff]  ;;  %v1817_v29 = vunpack.c.l.b16 %v1490_v33  ;;  %v2168_v32 = vperm.slane %v1816_v19, %v3493_v31 }
 0x1d8   : > { %v1324_v30 = vmul.f32 0.015625, %v808_v5  ;;  %v1323_v12 = vmul.f32 0.015625, %v805_v6  ;;  %v802_v42 = vpop.xlane.xlu0 %801  ;;  %v347_v6 = vld [vmem:[%s3023_s29 + $0x568] sm:$0xff]  ;;  %v2167_v50 = vsel %vm2020_vm4, %v2166_v13, %v2165_v17  ;;  %v1800_v13 = vunpack.c.h.b16 %v3834_v34  ;;  %v4721_v17 = vld [vmem:[#allocation34_spill] sm:$0xff] }
 0x1d9   : > { %v2268_v9 = vsel %vm2036_vm8, %v2267_v16, %v2266_v52  ;;  %v1322_v62 = vmul.f32 0.015625, %v802_v42  ;;  %v1254_v52 = vmul.f32 0.015625, %v4717_v41  ;;  %v950_v19 = vsel %vm430_vm0, %v347_v6, 0.0 }
 0x1da   : > { %v2270_v61 = vsel %vm2040_vm9, %v2269_v54, %v2268_v9  ;;  %v1517_v36 = vpack.c.bf16 %v1324_v30, %v1323_v12  ;;  %v4720_v54 = vld [vmem:[#allocation36_spill] sm:$0xff]  ;;  %v345_v9 = vld [vmem:[%s3023_s29 + $0x558] sm:$0xff]  ;;  %v2170_v41 = vperm.slane %v1817_v29, %v3499_v26  ;;  %v1273_v29 = vmul.f32 0.015625, %v4721_v17 }
 0x1db   : > { %v1516_v11 = vpack.c.bf16 %v1322_v62, %v1321_v45  ;;  %v1272_v45 = vmul.f32 0.015625, %v4719_v63  ;;  %v1271_v5 = vmul.f32 0.015625, %v4720_v54  ;;  %v1818_v62 = vunpack.c.h.b16 %v1490_v33  ;;  %v4722_v63 = vld [vmem:[#allocation39_spill] sm:$0xff] }
 0x1dc   : > { %v1871_v35 = vunpack.c.l.b16 %v1517_v36  ;;  %v1872_v59 = vunpack.c.h.b16 %v1517_v36  ;;  %942 = vadd.xlane.f32.xlu2 %v941_v39  ;;  %939 = vadd.xlane.f32.xlu1 %v938_v55  ;;  %v944_v33 = vsel %vm430_vm0, %v345_v9, 0.0  ;;  %v3911_v6 = vpack.c.bf16 %v1254_v52, %v1253_v14  ;;  %v349_v9 = vld [vmem:[%s3023_s29 + $0x578] sm:$0xff] }
 0x1dd   : > { %v1869_v60 = vunpack.c.l.b16 %v1516_v11  ;;  %v1870_v16 = vunpack.c.h.b16 %v1516_v11  ;;  %936 = vadd.xlane.f32.xlu0 %v935_v57  ;;  %v947_v11 = vsel %vm430_vm0, %v346_v15, 0.0  ;;  %v2172_v34 = vperm.slane %v1818_v62, %v3509_v47 }
 0x1de   : > { %v2275_v30 = vperm.slane %v1871_v35, %v3566_v0  ;;  %v2277_v39 = vperm.slane %v1872_v59, %v3574_v48  ;;  %v1491_v35 = vpack.c.bf16 %v1272_v45, %v1271_v5  ;;  %v2169_v59 = vsel %vm2024_vm5, %v2168_v32, %v2167_v50  ;;  %v4724_v50 = vld [vmem:[#allocation38_spill] sm:$0xff] }
 0x1df   : > { %v2271_v4 = vperm.slane %v1869_v60, %v3529_v56  ;;  %v2273_v1 = vperm.slane %v1870_v16, %v3532_v46  ;;  %v817_v12 = vpop.xlane.xlu2 %816  ;;  %v814_v42 = vpop.xlane.xlu1 %813  ;;  %v1274_v45 = vmul.f32 0.015625, %v4722_v63  ;;  %v2134_v5 = vsel %vm4638_vm3, %v2133_v25, %v2132_v2 }
 0x1e0   : > { %v1326_v55 = vmul.f32 0.015625, %v814_v42  ;;  %v811_v36 = vpop.xlane.xlu0 %810  ;;  %v350_v42 = vld [vmem:[%s3023_s29 + $0x580] sm:$0xff] }
 0x1e1   : > { %v2272_v57 = vsel %vm2044_vm10, %v2271_v4, %v2270_v61  ;;  %v1325_v40 = vmul.f32 0.015625, %v811_v36  ;;  %v2135_v61 = vperm.slane %v1799_v3, %v3489_v37  ;;  %v2171_v3 = vsel %vm2028_vm6, %v2170_v41, %v2169_v59  ;;  %v4723_v4 = vld [vmem:[#allocation37_spill] sm:$0xff] }
 0x1e2   : > { %v2274_v27 = vsel %vm4642_vm11, %v2273_v1, %v2272_v57  ;;  %v1276_v1 = vmul.f32 0.015625, %v4723_v4  ;;  %v348_v36 = vld [vmem:[%s3023_s29 + $0x570] sm:$0xff]  ;;  %v1820_v57 = vunpack.c.h.b16 %v1491_v35  ;;  %v956_v59 = vsel %vm430_vm0, %v349_v9, 0.0 }
 0x1e3   : > { %v2276_v60 = vsel %vm2052_vm12, %v2275_v30, %v2274_v27  ;;  %v1518_v16 = vpack.c.bf16 %v1326_v55, %v1325_v40  ;;  %v1819_v30 = vunpack.c.l.b16 %v1491_v35  ;;  %v1327_v55 = vmul.f32 0.015625, %v817_v12 }
 0x1e4   : > { %v2278_v54 = vsel %vm2056_vm13, %v2277_v39, %v2276_v60  ;;  %951 = vadd.xlane.f32.xlu2 %v950_v19  ;;  %948 = vadd.xlane.f32.xlu1 %v947_v11  ;;  %v1275_v39 = vmul.f32 0.015625, %v4724_v50  ;;  %v1492_v40 = vpack.c.bf16 %v1274_v45, %v1273_v29  ;;  %v953_v17 = vsel %vm430_vm0, %v348_v36, 0.0  ;;  %v352_v50 = vld [vmem:[%s3023_s29 + $0x590] sm:$0xff] }
 0x1e5   : > { %v1873_v15 = vunpack.c.l.b16 %v1518_v16  ;;  %v1874_v32 = vunpack.c.h.b16 %v1518_v16  ;;  %945 = vadd.xlane.f32.xlu0 %v944_v33  ;;  %v959_v33 = vsel %vm430_vm0, %v350_v42, 0.0  ;;  %v2174_v12 = vperm.slane %v1819_v30, %v3523_v49 }
 0x1e6   : > { %v2125_v35 = vsel %vm2060_vm14, %v3800_v53, %v3854_v18  ;;  %v2137_v29 = vperm.slane %v1800_v13, %v3493_v31  ;;  %v1493_v63 = vpack.c.bf16 %v1276_v1, %v1275_v39  ;;  %v1801_v4 = vunpack.c.l.b16 %v3911_v6  ;;  %v353_v1 = vld [vmem:[%s3023_s29 + $0x598] sm:$0xff] }
 0x1e7   : > { %v2279_v25 = vperm.slane %v1873_v15, %v3577_v28  ;;  %v2281_v52 = vperm.slane %v1874_v32, %v3603_v43  ;;  %v826_v2 = vpop.xlane.xlu2 %825  ;;  %v823_v14 = vpop.xlane.xlu1 %822  ;;  %v1821_v15 = vunpack.c.l.b16 %v1492_v40  ;;  %v2173_v42 = vsel %vm4639_vm7, %v2172_v34, %v2171_v3 }
 0x1e8   : > { %v1330_v62 = vmul.f32 0.015625, %v826_v2  ;;  %v1329_v19 = vmul.f32 0.015625, %v823_v14  ;;  %v820_v11 = vpop.xlane.xlu0 %819  ;;  %v1802_v18 = vunpack.c.h.b16 %v3911_v6  ;;  %v2175_v13 = vsel %vm2036_vm8, %v2174_v12, %v2173_v42  ;;  %v351_v2 = vld [vmem:[%s3023_s29 + $0x588] sm:$0xff]  ;;  %v4726_v12 = vld [vmem:[#allocation42_spill] sm:$0xff] }
 0x1e9   : > { %v2280_v41 = vsel %vm2060_vm14, %v2279_v25, %v2278_v54  ;;  %v1328_v27 = vmul.f32 0.015625, %v820_v11  ;;  %v2136_v54 = vsel %vm2020_vm4, %v2135_v61, %v2134_v5  ;;  %v2176_v61 = vperm.slane %v1820_v57, %v3535_v58 }
 0x1ea   : > { %v3927_v60 = vsel %vm2064_vm15, %v2281_v52, %v2280_v41  ;;  %v1520_v16 = vpack.c.bf16 %v1330_v62, %v1329_v19  ;;  %v1823_v39 = vunpack.c.l.b16 %v1493_v63  ;;  %v1824_v14 = vunpack.c.h.b16 %v1493_v63 }
 0x1eb   : > { %v1519_v45 = vpack.c.bf16 %v1328_v27, %v1327_v55  ;;  %v1822_v6 = vunpack.c.h.b16 %v1492_v40  ;;  %v2178_v36 = vperm.slane %v1821_v15, %v3529_v56  ;;  %v968_v41 = vsel %vm430_vm0, %v353_v1, 0.0  ;;  %v4728_v1 = vld [vmem:[#allocation21_spill] sm:$0xff] }
 0x1ec   : > { %v1877_v32 = vunpack.c.l.b16 %v1520_v16  ;;  %v1878_v30 = vunpack.c.h.b16 %v1520_v16  ;;  %960 = vadd.xlane.f32.xlu2 %v959_v33  ;;  %957 = vadd.xlane.f32.xlu1 %v956_v59  ;;  %v965_v27 = vsel %vm430_vm0, %v352_v50, 0.0  ;;  %v4725_v33 = vld [vmem:[#allocation41_spill] sm:$0xff]  ;;  %v1277_v16 = vmul.f32 0.015625, %v4726_v12 }
 0x1ed   : > { %v1875_v9 = vunpack.c.l.b16 %v1519_v45  ;;  %v1876_v53 = vunpack.c.h.b16 %v1519_v45  ;;  %954 = vadd.xlane.f32.xlu0 %v953_v17  ;;  %v1278_v59 = vmul.f32 0.015625, %v4725_v33  ;;  %v962_v63 = vsel %vm430_vm0, %v351_v2, 0.0 }
 0x1ee   : > { %v2286_v5 = vperm.slane %v1877_v32, %v3463_v51  ;;  %v2288_v55 = vperm.slane %v1878_v30, %v3479_v7  ;;  %v3957_v40 = vsel %vm2064_vm15, %v3826_v10, %v2125_v35  ;;  %v2138_v45 = vsel %vm2024_vm5, %v2137_v29, %v2136_v54  ;;  %v4727_v30 = vld [vmem:[#allocation16_spill] sm:$0xff] }
 0x1ef   : > { %v2283_v25 = vperm.slane %v1875_v9, %v3443_v44  ;;  %v2284_v34 = vperm.slane %v1876_v53, %v3457_v38  ;;  %v835_v3 = vpop.xlane.xlu2 %834  ;;  %v832_v52 = vpop.xlane.xlu1 %831  ;;  %v1255_v42 = vmul.f32 0.015625, %v4727_v30  ;;  %v2139_v9 = vperm.slane %v1801_v4, %v3499_v26 }
 0x1f0   : > { %v1332_v62 = vmul.f32 0.015625, %v832_v52  ;;  %v829_v57 = vpop.xlane.xlu0 %828  ;;  %v2177_v53 = vsel %vm2040_vm9, %v2176_v61, %v2175_v13  ;;  %v3966_v10 = vperm.slane %v1802_v18, %v3509_v47  ;;  %v1256_v50 = vmul.f32 0.015625, %v4728_v1  ;;  %v356_v61 = vld [vmem:[%s3023_s29 + $0x5b0] sm:$0xff] }
 0x1f1   : > { %v2285_v19 = vsel %vm2008_vm1, %v2284_v34, %v2283_v25  ;;  %v1331_v11 = vmul.f32 0.015625, %v829_v57  ;;  %v2179_v35 = vsel %vm2044_vm10, %v2178_v36, %v2177_v53  ;;  %v2184_v4 = vperm.slane %v1824_v14, %v3574_v48  ;;  %v355_v25 = vld [vmem:[%s3023_s29 + $0x5a8] sm:$0xff]  ;;  %v354_v57 = vld [vmem:[%s3023_s29 + $0x5a0] sm:$0xff] }
 0x1f2   : > { %v2287_v17 = vsel %vm2012_vm2, %v2286_v5, %v2285_v19  ;;  %v2180_v5 = vperm.slane %v1822_v6, %v3532_v46  ;;  %v1494_v13 = vpack.c.bf16 %v1278_v59, %v1277_v16  ;;  %v4729_v34 = vld [vmem:[#allocation40_spill] sm:$0xff]  ;;  %v1333_v2 = vmul.f32 0.015625, %v835_v3 }
 0x1f3   : > { %v2289_v15 = vsel %vm4638_vm3, %v2288_v55, %v2287_v17  ;;  %v1521_v32 = vpack.c.bf16 %v1332_v62, %v1331_v11  ;;  %v2182_v55 = vperm.slane %v1823_v39, %v3566_v0  ;;  %v1279_v52 = vmul.f32 0.015625, %v4729_v34  ;;  %v4730_v11 = vld [vmem:[#allocation45_spill] sm:$0xff] }
 0x1f4   : > { %969 = vadd.xlane.f32.xlu2 %v968_v41  ;;  %966 = vadd.xlane.f32.xlu1 %v965_v27  ;;  %v2181_v19 = vsel %vm4642_vm11, %v2180_v5, %v2179_v35  ;;  %v1280_v41 = vmul.f32 0.015625, %v4730_v11  ;;  %vm4641_vm3 = vcmask 1041409   ;;  %v977_v3 = vsel %vm430_vm0, %v356_v61, 0.0  ;;  %v4731_v5 = vld [vmem:[#allocation43_spill] sm:$0xff] }
 0x1f5   : > { %v1879_v29 = vunpack.c.l.b16 %v1521_v32  ;;  %v1880_v54 = vunpack.c.h.b16 %v1521_v32  ;;  %963 = vadd.xlane.f32.xlu0 %v962_v63  ;;  %v974_v12 = vsel %vm430_vm0, %v355_v25, 0.0  ;;  %v1825_v16 = vunpack.c.l.b16 %v1494_v13  ;;  %v4733_v25 = vld [vmem:[#allocation19_spill] sm:$0xff] }
 0x1f6   : > { %v971_v32 = vsel %vm430_vm0, %v354_v57, 0.0  ;;  %v2183_v30 = vsel %vm2052_vm12, %v2182_v55, %v2181_v19  ;;  %v1826_v53 = vunpack.c.h.b16 %v1494_v13  ;;  %v1282_v35 = vmul.f32 0.015625, %v4731_v5  ;;  %v359_v19 = vld [vmem:[%s3023_s29 + $0x5c8] sm:$0xff]  ;;  %v358_v11 = vld [vmem:[%s3023_s29 + $0x5c0] sm:$0xff] }
 0x1f7   : > { %v2290_v18 = vperm.slane %v1879_v29, %v3489_v37  ;;  %v2292_v6 = vperm.slane %v1880_v54, %v3493_v31  ;;  %v844_v36 = vpop.xlane.xlu2 %843  ;;  %v841_v62 = vpop.xlane.xlu1 %840  ;;  %v4732_v54 = vld [vmem:[#allocation44_spill] sm:$0xff]  ;;  %v1495_v1 = vpack.c.bf16 %v1280_v41, %v1279_v52  ;;  %v2140_v13 = vsel %vm2028_vm6, %v2139_v9, %v2138_v45 }
 0x1f8   : > { %v1336_v39 = vmul.f32 0.015625, %v844_v36  ;;  %v1335_v27 = vmul.f32 0.015625, %v841_v62  ;;  %v838_v14 = vpop.xlane.xlu0 %837  ;;  %v2185_v57 = vsel %vm2056_vm13, %v2184_v4, %v2183_v30  ;;  %v2186_v52 = vperm.slane %v1825_v16, %v3577_v28  ;;  %v4735_v30 = vld [vmem:[#allocation47_spill] sm:$0xff]  ;;  %v4736_v5 = vld [vmem:[#allocation48_spill] sm:$0xff] }
 0x1f9   : > { %v2291_v33 = vsel %vm2020_vm4, %v2290_v18, %v2289_v15  ;;  %v1334_v59 = vmul.f32 0.015625, %v838_v14  ;;  %v1281_v15 = vmul.f32 0.015625, %v4732_v54  ;;  %v1258_v18 = vmul.f32 0.015625, %v4733_v25 }
 0x1fa   : > { %v2293_v17 = vsel %vm2024_vm5, %v2292_v6, %v2291_v33  ;;  %v1523_v63 = vpack.c.bf16 %v1336_v39, %v1335_v27  ;;  %v4734_v6 = vld [vmem:[#allocation20_spill] sm:$0xff]  ;;  %v2188_v41 = vperm.slane %v1826_v53, %v3603_v43  ;;  %v1284_v53 = vmul.f32 0.015625, %v4735_v30 }
 0x1fb   : > { %v1522_v29 = vpack.c.bf16 %v1334_v59, %v1333_v2  ;;  %v1257_v36 = vmul.f32 0.015625, %v4734_v6  ;;  %v3991_v2 = vpack.c.bf16 %v1256_v50, %v1255_v42  ;;  %v4002_v45 = vpack.c.bf16 %v1282_v35, %v1281_v15 }
 0x1fc   : > { %v1883_v61 = vunpack.c.l.b16 %v1523_v63  ;;  %v1884_v34 = vunpack.c.h.b16 %v1523_v63  ;;  %978 = vadd.xlane.f32.xlu2 %v977_v3  ;;  %975 = vadd.xlane.f32.xlu1 %v974_v12  ;;  %v357_v3 = vld [vmem:[%s3023_s29 + $0x5b8] sm:$0xff]  ;;  %v1827_v42 = vunpack.c.l.b16 %v1495_v1  ;;  %v986_v63 = vsel %vm430_vm0, %v359_v19, 0.0 }
 0x1fd   : > { %v1881_v62 = vunpack.c.l.b16 %v1522_v29  ;;  %v1882_v55 = vunpack.c.h.b16 %v1522_v29  ;;  %972 = vadd.xlane.f32.xlu0 %v971_v32  ;;  %v983_v32 = vsel %vm430_vm0, %v358_v11, 0.0  ;;  %v1283_v29 = vmul.f32 0.015625, %v4736_v5 }
 0x1fe   : > { %v2298_v39 = vperm.slane %v1883_v61, %v3523_v49  ;;  %v2300_v9 = vperm.slane %v1884_v34, %v3535_v58  ;;  %v980_v35 = vsel %vm430_vm0, %v357_v3, 0.0  ;;  %v2187_v15 = vsel %vm2060_vm14, %v2186_v52, %v2185_v57  ;;  %v360_v3 = vld [vmem:[%s3023_s29 + $0x5d0] sm:$0xff] }
 0x1ff   : > { %v2294_v27 = vperm.slane %v1881_v62, %v3499_v26  ;;  %v2296_v14 = vperm.slane %v1882_v55, %v3509_v47  ;;  %v853_v33 = vpop.xlane.xlu2 %852  ;;  %v850_v59 = vpop.xlane.xlu1 %849  ;;  %v1828_v61 = vunpack.c.h.b16 %v1495_v1  ;;  %v4016_v25 = vsel %vm4639_vm7, %v3966_v10, %v2140_v13 }
 0x200   : > { %v1338_v50 = vmul.f32 0.015625, %v850_v59  ;;  %v847_v4 = vpop.xlane.xlu0 %846  ;;  %v1829_v6 = vunpack.c.l.b16 %v4002_v45  ;;  %v2532_v55 = vsel %vm4641_vm3, %v3957_v40, %v3658_v24  ;;  %v4023_v1 = vpack.c.bf16 %v1258_v18, %v1257_v36 }
 0x201   : > { %v2295_v12 = vsel %vm2028_vm6, %v2294_v27, %v2293_v17  ;;  %v1337_v16 = vmul.f32 0.015625, %v847_v4  ;;  %v1803_v57 = vunpack.c.l.b16 %v3991_v2  ;;  %v2189_v10 = vsel %vm2064_vm15, %v2188_v41, %v2187_v15  ;;  %v361_v27 = vld [vmem:[%s3023_s29 + $0x5d8] sm:$0xff] }
 0x202   : > { %v2297_v54 = vsel %vm4639_vm7, %v2296_v14, %v2295_v12  ;;  %v2190_v13 = vperm.slane %v1827_v42, %v3443_v44  ;;  %v4028_v11 = vpack.c.bf16 %v1284_v53, %v1283_v29  ;;  %vm4640_vm7 = vcmask 1042434   ;;  %v4737_v15 = vld [vmem:[#allocation46_spill] sm:$0xff] }
 0x203   : > { %v2299_v34 = vsel %vm2036_vm8, %v2298_v39, %v2297_v54  ;;  %v1524_v17 = vpack.c.bf16 %v1338_v50, %v1337_v16  ;;  %v362_v39 = vld [vmem:[%s3023_s29 + $0x5e0] sm:$0xff]  ;;  %v2191_v14 = vperm.slane %v1828_v61, %v3457_v38  ;;  %v1339_v24 = vmul.f32 0.015625, %v853_v33 }
 0x204   : > { %v2301_v62 = vsel %vm2040_vm9, %v2300_v9, %v2299_v34  ;;  %987 = vadd.xlane.f32.xlu2 %v986_v63  ;;  %984 = vadd.xlane.f32.xlu1 %v983_v32  ;;  %v1830_v9 = vunpack.c.h.b16 %v4002_v45  ;;  %v2193_v41 = vperm.slane %v1829_v6, %v3463_v51  ;;  %v995_v63 = vsel %vm430_vm0, %v362_v39, 0.0  ;;  %v4738_v34 = vld [vmem:[#allocation51_spill] sm:$0xff] }
 0x205   : > { %v1885_v52 = vunpack.c.l.b16 %v1524_v17  ;;  %v1886_v19 = vunpack.c.h.b16 %v1524_v17  ;;  %981 = vadd.xlane.f32.xlu0 %v980_v35  ;;  %v992_v33 = vsel %vm430_vm0, %v361_v27, 0.0  ;;  %v1831_v32 = vunpack.c.l.b16 %v4028_v11 }
 0x206   : > { %v989_v5 = vsel %vm430_vm0, %v360_v3, 0.0  ;;  %v1805_v45 = vunpack.c.l.b16 %v4023_v1  ;;  %v1804_v29 = vunpack.c.h.b16 %v3991_v2  ;;  %v2192_v54 = vsel %vm2008_vm1, %v2191_v14, %v2190_v13 }
 0x207   : > { %v2302_v40 = vperm.slane %v1885_v52, %v3529_v56  ;;  %v2304_v18 = vperm.slane %v1886_v19, %v3532_v46  ;;  %v862_v36 = vpop.xlane.xlu2 %861  ;;  %v859_v59 = vpop.xlane.xlu1 %858  ;;  %v1285_v61 = vmul.f32 0.015625, %v4737_v15  ;;  %v1286_v17 = vmul.f32 0.015625, %v4738_v34 }
 0x208   : > { %v1342_v42 = vmul.f32 0.015625, %v862_v36  ;;  %v1341_v50 = vmul.f32 0.015625, %v859_v59  ;;  %v856_v4 = vpop.xlane.xlu0 %855  ;;  %v2143_v52 = vperm.slane %v1803_v57, %v3523_v49  ;;  %v2534_v2 = vsel %vm4640_vm7, %v2189_v10, %v2532_v55  ;;  %v4739_v36 = vld [vmem:[#allocation49_spill] sm:$0xff]  ;;  %v363_v10 = vld [vmem:[%s3023_s29 + $0x5e8] sm:$0xff] }
 0x209   : > { %v2303_v12 = vsel %vm2044_vm10, %v2302_v40, %v2301_v62  ;;  %v1340_v16 = vmul.f32 0.015625, %v856_v4  ;;  %v2195_v13 = vperm.slane %v1830_v9, %v3479_v7  ;;  %v2194_v27 = vsel %vm2012_vm2, %v2193_v41, %v2192_v54  ;;  %v367_v40 = vld [vmem:[%s3023_s29 + $0x608] sm:$0xff] }
 0x20a   : > { %v2305_v30 = vsel %vm4642_vm11, %v2304_v18, %v2303_v12  ;;  %v1526_v53 = vpack.c.bf16 %v1342_v42, %v1341_v50  ;;  %v1832_v14 = vunpack.c.h.b16 %v4028_v11  ;;  %v366_v18 = vld [vmem:[%s3023_s29 + $0x600] sm:$0xff]  ;;  %v1288_v59 = vmul.f32 0.015625, %v4739_v36 }
 0x20b   : > { %v1525_v35 = vpack.c.bf16 %v1340_v16, %v1339_v24  ;;  %v2197_v24 = vperm.slane %v1831_v32, %v3489_v37  ;;  %v1498_v9 = vpack.c.bf16 %v1286_v17, %v1285_v61  ;;  %vm2535_vm7 = vcmask 1043459   ;;  %v4740_v32 = vld [vmem:[#allocation50_spill] sm:$0xff] }
 0x20c   : > { %v1889_v6 = vunpack.c.l.b16 %v1526_v53  ;;  %v1890_v62 = vunpack.c.h.b16 %v1526_v53  ;;  %996 = vadd.xlane.f32.xlu2 %v995_v63  ;;  %993 = vadd.xlane.f32.xlu1 %v992_v33  ;;  %v1010_v63 = vsel %vm430_vm0, %v367_v40, 0.0  ;;  %v1007_v33 = vsel %vm430_vm0, %v366_v18, 0.0  ;;  %v4743_v18 = vld [vmem:[#allocation23_spill] sm:$0xff] }
 0x20d   : > { %v1887_v19 = vunpack.c.l.b16 %v1525_v35  ;;  %v1888_v39 = vunpack.c.h.b16 %v1525_v35  ;;  %990 = vadd.xlane.f32.xlu0 %v989_v5  ;;  %v1287_v53 = vmul.f32 0.015625, %v4740_v32  ;;  %v998_v54 = vsel %vm430_vm0, %v363_v10, 0.0 }
 0x20e   : > { %v2310_v57 = vperm.slane %v1889_v6, %v3577_v28  ;;  %v2312_v41 = vperm.slane %v1890_v62, %v3603_v43  ;;  %vm4643_vm3 = vcmask 1044484   ;;  %vm4741_vm11 = vcmask 261312  }
 0x20f   : > { %v2306_v3 = vperm.slane %v1887_v19, %v3566_v0  ;;  %v2308_v42 = vperm.slane %v1888_v39, %v3574_v48  ;;  %v871_v50 = vpop.xlane.xlu2 %870  ;;  %v868_v55 = vpop.xlane.xlu1 %867  ;;  %v2196_v35 = vsel %vm4741_vm11, %v2195_v13, %v2194_v27  ;;  %v2199_v15 = vperm.slane %v1832_v14, %v3493_v31 }
 0x210   : > { %v1344_v4 = vmul.f32 0.015625, %v868_v55  ;;  %v865_v11 = vpop.xlane.xlu0 %864  ;;  %v2198_v17 = vsel %vm2020_vm4, %v2197_v24, %v2196_v35  ;;  %v2536_v62 = vsel %vm2535_vm7, %v3790_v23, %v2534_v2  ;;  %v4078_v19 = vperm.slane %v1805_v45, %v3529_v56  ;;  %v4742_v24 = vld [vmem:[#allocation22_spill] sm:$0xff]  ;;  %v368_v2 = vld [vmem:[%s3023_s29 + $0x610] sm:$0xff]  ;;  %v383_v45 = vld [vmem:[%s3023_s29 + $0x688] sm:$0xff] }
 0x211   : > { %v2307_v12 = vsel %vm2052_vm12, %v2306_v3, %v2305_v30  ;;  %v1343_v16 = vmul.f32 0.015625, %v865_v11  ;;  %v1806_v30 = vunpack.c.h.b16 %v4023_v1  ;;  %v2145_v39 = vperm.slane %v1804_v29, %v3535_v58 }
 0x212   : > { %v2309_v5 = vsel %vm2056_vm13, %v2308_v42, %v2307_v12  ;;  %v1833_v13 = vunpack.c.l.b16 %v1498_v9  ;;  %v2144_v14 = vsel %vm2036_vm8, %v2143_v52, %v4016_v25  ;;  %v4087_v40 = vmul.f32 0.015625, %v4742_v24 }
 0x213   : > { %v1527_v61 = vpack.c.bf16 %v1344_v4, %v1343_v16  ;;  %v2311_v34 = vsel %vm2060_vm14, %v2310_v57, %v2309_v5  ;;  %v1260_v36 = vmul.f32 0.015625, %v4743_v18  ;;  %v1499_v23 = vpack.c.bf16 %v1288_v59, %v1287_v53  ;;  %v4744_v57 = vld [vmem:[#allocation24_spill] sm:$0xff]  ;;  %v382_v4 = vld [vmem:[%s3023_s29 + $0x680] sm:$0xff] }
 0x214   : > { %1011 = vadd.xlane.f32.xlu2 %v1010_v63  ;;  %1008 = vadd.xlane.f32.xlu1 %v1007_v33  ;;  %v2313_v6 = vsel %vm2064_vm15, %v2312_v41, %v2311_v34  ;;  %v1259_v3 = vmul.f32 0.015625, %v4744_v57  ;;  %v2200_v29 = vsel %vm2024_vm5, %v2199_v15, %v2198_v17  ;;  %v1834_v42 = vunpack.c.h.b16 %v1498_v9  ;;  %v4745_v15 = vld [vmem:[#allocation53_spill] sm:$0xff] }
 0x215   : > { %999 = vadd.xlane.f32.xlu0 %v998_v54  ;;  %v4082_v27 = vsel %vm4643_vm3, %v2313_v6, %v2536_v62  ;;  %v1345_v55 = vmul.f32 0.015625, %v871_v50  ;;  %v1891_v11 = vunpack.c.l.b16 %v1527_v61  ;;  %v1892_v12 = vunpack.c.h.b16 %v1527_v61 }
 0x216   : > { %v2201_v63 = vperm.slane %v1833_v13, %v3499_v26  ;;  %v1013_v59 = vsel %vm430_vm0, %v368_v2, 0.0  ;;  %v1058_v32 = vsel %vm430_vm0, %v383_v45, 0.0  ;;  %v1835_v53 = vunpack.c.l.b16 %v1499_v23  ;;  %v4746_v45 = vld [vmem:[#allocation27_spill] sm:$0xff] }
 0x217   : > { %v880_v10 = vpop.xlane.xlu2 %879  ;;  %v877_v41 = vpop.xlane.xlu1 %876  ;;  %v1836_v5 = vunpack.c.h.b16 %v1499_v23  ;;  %v1055_v50 = vsel %vm430_vm0, %v382_v4, 0.0  ;;  %v2203_v9 = vperm.slane %v1834_v42, %v3509_v47  ;;  %v1290_v35 = vmul.f32 0.015625, %v3546_v8 }
 0x218   : > { %v1348_v25 = vmul.f32 0.015625, %v880_v10  ;;  %v1347_v52 = vmul.f32 0.015625, %v877_v41  ;;  %v874_v16 = vpop.xlane.xlu0 %873  ;;  %v1289_v61 = vmul.f32 0.015625, %v4745_v15  ;;  %v2314_v17 = vperm.slane %v1891_v11, %v3443_v44  ;;  %v385_v10 = vld [vmem:[%s3023_s29 + $0x698] sm:$0xff]  ;;  %v384_v41 = vld [vmem:[%s3023_s29 + $0x690] sm:$0xff] }
 0x219   : > { %v1346_v33 = vmul.f32 0.015625, %v874_v16  ;;  %v2315_v6 = vperm.slane %v1892_v12, %v3457_v38  ;;  %v2146_v24 = vsel %vm2040_vm9, %v2145_v39, %v2144_v14  ;;  %v2202_v18 = vsel %vm2028_vm6, %v2201_v63, %v2200_v29 }
 0x21a   : > { %v1529_v54 = vpack.c.bf16 %v1348_v25, %v1347_v52  ;;  %v4106_v2 = vpack.c.bf16 %v1260_v36, %v1259_v3  ;;  %v1262_v57 = vmul.f32 0.015625, %v4746_v45  ;;  %v2205_v42 = vperm.slane %v1835_v53, %v3523_v49  ;;  %v369_v36 = vld [vmem:[%s3023_s29 + $0x618] sm:$0xff] }
 0x21b   : > { %v1528_v34 = vpack.c.bf16 %v1346_v33, %v1345_v55  ;;  %v2207_v55 = vperm.slane %v1836_v5, %v3535_v58  ;;  %v4113_v4 = vpack.c.bf16 %v1290_v35, %v1289_v61  ;;  %vm4747_vm11 = vcmask 523712   ;;  %v4748_v5 = vld [vmem:[#allocation52_spill] sm:$0xff] }
 0x21c   : > { %v1895_v62 = vunpack.c.l.b16 %v1529_v54  ;;  %v1896_v13 = vunpack.c.h.b16 %v1529_v54  ;;  %1014 = vadd.xlane.f32.xlu2 %v1013_v59  ;;  %1059 = vadd.xlane.f32.xlu1 %v1058_v32  ;;  %v2204_v3 = vsel %vm4747_vm11, %v2203_v9, %v2202_v18  ;;  %v2316_v25 = vsel %vm2008_vm1, %v2315_v6, %v2314_v17 }
 0x21d   : > { %v1893_v23 = vunpack.c.l.b16 %v1528_v34  ;;  %v1894_v8 = vunpack.c.h.b16 %v1528_v34  ;;  %1056 = vadd.xlane.f32.xlu0 %v1055_v50  ;;  %v1064_v32 = vsel %vm430_vm0, %v385_v10, 0.0  ;;  %v1061_v53 = vsel %vm430_vm0, %v384_v41, 0.0  ;;  %v4749_v50 = vld [vmem:[#allocation56_spill] sm:$0xff] }
 0x21e   : > { %v2321_v39 = vperm.slane %v1895_v62, %v3489_v37  ;;  %v2323_v52 = vperm.slane %v1896_v13, %v3493_v31  ;;  %v1291_v54 = vmul.f32 0.015625, %v4748_v5  ;;  %v1292_v35 = vmul.f32 0.015625, %v4749_v50  ;;  %v399_v41 = vld [vmem:[%s3023_s29 + $0x708] sm:$0xff] }
 0x21f   : > { %v2317_v14 = vperm.slane %v1893_v23, %v3463_v51  ;;  %v2319_v29 = vperm.slane %v1894_v8, %v3479_v7  ;;  %v889_v11 = vpop.xlane.xlu2 %888  ;;  %v886_v12 = vpop.xlane.xlu1 %885  ;;  %vm4750_vm3 = vcmask 261312   ;;  %v1016_v9 = vsel %vm430_vm0, %v369_v36, 0.0 }
 0x220   : > { %v1350_v16 = vmul.f32 0.015625, %v886_v12  ;;  %v883_v63 = vpop.xlane.xlu0 %882  ;;  %v2206_v61 = vsel %vm2036_vm8, %v2205_v42, %v2204_v3  ;;  %v1837_v34 = vunpack.c.l.b16 %v4113_v4  ;;  %v2149_v62 = vperm.slane %v1806_v30, %v3532_v46  ;;  %v398_v3 = vld [vmem:[%s3023_s29 + $0x700] sm:$0xff] }
 0x221   : > { %v2318_v33 = vsel %vm2012_vm2, %v2317_v14, %v2316_v25  ;;  %v1349_v59 = vmul.f32 0.015625, %v883_v63  ;;  %v2148_v13 = vsel %vm2044_vm10, %v4078_v19, %v2146_v24  ;;  %v1807_v23 = vunpack.c.l.b16 %v4106_v2  ;;  %v414_v24 = vld [vmem:[%s3023_s29 + $0x780] sm:$0xff]  ;;  %v4751_v25 = vld [vmem:[#allocation54_spill] sm:$0xff] }
 0x222   : > { %v2320_v15 = vsel %vm4750_vm3, %v2319_v29, %v2318_v33  ;;  %v1808_v8 = vunpack.c.h.b16 %v4106_v2  ;;  %v4141_v10 = vpack.c.bf16 %v1262_v57, %v4087_v40  ;;  %v2208_v1 = vsel %vm2040_vm9, %v2207_v55, %v2206_v61  ;;  %v4752_v57 = vld [vmem:[#allocation55_spill] sm:$0xff]  ;;  %vm4753_vm3 = vmmov %vm4747_vm11 }
 0x223   : > { %v2322_v17 = vsel %vm2020_vm4, %v2321_v39, %v2320_v15  ;;  %v1530_v6 = vpack.c.bf16 %v1350_v16, %v1349_v59  ;;  %v1838_v30 = vunpack.c.h.b16 %v4113_v4  ;;  %v1501_v19 = vpack.c.bf16 %v1292_v35, %v1291_v54 }
 0x224   : > { %v2324_v18 = vsel %vm2024_vm5, %v2323_v52, %v2322_v17  ;;  %1065 = vadd.xlane.f32.xlu2 %v1064_v32  ;;  %1062 = vadd.xlane.f32.xlu1 %v1061_v53  ;;  %v2209_v39 = vperm.slane %v1837_v34, %v3529_v56  ;;  %v1351_v14 = vmul.f32 0.015625, %v889_v11  ;;  %v1294_v40 = vmul.f32 0.015625, %v4751_v25 }
 0x225   : > { %v1897_v45 = vunpack.c.l.b16 %v1530_v6  ;;  %v1898_v42 = vunpack.c.h.b16 %v1530_v6  ;;  %1017 = vadd.xlane.f32.xlu0 %v1016_v9  ;;  %v1293_v52 = vmul.f32 0.015625, %v4752_v57  ;;  %v1151_v59 = vsel %vm430_vm0, %v414_v24, 0.0 }
 0x226   : > { %v1106_v11 = vsel %vm430_vm0, %v399_v41, 0.0  ;;  %v1839_v32 = vunpack.c.l.b16 %v1501_v19  ;;  %v1103_v54 = vsel %vm430_vm0, %v398_v3, 0.0  ;;  %v1777_v50 = vunpack.c.l.b16 %v3795_v21 }
 0x227   : > { %v2325_v29 = vperm.slane %v1897_v45, %v3499_v26  ;;  %v2327_v2 = vperm.slane %v1898_v42, %v3509_v47  ;;  %v898_v12 = vpop.xlane.xlu2 %897  ;;  %v895_v36 = vpop.xlane.xlu1 %894  ;;  %v2210_v35 = vsel %vm2044_vm10, %v2209_v39, %v2208_v1  ;;  %v2211_v15 = vperm.slane %v1838_v30, %v3532_v46  ;;  %v401_v39 = vld [vmem:[%s3023_s29 + $0x718] sm:$0xff] }
 0x228   : > { %v1354_v55 = vmul.f32 0.015625, %v898_v12  ;;  %v1353_v16 = vmul.f32 0.015625, %v895_v36  ;;  %v892_v4 = vpop.xlane.xlu0 %891  ;;  %v4161_v61 = vpack.c.bf16 %v1294_v40, %v1293_v52  ;;  %v1840_v34 = vunpack.c.h.b16 %v1501_v19  ;;  %v415_v36 = vld [vmem:[%s3023_s29 + $0x788] sm:$0xff] }
 0x229   : > { %v2326_v63 = vsel %vm2028_vm6, %v2325_v29, %v2324_v18  ;;  %v1352_v33 = vmul.f32 0.015625, %v892_v4  ;;  %v1778_v18 = vunpack.c.h.b16 %v3795_v21  ;;  %vm4754_vm11 = vcmask 786112  }
 0x22a   : > { %v2328_v53 = vsel %vm4753_vm3, %v2327_v2, %v2326_v63  ;;  %v1532_v5 = vpack.c.bf16 %v1354_v55, %v1353_v16  ;;  %v2150_v45 = vsel %vm4754_vm11, %v2149_v62, %v2148_v13  ;;  %v2151_v1 = vperm.slane %v1807_v23, %v3566_v0  ;;  %vm4755_vm3 = vmmov %vm4754_vm11 }
 0x22b   : > { %v1531_v9 = vpack.c.bf16 %v1352_v33, %v1351_v14  ;;  %v2153_v30 = vperm.slane %v1808_v8, %v3574_v48  ;;  %v1809_v41 = vunpack.c.l.b16 %v4141_v10  ;;  %v2213_v19 = vperm.slane %v1839_v32, %v3566_v0  ;;  %v400_v14 = vld [vmem:[%s3023_s29 + $0x710] sm:$0xff]  ;;  %vm4756_vm11 = vmmov %vm4755_vm3 }
 0x22c   : > { %v1901_v17 = vunpack.c.l.b16 %v1532_v5  ;;  %v1902_v6 = vunpack.c.h.b16 %v1532_v5  ;;  %1152 = vadd.xlane.f32.xlu2 %v1151_v59  ;;  %1107 = vadd.xlane.f32.xlu1 %v1106_v11  ;;  %v2212_v29 = vsel %vm4755_vm3, %v2211_v15, %v2210_v35  ;;  %v1841_v23 = vunpack.c.l.b16 %v4161_v61 }
 0x22d   : > { %v1899_v42 = vunpack.c.l.b16 %v1531_v9  ;;  %v1900_v24 = vunpack.c.h.b16 %v1531_v9  ;;  %1104 = vadd.xlane.f32.xlu0 %v1103_v54  ;;  %v2215_v8 = vperm.slane %v1840_v34, %v3574_v48  ;;  %v1112_v55 = vsel %vm430_vm0, %v401_v39, 0.0 }
 0x22e   : > { %v2333_v21 = vperm.slane %v1901_v17, %v3529_v56  ;;  %v2335_v3 = vperm.slane %v1902_v6, %v3532_v46  ;;  %v1109_v16 = vsel %vm430_vm0, %v400_v14, 0.0  ;;  %v1810_v4 = vunpack.c.h.b16 %v4141_v10 }
 0x22f   : > { %v2329_v62 = vperm.slane %v1899_v42, %v3523_v49  ;;  %v2331_v13 = vperm.slane %v1900_v24, %v3535_v58  ;;  %v907_v2 = vpop.xlane.xlu2 %906  ;;  %v904_v12 = vpop.xlane.xlu1 %903  ;;  %v2214_v63 = vsel %vm2052_vm12, %v2213_v19, %v2212_v29  ;;  %v1154_v59 = vsel %vm430_vm0, %v415_v36, 0.0  ;;  %v370_v24 = vld [vmem:[%s3023_s29 + $0x620] sm:$0xff]  ;;  %v416_v29 = vld [vmem:[%s3023_s29 + $0x790] sm:$0xff] }
 0x230   : > { %v1356_v25 = vmul.f32 0.015625, %v904_v12  ;;  %v901_v40 = vpop.xlane.xlu0 %900  ;;  %v2152_v11 = vsel %vm2052_vm12, %v2151_v1, %v2150_v45  ;;  %v2155_v32 = vperm.slane %v1809_v41, %v3577_v28  ;;  %v1842_v54 = vunpack.c.h.b16 %v4161_v61  ;;  %v417_v1 = vld [vmem:[%s3023_s29 + $0x798] sm:$0xff] }
 0x231   : > { %v2330_v57 = vsel %vm2036_vm8, %v2329_v62, %v2328_v53  ;;  %v1355_v52 = vmul.f32 0.015625, %v901_v40  ;;  %v2217_v35 = vperm.slane %v1841_v23, %v3577_v28  ;;  %v2092_v15 = vsel %vm2056_vm13, %v3689_v20, %v3768_v22 }
 0x232   : > { %v2332_v33 = vsel %vm2040_vm9, %v2331_v13, %v2330_v57  ;;  %v2216_v9 = vsel %vm2056_vm13, %v2215_v8, %v2214_v63  ;;  %v2093_v6 = vperm.slane %v1777_v50, %v3577_v28  ;;  %v2095_v61 = vperm.slane %v1778_v18, %v3603_v43 }
 0x233   : > { %v2334_v5 = vsel %vm2044_vm10, %v2333_v21, %v2332_v33  ;;  %v1533_v53 = vpack.c.bf16 %v1356_v25, %v1355_v52  ;;  %v2154_v45 = vsel %vm2056_vm13, %v2153_v30, %v2152_v11  ;;  %v2157_v42 = vperm.slane %v1810_v4, %v3603_v43  ;;  %v387_v11 = vld [vmem:[%s3023_s29 + $0x6a8] sm:$0xff] }
 0x234   : > { %v2336_v10 = vsel %vm4756_vm11, %v2335_v3, %v2334_v5  ;;  %1113 = vadd.xlane.f32.xlu2 %v1112_v55  ;;  %1110 = vadd.xlane.f32.xlu1 %v1109_v16  ;;  %v2156_v41 = vsel %vm2060_vm14, %v2155_v32, %v2154_v45  ;;  %v1357_v19 = vmul.f32 0.015625, %v907_v2  ;;  %v2219_v50 = vperm.slane %v1842_v54, %v3603_v43  ;;  %v386_v32 = vld [vmem:[%s3023_s29 + $0x6a0] sm:$0xff] }
 0x235   : > { %v1903_v34 = vunpack.c.l.b16 %v1533_v53  ;;  %v1904_v17 = vunpack.c.h.b16 %v1533_v53  ;;  %1155 = vadd.xlane.f32.xlu0 %v1154_v59  ;;  %v2218_v18 = vsel %vm2060_vm14, %v2217_v35, %v2216_v9  ;;  %v1019_v36 = vsel %vm430_vm0, %v370_v24, 0.0 }
 0x236   : > { %v1160_v2 = vsel %vm430_vm0, %v417_v1, 0.0  ;;  %v2094_v23 = vsel %vm2060_vm14, %v2093_v6, %v2092_v15  ;;  %v1157_v25 = vsel %vm430_vm0, %v416_v29, 0.0  ;;  %v2158_v40 = vsel %vm2064_vm15, %v2157_v42, %v2156_v41  ;;  %v418_v29 = vld [vmem:[%s3023_s29 + $0x7a0] sm:$0xff] }
 0x237   : > { %v2337_v20 = vperm.slane %v1903_v34, %v3566_v0  ;;  %v2339_v22 = vperm.slane %v1904_v17, %v3574_v48  ;;  %v916_v39 = vpop.xlane.xlu2 %915  ;;  %v913_v14 = vpop.xlane.xlu1 %912  ;;  %v2220_v52 = vsel %vm2064_vm15, %v2219_v50, %v2218_v18  ;;  %v2096_v55 = vsel %vm2064_vm15, %v2095_v61, %v2094_v23  ;;  %v403_v50 = vld [vmem:[%s3023_s29 + $0x728] sm:$0xff] }
 0x238   : > { %v1360_v21 = vmul.f32 0.015625, %v916_v39  ;;  %v1359_v30 = vmul.f32 0.015625, %v913_v14  ;;  %v910_v62 = vpop.xlane.xlu0 %909  ;;  %vm4757_vm3 = vcmask 1041409   ;;  %vm4758_vm11 = vcmask 1042434  }
 0x239   : > { %v2338_v13 = vsel %vm2052_vm12, %v2337_v20, %v2336_v10  ;;  %v1358_v12 = vmul.f32 0.015625, %v910_v62  ;;  %v2545_v63 = vsel %vm4757_vm3, %v2158_v40, %v2096_v55  ;;  %v371_v10 = vld [vmem:[%s3023_s29 + $0x628] sm:$0xff]  ;;  %v1070_v45 = vsel %vm430_vm0, %v387_v11, 0.0  ;;  %v373_v11 = vld [vmem:[%s3023_s29 + $0x638] sm:$0xff] }
 0x23a   : > { %v2340_v8 = vsel %vm2056_vm13, %v2339_v22, %v2338_v13  ;;  %v1535_v3 = vpack.c.bf16 %v1360_v21, %v1359_v30  ;;  %v2546_v15 = vsel %vm4758_vm11, %v2220_v52, %v2545_v63  ;;  %v1067_v42 = vsel %vm430_vm0, %v386_v32, 0.0  ;;  %v372_v32 = vld [vmem:[%s3023_s29 + $0x630] sm:$0xff] }
 0x23b   : > { %v1534_v57 = vpack.c.bf16 %v1358_v12, %v1357_v19  ;;  %v2547_v17 = vsel %vm2535_vm7, %v3927_v60, %v2546_v15  ;;  %v1022_v41 = vsel %vm430_vm0, %v371_v10, 0.0  ;;  %vm4759_vm7 = vcmask 1044484   ;;  %v402_v12 = vld [vmem:[%s3023_s29 + $0x720] sm:$0xff]  ;;  %v419_v15 = vld [vmem:[%s3023_s29 + $0x7a8] sm:$0xff] }
 0x23c   : > { %1020 = vadd.xlane.f32.xlu2 %v1019_v36  ;;  %1161 = vadd.xlane.f32.xlu1 %v1160_v2  ;;  %v1907_v33 = vunpack.c.l.b16 %v1535_v3  ;;  %v1908_v59 = vunpack.c.h.b16 %v1535_v3  ;;  %v1118_v40 = vsel %vm430_vm0, %v403_v50, 0.0  ;;  %vm4760_vm3 = vcmask 261312  }
 0x23d   : > { %v1905_v16 = vunpack.c.l.b16 %v1534_v57  ;;  %v1906_v4 = vunpack.c.h.b16 %v1534_v57  ;;  %1158 = vadd.xlane.f32.xlu0 %v1157_v25  ;;  %v1163_v25 = vsel %vm430_vm0, %v418_v29, 0.0  ;;  %v1115_v55 = vsel %vm430_vm0, %v402_v12, 0.0  ;;  %v389_v29 = vld [vmem:[%s3023_s29 + $0x6b8] sm:$0xff] }
 0x23e   : > { %v2345_v24 = vperm.slane %v1907_v33, %v3443_v44  ;;  %v2346_v1 = vperm.slane %v1908_v59, %v3457_v38  ;;  %vm4761_vm11 = vcmask 523712  }
 0x23f   : > { %v2341_v5 = vperm.slane %v1905_v16, %v3577_v28  ;;  %v2343_v53 = vperm.slane %v1906_v4, %v3603_v43  ;;  %v925_v54 = vpop.xlane.xlu2 %924  ;;  %v922_v35 = vpop.xlane.xlu1 %921 }
 0x240   : > { %v1362_v9 = vmul.f32 0.015625, %v922_v35  ;;  %v919_v34 = vpop.xlane.xlu0 %918  ;;  %v2347_v14 = vsel %vm2008_vm1, %v2346_v1, %v2345_v24  ;;  %v1363_v18 = vmul.f32 0.015625, %v925_v54  ;;  %v1166_v1 = vsel %vm430_vm0, %v419_v15, 0.0 }
 0x241   : > { %v2342_v6 = vsel %vm2060_vm14, %v2341_v5, %v2340_v8  ;;  %v1361_v61 = vmul.f32 0.015625, %v919_v34 }
 0x242   : > { %v2344_v19 = vsel %vm2064_vm15, %v2343_v53, %v2342_v6 }
 0x243   : > { %v1536_v20 = vpack.c.bf16 %v1362_v9, %v1361_v61  ;;  %v4234_v60 = vsel %vm4759_vm7, %v2344_v19, %v2547_v17  ;;  %vm4762_vm7 = vcmask 786112  }
 0x244   : > { %1071 = vadd.xlane.f32.xlu2 %v1070_v45  ;;  %1068 = vadd.xlane.f32.xlu1 %v1067_v42  ;;  %v1028_v45 = vsel %vm430_vm0, %v373_v11, 0.0  ;;  %v1025_v42 = vsel %vm430_vm0, %v372_v32, 0.0  ;;  %v420_v11 = vld [vmem:[%s3023_s29 + $0x7b0] sm:$0xff] }
 0x245   : > { %v1909_v22 = vunpack.c.l.b16 %v1536_v20  ;;  %v1910_v39 = vunpack.c.h.b16 %v1536_v20  ;;  %1023 = vadd.xlane.f32.xlu0 %v1022_v41 }
 0x247   : > { %v2348_v21 = vperm.slane %v1909_v22, %v3463_v51  ;;  %v2350_v30 = vperm.slane %v1910_v39, %v3479_v7  ;;  %v934_v62 = vpop.xlane.xlu2 %933  ;;  %v931_v13 = vpop.xlane.xlu1 %930 }
 0x248   : > { %v1366_v36 = vmul.f32 0.015625, %v934_v62  ;;  %v1365_v2 = vmul.f32 0.015625, %v931_v13  ;;  %v928_v23 = vpop.xlane.xlu0 %927  ;;  %v388_v13 = vld [vmem:[%s3023_s29 + $0x6b0] sm:$0xff] }
 0x249   : > { %v2349_v8 = vsel %vm2012_vm2, %v2348_v21, %v2347_v14  ;;  %v1364_v3 = vmul.f32 0.015625, %v928_v23  ;;  %v404_v14 = vld [vmem:[%s3023_s29 + $0x730] sm:$0xff] }
 0x24a   : > { %v2351_v57 = vsel %vm4760_vm3, %v2350_v30, %v2349_v8  ;;  %v1538_v52 = vpack.c.bf16 %v1366_v36, %v1365_v2  ;;  %vm2539_vm3 = vcmask 1045509  }
 0x24b   : > { %v1537_v16 = vpack.c.bf16 %v1364_v3, %v1363_v18  ;;  %v1121_v3 = vsel %vm430_vm0, %v404_v14, 0.0  ;;  %v375_v14 = vld [vmem:[%s3023_s29 + $0x648] sm:$0xff] }
 0x24c   : > { %v1913_v4 = vunpack.c.l.b16 %v1538_v52  ;;  %v1914_v63 = vunpack.c.h.b16 %v1538_v52  ;;  %1164 = vadd.xlane.f32.xlu2 %v1163_v25  ;;  %1119 = vadd.xlane.f32.xlu1 %v1118_v40  ;;  %v1076_v25 = vsel %vm430_vm0, %v389_v29, 0.0  ;;  %v1073_v52 = vsel %vm430_vm0, %v388_v13, 0.0 }
 0x24d   : > { %v1911_v33 = vunpack.c.l.b16 %v1537_v16  ;;  %v1912_v59 = vunpack.c.h.b16 %v1537_v16  ;;  %1116 = vadd.xlane.f32.xlu0 %v1115_v55 }
 0x24e   : > { %v2356_v5 = vperm.slane %v1913_v4, %v3499_v26  ;;  %v2358_v9 = vperm.slane %v1914_v63, %v3509_v47 }
 0x24f   : > { %v2352_v53 = vperm.slane %v1911_v33, %v3489_v37  ;;  %v2354_v54 = vperm.slane %v1912_v59, %v3493_v31  ;;  %v943_v35 = vpop.xlane.xlu2 %942  ;;  %v940_v10 = vpop.xlane.xlu1 %939  ;;  %v421_v59 = vld [vmem:[%s3023_s29 + $0x7b8] sm:$0xff] }
 0x250   : > { %v1368_v34 = vmul.f32 0.015625, %v940_v10  ;;  %v937_v17 = vpop.xlane.xlu0 %936  ;;  %v1369_v50 = vmul.f32 0.015625, %v943_v35  ;;  %v405_v10 = vld [vmem:[%s3023_s29 + $0x738] sm:$0xff] }
 0x251   : > { %v2353_v6 = vsel %vm2020_vm4, %v2352_v53, %v2351_v57  ;;  %v1367_v61 = vmul.f32 0.015625, %v937_v17 }
 0x252   : > { %v2355_v24 = vsel %vm2024_vm5, %v2354_v54, %v2353_v6 }
 0x253   : > { %v2357_v41 = vsel %vm2028_vm6, %v2356_v5, %v2355_v24  ;;  %v1539_v19 = vpack.c.bf16 %v1368_v34, %v1367_v61  ;;  %v1172_v61 = vsel %vm430_vm0, %v421_v59, 0.0  ;;  %v1124_v24 = vsel %vm430_vm0, %v405_v10, 0.0  ;;  %v391_v10 = vld [vmem:[%s3023_s29 + $0x6c8] sm:$0xff] }
 0x254   : > { %v2359_v20 = vsel %vm4761_vm11, %v2358_v9, %v2357_v41  ;;  %1029 = vadd.xlane.f32.xlu2 %v1028_v45  ;;  %1026 = vadd.xlane.f32.xlu1 %v1025_v42  ;;  %v1169_v45 = vsel %vm430_vm0, %v420_v11, 0.0  ;;  %v407_v11 = vld [vmem:[%s3023_s29 + $0x748] sm:$0xff]  ;;  %vm4763_vm11 = vcmask 261312  }
 0x255   : > { %v1915_v22 = vunpack.c.l.b16 %v1539_v19  ;;  %v1916_v39 = vunpack.c.h.b16 %v1539_v19  ;;  %1167 = vadd.xlane.f32.xlu0 %v1166_v1 }
 0x257   : > { %v2360_v18 = vperm.slane %v1915_v22, %v3523_v49  ;;  %v2362_v21 = vperm.slane %v1916_v39, %v3535_v58  ;;  %v952_v30 = vpop.xlane.xlu2 %951  ;;  %v949_v62 = vpop.xlane.xlu1 %948  ;;  %v390_v39 = vld [vmem:[%s3023_s29 + $0x6c0] sm:$0xff] }
 0x258   : > { %v1372_v12 = vmul.f32 0.015625, %v952_v30  ;;  %v1371_v36 = vmul.f32 0.015625, %v949_v62  ;;  %v946_v2 = vpop.xlane.xlu0 %945  ;;  %v374_v62 = vld [vmem:[%s3023_s29 + $0x640] sm:$0xff] }
 0x259   : > { %v2361_v23 = vsel %vm2036_vm8, %v2360_v18, %v2359_v20  ;;  %v1370_v8 = vmul.f32 0.015625, %v946_v2 }
 0x25a   : > { %v2363_v40 = vsel %vm2040_vm9, %v2362_v21, %v2361_v23  ;;  %v1541_v57 = vpack.c.bf16 %v1372_v12, %v1371_v36  ;;  %v1079_v23 = vsel %vm430_vm0, %v390_v39, 0.0 }
 0x25b   : > { %v1540_v55 = vpack.c.bf16 %v1370_v8, %v1369_v50  ;;  %v1034_v8 = vsel %vm430_vm0, %v375_v14, 0.0 }
 0x25c   : > { %v1919_v16 = vunpack.c.l.b16 %v1541_v57  ;;  %v1920_v4 = vunpack.c.h.b16 %v1541_v57  ;;  %1122 = vadd.xlane.f32.xlu2 %v1121_v3  ;;  %1077 = vadd.xlane.f32.xlu1 %v1076_v25 }
 0x25d   : > { %v1917_v63 = vunpack.c.l.b16 %v1540_v55  ;;  %v1918_v33 = vunpack.c.h.b16 %v1540_v55  ;;  %1074 = vadd.xlane.f32.xlu0 %v1073_v52 }
 0x25e   : > { %v2368_v32 = vperm.slane %v1919_v16, %v3566_v0  ;;  %v2370_v15 = vperm.slane %v1920_v4, %v3574_v48 }
 0x25f   : > { %v2364_v5 = vperm.slane %v1917_v63, %v3529_v56  ;;  %v2366_v53 = vperm.slane %v1918_v33, %v3532_v46  ;;  %v961_v54 = vpop.xlane.xlu2 %960  ;;  %v958_v35 = vpop.xlane.xlu1 %957 }
 0x260   : > { %v1374_v9 = vmul.f32 0.015625, %v958_v35  ;;  %v955_v34 = vpop.xlane.xlu0 %954  ;;  %v1375_v29 = vmul.f32 0.015625, %v961_v54 }
 0x261   : > { %v2365_v17 = vsel %vm2044_vm10, %v2364_v5, %v2363_v40  ;;  %v1373_v6 = vmul.f32 0.015625, %v955_v34  ;;  %v1031_v40 = vsel %vm430_vm0, %v374_v62, 0.0 }
 0x262   : > { %v2367_v42 = vsel %vm4762_vm7, %v2366_v53, %v2365_v17  ;;  %vm4764_vm7 = vcmask 523712  }
 0x263   : > { %v2369_v1 = vsel %vm2052_vm12, %v2368_v32, %v2367_v42  ;;  %v1542_v41 = vpack.c.bf16 %v1374_v9, %v1373_v6  ;;  %v406_v32 = vld [vmem:[%s3023_s29 + $0x740] sm:$0xff]  ;;  %v1130_v6 = vsel %vm430_vm0, %v407_v11, 0.0  ;;  %v1082_v42 = vsel %vm430_vm0, %v391_v10, 0.0 }
 0x264   : > { %1173 = vadd.xlane.f32.xlu2 %v1172_v61  ;;  %1170 = vadd.xlane.f32.xlu1 %v1169_v45  ;;  %v2371_v19 = vsel %vm2056_vm13, %v2370_v15, %v2369_v1  ;;  %v1127_v61 = vsel %vm430_vm0, %v406_v32, 0.0 }
 0x265   : > { %v1921_v20 = vunpack.c.l.b16 %v1542_v41  ;;  %v1922_v22 = vunpack.c.h.b16 %v1542_v41  ;;  %1125 = vadd.xlane.f32.xlu0 %v1124_v24 }
 0x267   : > { %v2372_v50 = vperm.slane %v1921_v20, %v3577_v28  ;;  %v2374_v18 = vperm.slane %v1922_v22, %v3603_v43  ;;  %v970_v21 = vpop.xlane.xlu2 %969  ;;  %v967_v30 = vpop.xlane.xlu1 %966  ;;  %v376_v20 = vld [vmem:[%s3023_s29 + $0x650] sm:$0xff]  ;;  %v423_v22 = vld [vmem:[%s3023_s29 + $0x7c8] sm:$0xff] }
 0x268   : > { %v1378_v13 = vmul.f32 0.015625, %v970_v21  ;;  %v1377_v12 = vmul.f32 0.015625, %v967_v30  ;;  %v964_v36 = vpop.xlane.xlu0 %963  ;;  %v422_v21 = vld [vmem:[%s3023_s29 + $0x7c0] sm:$0xff] }
 0x269   : > { %v1376_v2 = vmul.f32 0.015625, %v964_v36  ;;  %v2373_v3 = vsel %vm2060_vm14, %v2372_v50, %v2371_v19 }
 0x26a   : > { %v1544_v25 = vpack.c.bf16 %v1378_v13, %v1377_v12  ;;  %v2375_v57 = vsel %vm2064_vm15, %v2374_v18, %v2373_v3 }
 0x26b   : > { %v1543_v52 = vpack.c.bf16 %v1376_v2, %v1375_v29  ;;  %v4297_v55 = vsel %vm2539_vm3, %v2375_v57, %v4082_v27  ;;  %v1037_v2 = vsel %vm430_vm0, %v376_v20, 0.0  ;;  %v409_v20 = vld [vmem:[%s3023_s29 + $0x758] sm:$0xff] }
 0x26c   : > { %v1925_v16 = vunpack.c.l.b16 %v1544_v25  ;;  %v1926_v4 = vunpack.c.h.b16 %v1544_v25  ;;  %1080 = vadd.xlane.f32.xlu2 %v1079_v23  ;;  %1035 = vadd.xlane.f32.xlu1 %v1034_v8  ;;  %v1178_v23 = vsel %vm430_vm0, %v423_v22, 0.0  ;;  %v1175_v25 = vsel %vm430_vm0, %v422_v21, 0.0 }
 0x26d   : > { %v1923_v63 = vunpack.c.l.b16 %v1543_v52  ;;  %v1924_v33 = vunpack.c.h.b16 %v1543_v52  ;;  %1032 = vadd.xlane.f32.xlu0 %v1031_v40 }
 0x26e   : > { %v2379_v59 = vperm.slane %v1925_v16, %v3463_v51  ;;  %v2381_v5 = vperm.slane %v1926_v4, %v3479_v7 }
 0x26f   : > { %v2376_v53 = vperm.slane %v1923_v63, %v3443_v44  ;;  %v2377_v54 = vperm.slane %v1924_v33, %v3457_v38  ;;  %v979_v27 = vpop.xlane.xlu2 %978  ;;  %v976_v35 = vpop.xlane.xlu1 %975  ;;  %v393_v63 = vld [vmem:[%s3023_s29 + $0x6d8] sm:$0xff]  ;;  %v392_v33 = vld [vmem:[%s3023_s29 + $0x6d0] sm:$0xff] }
 0x270   : > { %v1380_v15 = vmul.f32 0.015625, %v976_v35  ;;  %v973_v9 = vpop.xlane.xlu0 %972  ;;  %v1381_v39 = vmul.f32 0.015625, %v979_v27 }
 0x271   : > { %v2378_v34 = vsel %vm2008_vm1, %v2377_v54, %v2376_v53  ;;  %v1379_v17 = vmul.f32 0.015625, %v973_v9  ;;  %v377_v54 = vld [vmem:[%s3023_s29 + $0x658] sm:$0xff] }
 0x272   : > { %v2380_v45 = vsel %vm2012_vm2, %v2379_v59, %v2378_v34  ;;  %v1088_v34 = vsel %vm430_vm0, %v393_v63, 0.0 }
 0x273   : > { %v2382_v24 = vsel %vm4763_vm11, %v2381_v5, %v2380_v45  ;;  %v1545_v1 = vpack.c.bf16 %v1380_v15, %v1379_v17  ;;  %v1085_v17 = vsel %vm430_vm0, %v392_v33, 0.0  ;;  %vm4765_vm11 = vcmask 786112  }
 0x274   : > { %1131 = vadd.xlane.f32.xlu2 %v1130_v6  ;;  %1128 = vadd.xlane.f32.xlu1 %v1127_v61  ;;  %v1040_v61 = vsel %vm430_vm0, %v377_v54, 0.0 }
 0x275   : > { %v1927_v41 = vunpack.c.l.b16 %v1545_v1  ;;  %v1928_v19 = vunpack.c.h.b16 %v1545_v1  ;;  %1083 = vadd.xlane.f32.xlu0 %v1082_v42 }
 0x277   : > { %v2383_v14 = vperm.slane %v1927_v41, %v3489_v37  ;;  %v2385_v29 = vperm.slane %v1928_v19, %v3493_v31  ;;  %v988_v50 = vpop.xlane.xlu2 %987  ;;  %v985_v18 = vpop.xlane.xlu1 %984  ;;  %v424_v19 = vld [vmem:[%s3023_s29 + $0x7d0] sm:$0xff] }
 0x278   : > { %v1384_v30 = vmul.f32 0.015625, %v988_v50  ;;  %v1383_v62 = vmul.f32 0.015625, %v985_v18  ;;  %v982_v13 = vpop.xlane.xlu0 %981  ;;  %v408_v18 = vld [vmem:[%s3023_s29 + $0x750] sm:$0xff] }
 0x279   : > { %v2384_v12 = vsel %vm2020_vm4, %v2383_v14, %v2382_v24  ;;  %v1382_v36 = vmul.f32 0.015625, %v982_v13 }
 0x27a   : > { %v2386_v8 = vsel %vm2024_vm5, %v2385_v29, %v2384_v12  ;;  %v1547_v3 = vpack.c.bf16 %v1384_v30, %v1383_v62 }
 0x27b   : > { %v1546_v40 = vpack.c.bf16 %v1382_v36, %v1381_v39  ;;  %v1181_v36 = vsel %vm430_vm0, %v424_v19, 0.0 }
 0x27c   : > { %v1931_v57 = vunpack.c.l.b16 %v1547_v3  ;;  %v1932_v52 = vunpack.c.h.b16 %v1547_v3  ;;  %1038 = vadd.xlane.f32.xlu2 %v1037_v2  ;;  %1179 = vadd.xlane.f32.xlu1 %v1178_v23  ;;  %v1136_v2 = vsel %vm430_vm0, %v409_v20, 0.0  ;;  %v1133_v3 = vsel %vm430_vm0, %v408_v18, 0.0 }
 0x27d   : > { %v1929_v16 = vunpack.c.l.b16 %v1546_v40  ;;  %v1930_v4 = vunpack.c.h.b16 %v1546_v40  ;;  %1176 = vadd.xlane.f32.xlu0 %v1175_v25 }
 0x27e   : > { %v2391_v59 = vperm.slane %v1931_v57, %v3523_v49  ;;  %v2393_v27 = vperm.slane %v1932_v52, %v3535_v58  ;;  %v379_v52 = vld [vmem:[%s3023_s29 + $0x668] sm:$0xff] }
 0x27f   : > { %v2387_v11 = vperm.slane %v1929_v16, %v3499_v26  ;;  %v2389_v32 = vperm.slane %v1930_v4, %v3509_v47  ;;  %v997_v5 = vpop.xlane.xlu2 %996  ;;  %v994_v53 = vpop.xlane.xlu1 %993  ;;  %v378_v16 = vld [vmem:[%s3023_s29 + $0x660] sm:$0xff] }
 0x280   : > { %v1386_v35 = vmul.f32 0.015625, %v994_v53  ;;  %v991_v10 = vpop.xlane.xlu0 %990  ;;  %v1387_v22 = vmul.f32 0.015625, %v997_v5 }
 0x281   : > { %v2388_v15 = vsel %vm2028_vm6, %v2387_v11, %v2386_v8  ;;  %v1385_v9 = vmul.f32 0.015625, %v991_v10  ;;  %v425_v11 = vld [vmem:[%s3023_s29 + $0x7d8] sm:$0xff] }
 0x282   : > { %v2390_v6 = vsel %vm4764_vm7, %v2389_v32, %v2388_v15  ;;  %v1184_v15 = vsel %vm430_vm0, %v425_v11, 0.0  ;;  %v365_v11 = vld [vmem:[%s3023_s29 + $0x5f8] sm:$0xff]  ;;  %vm4766_vm7 = vcmask 261312  }
 0x283   : > { %v2392_v45 = vsel %vm2036_vm8, %v2391_v59, %v2390_v6  ;;  %v1548_v42 = vpack.c.bf16 %v1386_v35, %v1385_v9  ;;  %v1043_v35 = vsel %vm430_vm0, %v378_v16, 0.0 }
 0x284   : > { %v2394_v24 = vsel %vm2040_vm9, %v2393_v27, %v2392_v45  ;;  %1089 = vadd.xlane.f32.xlu2 %v1088_v34  ;;  %1086 = vadd.xlane.f32.xlu1 %v1085_v17  ;;  %v1046_v27 = vsel %vm430_vm0, %v379_v52, 0.0  ;;  %v364_v34 = vld [vmem:[%s3023_s29 + $0x5f0] sm:$0xff]  ;;  %v395_v17 = vld [vmem:[%s3023_s29 + $0x6e8] sm:$0xff]  ;;  %v410_v52 = vld [vmem:[%s3023_s29 + $0x760] sm:$0xff] }
 0x285   : > { %v1933_v1 = vunpack.c.l.b16 %v1548_v42  ;;  %v1934_v41 = vunpack.c.h.b16 %v1548_v42  ;;  %1041 = vadd.xlane.f32.xlu0 %v1040_v61 }
 0x287   : > { %v2395_v39 = vperm.slane %v1933_v1, %v3529_v56  ;;  %v2397_v14 = vperm.slane %v1934_v41, %v3532_v46  ;;  %v1012_v29 = vpop.xlane.xlu2 %1011  ;;  %v1009_v50 = vpop.xlane.xlu1 %1008  ;;  %v394_v1 = vld [vmem:[%s3023_s29 + $0x6e0] sm:$0xff] }
 0x288   : > { %v1392_v21 = vmul.f32 0.015625, %v1012_v29  ;;  %v1391_v30 = vmul.f32 0.015625, %v1009_v50  ;;  %v1000_v62 = vpop.xlane.xlu0 %999  ;;  %v1001_v29 = vsel %vm430_vm0, %v364_v34, 0.0  ;;  %v1094_v50 = vsel %vm430_vm0, %v395_v17, 0.0 }
 0x289   : > { %v2396_v13 = vsel %vm2044_vm10, %v2395_v39, %v2394_v24  ;;  %v1388_v12 = vmul.f32 0.015625, %v1000_v62  ;;  %v1139_v34 = vsel %vm430_vm0, %v410_v52, 0.0 }
 0x28a   : > { %v2398_v23 = vsel %vm4765_vm11, %v2397_v14, %v2396_v13  ;;  %v1551_v8 = vpack.c.bf16 %v1392_v21, %v1391_v30  ;;  %v1091_v21 = vsel %vm430_vm0, %v394_v1, 0.0  ;;  %vm4767_vm11 = vmmov %vm4766_vm7 }
 0x28b   : > { %v1549_v25 = vpack.c.bf16 %v1388_v12, %v1387_v22 }
 0x28c   : > { %1182 = vadd.xlane.f32.xlu2 %v1181_v36  ;;  %1137 = vadd.xlane.f32.xlu1 %v1136_v2  ;;  %v1939_v41 = vunpack.c.l.b16 %v1551_v8  ;;  %v1940_v19 = vunpack.c.h.b16 %v1551_v8 }
 0x28d   : > { %v1935_v40 = vunpack.c.l.b16 %v1549_v25  ;;  %v1936_v57 = vunpack.c.h.b16 %v1549_v25  ;;  %1134 = vadd.xlane.f32.xlu0 %v1133_v3  ;;  %v411_v25 = vld [vmem:[%s3023_s29 + $0x768] sm:$0xff] }
 0x28e   : > { %v2407_v12 = vperm.slane %v1939_v41, %v3443_v44  ;;  %v2408_v36 = vperm.slane %v1940_v19, %v3457_v38 }
 0x28f   : > { %v2399_v4 = vperm.slane %v1935_v40, %v3566_v0  ;;  %v2401_v63 = vperm.slane %v1936_v57, %v3574_v48  ;;  %v1015_v33 = vpop.xlane.xlu2 %1014  ;;  %v1060_v59 = vpop.xlane.xlu1 %1059 }
 0x290   : > { %v1408_v32 = vmul.f32 0.015625, %v1060_v59  ;;  %v1057_v5 = vpop.xlane.xlu0 %1056  ;;  %v1393_v6 = vmul.f32 0.015625, %v1015_v33 }
 0x291   : > { %v2400_v53 = vsel %vm2052_vm12, %v2399_v4, %v2398_v23  ;;  %v1407_v54 = vmul.f32 0.015625, %v1057_v5 }
 0x292   : > { %v4355_v10 = vsel %vm2056_vm13, %v2401_v63, %v2400_v53 }
 0x293   : > { %v1559_v9 = vpack.c.bf16 %v1408_v32, %v1407_v54  ;;  %v2409_v32 = vsel %vm2008_vm1, %v2408_v36, %v2407_v12 }
 0x294   : > { %1047 = vadd.xlane.f32.xlu2 %v1046_v27  ;;  %1044 = vadd.xlane.f32.xlu1 %v1043_v35  ;;  %v1142_v27 = vsel %vm430_vm0, %v411_v25, 0.0  ;;  %v397_v25 = vld [vmem:[%s3023_s29 + $0x6f8] sm:$0xff] }
 0x295   : > { %1185 = vadd.xlane.f32.xlu0 %v1184_v15  ;;  %v1955_v61 = vunpack.c.l.b16 %v1559_v9  ;;  %v1956_v45 = vunpack.c.h.b16 %v1559_v9 }
 0x297   : > { %v1066_v42 = vpop.xlane.xlu2 %1065  ;;  %v1063_v24 = vpop.xlane.xlu1 %1062  ;;  %v2438_v30 = vperm.slane %v1955_v61, %v3443_v44  ;;  %v2439_v62 = vperm.slane %v1956_v45, %v3457_v38  ;;  %v380_v45 = vld [vmem:[%s3023_s29 + $0x670] sm:$0xff] }
 0x298   : > { %v1410_v20 = vmul.f32 0.015625, %v1066_v42  ;;  %v1409_v22 = vmul.f32 0.015625, %v1063_v24  ;;  %v1018_v39 = vpop.xlane.xlu0 %1017  ;;  %v427_v42 = vld [vmem:[%s3023_s29 + $0x7e8] sm:$0xff] }
 0x299   : > { %v1394_v14 = vmul.f32 0.015625, %v1018_v39  ;;  %v2440_v16 = vsel %vm2008_vm1, %v2439_v62, %v2438_v30 }
 0x29a   : > { %v1560_v18 = vpack.c.bf16 %v1410_v20, %v1409_v22  ;;  %v426_v22 = vld [vmem:[%s3023_s29 + $0x7e0] sm:$0xff] }
 0x29b   : > { %v1552_v13 = vpack.c.bf16 %v1394_v14, %v1393_v6  ;;  %v1004_v6 = vsel %vm430_vm0, %v365_v11, 0.0  ;;  %v1187_v62 = vsel %vm430_vm0, %v426_v22, 0.0 }
 0x29c   : > { %v1957_v2 = vunpack.c.l.b16 %v1560_v18  ;;  %v1958_v23 = vunpack.c.h.b16 %v1560_v18  ;;  %1002 = vadd.xlane.f32.xlu2 %v1001_v29  ;;  %1095 = vadd.xlane.f32.xlu1 %v1094_v50  ;;  %v1049_v18 = vsel %vm430_vm0, %v380_v45, 0.0 }
 0x29d   : > { %v1941_v8 = vunpack.c.l.b16 %v1552_v13  ;;  %v1942_v3 = vunpack.c.h.b16 %v1552_v13  ;;  %1092 = vadd.xlane.f32.xlu0 %v1091_v21  ;;  %v1190_v21 = vsel %vm430_vm0, %v427_v42, 0.0  ;;  %v413_v42 = vld [vmem:[%s3023_s29 + $0x778] sm:$0xff] }
 0x29e   : > { %v2441_v40 = vperm.slane %v1957_v2, %v3463_v51  ;;  %v2443_v57 = vperm.slane %v1958_v23, %v3479_v7 }
 0x29f   : > { %v2410_v4 = vperm.slane %v1941_v8, %v3463_v51  ;;  %v2412_v63 = vperm.slane %v1942_v3, %v3479_v7  ;;  %v1153_v33 = vpop.xlane.xlu2 %1152  ;;  %v1108_v59 = vpop.xlane.xlu1 %1107 }
 0x2a0   : > { %v2442_v5 = vsel %vm2012_vm2, %v2441_v40, %v2440_v16  ;;  %v1424_v53 = vmul.f32 0.015625, %v1108_v59  ;;  %v1105_v54 = vpop.xlane.xlu0 %1104  ;;  %v1439_v24 = vmul.f32 0.015625, %v1153_v33  ;;  %v396_v40 = vld [vmem:[%s3023_s29 + $0x6f0] sm:$0xff] }
 0x2a1   : > { %v4380_v35 = vsel %vm4766_vm7, %v2443_v57, %v2442_v5  ;;  %v2411_v15 = vsel %vm2012_vm2, %v2410_v4, %v2409_v32  ;;  %v1423_v9 = vmul.f32 0.015625, %v1105_v54  ;;  %v381_v4 = vld [vmem:[%s3023_s29 + $0x678] sm:$0xff]  ;;  %v1100_v54 = vsel %vm430_vm0, %v397_v25, 0.0 }
 0x2a2   : > { %v4385_v17 = vsel %vm4767_vm11, %v2412_v63, %v2411_v15  ;;  %v1052_v15 = vsel %vm430_vm0, %v381_v4, 0.0  ;;  %vm4768_vm11 = vmmov %vm4766_vm7 }
 0x2a3   : > { %v1567_v61 = vpack.c.bf16 %v1424_v53, %v1423_v9 }
 0x2a4   : > { %1143 = vadd.xlane.f32.xlu2 %v1142_v27  ;;  %1140 = vadd.xlane.f32.xlu1 %v1139_v34  ;;  %v1097_v27 = vsel %vm430_vm0, %v396_v40, 0.0 }
 0x2a5   : > { %1005 = vadd.xlane.f32.xlu0 %v1004_v6  ;;  %v1971_v1 = vunpack.c.l.b16 %v1567_v61  ;;  %v1972_v41 = vunpack.c.h.b16 %v1567_v61 }
 0x2a7   : > { %v1114_v19 = vpop.xlane.xlu2 %1113  ;;  %v1111_v20 = vpop.xlane.xlu1 %1110  ;;  %v2469_v13 = vperm.slane %v1971_v1, %v3443_v44  ;;  %v2470_v12 = vperm.slane %v1972_v41, %v3457_v38 }
 0x2a8   : > { %v1426_v39 = vmul.f32 0.015625, %v1114_v19  ;;  %v1425_v14 = vmul.f32 0.015625, %v1111_v20  ;;  %v1156_v29 = vpop.xlane.xlu0 %1155 }
 0x2a9   : > { %v1440_v50 = vmul.f32 0.015625, %v1156_v29  ;;  %v2471_v57 = vsel %vm2008_vm1, %v2470_v12, %v2469_v13 }
 0x2aa   : > { %v1568_v30 = vpack.c.bf16 %v1426_v39, %v1425_v14  ;;  %v412_v39 = vld [vmem:[%s3023_s29 + $0x770] sm:$0xff] }
 0x2ab   : > { %v1575_v36 = vpack.c.bf16 %v1440_v50, %v1439_v24  ;;  %v428_v24 = vld [vmem:[%s3023_s29 + $0x7f0] sm:$0xff] }
 0x2ac   : > { %v1973_v2 = vunpack.c.l.b16 %v1568_v30  ;;  %v1974_v23 = vunpack.c.h.b16 %v1568_v30  ;;  %1050 = vadd.xlane.f32.xlu2 %v1049_v18  ;;  %1191 = vadd.xlane.f32.xlu1 %v1190_v21  ;;  %v1148_v21 = vsel %vm430_vm0, %v413_v42, 0.0  ;;  %v1193_v30 = vsel %vm430_vm0, %v428_v24, 0.0 }
 0x2ad   : > { %1188 = vadd.xlane.f32.xlu0 %v1187_v62  ;;  %v1987_v33 = vunpack.c.l.b16 %v1575_v36  ;;  %v1988_v59 = vunpack.c.h.b16 %v1575_v36 }
 0x2ae   : > { %v2472_v8 = vperm.slane %v1973_v2, %v3463_v51  ;;  %v2474_v3 = vperm.slane %v1974_v23, %v3479_v7 }
 0x2af   : > { %v1021_v52 = vpop.xlane.xlu2 %1020  ;;  %v1162_v16 = vpop.xlane.xlu1 %1161  ;;  %v2500_v34 = vperm.slane %v1987_v33, %v3443_v44  ;;  %v2501_v6 = vperm.slane %v1988_v59, %v3457_v38 }
 0x2b0   : > { %v2473_v63 = vsel %vm2012_vm2, %v2472_v8, %v2471_v57  ;;  %v1442_v11 = vmul.f32 0.015625, %v1162_v16  ;;  %v1159_v32 = vpop.xlane.xlu0 %1158  ;;  %v1395_v1 = vmul.f32 0.015625, %v1021_v52  ;;  %v429_v16 = vld [vmem:[%s3023_s29 + $0x7f8] sm:$0xff] }
 0x2b1   : > { %v4404_v5 = vsel %vm4766_vm7, %v2474_v3, %v2473_v63  ;;  %v1441_v53 = vmul.f32 0.015625, %v1159_v32  ;;  %v2502_v14 = vsel %vm2008_vm1, %v2501_v6, %v2500_v34 }
 0x2b3   : > { %v1576_v9 = vpack.c.bf16 %v1442_v11, %v1441_v53 }
 0x2b4   : > { %1101 = vadd.xlane.f32.xlu2 %v1100_v54  ;;  %1098 = vadd.xlane.f32.xlu1 %v1097_v27  ;;  %v1196_v54 = vsel %vm430_vm0, %v429_v16, 0.0 }
 0x2b5   : > { %v1989_v61 = vunpack.c.l.b16 %v1576_v9  ;;  %v1990_v45 = vunpack.c.h.b16 %v1576_v9  ;;  %1053 = vadd.xlane.f32.xlu0 %v1052_v15 }
 0x2b7   : > { %v2503_v41 = vperm.slane %v1989_v61, %v3463_v51  ;;  %v2505_v19 = vperm.slane %v1990_v45, %v3479_v7  ;;  %v1072_v20 = vpop.xlane.xlu2 %1071  ;;  %v1069_v22 = vpop.xlane.xlu1 %1068  ;;  %v1145_v7 = vsel %vm430_vm0, %v412_v39, 0.0  ;;  %vm4769_vm0 = vcmask 523712  }
 0x2b8   : > { %v1412_v44 = vmul.f32 0.015625, %v1072_v20  ;;  %v1411_v29 = vmul.f32 0.015625, %v1069_v22  ;;  %v1024_v38 = vpop.xlane.xlu0 %1023  ;;  %vm4770_vm1 = vmmov %vm4769_vm0 }
 0x2b9   : > { %v2504_v50 = vsel %vm2012_vm2, %v2503_v41, %v2502_v14  ;;  %v1396_v18 = vmul.f32 0.015625, %v1024_v38  ;;  %vm4771_vm2 = vmmov %vm4769_vm0 }
 0x2ba   : > { %v2506_v62 = vsel %vm4768_vm11, %v2505_v19, %v2504_v50  ;;  %v1561_v51 = vpack.c.bf16 %v1412_v44, %v1411_v29 }
 0x2bb   : > { %v1553_v13 = vpack.c.bf16 %v1396_v18, %v1395_v1 }
 0x2bc   : > { %v1959_v12 = vunpack.c.l.b16 %v1561_v51  ;;  %v1960_v36 = vunpack.c.h.b16 %v1561_v51  ;;  %1149 = vadd.xlane.f32.xlu1 %v1148_v21  ;;  %1194 = vadd.xlane.f32.xlu2 %v1193_v30 }
 0x2bd   : > { %v1943_v2 = vunpack.c.l.b16 %v1553_v13  ;;  %v1944_v23 = vunpack.c.h.b16 %v1553_v13  ;;  %1146 = vadd.xlane.f32.xlu0 %v1145_v7 }
 0x2be   : > { %v2445_v8 = vperm.slane %v1959_v12, %v3489_v37  ;;  %v2447_v3 = vperm.slane %v1960_v36, %v3493_v31 }
 0x2bf   : > { %v2414_v25 = vperm.slane %v1943_v2, %v3489_v37  ;;  %v2416_v40 = vperm.slane %v1944_v23, %v3493_v31  ;;  %v1165_v57 = vpop.xlane.xlu2 %1164  ;;  %v1120_v52 = vpop.xlane.xlu1 %1119 }
 0x2c0   : > { %v2446_v4 = vsel %vm2020_vm4, %v2445_v8, %v4380_v35  ;;  %v1428_v63 = vmul.f32 0.015625, %v1120_v52  ;;  %v1117_v33 = vpop.xlane.xlu0 %1116  ;;  %v1443_v34 = vmul.f32 0.015625, %v1165_v57 }
 0x2c1   : > { %v2448_v59 = vsel %vm2024_vm5, %v2447_v3, %v2446_v4  ;;  %v2415_v11 = vsel %vm2020_vm4, %v2414_v25, %v4385_v17  ;;  %v1427_v32 = vmul.f32 0.015625, %v1117_v33 }
 0x2c2   : > { %v2417_v53 = vsel %vm2024_vm5, %v2416_v40, %v2415_v11 }
 0x2c3   : > { %v1569_v27 = vpack.c.bf16 %v1428_v63, %v1427_v32 }
 0x2c5   : > { %v1975_v15 = vunpack.c.l.b16 %v1569_v27  ;;  %v1976_v9 = vunpack.c.h.b16 %v1569_v27  ;;  %1197 = vadd.xlane.f32.xlu0 %v1196_v54 }
 0x2c7   : > { %v2476_v6 = vperm.slane %v1975_v15, %v3489_v37  ;;  %v2478_v35 = vperm.slane %v1976_v9, %v3493_v31  ;;  %v1030_v61 = vpop.xlane.xlu2 %1029  ;;  %v1027_v45 = vpop.xlane.xlu1 %1026 }
 0x2c8   : > { %v1398_v42 = vmul.f32 0.015625, %v1030_v61  ;;  %v1397_v24 = vmul.f32 0.015625, %v1027_v45  ;;  %v1168_v1 = vpop.xlane.xlu0 %1167 }
 0x2c9   : > { %v2477_v17 = vsel %vm2020_vm4, %v2476_v6, %v4404_v5  ;;  %v1444_v41 = vmul.f32 0.015625, %v1168_v1 }
 0x2ca   : > { %v2479_v19 = vsel %vm2024_vm5, %v2478_v35, %v2477_v17  ;;  %v1554_v20 = vpack.c.bf16 %v1398_v42, %v1397_v24 }
 0x2cb   : > { %v1577_v22 = vpack.c.bf16 %v1444_v41, %v1443_v34 }
 0x2cc   : > { %v1945_v39 = vunpack.c.l.b16 %v1554_v20  ;;  %v1946_v14 = vunpack.c.h.b16 %v1554_v20 }
 0x2cd   : > { %v1991_v44 = vunpack.c.l.b16 %v1577_v22  ;;  %v1992_v29 = vunpack.c.h.b16 %v1577_v22 }
 0x2ce   : > { %v2418_v38 = vperm.slane %v1945_v39, %v3499_v26  ;;  %v2420_v50 = vperm.slane %v1946_v14, %v3509_v47 }
 0x2cf   : > { %v2507_v18 = vperm.slane %v1991_v44, %v3489_v37  ;;  %v2509_v21 = vperm.slane %v1992_v29, %v3493_v31  ;;  %v1123_v30 = vpop.xlane.xlu2 %1122  ;;  %v1078_v51 = vpop.xlane.xlu1 %1077 }
 0x2d0   : > { %v2419_v5 = vsel %vm2028_vm6, %v2418_v38, %v2417_v53  ;;  %v1414_v7 = vmul.f32 0.015625, %v1078_v51  ;;  %v1075_v13 = vpop.xlane.xlu0 %1074  ;;  %v1429_v40 = vmul.f32 0.015625, %v1123_v30 }
 0x2d1   : > { %v2421_v12 = vsel %vm4769_vm0, %v2420_v50, %v2419_v5  ;;  %v2508_v36 = vsel %vm2020_vm4, %v2507_v18, %v2506_v62  ;;  %v1413_v2 = vmul.f32 0.015625, %v1075_v13  ;;  %vm4772_vm4 = vmmov %vm4769_vm0 }
 0x2d2   : > { %v2510_v23 = vsel %vm2024_vm5, %v2509_v21, %v2508_v36  ;;  %vm4773_vm5 = vcmask 786112  }
 0x2d3   : > { %v1562_v8 = vpack.c.bf16 %v1414_v7, %v1413_v2  ;;  %vm4776_vm7 = vmmov %vm4773_vm5 }
 0x2d5   : > { %v1961_v3 = vunpack.c.l.b16 %v1562_v8  ;;  %v1962_v25 = vunpack.c.h.b16 %v1562_v8 }
 0x2d7   : > { %v2449_v37 = vperm.slane %v1961_v3, %v3499_v26  ;;  %v2451_v31 = vperm.slane %v1962_v25, %v3509_v47  ;;  %v1174_v57 = vpop.xlane.xlu2 %1173  ;;  %v1171_v52 = vpop.xlane.xlu1 %1170 }
 0x2d8   : > { %v1446_v16 = vmul.f32 0.015625, %v1174_v57  ;;  %v1445_v4 = vmul.f32 0.015625, %v1171_v52  ;;  %v1126_v63 = vpop.xlane.xlu0 %1125 }
 0x2d9   : > { %v2450_v33 = vsel %vm2028_vm6, %v2449_v37, %v2448_v59  ;;  %v1430_v11 = vmul.f32 0.015625, %v1126_v63 }
 0x2da   : > { %v2452_v62 = vsel %vm4770_vm1, %v2451_v31, %v2450_v33  ;;  %v1578_v32 = vpack.c.bf16 %v1446_v16, %v1445_v4 }
 0x2db   : > { %v1570_v53 = vpack.c.bf16 %v1430_v11, %v1429_v40 }
 0x2dc   : > { %v1993_v54 = vunpack.c.l.b16 %v1578_v32  ;;  %v1994_v27 = vunpack.c.h.b16 %v1578_v32 }
 0x2dd   : > { %v1977_v15 = vunpack.c.l.b16 %v1570_v53  ;;  %v1978_v9 = vunpack.c.h.b16 %v1570_v53 }
 0x2de   : > { %v2511_v34 = vperm.slane %v1993_v54, %v3499_v26  ;;  %v2513_v6 = vperm.slane %v1994_v27, %v3509_v47 }
 0x2df   : > { %v2480_v35 = vperm.slane %v1977_v15, %v3499_v26  ;;  %v2482_v61 = vperm.slane %v1978_v9, %v3509_v47  ;;  %v1081_v45 = vpop.xlane.xlu2 %1080  ;;  %v1036_v42 = vpop.xlane.xlu1 %1035 }
 0x2e0   : > { %v2512_v59 = vsel %vm2028_vm6, %v2511_v34, %v2510_v23  ;;  %v1400_v24 = vmul.f32 0.015625, %v1036_v42  ;;  %v1033_v1 = vpop.xlane.xlu0 %1032  ;;  %v1415_v29 = vmul.f32 0.015625, %v1081_v45 }
 0x2e1   : > { %v2514_v17 = vsel %vm4771_vm2, %v2513_v6, %v2512_v59  ;;  %v2481_v41 = vsel %vm2028_vm6, %v2480_v35, %v2479_v19  ;;  %v1399_v20 = vmul.f32 0.015625, %v1033_v1  ;;  %vm4774_vm6 = vmmov %vm4773_vm5 }
 0x2e2   : > { %v2483_v22 = vsel %vm4772_vm4, %v2482_v61, %v2481_v41 }
 0x2e3   : > { %v1555_v39 = vpack.c.bf16 %v1400_v24, %v1399_v20  ;;  %v2846_v24 = vld [vmem:[%s4635_s1 + $0x78] sm:$0xff]  ;;  %v2835_v20 = vld [vmem:[%s4635_s1 + $0x20] sm:$0xff] }
 0x2e4   : > { %2665 = vmatpush.bf16.msra.mxu1 %v2846_v24 }
 0x2e5   : > { %v1947_v14 = vunpack.c.l.b16 %v1555_v39  ;;  %v1948_v44 = vunpack.c.h.b16 %v1555_v39  ;;  %v2834_v39 = vld [vmem:[%s4635_s1 + $0x18] sm:$0xff] }
 0x2e7   : > { %v2422_v26 = vperm.slane %v1947_v14, %v3523_v49  ;;  %v2424_v47 = vperm.slane %v1948_v44, %v3535_v58  ;;  %v1132_v38 = vpop.xlane.xlu2 %1131  ;;  %v1129_v50 = vpop.xlane.xlu1 %1128  ;;  %v2844_v14 = vld [vmem:[%s4635_s1 + $0x68] sm:$0xff] }
 0x2e8   : > { %v1432_v18 = vmul.f32 0.015625, %v1132_v38  ;;  %v1431_v21 = vmul.f32 0.015625, %v1129_v50  ;;  %v1084_v30 = vpop.xlane.xlu0 %1083  ;;  %v2843_v38 = vld [vmem:[%s4635_s1 + $0x60] sm:$0xff] }
 0x2e9   : > { %v2423_v51 = vsel %vm2036_vm8, %v2422_v26, %v2421_v12  ;;  %v1416_v5 = vmul.f32 0.015625, %v1084_v30  ;;  %v2842_v30 = vld [vmem:[%s4635_s1 + $0x58] sm:$0xff] }
 0x2ea   : > { %v4463_v19 = vsel %vm2040_vm9, %v2424_v47, %v2423_v51  ;;  %v1571_v7 = vpack.c.bf16 %v1432_v18, %v1431_v21  ;;  %v2833_v47 = vld [vmem:[%s4635_s1 + $0x10] sm:$0xff]  ;;  %v2832_v21 = vld [vmem:[%s4635_s1 + $0x8] sm:$0xff] }
 0x2eb   : > { %v1563_v13 = vpack.c.bf16 %v1416_v5, %v1415_v29 }
 0x2ec   : > { %v1979_v36 = vunpack.c.l.b16 %v1571_v7  ;;  %v1980_v2 = vunpack.c.h.b16 %v1571_v7 }
 0x2ed   : > { %v1963_v23 = vunpack.c.l.b16 %v1563_v13  ;;  %v1964_v8 = vunpack.c.h.b16 %v1563_v13 }
 0x2ee   : > { %v2484_v3 = vperm.slane %v1979_v36, %v3523_v49  ;;  %v2486_v25 = vperm.slane %v1980_v2, %v3535_v58 }
 0x2ef   : > { %v2453_v40 = vperm.slane %v1963_v23, %v3523_v49  ;;  %v2455_v37 = vperm.slane %v1964_v8, %v3535_v58  ;;  %v1039_v31 = vpop.xlane.xlu2 %1038  ;;  %v1180_v12 = vpop.xlane.xlu1 %1179 }
 0x2f0   : > { %v2485_v57 = vsel %vm2036_vm8, %v2484_v3, %v2483_v22  ;;  %v1448_v52 = vmul.f32 0.015625, %v1180_v12  ;;  %v1177_v16 = vpop.xlane.xlu0 %1176  ;;  %v2845_v22 = vld [vmem:[%s4635_s1 + $0x70] sm:$0xff]  ;;  %v1401_v51 = vmul.f32 0.015625, %v1039_v31  ;;  %v2831_v3 = vld [vmem:[%s4635_s1] sm:$0xff] }
 0x2f1   : > { %v4471_v4 = vsel %vm2040_vm9, %v2486_v25, %v2485_v57  ;;  %v2454_v63 = vsel %vm2036_vm8, %v2453_v40, %v2452_v62  ;;  %v1447_v33 = vmul.f32 0.015625, %v1177_v16  ;;  %v2838_v62 = vld [vmem:[%s4635_s1 + $0x38] sm:$0xff]  ;;  %2666 = vmatpush.bf16.msra.mxu1 %v2845_v22  ;;  %v2841_v25 = vld [vmem:[%s4635_s1 + $0x50] sm:$0xff] }
 0x2f2   : > { %v4475_v11 = vsel %vm2040_vm9, %v2455_v37, %v2454_v63  ;;  %2652 = vmatpush.bf16.msra.mxu0 %v2838_v62 }
 0x2f3   : > { %v1579_v32 = vpack.c.bf16 %v1448_v52, %v1447_v33 }
 0x2f5   : > { %v1995_v53 = vunpack.c.l.b16 %v1579_v32  ;;  %v1996_v54 = vunpack.c.h.b16 %v1579_v32  ;;  %2667 = vmatpush.bf16.msra.mxu1 %v2844_v14 }
 0x2f7   : > { %v2515_v27 = vperm.slane %v1995_v53, %v3523_v49  ;;  %v2517_v15 = vperm.slane %v1996_v54, %v3535_v58  ;;  %v1090_v9 = vpop.xlane.xlu2 %1089  ;;  %v1087_v34 = vpop.xlane.xlu1 %1086  ;;  %v2837_v49 = vld [vmem:[%s4635_s1 + $0x30] sm:$0xff]  ;;  %v2836_v58 = vld [vmem:[%s4635_s1 + $0x28] sm:$0xff] }
 0x2f8   : > { %v1042_v6 = vpop.xlane.xlu0 %1041  ;;  %2653 = vmatpush.bf16.msra.mxu0 %v2837_v49  ;;  %v1418_v50 = vmul.f32 0.015625, %v1090_v9  ;;  %v1417_v18 = vmul.f32 0.015625, %v1087_v34  ;;  %v2840_v54 = vld [vmem:[%s4635_s1 + $0x48] sm:$0xff] }
 0x2f9   : > { %v2516_v35 = vsel %vm2036_vm8, %v2515_v27, %v2514_v17  ;;  %2668 = vmatpush.bf16.msra.mxu1 %v2843_v38  ;;  %v1402_v5 = vmul.f32 0.015625, %v1042_v6  ;;  %vm2541_vm8 = vcmask 1046534  }
 0x2fa   : > { %v4481_v61 = vsel %vm2040_vm9, %v2517_v15, %v2516_v35  ;;  %v1564_v23 = vpack.c.bf16 %v1418_v50, %v1417_v18  ;;  %vm4775_vm9 = vmmov %vm4773_vm5 }
 0x2fb   : > { %v1556_v40 = vpack.c.bf16 %v1402_v5, %v1401_v51 }
 0x2fc   : > { %2654 = vmatpush.bf16.msra.mxu0 %v2836_v58  ;;  %v1965_v33 = vunpack.c.l.b16 %v1564_v23  ;;  %v1966_v58 = vunpack.c.h.b16 %v1564_v23 }
 0x2fd   : > { %2669 = vmatpush.bf16.msra.mxu1 %v2842_v30  ;;  %v1949_v27 = vunpack.c.l.b16 %v1556_v40 }
 0x2fe   : > { %v2457_v24 = vperm.slane %v1965_v33, %v3529_v56  ;;  %v2459_v50 = vperm.slane %v1966_v58, %v3532_v46 }
 0x2ff   : > { %v4486_v45 = vpop.xlane.xlu2 %1182  ;;  %v1138_v42 = vpop.xlane.xlu1 %1137 }
 0x300   : > { %v1135_v59 = vpop.xlane.xlu0 %1134  ;;  %2655 = vmatpush.bf16.msra.mxu0 %v2835_v20  ;;  %v1434_v37 = vmul.f32 0.015625, %v1138_v42  ;;  %v2839_v42 = vld [vmem:[%s4635_s1 + $0x40] sm:$0xff]  ;;  %v2426_v20 = vperm.slane %v1949_v27, %v3529_v56  ;;  %v2458_v38 = vsel %vm2044_vm10, %v2457_v24, %v4475_v11  ;;  %v1449_v18 = vmul.f32 0.015625, %v4486_v45 }
 0x301   : > { %v1433_v31 = vmul.f32 0.015625, %v1135_v59  ;;  %2670 = vmatpush.bf16.msra.mxu1 %v2841_v25 }
 0x303   : > { %v1572_v15 = vpack.c.bf16 %v1434_v37, %v1433_v31 }
 0x304   : > { %2656 = vmatpush.bf16.msra.mxu0 %v2834_v39 }
 0x305   : > { %2671 = vmatpush.bf16.msra.mxu1 %v2840_v54  ;;  %v1981_v39 = vunpack.c.l.b16 %v1572_v15  ;;  %v1982_v30 = vunpack.c.h.b16 %v1572_v15 }
 0x307   : > { %v1048_v1 = vpop.xlane.xlu2 %1047  ;;  %v1045_v17 = vpop.xlane.xlu1 %1044 }
 0x308   : > { %v4497_v41 = vpop.xlane.xlu0 %1185  ;;  %2657 = vmatpush.bf16.msra.mxu0 %v2833_v47  ;;  %v1404_v12 = vmul.f32 0.015625, %v1048_v1  ;;  %v1403_v57 = vmul.f32 0.015625, %v1045_v17  ;;  %v1950_v1 = vunpack.c.h.b16 %v1556_v40 }
 0x309   : > { %2672 = vmatpush.bf16.msra.mxu1 %v2839_v42  ;;  %v1450_v5 = vmul.f32 0.015625, %v4497_v41  ;;  %v2490_v41 = vperm.slane %v1982_v30, %v3532_v46 }
 0x30a   : > { %v1557_v9 = vpack.c.bf16 %v1404_v12, %v1403_v57 }
 0x30b   : > { %v1580_v12 = vpack.c.bf16 %v1450_v5, %v1449_v18 }
 0x30c   : > { %2658 = vmatpush.bf16.msra.mxu0 %v2832_v21  ;;  %v1951_v14 = vunpack.c.l.b16 %v1557_v9  ;;  %v2427_v21 = vsel %vm2044_vm10, %v2426_v20, %v4463_v19  ;;  %v1952_v51 = vunpack.c.h.b16 %v1557_v9  ;;  %v2460_v19 = vsel %vm4773_vm5, %v2459_v50, %v2458_v38 }
 0x30d   : > { %v1998_v30 = vunpack.c.h.b16 %v1580_v12 }
 0x30e   : > { %v2432_v31 = vperm.slane %v1952_v51, %v3574_v48 }
 0x30f   : > { %v1003_v44 = vpop.xlane.xlu2 %1002  ;;  %v1096_v29 = vpop.xlane.xlu1 %1095 }
 0x310   : > { %v1093_v26 = vpop.xlane.xlu0 %1092  ;;  %v1389_v7 = vmul.f32 0.015625, %v1003_v44  ;;  %2659 = vmatpush.bf16.msra.mxu0 %v2831_v3  ;;  %v1420_v16 = vmul.f32 0.015625, %v1096_v29 }
 0x311   : > { %v1419_v63 = vmul.f32 0.015625, %v1093_v26 }
 0x313   : > { %v1565_v59 = vpack.c.bf16 %v1420_v16, %v1419_v63 }
 0x315   : > { %v1967_v29 = vunpack.c.l.b16 %v1565_v59 }
 0x317   : > { %v1144_v13 = vpop.xlane.xlu2 %1143  ;;  %v1141_v36 = vpop.xlane.xlu1 %1140  ;;  %v2461_v23 = vperm.slane %v1967_v29, %v3566_v0 }
 0x318   : > { %v1006_v2 = vpop.xlane.xlu0 %1005  ;;  %v1436_v26 = vmul.f32 0.015625, %v1144_v13  ;;  %v1435_v47 = vmul.f32 0.015625, %v1141_v36  ;;  %v1968_v13 = vunpack.c.h.b16 %v1565_v59 }
 0x319   : > { %v1390_v8 = vmul.f32 0.015625, %v1006_v2 }
 0x31a   : > { %v2463_v63 = vperm.slane %v1968_v13, %v3574_v48 }
 0x31b   : > { %v1550_v52 = vpack.c.bf16 %v1390_v8, %v1389_v7  ;;  %v2430_v7 = vperm.slane %v1951_v14, %v3566_v0  ;;  %v1573_v8 = vpack.c.bf16 %v1436_v26, %v1435_v47 }
 0x31d   : > { %v1937_v32 = vunpack.c.l.b16 %v1550_v52  ;;  %v1938_v53 = vunpack.c.h.b16 %v1550_v52  ;;  %v1984_v20 = vunpack.c.h.b16 %v1573_v8 }
 0x31f   : > { %v2403_v34 = vperm.slane %v1937_v32, %v3577_v28  ;;  %v2405_v6 = vperm.slane %v1938_v53, %v3603_v43  ;;  %v1051_v35 = vpop.xlane.xlu2 %1050  ;;  %v1192_v62 = vpop.xlane.xlu1 %1191  ;;  %v2462_v32 = vsel %vm2052_vm12, %v2461_v23, %v2460_v19  ;;  %v1983_v53 = vunpack.c.l.b16 %v1573_v8 }
 0x320   : > { %v1189_v49 = vpop.xlane.xlu0 %1188  ;;  %v1405_v36 = vmul.f32 0.015625, %v1051_v35  ;;  %v1452_v15 = vmul.f32 0.015625, %v1192_v62  ;;  %v1997_v35 = vunpack.c.l.b16 %v1580_v12  ;;  %v2494_v5 = vperm.slane %v1984_v20, %v3574_v48 }
 0x321   : > { %v2404_v17 = vsel %vm2060_vm14, %v2403_v34, %v4355_v10  ;;  %v2428_v10 = vperm.slane %v1950_v1, %v3532_v46  ;;  %v1451_v9 = vmul.f32 0.015625, %v1189_v49  ;;  %v2492_v62 = vperm.slane %v1983_v53, %v3566_v0 }
 0x322   : > { %v2406_v22 = vsel %vm2064_vm15, %v2405_v6, %v2404_v17  ;;  %v2464_v17 = vsel %vm2056_vm13, %v2463_v63, %v2462_v32  ;;  %v2519_v51 = vperm.slane %v1997_v35, %v3529_v56 }
 0x323   : > { %v2549_v44 = vsel %vm2539_vm3, %v2406_v22, %v4234_v60  ;;  %v2488_v60 = vperm.slane %v1981_v39, %v3529_v56  ;;  %v2429_v40 = vsel %vm4774_vm6, %v2428_v10, %v2427_v21  ;;  %v1581_v14 = vpack.c.bf16 %v1452_v15, %v1451_v9  ;;  %v2886_v15 = vld [vmem:[%s4636_s2] ss:$0 sm:$0xff] }
 0x324   : > { %v2431_v16 = vsel %vm2052_vm12, %v2430_v7, %v2429_v40  ;;  %vm2543_vm3 = vcmask 1047559   ;;  %v2520_v56 = vsel %vm2044_vm10, %v2519_v51, %v4481_v61 }
 0x325   : > { %v2489_v52 = vsel %vm2044_vm10, %v2488_v60, %v4471_v4  ;;  %v2433_v4 = vsel %vm2056_vm13, %v2432_v31, %v2431_v16  ;;  %v1999_v7 = vunpack.c.l.b16 %v1581_v14  ;;  %v2000_v8 = vunpack.c.h.b16 %v1581_v14 }
 0x326   : > { %v2491_v21 = vsel %vm4775_vm9, %v2490_v41, %v2489_v52 }
 0x327   : > { %v1102_v11 = vpop.xlane.xlu2 %1101  ;;  %v1099_v2 = vpop.xlane.xlu1 %1098  ;;  %v2525_v12 = vperm.slane %v2000_v8, %v3574_v48 }
 0x328   : > { %v1422_v3 = vmul.f32 0.015625, %v1102_v11  ;;  %v1421_v45 = vmul.f32 0.015625, %v1099_v2  ;;  %v1054_v25 = vpop.xlane.xlu0 %1053  ;;  %v2493_v11 = vsel %vm2052_vm12, %v2492_v62, %v2491_v21 }
 0x329   : > { %v1406_v37 = vmul.f32 0.015625, %v1054_v25  ;;  %v2523_v25 = vperm.slane %v1999_v7, %v3566_v0 }
 0x32a   : > { %v1566_v57 = vpack.c.bf16 %v1422_v3, %v1421_v45  ;;  %v2495_v45 = vsel %vm2056_vm13, %v2494_v5, %v2493_v11 }
 0x32b   : > { %v1558_v33 = vpack.c.bf16 %v1406_v37, %v1405_v36 }
 0x32c   : > { %v1969_v54 = vunpack.c.l.b16 %v1566_v57  ;;  %v1970_v27 = vunpack.c.h.b16 %v1566_v57 }
 0x32d   : > { %v1953_v34 = vunpack.c.l.b16 %v1558_v33  ;;  %v1954_v6 = vunpack.c.h.b16 %v1558_v33 }
 0x32e   : > { %v2465_v42 = vperm.slane %v1969_v54, %v3577_v28  ;;  %v2467_v59 = vperm.slane %v1970_v27, %v3603_v43 }
 0x32f   : > { %v2434_v58 = vperm.slane %v1953_v34, %v3577_v28  ;;  %v2436_v24 = vperm.slane %v1954_v6, %v3603_v43  ;;  %v1150_v1 = vpop.xlane.xlu1 %1149  ;;  %v1195_v60 = vpop.xlane.xlu2 %1194 }
 0x330   : > { %v1438_v49 = vmul.f32 0.015625, %v1150_v1  ;;  %v1147_v22 = vpop.xlane.xlu0 %1146  ;;  %v2466_v39 = vsel %vm2060_vm14, %v2465_v42, %v2464_v17  ;;  %v1453_v23 = vmul.f32 0.015625, %v1195_v60 }
 0x331   : > { %v1437_v29 = vmul.f32 0.015625, %v1147_v22  ;;  %v2435_v26 = vsel %vm2060_vm14, %v2434_v58, %v2433_v4  ;;  %v2468_v47 = vsel %vm2064_vm15, %v2467_v59, %v2466_v39 }
 0x332   : > { %v2437_v38 = vsel %vm2064_vm15, %v2436_v24, %v2435_v26  ;;  %v2550_v50 = vsel %vm2541_vm8, %v2468_v47, %v2549_v44 }
 0x333   : > { %v1574_v10 = vpack.c.bf16 %v1438_v49, %v1437_v29  ;;  %v2542_v18 = vsel %vm2541_vm8, %v2437_v38, %v4297_v55  ;;  %v2521_v55 = vperm.slane %v1998_v30, %v3532_v46 }
 0x335   : > { %v1985_v13 = vunpack.c.l.b16 %v1574_v10  ;;  %v1986_v36 = vunpack.c.h.b16 %v1574_v10  ;;  %v2522_v46 = vsel %vm4776_vm7, %v2521_v55, %v2520_v56 }
 0x336   : > { %v2524_v61 = vsel %vm2052_vm12, %v2523_v25, %v2522_v46 }
 0x337   : > { %v2496_v2 = vperm.slane %v1985_v13, %v3577_v28  ;;  %v2498_v44 = vperm.slane %v1986_v36, %v3603_v43  ;;  %v2526_v33 = vsel %vm2056_vm13, %v2525_v12, %v2524_v61 }
 0x338   : > { %v1198_v3 = vpop.xlane.xlu0 %1197 }
 0x339   : > { %v1454_v19 = vmul.f32 0.015625, %v1198_v3  ;;  %v2497_v40 = vsel %vm2060_vm14, %v2496_v2, %v2495_v45 }
 0x33a   : > { %v2499_v37 = vsel %vm2064_vm15, %v2498_v44, %v2497_v40 }
 0x33b   : > { %v1582_v41 = vpack.c.bf16 %v1454_v19, %v1453_v23  ;;  %v2544_v31 = vsel %vm2543_vm3, %v2499_v37, %v2542_v18 }
 0x33c   : > { %v2552_v57 = vpack.c.b16 %v2544_v31, %v2544_v31 }
 0x33d   : > { %v2001_v52 = vunpack.c.l.b16 %v1582_v41  ;;  %v2002_v16 = vunpack.c.h.b16 %v1582_v41 }
 0x33e   : > { %2660 = vmatmul.bf16.vlgmr.msra.gmra.mxu0 %v2552_v57 }
 0x33f   : > { %v2527_v0 = vperm.slane %v2001_v52, %v3577_v28  ;;  %v2529_v63 = vperm.slane %v2002_v16, %v3603_v43 }
 0x341   : > { %v2528_v32 = vsel %vm2060_vm14, %v2527_v0, %v2526_v33 }
 0x342   : > { %v2530_v53 = vsel %vm2064_vm15, %v2529_v63, %v2528_v32 }
 0x343   : > { %v2551_v54 = vsel %vm2543_vm3, %v2530_v53, %v2550_v50 }
 0x344   : > { %v2553_v48 = vpack.c.b16 %v2551_v54, %v2551_v54 }
 0x346   : > { %2673 = vmatmul.bf16.vlgmr.msra.gmra.mxu1 %v2553_v48 }
 0x3bb   : > { %v2661_v27 = vpop.f32.mrf.mxu0 }
 0x3bc   : > { %v2662_v28 = vadd.f32 %v2886_v15, %v2661_v27 }
 0x3c3   : > { %v2663_v43 = vpop.f32.mrf.mxu0  ;;  %v2674_v9 = vpop.f32.mrf.mxu1 }
 0x3c4   : > { %v2675_v34 = vadd.f32 %v2674_v9, %v2662_v28 }
 0x3c6   : > { %2678 = vst [vmem:[%s166_s6] sm:$0xff] %v2675_v34 }
 0x3c7   : > { %2914 = shalt.err (!%p2911_p3)
}
 0x3c8   : > { %2847 = dma.vmem_to_hbm [thread:$0]  (%p3006_p5), %s2693_s7, 128, %s2695_s8, %s2680_s9  }
 0x3cb   : > { %v2676_v6 = vpop.f32.mrf.mxu1 }
 0x3cc PF: > { %p2853_p4 = scmp.ge.s32.totalorder %s2949_s15, 2  ;;  %s2706_s25 = sand.u32 1, %s2937_s12  }
 0x3cd   : > { %s2707_s26 = scalar_lea.sflag [#allocation3], %s2706_s25 }
 0x3ce   : > { %p2850_p7 = pnand %p2853_p4, %p3010_p6 }
 0x3d0   : > { %p2851_p8 = pneg %p2850_p7 }
 0x3d2   : > { %2932 = dma.done.wait (%p2851_p8), %s2707_s26, 128  }
 0x3d3   : > { %2934 = vsyncadd (%p2851_p8), %s2707_s26, 4294967168  ;;  %p13_p9 = scmp.ge.s32.totalorder %s2994_s18, 4   ;;  %s4777_s12 = smov %s2941_s13 }
 0x3d4   : > { %s4778_s13 = smov %s2945_s14  ;;  %s4779_s14 = smov %s3004_s21 }
 0x3d5   : > { %s4780_s15 = smov %s2994_s18  ;;  %15 = sbr.rel (!%p13_p9) target bundleno = 3 (0x3), region = 67 }
 0x3da   :  { %2713 = vsyncpa [#allocation3], 1 }
 0x3db   :  { %2715 = vsyncpa [#allocation3 + $0x1], 1 }

</bundles_post_ra>
